<compile_context>
chip_gen: v7x
topology: tpu7x:2x2x1
jax: 0.10.0
libtpu: 0.0.40
codegen_flags: <defaults>
</compile_context>

<pallas_src>
import jax
import jax.numpy as jnp
from jax import lax
from jax.experimental import pallas as pl
from jax.experimental.pallas import tpu as pltpu

NEG_SLOPE = 0.01   # nn.LeakyReLU default
LN_EPS = 1e-5      # nn.LayerNorm default


def _lrelu(x):
    return jnp.where(x >= 0, x, NEG_SLOPE * x)


def _tc_per_chip():
    """2 TensorCores per chip on v7x-class devices, else 1 (v5e / v6e)."""
    try:
        kind = (getattr(jax.devices()[0], "device_kind", "") or "").lower()
    except Exception:
        return 1
    return 2 if ("v7" in kind or "7x" in kind) else 1


# --------------------------------------------------------------------------
# Kernel A (fused): conv1 -> LeakyReLU -> LayerNorm -> conv2 -> LeakyReLU ->
# MaxPool2d((2,1)), one grid step per batch sample ("parallel").
#
#   p_ref   : (1, P, 2*KH1*W) bf16  paired im2col patches (even | odd row)
#   w1_ref  : (2*KH1*W, 128)  bf16  block-diagonal conv1 weight
#   b1_ref  : (1, 128)        f32   conv1 bias duplicated over both halves
#   g_ref   : (P, 128)        f32   LN gamma per (paired row, channel-half)
#   beta_ref: (P, 128)        f32   LN beta
#   w2_ref  : (S, 128, 256)   bf16  conv2 tap-slab weights, cols [0:128]=even
#                                   conv2 rows, [128:256]=odd conv2 rows
#   b2_ref  : (1, 128)        f32   conv2 bias (shared by both pooled rows)
#   o_ref   : (1, Hp, 128)    bf16  pooled output (lane-dense)
#   acc_ref : (Hp, 256)       f32   VMEM accumulator for the 5 shifted dots
# --------------------------------------------------------------------------
def conv_fused_kernel(p_ref, w1_ref, b1_ref, g_ref, beta_ref, w2_ref, b2_ref,
                      o_ref, acc_ref):
    rows = p_ref.shape[1]          # P paired rows (last odd half is a duplicate)
    hp = o_ref.shape[1]

    # conv1 via one big bf16 matmul (block-diagonal weight keeps the even/odd
    # halves independent), then bias + LeakyReLU in f32.
    y = jnp.dot(p_ref[0], w1_ref[...], preferred_element_type=jnp.float32)
    y = _lrelu(y + b1_ref[...])

    # LayerNorm over all 64*H1 real elements; the duplicated last odd half-row
    # is excluded from the statistics.  Two-pass (mean, centred variance).
    n = float((2 * rows - 1) * 64)
    dup = y[rows - 1:rows, 64:]
    mean = (jnp.sum(y) - jnp.sum(dup)) / n
    d = y - mean
    ddup = d[rows - 1:rows, 64:]
    var = (jnp.sum(d * d) - jnp.sum(ddup * ddup)) / n
    y = d * lax.rsqrt(var + LN_EPS)
    y = (y * g_ref[...] + beta_ref[...]).astype(jnp.bfloat16)   # (P, 128) bf16

    # conv2 + maxpool: S shifted K=128 / N=256 bf16 dots into a VMEM f32
    # accumulator.  Columns [0:128] accumulate the even conv2 rows, columns
    # [128:256] the odd rows; the duplicated activation half only ever meets
    # zero weights (built statically in prepare_params).
    acc_ref[...] = jnp.dot(y[0:hp], w2_ref[0],
                           preferred_element_type=jnp.float32)
    for s in range(1, w2_ref.shape[0]):
        acc_ref[...] += jnp.dot(y[s:s + hp], w2_ref[s],
                                preferred_element_type=jnp.float32)
    zz = acc_ref[...]
    # Shared bias + monotonic LeakyReLU commute with the max, so pooling first
    # is exact (torch order: conv2 -> lrelu -> maxpool).
    z = jnp.maximum(zz[:, :128], zz[:, 128:]) + b2_ref[...]
    o_ref[0] = _lrelu(z).astype(o_ref.dtype)


# --------------------------------------------------------------------------
# Kernel B: fc1 + LeakyReLU + (Dropout = identity) + fc2.
# grid = (NS, nk): axis 0 ("parallel") splits fc1's 128 output columns across
# TensorCores (NS = 2 only on v7x, else 1); axis 1 ("arbitrary") tiles the big
# K = 128*Hp reduction with large tk.  fc2 is linear, so each column split
# emits a partial (B, C) summed outside.
# --------------------------------------------------------------------------
def mlp_kernel(x_ref, w1_ref, b1_ref, w2_ref, o_ref, acc_ref):
    k = pl.program_id(1)

    @pl.when(k == 0)
    def _():
        acc_ref[...] = jnp.zeros_like(acc_ref)

    acc_ref[...] += jnp.dot(x_ref[...], w1_ref[0],
                            preferred_element_type=jnp.float32)

    @pl.when(k == pl.num_programs(1) - 1)
    def _():
        h = _lrelu(acc_ref[...] + b1_ref[0])     # (B, n_cols) f32
        o_ref[0] = jnp.dot(h, w2_ref[0], preferred_element_type=jnp.float32)


# --------------------------------------------------------------------------
# Parameter init (deterministic, torch-like uniform(-1/sqrt(fan_in), ...)),
# kept in the PyTorch layouts.
# --------------------------------------------------------------------------
def init_params(key, num_rows, num_columns, num_classes):
    factor = num_rows // 512
    KH1, KH2 = 30 * factor, 8 * factor
    H1 = num_rows - KH1 + 1
    Hp = (num_rows + 2 - 38 * factor) // 2
    in_feat = 128 * Hp
    ks = jax.random.split(key, 10)

    def u(k, shape, fan_in):
        bound = 1.0 / jnp.sqrt(jnp.float32(fan_in))
        return jax.random.uniform(k, shape, jnp.float32, -bound, bound)

    return dict(
        w1=u(ks[0], (64, 1, KH1, num_columns), KH1 * num_columns),  # conv1 (O,I,KH,KW)
        b1=u(ks[1], (64,), KH1 * num_columns),
        ln_g=1.0 + 0.1 * jax.random.normal(ks[2], (64, H1, 1), jnp.float32),
        ln_b=0.1 * jax.random.normal(ks[3], (64, H1, 1), jnp.float32),
        w2=u(ks[4], (128, 64, KH2, 1), 64 * KH2),                   # conv2 (O,I,KH,KW)
        b2=u(ks[5], (128,), 64 * KH2),
        wfc1=u(ks[6], (in_feat, 128), in_feat),                     # fc1 (K, 128), K = c*Hp + h
        bfc1=u(ks[7], (128,), in_feat),
        wfc2=u(ks[8], (128, num_classes), 128),                     # fc2 (128, C)
        bfc2=u(ks[9], (num_classes,), 128),
    )


# --------------------------------------------------------------------------
# One-time (outside jit) static weight preparation: paired/block-diagonal
# conv1 weight, paired LN affine params, conv2 tap-slab weights, the flatten
# permutation of wfc1, and bf16 casts of the bandwidth-dominant weights.
# --------------------------------------------------------------------------
def prepare_params(params, num_rows, num_columns):
    factor = num_rows // 512
    KH1, KH2 = 30 * factor, 8 * factor
    H1 = num_rows - KH1 + 1
    Hp = (num_rows + 2 - 38 * factor) // 2
    Th = KH2 // 2                    # conv2 taps per pool parity
    P = Hp + Th                      # paired conv1 rows = (H1 + 1) // 2
    in_feat = 128 * Hp
    C = params["wfc2"].shape[1]
    NS = _tc_per_chip()              # fc1 column splits (2 only on 2-TC chips)

    # conv1: (O,1,KH,W) -> (KH*W, 64), then block-diagonal (2*KH*W, 128) bf16
    # so the paired patches [even | odd] map to output lanes [0:64 | 64:128].
    w1m = params["w1"].reshape(64, KH1 * num_columns).T            # (KH1*W, 64)
    zcol = jnp.zeros_like(w1m)
    w1pair = jnp.concatenate(
        [jnp.concatenate([w1m, zcol], axis=1),
         jnp.concatenate([zcol, w1m], axis=1)], axis=0).astype(jnp.bfloat16)
    b1pair = jnp.tile(params["b1"], 2).reshape(1, 128)

    # LayerNorm affine params in the paired layout; the duplicated last odd
    # half-row gets a (harmless) copy of row H1-1's params.
    gT = params["ln_g"][:, :, 0].T                                  # (H1, 64)
    bT = params["ln_b"][:, :, 0].T
    g_pair = jnp.concatenate(
        [gT[0::2], jnp.concatenate([gT[1::2], gT[H1 - 1:H1]], axis=0)], axis=1)
    beta_pair = jnp.concatenate(
        [bT[0::2], jnp.concatenate([bT[1::2], bT[H1 - 1:H1]], axis=0)], axis=1)

    # conv2: (O,I,KH,1) -> tap matrices Wm[m] (64,128), then Th+1 static
    # (128, 256) slabs.  Slab s, cols [0:128] (even conv2 rows):
    #   rows 0:64 = Wm[2s], rows 64:128 = Wm[2s+1]   (zero for s == Th)
    # Slab s, cols [128:256] (odd conv2 rows):
    #   rows 0:64 = Wm[2s-1] (zero for s == 0), rows 64:128 = Wm[2s] (zero s==Th)
    Wm = jnp.transpose(params["w2"][:, :, :, 0], (2, 1, 0))         # (KH2, 64, 128)
    zero = jnp.zeros((64, 128), jnp.float32)
    slabs = []
    for s in range(Th + 1):
        u_top = Wm[2 * s] if s < Th else zero
        u_bot = Wm[2 * s + 1] if s < Th else zero
        v_top = Wm[2 * s - 1] if s >= 1 else zero
        v_bot = Wm[2 * s] if s < Th else zero
        U = jnp.concatenate([u_top, u_bot], axis=0)                 # (128, 128)
        V = jnp.concatenate([v_top, v_bot], axis=0)                 # (128, 128)
        slabs.append(jnp.concatenate([U, V], axis=1))               # (128, 256)
    w2big = jnp.stack(slabs).astype(jnp.bfloat16)                   # (Th+1, 128, 256)

    # fc1: permute rows from torch channel-major (c*Hp + h) to the natural
    # (h*128 + c) order of the (B, Hp, 128) activation, split the 128 output
    # columns into NS slabs, and cast to bf16.
    wfc1_perm = (params["wfc1"].reshape(128, Hp, 128)
                 .transpose(1, 0, 2).reshape(in_feat, 128))
    n_cols = 128 // NS
    wfc1_s = (wfc1_perm.reshape(in_feat, NS, n_cols)
              .transpose(1, 0, 2).astype(jnp.bfloat16))             # (NS, K, n_cols)
    bfc1_s = params["bfc1"].reshape(NS, 1, n_cols)
    wfc2_s = params["wfc2"].reshape(NS, n_cols, C)

    return dict(
        w1pair=w1pair, b1pair=b1pair, g_pair=g_pair, beta_pair=beta_pair,
        w2big=w2big, b2=params["b2"].reshape(1, 128),
        wfc1=wfc1_s, bfc1=bfc1_s, wfc2=wfc2_s,
        bfc2=params["bfc2"].reshape(1, C),
    )


# --------------------------------------------------------------------------
# Forward pass (glue in plain JAX, hot paths in Pallas kernels)
# --------------------------------------------------------------------------
def cnn2d_forward(prep, x):
    # x: (B, num_rows, num_columns) float32 — torch forward does unsqueeze(dim=1).
    B, H, Wc = x.shape
    factor = H // 512
    KH1, KH2 = 30 * factor, 8 * factor
    H1 = H - KH1 + 1
    Hp = (H + 2 - 38 * factor) // 2
    Th = KH2 // 2
    P = Hp + Th                          # paired conv1 rows
    in_feat = 128 * Hp
    C = prep["bfc2"].shape[1]

    # ---- paired im2col in bf16: row j holds the conv1 patch of output row 2j
    #      (cols 0:KH1*Wc) and of row 2j+1 (cols KH1*Wc:), with the last odd
    #      patch duplicated because H1 is odd (the duplicate only ever meets
    #      zero conv2 weights and is excluded from the LN statistics).
    xb = x.astype(jnp.bfloat16)
    taps = jnp.arange(KH1)
    r_e = 2 * jnp.arange(P)
    r_o = jnp.minimum(r_e + 1, H1 - 1)
    idx = jnp.concatenate([r_e[:, None] + taps[None, :],
                           r_o[:, None] + taps[None, :]], axis=1)   # (P, 2*KH1)
    p1 = xb[:, idx, :].reshape(B, P, 2 * KH1 * Wc)

    # ---- fused conv1 + LN + conv2 + maxpool (one grid step per sample)
    y2 = pl.pallas_call(
        conv_fused_kernel,
        out_shape=jax.ShapeDtypeStruct((B, Hp, 128), jnp.bfloat16),
        grid_spec=pltpu.PrefetchScalarGridSpec(
            num_scalar_prefetch=0, grid=(B,),
            in_specs=[
                pl.BlockSpec((1, P, 2 * KH1 * Wc), lambda b: (b, 0, 0)),
                pl.BlockSpec((2 * KH1 * Wc, 128), lambda b: (0, 0)),
                pl.BlockSpec((1, 128), lambda b: (0, 0)),
                pl.BlockSpec((P, 128), lambda b: (0, 0)),
                pl.BlockSpec((P, 128), lambda b: (0, 0)),
                pl.BlockSpec((Th + 1, 128, 256), lambda b: (0, 0, 0)),
                pl.BlockSpec((1, 128), lambda b: (0, 0)),
            ],
            out_specs=pl.BlockSpec((1, Hp, 128), lambda b: (b, 0, 0)),
            scratch_shapes=[pltpu.VMEM((Hp, 256), jnp.float32)],
        ),
        compiler_params=pltpu.CompilerParams(dimension_semantics=("parallel",)),
    )(p1, prep["w1pair"], prep["b1pair"], prep["g_pair"], prep["beta_pair"],
      prep["w2big"], prep["b2"])

    # ---- flatten is free: wfc1 was pre-permuted to the (B, Hp, 128) row-major
    #      order, so no activation transpose is needed.
    feat = y2.reshape(B, in_feat)                                    # bf16

    # ---- fc1 + lrelu + (dropout = identity) + fc2.  Large K tiles: biggest
    #      multiple of 128 dividing in_feat with >= 2 grid steps (15232 for
    #      Hp = 238 -> nk = 2).  Double-buffered weight blocks stay well under
    #      every generation's default scoped VMEM (set vmem_limit_bytes rather
    #      than shrinking tk if tiles ever grow past it).
    NS = prep["wfc1"].shape[0]
    n_cols = prep["wfc1"].shape[2]
    c_best = 1
    for cand in range(1, Hp // 2 + 1):
        if Hp % cand == 0:
            c_best = cand
    tk = 128 * c_best
    nk = in_feat // tk

    part = pl.pallas_call(
        mlp_kernel,
        out_shape=jax.ShapeDtypeStruct((NS, B, C), jnp.float32),
        grid_spec=pltpu.PrefetchScalarGridSpec(
            num_scalar_prefetch=0, grid=(NS, nk),
            in_specs=[
                pl.BlockSpec((B, tk), lambda j, k: (0, k)),
                pl.BlockSpec((1, tk, n_cols), lambda j, k: (j, k, 0)),
                pl.BlockSpec((1, 1, n_cols), lambda j, k: (j, 0, 0)),
                pl.BlockSpec((1, n_cols, C), lambda j, k: (j, 0, 0)),
            ],
            out_specs=pl.BlockSpec((1, B, C), lambda j, k: (j, 0, 0)),
            scratch_shapes=[pltpu.VMEM((B, n_cols), jnp.float32)],
        ),
        compiler_params=pltpu.CompilerParams(
            dimension_semantics=("parallel", "arbitrary")),
    )(feat, prep["wfc1"], prep["bfc1"], prep["wfc2"])

    # Combine the (possibly single) linear fc2 partials and add the fc2 bias.
    return part.sum(axis=0) + prep["bfc2"]


if __name__ == "__main__":
    NUM_ROWS, NUM_COLS, NUM_CLASSES, BATCH = 512, 12, 10, 2
    key = jax.random.PRNGKey(0)
    pkey, xkey = jax.random.split(key)
    params = init_params(pkey, NUM_ROWS, NUM_COLS, NUM_CLASSES)
    prep = prepare_params(params, NUM_ROWS, NUM_COLS)   # static, outside jit
    x = jax.random.normal(xkey, (BATCH, NUM_ROWS, NUM_COLS), jnp.float32)

    out = jax.jit(cnn2d_forward)(prep, x)
    jax.block_until_ready(out)
    assert out.shape == (BATCH, NUM_CLASSES)
    assert bool(jnp.all(jnp.isfinite(out)))
    print("KERNEL_OK")
</pallas_src>

<mosaic_0001>
module attributes {stable_mosaic.version = 11 : i64} {
  func.func @conv_fused_kernel(%arg0: i32, %arg1: memref<1x242x720xbf16, #tpu.memory_space<vmem>>, %arg2: memref<720x128xbf16, #tpu.memory_space<vmem>>, %arg3: memref<1x128xf32, #tpu.memory_space<vmem>>, %arg4: memref<242x128xf32, #tpu.memory_space<vmem>>, %arg5: memref<242x128xf32, #tpu.memory_space<vmem>>, %arg6: memref<5x128x256xbf16, #tpu.memory_space<vmem>>, %arg7: memref<1x128xf32, #tpu.memory_space<vmem>>, %arg8: memref<1x238x128xbf16, #tpu.memory_space<vmem>>, %arg9: memref<238x256xf32, #tpu.memory_space<vmem>>) attributes {dimension_semantics = [#tpu.dimension_semantics<parallel>], iteration_bounds = array<i64: 2>, scalar_prefetch = 0 : i64, scratch_operands = 1 : i64, tpu.core_type = #tpu.core_type<tc>, window_params = [{transform_indices = @transform_0, window_bounds = array<i64: 1, 242, 720>}, {pipeline_mode = #tpu.pipeline_mode<synchronous>, transform_indices = @transform_1, window_bounds = array<i64: 720, 128>}, {pipeline_mode = #tpu.pipeline_mode<synchronous>, transform_indices = @transform_2, window_bounds = array<i64: 1, 128>}, {pipeline_mode = #tpu.pipeline_mode<synchronous>, transform_indices = @transform_3, window_bounds = array<i64: 242, 128>}, {pipeline_mode = #tpu.pipeline_mode<synchronous>, transform_indices = @transform_4, window_bounds = array<i64: 242, 128>}, {pipeline_mode = #tpu.pipeline_mode<synchronous>, transform_indices = @transform_5, window_bounds = array<i64: 5, 128, 256>}, {pipeline_mode = #tpu.pipeline_mode<synchronous>, transform_indices = @transform_6, window_bounds = array<i64: 1, 128>}, {transform_indices = @transform_7, window_bounds = array<i64: 1, 238, 128>}]} {
    %c0 = arith.constant 0 : index
    %c0_0 = arith.constant 0 : index
    %c0_1 = arith.constant 0 : index
    %0 = vector.load %arg1[%c0, %c0_0, %c0_1] : memref<1x242x720xbf16, #tpu.memory_space<vmem>>, vector<1x242x720xbf16>
    %1 = vector.shape_cast %0 : vector<1x242x720xbf16> to vector<242x720xbf16>
    %c0_2 = arith.constant 0 : index
    %c0_3 = arith.constant 0 : index
    %2 = vector.load %arg2[%c0_2, %c0_3] : memref<720x128xbf16, #tpu.memory_space<vmem>>, vector<720x128xbf16>
    %cst = arith.constant dense<0.000000e+00> : vector<242x128xf32>
    %3 = tpu.matmul %1, %2, %cst {dimension_numbers = #tpu.dot_dimension_numbers<[1], [0], [0], [1], [0, 0, 1, 1], [], []>} : vector<242x720xbf16>, vector<720x128xbf16>, vector<242x128xf32> -> vector<242x128xf32>
    %c0_4 = arith.constant 0 : index
    %c0_5 = arith.constant 0 : index
    %4 = vector.load %arg3[%c0_4, %c0_5] : memref<1x128xf32, #tpu.memory_space<vmem>>, vector<1x128xf32>
    %5 = vector.broadcast %4 : vector<1x128xf32> to vector<242x128xf32>
    %6 = arith.addf %3, %5 : vector<242x128xf32>
    %cst_6 = arith.constant 0.000000e+00 : f32
    %7 = vector.broadcast %cst_6 : f32 to vector<242x128xf32>
    %8 = arith.cmpf oge, %6, %7 : vector<242x128xf32>
    %cst_7 = arith.constant 0.00999999977 : f32
    %9 = vector.broadcast %cst_7 : f32 to vector<242x128xf32>
    %10 = arith.mulf %9, %6 : vector<242x128xf32>
    %11 = arith.select %8, %6, %10 : vector<242x128xi1>, vector<242x128xf32>
    %12 = vector.extract_strided_slice %11 {offsets = [241, 64], sizes = [1, 64], strides = [1, 1]} : vector<242x128xf32> to vector<1x64xf32>
    %13 = vector.shape_cast %11 : vector<242x128xf32> to vector<1x242x128xf32>
    %cst_8 = arith.constant dense<0.000000e+00> : vector<1xf32>
    %14 = vector.multi_reduction <add>, %13, %cst_8 [1, 2] : vector<1x242x128xf32> to vector<1xf32>
    %15 = vector.shape_cast %14 : vector<1xf32> to vector<1x1x1xf32>
    %16 = vector.extract %15[0, 0, 0] : f32 from vector<1x1x1xf32>
    %17 = vector.shape_cast %12 : vector<1x64xf32> to vector<1x1x64xf32>
    %cst_9 = arith.constant dense<0.000000e+00> : vector<1xf32>
    %18 = vector.multi_reduction <add>, %17, %cst_9 [1, 2] : vector<1x1x64xf32> to vector<1xf32>
    %19 = vector.shape_cast %18 : vector<1xf32> to vector<1x1x1xf32>
    %20 = vector.extract %19[0, 0, 0] : f32 from vector<1x1x1xf32>
    %21 = arith.subf %16, %20 : f32
    %cst_10 = arith.constant 3.091200e+04 : f32
    %22 = arith.divf %21, %cst_10 : f32
    %23 = vector.broadcast %22 : f32 to vector<242x128xf32>
    %24 = arith.subf %11, %23 : vector<242x128xf32>
    %25 = vector.extract_strided_slice %24 {offsets = [241, 64], sizes = [1, 64], strides = [1, 1]} : vector<242x128xf32> to vector<1x64xf32>
    %26 = arith.mulf %24, %24 : vector<242x128xf32>
    %27 = vector.shape_cast %26 : vector<242x128xf32> to vector<1x242x128xf32>
    %cst_11 = arith.constant dense<0.000000e+00> : vector<1xf32>
    %28 = vector.multi_reduction <add>, %27, %cst_11 [1, 2] : vector<1x242x128xf32> to vector<1xf32>
    %29 = vector.shape_cast %28 : vector<1xf32> to vector<1x1x1xf32>
    %30 = vector.extract %29[0, 0, 0] : f32 from vector<1x1x1xf32>
    %31 = arith.mulf %25, %25 : vector<1x64xf32>
    %32 = vector.shape_cast %31 : vector<1x64xf32> to vector<1x1x64xf32>
    %cst_12 = arith.constant dense<0.000000e+00> : vector<1xf32>
    %33 = vector.multi_reduction <add>, %32, %cst_12 [1, 2] : vector<1x1x64xf32> to vector<1xf32>
    %34 = vector.shape_cast %33 : vector<1xf32> to vector<1x1x1xf32>
    %35 = vector.extract %34[0, 0, 0] : f32 from vector<1x1x1xf32>
    %36 = arith.subf %30, %35 : f32
    %cst_13 = arith.constant 3.091200e+04 : f32
    %37 = arith.divf %36, %cst_13 : f32
    %cst_14 = arith.constant 9.99999974E-6 : f32
    %38 = arith.addf %37, %cst_14 : f32
    %39 = math.rsqrt %38 : f32
    %40 = vector.broadcast %39 : f32 to vector<242x128xf32>
    %41 = arith.mulf %24, %40 : vector<242x128xf32>
    %c0_15 = arith.constant 0 : index
    %c0_16 = arith.constant 0 : index
    %42 = vector.load %arg4[%c0_15, %c0_16] : memref<242x128xf32, #tpu.memory_space<vmem>>, vector<242x128xf32>
    %43 = arith.mulf %41, %42 : vector<242x128xf32>
    %c0_17 = arith.constant 0 : index
    %c0_18 = arith.constant 0 : index
    %44 = vector.load %arg5[%c0_17, %c0_18] : memref<242x128xf32, #tpu.memory_space<vmem>>, vector<242x128xf32>
    %45 = arith.addf %43, %44 : vector<242x128xf32>
    %46 = arith.truncf %45 : vector<242x128xf32> to vector<242x128xbf16>
    %47 = vector.extract_strided_slice %46 {offsets = [0, 0], sizes = [238, 128], strides = [1, 1]} : vector<242x128xbf16> to vector<238x128xbf16>
    %c0_19 = arith.constant 0 : index
    %c0_20 = arith.constant 0 : index
    %c0_21 = arith.constant 0 : index
    %48 = vector.load %arg6[%c0_19, %c0_20, %c0_21] : memref<5x128x256xbf16, #tpu.memory_space<vmem>>, vector<1x128x256xbf16>
    %49 = vector.shape_cast %48 : vector<1x128x256xbf16> to vector<128x256xbf16>
    %cst_22 = arith.constant dense<0.000000e+00> : vector<238x256xf32>
    %50 = tpu.matmul %47, %49, %cst_22 {dimension_numbers = #tpu.dot_dimension_numbers<[1], [0], [0], [1], [0, 0, 1, 1], [], []>} : vector<238x128xbf16>, vector<128x256xbf16>, vector<238x256xf32> -> vector<238x256xf32>
    %c0_23 = arith.constant 0 : index
    %c0_24 = arith.constant 0 : index
    %51 = vector.load %arg9[%c0_23, %c0_24] : memref<238x256xf32, #tpu.memory_space<vmem>>, vector<238x256xf32>
    tpu.vector_store %arg9[%c0_23, %c0_24], %50 {strides = array<i32>} : memref<238x256xf32, #tpu.memory_space<vmem>>, vector<238x256xf32>,
    %c0_25 = arith.constant 0 : index
    %c0_26 = arith.constant 0 : index
    %52 = vector.load %arg9[%c0_25, %c0_26] : memref<238x256xf32, #tpu.memory_space<vmem>>, vector<238x256xf32>
    %53 = vector.extract_strided_slice %46 {offsets = [1, 0], sizes = [238, 128], strides = [1, 1]} : vector<242x128xbf16> to vector<238x128xbf16>
    %c1 = arith.constant 1 : index
    %c0_27 = arith.constant 0 : index
    %c0_28 = arith.constant 0 : index
    %54 = vector.load %arg6[%c1, %c0_27, %c0_28] : memref<5x128x256xbf16, #tpu.memory_space<vmem>>, vector<1x128x256xbf16>
    %55 = vector.shape_cast %54 : vector<1x128x256xbf16> to vector<128x256xbf16>
    %cst_29 = arith.constant dense<0.000000e+00> : vector<238x256xf32>
    %56 = tpu.matmul %53, %55, %cst_29 {dimension_numbers = #tpu.dot_dimension_numbers<[1], [0], [0], [1], [0, 0, 1, 1], [], []>} : vector<238x128xbf16>, vector<128x256xbf16>, vector<238x256xf32> -> vector<238x256xf32>
    %57 = arith.addf %52, %56 : vector<238x256xf32>
    %c0_30 = arith.constant 0 : index
    %c0_31 = arith.constant 0 : index
    %58 = vector.load %arg9[%c0_30, %c0_31] : memref<238x256xf32, #tpu.memory_space<vmem>>, vector<238x256xf32>
    tpu.vector_store %arg9[%c0_30, %c0_31], %57 {strides = array<i32>} : memref<238x256xf32, #tpu.memory_space<vmem>>, vector<238x256xf32>,
    %c0_32 = arith.constant 0 : index
    %c0_33 = arith.constant 0 : index
    %59 = vector.load %arg9[%c0_32, %c0_33] : memref<238x256xf32, #tpu.memory_space<vmem>>, vector<238x256xf32>
    %60 = vector.extract_strided_slice %46 {offsets = [2, 0], sizes = [238, 128], strides = [1, 1]} : vector<242x128xbf16> to vector<238x128xbf16>
    %c2 = arith.constant 2 : index
    %c0_34 = arith.constant 0 : index
    %c0_35 = arith.constant 0 : index
    %61 = vector.load %arg6[%c2, %c0_34, %c0_35] : memref<5x128x256xbf16, #tpu.memory_space<vmem>>, vector<1x128x256xbf16>
    %62 = vector.shape_cast %61 : vector<1x128x256xbf16> to vector<128x256xbf16>
    %cst_36 = arith.constant dense<0.000000e+00> : vector<238x256xf32>
    %63 = tpu.matmul %60, %62, %cst_36 {dimension_numbers = #tpu.dot_dimension_numbers<[1], [0], [0], [1], [0, 0, 1, 1], [], []>} : vector<238x128xbf16>, vector<128x256xbf16>, vector<238x256xf32> -> vector<238x256xf32>
    %64 = arith.addf %59, %63 : vector<238x256xf32>
    %c0_37 = arith.constant 0 : index
    %c0_38 = arith.constant 0 : index
    %65 = vector.load %arg9[%c0_37, %c0_38] : memref<238x256xf32, #tpu.memory_space<vmem>>, vector<238x256xf32>
    tpu.vector_store %arg9[%c0_37, %c0_38], %64 {strides = array<i32>} : memref<238x256xf32, #tpu.memory_space<vmem>>, vector<238x256xf32>,
    %c0_39 = arith.constant 0 : index
    %c0_40 = arith.constant 0 : index
    %66 = vector.load %arg9[%c0_39, %c0_40] : memref<238x256xf32, #tpu.memory_space<vmem>>, vector<238x256xf32>
    %67 = vector.extract_strided_slice %46 {offsets = [3, 0], sizes = [238, 128], strides = [1, 1]} : vector<242x128xbf16> to vector<238x128xbf16>
    %c3 = arith.constant 3 : index
    %c0_41 = arith.constant 0 : index
    %c0_42 = arith.constant 0 : index
    %68 = vector.load %arg6[%c3, %c0_41, %c0_42] : memref<5x128x256xbf16, #tpu.memory_space<vmem>>, vector<1x128x256xbf16>
    %69 = vector.shape_cast %68 : vector<1x128x256xbf16> to vector<128x256xbf16>
    %cst_43 = arith.constant dense<0.000000e+00> : vector<238x256xf32>
    %70 = tpu.matmul %67, %69, %cst_43 {dimension_numbers = #tpu.dot_dimension_numbers<[1], [0], [0], [1], [0, 0, 1, 1], [], []>} : vector<238x128xbf16>, vector<128x256xbf16>, vector<238x256xf32> -> vector<238x256xf32>
    %71 = arith.addf %66, %70 : vector<238x256xf32>
    %c0_44 = arith.constant 0 : index
    %c0_45 = arith.constant 0 : index
    %72 = vector.load %arg9[%c0_44, %c0_45] : memref<238x256xf32, #tpu.memory_space<vmem>>, vector<238x256xf32>
    tpu.vector_store %arg9[%c0_44, %c0_45], %71 {strides = array<i32>} : memref<238x256xf32, #tpu.memory_space<vmem>>, vector<238x256xf32>,
    %c0_46 = arith.constant 0 : index
    %c0_47 = arith.constant 0 : index
    %73 = vector.load %arg9[%c0_46, %c0_47] : memref<238x256xf32, #tpu.memory_space<vmem>>, vector<238x256xf32>
    %74 = vector.extract_strided_slice %46 {offsets = [4, 0], sizes = [238, 128], strides = [1, 1]} : vector<242x128xbf16> to vector<238x128xbf16>
    %c4 = arith.constant 4 : index
    %c0_48 = arith.constant 0 : index
    %c0_49 = arith.constant 0 : index
    %75 = vector.load %arg6[%c4, %c0_48, %c0_49] : memref<5x128x256xbf16, #tpu.memory_space<vmem>>, vector<1x128x256xbf16>
    %76 = vector.shape_cast %75 : vector<1x128x256xbf16> to vector<128x256xbf16>
    %cst_50 = arith.constant dense<0.000000e+00> : vector<238x256xf32>
    %77 = tpu.matmul %74, %76, %cst_50 {dimension_numbers = #tpu.dot_dimension_numbers<[1], [0], [0], [1], [0, 0, 1, 1], [], []>} : vector<238x128xbf16>, vector<128x256xbf16>, vector<238x256xf32> -> vector<238x256xf32>
    %78 = arith.addf %73, %77 : vector<238x256xf32>
    %c0_51 = arith.constant 0 : index
    %c0_52 = arith.constant 0 : index
    %79 = vector.load %arg9[%c0_51, %c0_52] : memref<238x256xf32, #tpu.memory_space<vmem>>, vector<238x256xf32>
    tpu.vector_store %arg9[%c0_51, %c0_52], %78 {strides = array<i32>} : memref<238x256xf32, #tpu.memory_space<vmem>>, vector<238x256xf32>,
    %c0_53 = arith.constant 0 : index
    %c0_54 = arith.constant 0 : index
    %80 = vector.load %arg9[%c0_53, %c0_54] : memref<238x256xf32, #tpu.memory_space<vmem>>, vector<238x256xf32>
    %81 = vector.extract_strided_slice %80 {offsets = [0, 0], sizes = [238, 128], strides = [1, 1]} : vector<238x256xf32> to vector<238x128xf32>
    %82 = vector.extract_strided_slice %80 {offsets = [0, 128], sizes = [238, 128], strides = [1, 1]} : vector<238x256xf32> to vector<238x128xf32>
    %83 = arith.maximumf %81, %82 : vector<238x128xf32>
    %c0_55 = arith.constant 0 : index
    %c0_56 = arith.constant 0 : index
    %84 = vector.load %arg7[%c0_55, %c0_56] : memref<1x128xf32, #tpu.memory_space<vmem>>, vector<1x128xf32>
    %85 = vector.broadcast %84 : vector<1x128xf32> to vector<238x128xf32>
    %86 = arith.addf %83, %85 : vector<238x128xf32>
    %cst_57 = arith.constant 0.000000e+00 : f32
    %87 = vector.broadcast %cst_57 : f32 to vector<238x128xf32>
    %88 = arith.cmpf oge, %86, %87 : vector<238x128xf32>
    %cst_58 = arith.constant 0.00999999977 : f32
    %89 = vector.broadcast %cst_58 : f32 to vector<238x128xf32>
    %90 = arith.mulf %89, %86 : vector<238x128xf32>
    %91 = arith.select %88, %86, %90 : vector<238x128xi1>, vector<238x128xf32>
    %92 = arith.truncf %91 : vector<238x128xf32> to vector<238x128xbf16>
    %c0_59 = arith.constant 0 : index
    %c0_60 = arith.constant 0 : index
    %c0_61 = arith.constant 0 : index
    %93 = vector.load %arg8[%c0_59, %c0_60, %c0_61] : memref<1x238x128xbf16, #tpu.memory_space<vmem>>, vector<1x238x128xbf16>
    %94 = vector.shape_cast %93 : vector<1x238x128xbf16> to vector<238x128xbf16>
    %95 = vector.shape_cast %92 : vector<238x128xbf16> to vector<1x238x128xbf16>
    tpu.vector_store %arg8[%c0_59, %c0_60, %c0_61], %95 {strides = array<i32>} : memref<1x238x128xbf16, #tpu.memory_space<vmem>>, vector<1x238x128xbf16>,
    return
  }
  func.func @transform_0(%arg0: i32) -> (i32, i32, i32) {
    %c0_i32 = arith.constant 0 : i32
    %c0_i32_0 = arith.constant 0 : i32
    %c0_i32_1 = arith.constant 0 : i32
    return %arg0, %c0_i32, %c0_i32_0 : i32, i32, i32
  }
  func.func @transform_1(%arg0: i32) -> (i32, i32) {
    %c0_i32 = arith.constant 0 : i32
    %c0_i32_0 = arith.constant 0 : i32
    %c0_i32_1 = arith.constant 0 : i32
    return %c0_i32, %c0_i32_0 : i32, i32
  }
  func.func @transform_2(%arg0: i32) -> (i32, i32) {
    %c0_i32 = arith.constant 0 : i32
    %c0_i32_0 = arith.constant 0 : i32
    %c0_i32_1 = arith.constant 0 : i32
    return %c0_i32, %c0_i32_0 : i32, i32
  }
  func.func @transform_3(%arg0: i32) -> (i32, i32) {
    %c0_i32 = arith.constant 0 : i32
    %c0_i32_0 = arith.constant 0 : i32
    %c0_i32_1 = arith.constant 0 : i32
    return %c0_i32, %c0_i32_0 : i32, i32
  }
  func.func @transform_4(%arg0: i32) -> (i32, i32) {
    %c0_i32 = arith.constant 0 : i32
    %c0_i32_0 = arith.constant 0 : i32
    %c0_i32_1 = arith.constant 0 : i32
    return %c0_i32, %c0_i32_0 : i32, i32
  }
  func.func @transform_5(%arg0: i32) -> (i32, i32, i32) {
    %c0_i32 = arith.constant 0 : i32
    %c0_i32_0 = arith.constant 0 : i32
    %c0_i32_1 = arith.constant 0 : i32
    %c0_i32_2 = arith.constant 0 : i32
    return %c0_i32, %c0_i32_0, %c0_i32_1 : i32, i32, i32
  }
  func.func @transform_6(%arg0: i32) -> (i32, i32) {
    %c0_i32 = arith.constant 0 : i32
    %c0_i32_0 = arith.constant 0 : i32
    %c0_i32_1 = arith.constant 0 : i32
    return %c0_i32, %c0_i32_0 : i32, i32
  }
  func.func @transform_7(%arg0: i32) -> (i32, i32, i32) {
    %c0_i32 = arith.constant 0 : i32
    %c0_i32_0 = arith.constant 0 : i32
    %c0_i32_1 = arith.constant 0 : i32
    return %arg0, %c0_i32, %c0_i32_0 : i32, i32, i32
  }
}

module attributes {stable_mosaic.version = 11 : i64} {
  func.func @mlp_kernel(%arg0: i32, %arg1: i32, %arg2: memref<2x15232xbf16, #tpu.memory_space<vmem>>, %arg3: memref<1x15232x128xbf16, #tpu.memory_space<vmem>>, %arg4: memref<1x1x128xf32, #tpu.memory_space<vmem>>, %arg5: memref<1x128x10xf32, #tpu.memory_space<vmem>>, %arg6: memref<1x2x10xf32, #tpu.memory_space<vmem>>, %arg7: memref<2x128xf32, #tpu.memory_space<vmem>>) attributes {dimension_semantics = [#tpu.dimension_semantics<parallel>, #tpu.dimension_semantics<arbitrary>], iteration_bounds = array<i64: 1, 2>, scalar_prefetch = 0 : i64, scratch_operands = 1 : i64, tpu.core_type = #tpu.core_type<tc>, window_params = [{transform_indices = @transform_0, window_bounds = array<i64: 2, 15232>}, {transform_indices = @transform_1, window_bounds = array<i64: 1, 15232, 128>}, {transform_indices = @transform_2, window_bounds = array<i64: 1, 1, 128>}, {transform_indices = @transform_3, window_bounds = array<i64: 1, 128, 10>}, {transform_indices = @transform_4, window_bounds = array<i64: 1, 2, 10>}]} {
    %c0_i32 = arith.constant 0 : i32
    %0 = arith.cmpi eq, %arg1, %c0_i32 : i32
    %1 = arith.extui %0 : i1 to i32
    %c0_i32_0 = arith.constant 0 : i32
    %2 = arith.cmpi ne, %1, %c0_i32_0 : i32
    scf.if %2 {
      %cst_10 = arith.constant 0.000000e+00 : f32
      %13 = vector.broadcast %cst_10 : f32 to vector<2x128xf32>
      %c0_11 = arith.constant 0 : index
      %c0_12 = arith.constant 0 : index
      %14 = vector.load %arg7[%c0_11, %c0_12] : memref<2x128xf32, #tpu.memory_space<vmem>>, vector<2x128xf32>
      tpu.vector_store %arg7[%c0_11, %c0_12], %13 {strides = array<i32>} : memref<2x128xf32, #tpu.memory_space<vmem>>, vector<2x128xf32>,
    } else {
    }
    %c0 = arith.constant 0 : index
    %c0_1 = arith.constant 0 : index
    %3 = vector.load %arg7[%c0, %c0_1] : memref<2x128xf32, #tpu.memory_space<vmem>>, vector<2x128xf32>
    %c0_2 = arith.constant 0 : index
    %c0_3 = arith.constant 0 : index
    %4 = vector.load %arg2[%c0_2, %c0_3] : memref<2x15232xbf16, #tpu.memory_space<vmem>>, vector<2x15232xbf16>
    %c0_4 = arith.constant 0 : index
    %c0_5 = arith.constant 0 : index
    %c0_6 = arith.constant 0 : index
    %5 = vector.load %arg3[%c0_4, %c0_5, %c0_6] : memref<1x15232x128xbf16, #tpu.memory_space<vmem>>, vector<1x15232x128xbf16>
    %6 = vector.shape_cast %5 : vector<1x15232x128xbf16> to vector<15232x128xbf16>
    %cst = arith.constant dense<0.000000e+00> : vector<2x128xf32>
    %7 = tpu.matmul %4, %6, %cst {dimension_numbers = #tpu.dot_dimension_numbers<[1], [0], [0], [1], [0, 0, 1, 1], [], []>} : vector<2x15232xbf16>, vector<15232x128xbf16>, vector<2x128xf32> -> vector<2x128xf32>
    %8 = arith.addf %3, %7 : vector<2x128xf32>
    %c0_7 = arith.constant 0 : index
    %c0_8 = arith.constant 0 : index
    %9 = vector.load %arg7[%c0_7, %c0_8] : memref<2x128xf32, #tpu.memory_space<vmem>>, vector<2x128xf32>
    tpu.vector_store %arg7[%c0_7, %c0_8], %8 {strides = array<i32>} : memref<2x128xf32, #tpu.memory_space<vmem>>, vector<2x128xf32>,
    %c1_i32 = arith.constant 1 : i32
    %10 = arith.cmpi eq, %arg1, %c1_i32 : i32
    %11 = arith.extui %10 : i1 to i32
    %c0_i32_9 = arith.constant 0 : i32
    %12 = arith.cmpi ne, %11, %c0_i32_9 : i32
    scf.if %12 {
      %c0_10 = arith.constant 0 : index
      %c0_11 = arith.constant 0 : index
      %13 = vector.load %arg7[%c0_10, %c0_11] : memref<2x128xf32, #tpu.memory_space<vmem>>, vector<2x128xf32>
      %c0_12 = arith.constant 0 : index
      %c0_13 = arith.constant 0 : index
      %c0_14 = arith.constant 0 : index
      %14 = vector.load %arg4[%c0_12, %c0_13, %c0_14] : memref<1x1x128xf32, #tpu.memory_space<vmem>>, vector<1x1x128xf32>
      %15 = vector.shape_cast %14 : vector<1x1x128xf32> to vector<1x128xf32>
      %16 = vector.broadcast %15 : vector<1x128xf32> to vector<2x128xf32>
      %17 = arith.addf %13, %16 : vector<2x128xf32>
      %cst_15 = arith.constant 0.000000e+00 : f32
      %18 = vector.broadcast %cst_15 : f32 to vector<2x128xf32>
      %19 = arith.cmpf oge, %17, %18 : vector<2x128xf32>
      %cst_16 = arith.constant 0.00999999977 : f32
      %20 = vector.broadcast %cst_16 : f32 to vector<2x128xf32>
      %21 = arith.mulf %20, %17 : vector<2x128xf32>
      %22 = arith.select %19, %17, %21 : vector<2x128xi1>, vector<2x128xf32>
      %c0_17 = arith.constant 0 : index
      %c0_18 = arith.constant 0 : index
      %c0_19 = arith.constant 0 : index
      %23 = vector.load %arg5[%c0_17, %c0_18, %c0_19] : memref<1x128x10xf32, #tpu.memory_space<vmem>>, vector<1x128x10xf32>
      %24 = vector.shape_cast %23 : vector<1x128x10xf32> to vector<128x10xf32>
      %cst_20 = arith.constant dense<0.000000e+00> : vector<2x10xf32>
      %25 = tpu.matmul %22, %24, %cst_20 {dimension_numbers = #tpu.dot_dimension_numbers<[1], [0], [0], [1], [0, 0, 1, 1], [], []>} : vector<2x128xf32>, vector<128x10xf32>, vector<2x10xf32> -> vector<2x10xf32>
      %c0_21 = arith.constant 0 : index
      %c0_22 = arith.constant 0 : index
      %c0_23 = arith.constant 0 : index
      %26 = vector.load %arg6[%c0_21, %c0_22, %c0_23] : memref<1x2x10xf32, #tpu.memory_space<vmem>>, vector<1x2x10xf32>
      %27 = vector.shape_cast %26 : vector<1x2x10xf32> to vector<2x10xf32>
      %28 = vector.shape_cast %25 : vector<2x10xf32> to vector<1x2x10xf32>
      tpu.vector_store %arg6[%c0_21, %c0_22, %c0_23], %28 {strides = array<i32>} : memref<1x2x10xf32, #tpu.memory_space<vmem>>, vector<1x2x10xf32>,
    } else {
    }
    return
  }
  func.func @transform_0(%arg0: i32, %arg1: i32) -> (i32, i32) {
    %c0_i32 = arith.constant 0 : i32
    %c0_i32_0 = arith.constant 0 : i32
    return %c0_i32, %arg1 : i32, i32
  }
  func.func @transform_1(%arg0: i32, %arg1: i32) -> (i32, i32, i32) {
    %c0_i32 = arith.constant 0 : i32
    %c0_i32_0 = arith.constant 0 : i32
    return %arg0, %arg1, %c0_i32 : i32, i32, i32
  }
  func.func @transform_2(%arg0: i32, %arg1: i32) -> (i32, i32, i32) {
    %c0_i32 = arith.constant 0 : i32
    %c0_i32_0 = arith.constant 0 : i32
    %c0_i32_1 = arith.constant 0 : i32
    return %arg0, %c0_i32, %c0_i32_0 : i32, i32, i32
  }
  func.func @transform_3(%arg0: i32, %arg1: i32) -> (i32, i32, i32) {
    %c0_i32 = arith.constant 0 : i32
    %c0_i32_0 = arith.constant 0 : i32
    %c0_i32_1 = arith.constant 0 : i32
    return %arg0, %c0_i32, %c0_i32_0 : i32, i32, i32
  }
  func.func @transform_4(%arg0: i32, %arg1: i32) -> (i32, i32, i32) {
    %c0_i32 = arith.constant 0 : i32
    %c0_i32_0 = arith.constant 0 : i32
    %c0_i32_1 = arith.constant 0 : i32
    return %arg0, %c0_i32, %c0_i32_0 : i32, i32, i32
  }
}

</mosaic_0001>

<bundles_post_ra>
// kernel: cnn2d_forward.2
= control target key start
LH: loop header
LB: loop body
LE: loop exit
PB: predicated region body
PF: predicated region fallthrough
CT: control target
= control target key end

     0   :  { %s6527_s24 = smov 0   ;;  %s8730_s0 = inlined_call_operand.vmem [shape: bf16[2,242,720], index: 0, kind: input, shape index: {}]   ;;  %s8731_s1 = inlined_call_operand.vmem [shape: bf16[720,128], index: 1, kind: input, shape index: {}]   ;;  %s8732_s2 = inlined_call_operand.vmem [shape: f32[1,128], index: 2, kind: input, shape index: {}]   ;;  %s8733_s3 = inlined_call_operand.vmem [shape: f32[242,128], index: 3, kind: input, shape index: {}]   ;;  %s8734_s4 = inlined_call_operand.vmem [shape: f32[242,128], index: 4, kind: input, shape index: {}]   ;;  %s8735_s5 = inlined_call_operand.vmem [shape: bf16[5,128,256], index: 5, kind: input, shape index: {}]   ;;  %s8736_s6 = inlined_call_operand.vmem [shape: f32[1,128], index: 6, kind: input, shape index: {}]   ;;  %s8737_s7 = inlined_call_operand.vmem [shape: bf16[2,238,128], index: 7, kind: output, shape index: {}]  }
   0x1 LB: > { %s5100_s25 = sadd.s32 4294967295, %s6483_s24   ;;  %p5104_p0 = scmp.ge.s32.totalorder %s6483_s24, 1  ;;  %s6483_s24 = sphi %s6527_s24, %s17_s24  }
   0x2   : > { %p237_p1 = scmp.lt.s32.totalorder %s6483_s24, 3 }
   0x4   : > { %p238_p2 = pnand %p5104_p0, %p237_p1 }
   0x6   : > { %241 = sbr.rel (%p238_p2) target bundleno = 2086 (0x826), region = 48 }
   0xd   : > { %v6153_v0 = vld [vmem:[%s8731_s1 + $0x40] sm:$0xff]   ;;  %v6155_v2 = vld [vmem:[%s8731_s1 + $0x48] sm:$0xff]   ;;  %p269_p3 = scmp.lt.s32.totalorder %s5100_s25, 1  ;;  %v6157_v4 = vld [vmem:[%s8731_s1 + $0x50] sm:$0xff]   ;;  %v6485_v24 = vmov 0   ;;  %vm1195_vm0 = vcmask 654336  }
   0xe   : > { %v6154_v1 = vld [vmem:[%s8731_s1] sm:$0xff]   ;;  %5555 = vmatprep.subr.bf16.mxu0 %v6153_v0  ;;  %v6156_v3 = vld [vmem:[%s8731_s1 + $0x8] sm:$0xff]   ;;  %v6158_v5 = vld [vmem:[%s8731_s1 + $0x10] sm:$0xff]   ;;  %2304 = vmatprep.mubr.bf16.mxu1 %v6485_v24 }
   0xf   : > { %5556 = vmatpush3.bf16.msra.mxu0 %v6154_v1  ;;  %s8823_s25 = smov (!%p269_p3, %s5100_s25), 1  ;;  %v6159_v6 = vld [vmem:[%s8731_s1 + $0x58] sm:$0xff]   ;;  %v6161_v8 = vld [vmem:[%s8731_s1 + $0x60] sm:$0xff]   ;;  %v6163_v10 = vld [vmem:[%s8731_s1 + $0x68] sm:$0xff]  }
  0x10   : > { %5557 = vmatprep.subr.bf16.mxu0 %v6155_v2  ;;  %s6131_s17 = smul.u32 744, %s8823_s25  ;;  %v6160_v7 = vld [vmem:[%s8731_s1 + $0x18] sm:$0xff]   ;;  %v6162_v9 = vld [vmem:[%s8731_s1 + $0x20] sm:$0xff]   ;;  %v6164_v12 = vld [vmem:[%s8731_s1 + $0x28] sm:$0xff]  }
  0x11   : > { %v6165_v13 = vld [vmem:[%s8731_s1 + $0x70] sm:$0xff]   ;;  %v6167_v15 = vld [vmem:[%s8731_s1 + $0x78] sm:$0xff]   ;;  %v6172_v17 = vld [vmem:[%s8731_s1 + $0xc0] sm:$0xff]   ;;  %s6132_s11 = smul.u32 120, %s8823_s25 }
  0x12   : > { %s6568_s26 = scalar_lea.vmem %s8730_s0, %s6131_s17  ;;  %v6166_v14 = vld [vmem:[%s8731_s1 + $0x30] sm:$0xff]   ;;  %v6168_v16 = vld [vmem:[%s8731_s1 + $0x38] sm:$0xff]   ;;  %v6173_v19 = vld [vmem:[%s8731_s1 + $0x80] sm:$0xff]  }
  0x13   : > { %5558 = vmatpush3.bf16.msra.mxu0 %v6156_v3  ;;  %v6171_v11 = vld [vmem:[%s6568_s26 + $0x4] ss:$24 sps:$4 sm:$0xff]   ;;  %v6169_v18 = vld [vmem:[%s6568_s26] ss:$24 sps:$4 sm:$0xff]   ;;  %v6174_v20 = vld [vmem:[%s6568_s26 + $0x34] ss:$24 sps:$4 sm:$0xff]   ;;  %s8632_s25 = scalar_lea.vmem %s8737_s7, %s6132_s11 }
  0x14   : > { %5559 = vmatprep.subr.bf16.mxu0 %v6157_v4  ;;  %1276 = vmatprep.mubr.bf16.mxu0 %v6171_v11  ;;  %v6180_v21 = vld [vmem:[%s8731_s1 + $0xc8] sm:$0xff]   ;;  %v6188_v23 = vld [vmem:[%s8731_s1 + $0xd0] sm:$0xff]   ;;  %v6177_v26 = vld [vmem:[%s6568_s26 + $0x64] ss:$24 sps:$4 sm:$0xff]  }
  0x15   : > { %v6181_v22 = vld [vmem:[%s8731_s1 + $0x88] sm:$0xff]   ;;  %v6189_v27 = vld [vmem:[%s8731_s1 + $0x90] sm:$0xff]   ;;  %v6196_v28 = vld [vmem:[%s8731_s1 + $0xd8] sm:$0xff]  }
  0x16   : > { %v6176_v25 = vld [vmem:[%s6568_s26 + $0x30] ss:$24 sps:$4 sm:$0xff]   ;;  %v6197_v29 = vld [vmem:[%s8731_s1 + $0x98] sm:$0xff]   ;;  %v6204_v30 = vld [vmem:[%s8731_s1 + $0xe0] sm:$0xff]  }
  0x17   : > { %5560 = vmatpush3.bf16.msra.mxu0 %v6158_v5  ;;  %v6179_v31 = vld [vmem:[%s6568_s26 + $0x60] ss:$24 sps:$4 sm:$0xff]   ;;  %v6182_v32 = vld [vmem:[%s6568_s26 + $0x94] ss:$24 sps:$4 sm:$0xff]   ;;  %v6184_v37 = vld [vmem:[%s6568_s26 + $0x90] ss:$24 sps:$4 sm:$0xff]  }
  0x18   : > { %5561 = vmatprep.subr.bf16.mxu0 %v6159_v6  ;;  %v6205_v33 = vld [vmem:[%s8731_s1 + $0xa0] sm:$0xff]   ;;  %v6212_v34 = vld [vmem:[%s8731_s1 + $0xe8] sm:$0xff]   ;;  %v6220_v36 = vld [vmem:[%s8731_s1 + $0xf0] sm:$0xff]  }
  0x19   : > { %v6213_v35 = vld [vmem:[%s8731_s1 + $0xa8] sm:$0xff]   ;;  %v6185_v38 = vld [vmem:[%s6568_s26 + $0xc4] ss:$24 sps:$4 sm:$0xff]   ;;  %v6221_v39 = vld [vmem:[%s8731_s1 + $0xb0] sm:$0xff]  }
  0x1a   : > { %v6228_v40 = vld [vmem:[%s8731_s1 + $0xf8] sm:$0xff]   ;;  %v6190_v43 = vld [vmem:[%s6568_s26 + $0xf4] ss:$24 sps:$4 sm:$0xff]   ;;  %v6192_v44 = vld [vmem:[%s6568_s26 + $0xf0] ss:$24 sps:$4 sm:$0xff]  }
  0x1b   : > { %5562 = vmatpush3.bf16.msra.mxu0 %v6160_v7  ;;  %v6229_v41 = vld [vmem:[%s8731_s1 + $0xb8] sm:$0xff]   ;;  %v6198_v47 = vld [vmem:[%s6568_s26 + $0x154] ss:$24 sps:$4 sm:$0xff]   ;;  %v6200_v48 = vld [vmem:[%s6568_s26 + $0x150] ss:$24 sps:$4 sm:$0xff]  }
  0x1c   : > { %5563 = vmatprep.subr.bf16.mxu0 %v6161_v8  ;;  %v6187_v42 = vld [vmem:[%s6568_s26 + $0xc0] ss:$24 sps:$4 sm:$0xff]   ;;  %v6193_v45 = vld [vmem:[%s6568_s26 + $0x124] ss:$24 sps:$4 sm:$0xff]   ;;  %v6206_v51 = vld [vmem:[%s6568_s26 + $0x1b4] ss:$24 sps:$4 sm:$0xff]  }
  0x1d   : > { %v6195_v46 = vld [vmem:[%s6568_s26 + $0x120] ss:$24 sps:$4 sm:$0xff]   ;;  %v6201_v49 = vld [vmem:[%s6568_s26 + $0x184] ss:$24 sps:$4 sm:$0xff]   ;;  %v6208_v52 = vld [vmem:[%s6568_s26 + $0x1b0] ss:$24 sps:$4 sm:$0xff]  }
  0x1e   : > { %v6203_v50 = vld [vmem:[%s6568_s26 + $0x180] ss:$24 sps:$4 sm:$0xff]   ;;  %v6209_v53 = vld [vmem:[%s6568_s26 + $0x1e4] ss:$24 sps:$4 sm:$0xff]   ;;  %v6214_v55 = vld [vmem:[%s6568_s26 + $0x214] ss:$24 sps:$4 sm:$0xff]  }
  0x1f   : > { %5564 = vmatpush3.bf16.msra.mxu0 %v6162_v9  ;;  %v6211_v54 = vld [vmem:[%s6568_s26 + $0x1e0] ss:$24 sps:$4 sm:$0xff]   ;;  %v6216_v56 = vld [vmem:[%s6568_s26 + $0x210] ss:$24 sps:$4 sm:$0xff]   ;;  %v6217_v57 = vld [vmem:[%s6568_s26 + $0x244] ss:$24 sps:$4 sm:$0xff]  }
  0x20   : > { %5565 = vmatprep.subr.bf16.mxu0 %v6163_v10  ;;  %v6219_v58 = vld [vmem:[%s6568_s26 + $0x240] ss:$24 sps:$4 sm:$0xff]   ;;  %v6222_v59 = vld [vmem:[%s6568_s26 + $0x274] ss:$24 sps:$4 sm:$0xff]   ;;  %v6224_v60 = vld [vmem:[%s6568_s26 + $0x270] ss:$24 sps:$4 sm:$0xff]  }
  0x21   : > { %v6225_v61 = vld [vmem:[%s6568_s26 + $0x2a4] ss:$24 sps:$4 sm:$0xff]   ;;  %v370_v62 = vld [vmem:[%s6568_s26 + $0x2d0] sm:$0x11]  ;;  %v6227_v63 = vld [vmem:[%s6568_s26 + $0x2a0] ss:$24 sps:$4 sm:$0xff]  }
  0x22   : > { %v5199_v0 = vcombine.high %v370_v62, %v370_v62  ;;  %v5198_v1 = vcombine.low %v370_v62, %v370_v62  ;;  %v6234_v2 = vld [vmem:[%s6568_s26 + $0xc] ss:$24 sps:$4 sm:$0xff]   ;;  %v6232_v3 = vld [vmem:[%s6568_s26 + $0x8] ss:$24 sps:$4 sm:$0xff]   ;;  %v6236_v5 = vld [vmem:[%s6568_s26 + $0x3c] ss:$24 sps:$4 sm:$0xff]  }
  0x23   : > { %5566 = vmatpush3.bf16.msra.mxu0 %v6164_v12  ;;  %v6235_v4 = vld [vmem:[%s8731_s1 + $0x100] sm:$0xff]   ;;  %v6239_v6 = vld [vmem:[%s8731_s1 + $0x108] sm:$0xff]   ;;  %v6238_v7 = vld [vmem:[%s6568_s26 + $0x38] ss:$24 sps:$4 sm:$0xff]  }
  0x24   : > { %5567 = vmatprep.subr.bf16.mxu0 %v6165_v13  ;;  %v6240_v8 = vld [vmem:[%s6568_s26 + $0x6c] ss:$24 sps:$4 sm:$0xff]   ;;  %v6243_v9 = vld [vmem:[%s8731_s1 + $0x110] sm:$0xff]   ;;  %v6249_v10 = vld [vmem:[%s8731_s1 + $0x118] sm:$0xff]  }
  0x25   : > { %v6242_v11 = vld [vmem:[%s6568_s26 + $0x68] ss:$24 sps:$4 sm:$0xff]   ;;  %v6244_v12 = vld [vmem:[%s6568_s26 + $0x9c] ss:$24 sps:$4 sm:$0xff]  }
  0x26   : > { %v6254_v13 = vld [vmem:[%s8731_s1 + $0x120] sm:$0xff]  }
  0x27   : > { %5568 = vmatpush3.bf16.msra.mxu0 %v6166_v14  ;;  %v6258_v14 = vld [vmem:[%s8731_s1 + $0x128] sm:$0xff]  }
  0x28   : > { %5569 = vmatprep.subr.bf16.mxu0 %v6167_v15  ;;  %v6246_v15 = vld [vmem:[%s6568_s26 + $0x98] ss:$24 sps:$4 sm:$0xff]  }
  0x2b   : > { %5570 = vmatpush3.bf16.msra.mxu0 %v6168_v16  ;;  %v6247_v16 = vld [vmem:[%s6568_s26 + $0xcc] ss:$24 sps:$4 sm:$0xff]  }
  0x2c   : > { %5667 = vmatprep.subr.bf16.mxu0 %v6172_v17  ;;  %v6262_v17 = vld [vmem:[%s8731_s1 + $0x130] sm:$0xff]  }
  0x2e   : > { %1277 = vmatmul.mubr.bf16.vlgmr.msra.gmra.mrb[0].mxu0 %v6169_v18  ;;  %v6266_v18 = vld [vmem:[%s8731_s1 + $0x138] sm:$0xff]  }
  0x2f   : > { %5668 = vmatpush3.bf16.msra.mxu0 %v6173_v19  ;;  %1284 = vmatprep.mubr.bf16.mxu0 %v6174_v20  ;;  %v6250_v19 = vld [vmem:[%s6568_s26 + $0xc8] ss:$24 sps:$4 sm:$0xff]   ;;  %v6251_v20 = vld [vmem:[%s6568_s26 + $0xfc] ss:$24 sps:$4 sm:$0xff]  }
  0x30   : > { %5669 = vmatprep.subr.bf16.mxu0 %v6180_v21  ;;  %v6273_v21 = vld [vmem:[%s8731_s1 + $0x140] sm:$0xff]  }
  0x33   : > { %5670 = vmatpush3.bf16.msra.mxu0 %v6181_v22  ;;  %v6277_v22 = vld [vmem:[%s8731_s1 + $0x148] sm:$0xff]  }
  0x34   : > { %5671 = vmatprep.subr.bf16.mxu0 %v6188_v23  ;;  %v6253_v23 = vld [vmem:[%s6568_s26 + $0xf8] ss:$24 sps:$4 sm:$0xff]  }
  0x36   : > { %1285 = vmatmul.mubr.bf16.gmra.mrb[4].mxu0 %v6176_v25  ;;  %v6255_v25 = vld [vmem:[%s6568_s26 + $0x12c] ss:$24 sps:$4 sm:$0xff]  }
  0x37   : > { %1292 = vmatprep.mubr.bf16.mxu0 %v6177_v26  ;;  %5672 = vmatpush3.bf16.msra.mxu0 %v6189_v27  ;;  %v6281_v26 = vld [vmem:[%s8731_s1 + $0x150] sm:$0xff]   ;;  %v6285_v27 = vld [vmem:[%s8731_s1 + $0x158] sm:$0xff]  }
  0x38   : > { %5673 = vmatprep.subr.bf16.mxu0 %v6196_v28  ;;  %v6257_v28 = vld [vmem:[%s6568_s26 + $0x128] ss:$24 sps:$4 sm:$0xff]  }
  0x3b   : > { %5674 = vmatpush3.bf16.msra.mxu0 %v6197_v29  ;;  %v6259_v29 = vld [vmem:[%s6568_s26 + $0x15c] ss:$24 sps:$4 sm:$0xff]  }
  0x3c   : > { %5675 = vmatprep.subr.bf16.mxu0 %v6204_v30  ;;  %v6291_v30 = vld [vmem:[%s8731_s1 + $0x160] sm:$0xff]  }
  0x3e   : > { %1293 = vmatmul.mubr.bf16.gmra.mrb[8].mxu0 %v6179_v31  ;;  %v6261_v31 = vld [vmem:[%s6568_s26 + $0x158] ss:$24 sps:$4 sm:$0xff]  }
  0x3f   : > { %1300 = vmatprep.mubr.bf16.mxu0 %v6182_v32  ;;  %5676 = vmatpush3.bf16.msra.mxu0 %v6205_v33  ;;  %v6263_v32 = vld [vmem:[%s6568_s26 + $0x18c] ss:$24 sps:$4 sm:$0xff]   ;;  %v6265_v33 = vld [vmem:[%s6568_s26 + $0x188] ss:$24 sps:$4 sm:$0xff]  }
  0x40   : > { %5677 = vmatprep.subr.bf16.mxu0 %v6212_v34  ;;  %v6267_v34 = vld [vmem:[%s6568_s26 + $0x1bc] ss:$24 sps:$4 sm:$0xff]  }
  0x43   : > { %5678 = vmatpush3.bf16.msra.mxu0 %v6213_v35  ;;  %v6269_v35 = vld [vmem:[%s6568_s26 + $0x1b8] ss:$24 sps:$4 sm:$0xff]  }
  0x44   : > { %5679 = vmatprep.subr.bf16.mxu0 %v6220_v36  ;;  %v6270_v36 = vld [vmem:[%s6568_s26 + $0x1ec] ss:$24 sps:$4 sm:$0xff]  }
  0x46   : > { %1301 = vmatmul.mubr.bf16.gmra.mrb[12].mxu0 %v6184_v37  ;;  %v6272_v37 = vld [vmem:[%s6568_s26 + $0x1e8] ss:$24 sps:$4 sm:$0xff]  }
  0x47   : > { %1308 = vmatprep.mubr.bf16.mxu0 %v6185_v38  ;;  %5680 = vmatpush3.bf16.msra.mxu0 %v6221_v39  ;;  %v6274_v38 = vld [vmem:[%s6568_s26 + $0x21c] ss:$24 sps:$4 sm:$0xff]  }
  0x48   : > { %5681 = vmatprep.subr.bf16.mxu0 %v6228_v40 }
  0x4b   : > { %5682 = vmatpush3.bf16.msra.mxu0 %v6229_v41  ;;  %v6276_v41 = vld [vmem:[%s6568_s26 + $0x218] ss:$24 sps:$4 sm:$0xff]  }
  0x4c   : > { %1564 = vmatprep.subr.bf16.mxu0 %v6485_v24 }
  0x4e   : > { %1309 = vmatmul.mubr.bf16.gmra.mrb[16].mxu0 %v6187_v42 }
  0x4f   : > { %1316 = vmatprep.mubr.bf16.mxu0 %v6190_v43 }
  0x56   : > { %1317 = vmatmul.mubr.bf16.gmra.mrb[20].mxu0 %v6192_v44  ;;  %v6278_v44 = vld [vmem:[%s6568_s26 + $0x24c] ss:$24 sps:$4 sm:$0xff]  }
  0x57   : > { %1324 = vmatprep.mubr.bf16.mxu0 %v6193_v45 }
  0x5e   : > { %1325 = vmatmul.mubr.bf16.gmra.mrb[24].mxu0 %v6195_v46 }
  0x5f   : > { %1332 = vmatprep.mubr.bf16.mxu0 %v6198_v47 }
  0x66   : > { %1333 = vmatmul.mubr.bf16.gmra.mrb[28].mxu0 %v6200_v48 }
  0x67   : > { %1340 = vmatprep.mubr.bf16.mxu0 %v6201_v49  ;;  %v6280_v49 = vld [vmem:[%s6568_s26 + $0x248] ss:$24 sps:$4 sm:$0xff]  }
  0x6e   : > { %1341 = vmatmul.mubr.bf16.gmra.mrb[32].mxu0 %v6203_v50 }
  0x6f   : > { %1348 = vmatprep.mubr.bf16.mxu0 %v6206_v51 }
  0x76   : > { %1349 = vmatmul.mubr.bf16.gmra.mrb[36].mxu0 %v6208_v52  ;;  %v6282_v52 = vld [vmem:[%s6568_s26 + $0x27c] ss:$24 sps:$4 sm:$0xff]  }
  0x77   : > { %1356 = vmatprep.mubr.bf16.mxu0 %v6209_v53 }
  0x7e   : > { %1357 = vmatmul.mubr.bf16.gmra.mrb[40].mxu0 %v6211_v54 }
  0x7f   : > { %1364 = vmatprep.mubr.bf16.mxu0 %v6214_v55 }
  0x86   : > { %1365 = vmatmul.mubr.bf16.gmra.mrb[44].mxu0 %v6216_v56 }
  0x87   : > { %1372 = vmatprep.mubr.bf16.mxu0 %v6217_v57  ;;  %v6284_v57 = vld [vmem:[%s6568_s26 + $0x278] ss:$24 sps:$4 sm:$0xff]  }
  0x8e   : > { %1373 = vmatmul.mubr.bf16.gmra.mrb[48].mxu0 %v6219_v58 }
  0x8f   : > { %1380 = vmatprep.mubr.bf16.mxu0 %v6222_v59 }
  0x96   : > { %1381 = vmatmul.mubr.bf16.gmra.mrb[52].mxu0 %v6224_v60  ;;  %v6286_v60 = vld [vmem:[%s6568_s26 + $0x2ac] ss:$24 sps:$4 sm:$0xff]  }
  0x97   : > { %1388 = vmatprep.mubr.bf16.mxu0 %v6225_v61 }
  0x9e   : > { %1389 = vmatmul.mubr.bf16.gmra.mrb[56].mxu0 %v6227_v63  ;;  %v371_v63 = vld [vmem:[%s6568_s26 + $0x2d8] sm:$0x11] }
  0x9f   : > { %1396 = vmatprep.mubr.bf16.mxu0 %v5199_v0 }
  0xa6   : > { %1397 = vmatmul.mubr.bf16.gmra.mrb[60].mxu0 %v5198_v1 }
  0xa7   : > { %1436 = vmatprep.mubr.bf16.mxu0 %v6234_v2  ;;  %v6288_v2 = vld [vmem:[%s6568_s26 + $0x2a8] ss:$24 sps:$4 sm:$0xff]  }
  0xae   : > { %1437 = vmatmul.mubr.bf16.vlgmr.msra.gmra.mrb[64].mxu0 %v6232_v3 }
  0xaf   : > { %1565 = vmatpush1.bf16.msra.mxu0 %v6235_v4  ;;  %1444 = vmatprep.mubr.bf16.mxu0 %v6236_v5  ;;  %v5201_v5 = vcombine.high %v371_v63, %v371_v63 }
  0xb0   : > { %1566 = vmatprep.subr.bf16.mxu0 %v6485_v24 }
  0xb3   : > { %1567 = vmatpush1.bf16.msra.mxu0 %v6239_v6 }
  0xb4   : > { %1568 = vmatprep.subr.bf16.mxu0 %v6485_v24 }
  0xb6   : > { %1445 = vmatmul.mubr.bf16.gmra.mrb[68].mxu0 %v6238_v7 }
  0xb7   : > { %1452 = vmatprep.mubr.bf16.mxu0 %v6240_v8  ;;  %1569 = vmatpush1.bf16.msra.mxu0 %v6243_v9 }
  0xb8   : > { %1570 = vmatprep.subr.bf16.mxu0 %v6485_v24 }
  0xbb   : > { %1571 = vmatpush1.bf16.msra.mxu0 %v6249_v10  ;;  %v5200_v10 = vcombine.low %v371_v63, %v371_v63 }
  0xbc   : > { %1572 = vmatprep.subr.bf16.mxu0 %v6485_v24 }
  0xbe   : > { %1453 = vmatmul.mubr.bf16.gmra.mrb[72].mxu0 %v6242_v11 }
  0xbf   : > { %1460 = vmatprep.mubr.bf16.mxu0 %v6244_v12  ;;  %1573 = vmatpush1.bf16.msra.mxu0 %v6254_v13  ;;  %v6294_v13 = vld [vmem:[%s6568_s26 + $0x14] ss:$24 sps:$4 sm:$0xff]  }
  0xc0   : > { %1574 = vmatprep.subr.bf16.mxu0 %v6485_v24 }
  0xc3   : > { %1575 = vmatpush1.bf16.msra.mxu0 %v6258_v14 }
  0xc4   : > { %1576 = vmatprep.subr.bf16.mxu0 %v6485_v24 }
  0xc6   : > { %1461 = vmatmul.mubr.bf16.gmra.mrb[76].mxu0 %v6246_v15 }
  0xc7   : > { %1468 = vmatprep.mubr.bf16.mxu0 %v6247_v16  ;;  %1577 = vmatpush1.bf16.msra.mxu0 %v6262_v17 }
  0xc8   : > { %1578 = vmatprep.subr.bf16.mxu0 %v6485_v24 }
  0xcb   : > { %1579 = vmatpush1.bf16.msra.mxu0 %v6266_v18  ;;  %v6292_v18 = vld [vmem:[%s6568_s26 + $0x10] ss:$24 sps:$4 sm:$0xff]  }
  0xcc   : > { %1580 = vmatprep.subr.bf16.mxu0 %v6485_v24 }
  0xce   : > { %1469 = vmatmul.mubr.bf16.gmra.mrb[80].mxu0 %v6250_v19 }
  0xcf   : > { %1476 = vmatprep.mubr.bf16.mxu0 %v6251_v20  ;;  %1581 = vmatpush1.bf16.msra.mxu0 %v6273_v21  ;;  %v6295_v21 = vld [vmem:[%s6568_s26 + $0x44] ss:$24 sps:$4 sm:$0xff]  }
  0xd0   : > { %1582 = vmatprep.subr.bf16.mxu0 %v6485_v24 }
  0xd3   : > { %1583 = vmatpush1.bf16.msra.mxu0 %v6277_v22 }
  0xd4   : > { %1584 = vmatprep.subr.bf16.mxu0 %v6485_v24 }
  0xd6   : > { %1477 = vmatmul.mubr.bf16.gmra.mrb[84].mxu0 %v6253_v23 }
  0xd7   : > { %1484 = vmatprep.mubr.bf16.mxu0 %v6255_v25  ;;  %1585 = vmatpush1.bf16.msra.mxu0 %v6281_v26 }
  0xd8   : > { %1586 = vmatprep.subr.bf16.mxu0 %v6485_v24 }
  0xdb   : > { %1587 = vmatpush1.bf16.msra.mxu0 %v6285_v27  ;;  %v6297_v27 = vld [vmem:[%s6568_s26 + $0x40] ss:$24 sps:$4 sm:$0xff]  }
  0xdc   : > { %1588 = vmatprep.subr.bf16.mxu0 %v6485_v24 }
  0xde   : > { %1485 = vmatmul.mubr.bf16.gmra.mrb[88].mxu0 %v6257_v28 }
  0xdf   : > { %1492 = vmatprep.mubr.bf16.mxu0 %v6259_v29  ;;  %1589 = vmatpush1.bf16.msra.mxu0 %v6291_v30  ;;  %v6298_v30 = vld [vmem:[%s6568_s26 + $0x74] ss:$24 sps:$4 sm:$0xff]  }
  0xe6   : > { %1493 = vmatmul.mubr.bf16.gmra.mrb[92].mxu0 %v6261_v31 }
  0xe7   : > { %1500 = vmatprep.mubr.bf16.mxu0 %v6263_v32 }
  0xee   : > { %1501 = vmatmul.mubr.bf16.gmra.mrb[96].mxu0 %v6265_v33 }
  0xef   : > { %1508 = vmatprep.mubr.bf16.mxu0 %v6267_v34 }
  0xf6   : > { %1509 = vmatmul.mubr.bf16.gmra.mrb[100].mxu0 %v6269_v35  ;;  %v6300_v35 = vld [vmem:[%s6568_s26 + $0x70] ss:$24 sps:$4 sm:$0xff]  }
  0xf7   : > { %1516 = vmatprep.mubr.bf16.mxu0 %v6270_v36 }
  0xfe   : > { %1517 = vmatmul.mubr.bf16.gmra.mrb[104].mxu0 %v6272_v37 }
  0xff   : > { %1524 = vmatprep.mubr.bf16.mxu0 %v6274_v38  ;;  %v6301_v38 = vld [vmem:[%s6568_s26 + $0xa4] ss:$24 sps:$4 sm:$0xff]  }
 0x101   : > { %v5571_v39 = vpop.f32.mrb[0].mxu0 }
 0x102   : > { %v5572_v40 = vpop.f32.mrb[1].mxu0 }
 0x103   : > { %v6747_v42 = vadd.f32 %v5572_v40, %v5571_v39  ;;  %v5574_v43 = vpop.f32.mrb[2].mxu0 }
 0x104   : > { %v5575_v45 = vpop.f32.mrb[3].mxu0 }
 0x105   : > { %v6750_v46 = vadd.f32 %v5575_v45, %v5574_v43 }
 0x106   : > { %1525 = vmatmul.mubr.bf16.gmra.mrb[108].mxu0 %v6276_v41 }
 0x107   : > { %1532 = vmatprep.mubr.bf16.mxu0 %v6278_v44  ;;  %v6303_v44 = vld [vmem:[%s6568_s26 + $0xa0] ss:$24 sps:$4 sm:$0xff]  }
 0x109   : > { %v5577_v47 = vpop.f32.mrb[4].mxu0 }
 0x10a   : > { %v5578_v48 = vpop.f32.mrb[5].mxu0 }
 0x10b   : > { %v6753_v50 = vadd.f32 %v5578_v48, %v5577_v47  ;;  %v5580_v51 = vpop.f32.mrb[6].mxu0  ;;  %v6304_v48 = vld [vmem:[%s6568_s26 + $0xd4] ss:$24 sps:$4 sm:$0xff]  }
 0x10c   : > { %v5581_v53 = vpop.f32.mrb[7].mxu0 }
 0x10d   : > { %v6756_v54 = vadd.f32 %v5581_v53, %v5580_v51 }
 0x10e   : > { %1533 = vmatmul.mubr.bf16.gmra.mrb[112].mxu0 %v6280_v49 }
 0x10f   : > { %1540 = vmatprep.mubr.bf16.mxu0 %v6282_v52 }
 0x111   : > { %v5583_v55 = vpop.f32.mrb[8].mxu0 }
 0x112   : > { %v5584_v56 = vpop.f32.mrb[9].mxu0 }
 0x113   : > { %v6759_v58 = vadd.f32 %v5584_v56, %v5583_v55  ;;  %v5586_v59 = vpop.f32.mrb[10].mxu0  ;;  %v6306_v55 = vld [vmem:[%s6568_s26 + $0xd0] ss:$24 sps:$4 sm:$0xff]  }
 0x114   : > { %v5587_v61 = vpop.f32.mrb[11].mxu0 }
 0x115   : > { %v6762_v62 = vadd.f32 %v5587_v61, %v5586_v59  ;;  %v6307_v59 = vld [vmem:[%s6568_s26 + $0x104] ss:$24 sps:$4 sm:$0xff]  }
 0x116   : > { %1541 = vmatmul.mubr.bf16.gmra.mrb[116].mxu0 %v6284_v57 }
 0x117   : > { %1548 = vmatprep.mubr.bf16.mxu0 %v6286_v60 }
 0x119   : > { %v5589_v0 = vpop.f32.mrb[12].mxu0 }
 0x11a   : > { %v5590_v1 = vpop.f32.mrb[13].mxu0 }
 0x11b   : > { %v6766_v3 = vadd.f32 %v5590_v1, %v5589_v0  ;;  %v5592_v4 = vpop.f32.mrb[14].mxu0  ;;  %v6309_v1 = vld [vmem:[%s6568_s26 + $0x100] ss:$24 sps:$4 sm:$0xff]  }
 0x11c   : > { %v5593_v6 = vpop.f32.mrb[15].mxu0 }
 0x11d   : > { %v6768_v7 = vadd.f32 %v5593_v6, %v5592_v4 }
 0x11e   : > { %1549 = vmatmul.mubr.bf16.gmra.mrb[120].mxu0 %v6288_v2 }
 0x11f   : > { %1556 = vmatprep.mubr.bf16.mxu0 %v5201_v5  ;;  %v6310_v5 = vld [vmem:[%s6568_s26 + $0x134] ss:$24 sps:$4 sm:$0xff]  }
 0x121   : > { %v5595_v8 = vpop.f32.mrb[16].mxu0 }
 0x122   : > { %v5596_v9 = vpop.f32.mrb[17].mxu0 }
 0x123   : > { %v6770_v11 = vadd.f32 %v5596_v9, %v5595_v8  ;;  %v5598_v12 = vpop.f32.mrb[18].mxu0 }
 0x124   : > { %v5599_v14 = vpop.f32.mrb[19].mxu0 }
 0x125   : > { %v6773_v15 = vadd.f32 %v5599_v14, %v5598_v12  ;;  %v6312_v12 = vld [vmem:[%s6568_s26 + $0x130] ss:$24 sps:$4 sm:$0xff]  }
 0x126   : > { %1557 = vmatmul.mubr.bf16.gmra.mrb[124].mxu0 %v5200_v10 }
 0x127   : > { %5249 = vmatprep.mubr.msk.bf16.mxu0 %vm1195_vm0, %v6294_v13 }
 0x129   : > { %v5601_v16 = vpop.f32.mrb[20].mxu0 }
 0x12a   : > { %v5602_v17 = vpop.f32.mrb[21].mxu0 }
 0x12b   : > { %v6777_v19 = vadd.f32 %v5602_v17, %v5601_v16  ;;  %v5604_v20 = vpop.f32.mrb[22].mxu0  ;;  %v6313_v16 = vld [vmem:[%s6568_s26 + $0x164] ss:$24 sps:$4 sm:$0xff]  }
 0x12c   : > { %v5605_v22 = vpop.f32.mrb[23].mxu0 }
 0x12d   : > { %v6780_v23 = vadd.f32 %v5605_v22, %v5604_v20  ;;  %v6315_v22 = vld [vmem:[%s6568_s26 + $0x160] ss:$24 sps:$4 sm:$0xff]  }
 0x12e   : > { %1597 = vmatmul.mubr.bf16.vlgmr.msra.gmra.mrb[128].mxu0 %v6292_v18 }
 0x12f   : > { %5250 = vmatprep.mubr.msk.bf16.mxu0 %vm1195_vm0, %v6295_v21 }
 0x131   : > { %v5607_v25 = vpop.f32.mrb[24].mxu0 }
 0x132   : > { %v5608_v26 = vpop.f32.mrb[25].mxu0 }
 0x133   : > { %v6784_v28 = vadd.f32 %v5608_v26, %v5607_v25  ;;  %v5610_v29 = vpop.f32.mrb[26].mxu0 }
 0x134   : > { %v5611_v31 = vpop.f32.mrb[27].mxu0 }
 0x135   : > { %v6787_v32 = vadd.f32 %v5611_v31, %v5610_v29 }
 0x136   : > { %1605 = vmatmul.mubr.bf16.gmra.mrb[132].mxu0 %v6297_v27  ;;  %v6316_v27 = vld [vmem:[%s6568_s26 + $0x194] ss:$24 sps:$4 sm:$0xff]  }
 0x137   : > { %5251 = vmatprep.mubr.msk.bf16.mxu0 %vm1195_vm0, %v6298_v30 }
 0x139   : > { %v5613_v33 = vpop.f32.mrb[28].mxu0 }
 0x13a   : > { %v5614_v34 = vpop.f32.mrb[29].mxu0 }
 0x13b   : > { %v6791_v36 = vadd.f32 %v5614_v34, %v5613_v33  ;;  %v5616_v37 = vpop.f32.mrb[30].mxu0  ;;  %v6318_v34 = vld [vmem:[%s6568_s26 + $0x190] ss:$24 sps:$4 sm:$0xff]  }
 0x13c   : > { %v5617_v39 = vpop.f32.mrb[31].mxu0 }
 0x13d   : > { %v6794_v40 = vadd.f32 %v5617_v39, %v5616_v37 }
 0x13e   : > { %1613 = vmatmul.mubr.bf16.gmra.mrb[136].mxu0 %v6300_v35 }
 0x13f   : > { %5252 = vmatprep.mubr.msk.bf16.mxu0 %vm1195_vm0, %v6301_v38  ;;  %v6319_v38 = vld [vmem:[%s6568_s26 + $0x1c4] ss:$24 sps:$4 sm:$0xff]  }
 0x141   : > { %v5619_v41 = vpop.f32.mrb[32].mxu0 }
 0x142   : > { %v5620_v43 = vpop.f32.mrb[33].mxu0 }
 0x143   : > { %v6798_v45 = vadd.f32 %v5620_v43, %v5619_v41  ;;  %v5622_v47 = vpop.f32.mrb[34].mxu0 }
 0x144   : > { %v5623_v49 = vpop.f32.mrb[35].mxu0 }
 0x145   : > { %v6801_v51 = vadd.f32 %v5623_v49, %v5622_v47  ;;  %v6321_v47 = vld [vmem:[%s6568_s26 + $0x1c0] ss:$24 sps:$4 sm:$0xff]  }
 0x146   : > { %1621 = vmatmul.mubr.bf16.gmra.mrb[140].mxu0 %v6303_v44 }
 0x147   : > { %5253 = vmatprep.mubr.msk.bf16.mxu0 %vm1195_vm0, %v6304_v48 }
 0x149   : > { %v5625_v52 = vpop.f32.mrb[36].mxu0 }
 0x14a   : > { %v5626_v53 = vpop.f32.mrb[37].mxu0 }
 0x14b   : > { %v6805_v56 = vadd.f32 %v5626_v53, %v5625_v52  ;;  %v5628_v57 = vpop.f32.mrb[38].mxu0  ;;  %v6322_v52 = vld [vmem:[%s6568_s26 + $0x1f4] ss:$24 sps:$4 sm:$0xff]  }
 0x14c   : > { %v5629_v60 = vpop.f32.mrb[39].mxu0 }
 0x14d   : > { %v6808_v61 = vadd.f32 %v5629_v60, %v5628_v57  ;;  %v6324_v60 = vld [vmem:[%s6568_s26 + $0x1f0] ss:$24 sps:$4 sm:$0xff]  }
 0x14e   : > { %1629 = vmatmul.mubr.bf16.gmra.mrb[144].mxu0 %v6306_v55 }
 0x14f   : > { %5254 = vmatprep.mubr.msk.bf16.mxu0 %vm1195_vm0, %v6307_v59 }
 0x151   : > { %v5631_v63 = vpop.f32.mrb[40].mxu0 }
 0x152   : > { %v5632_v0 = vpop.f32.mrb[41].mxu0 }
 0x153   : > { %v6812_v2 = vadd.f32 %v5632_v0, %v5631_v63  ;;  %v5634_v4 = vpop.f32.mrb[42].mxu0 }
 0x154   : > { %v5635_v6 = vpop.f32.mrb[43].mxu0 }
 0x155   : > { %v6815_v8 = vadd.f32 %v5635_v6, %v5634_v4 }
 0x156   : > { %1637 = vmatmul.mubr.bf16.gmra.mrb[148].mxu0 %v6309_v1  ;;  %v6325_v1 = vld [vmem:[%s6568_s26 + $0x224] ss:$24 sps:$4 sm:$0xff]  }
 0x157   : > { %5255 = vmatprep.mubr.msk.bf16.mxu0 %vm1195_vm0, %v6310_v5  ;;  %v6854_v5 = vld [vmem:[%s8732_s2] ss:$0 sm:$0xff] }
 0x159   : > { %v5637_v9 = vpop.f32.mrb[44].mxu0 }
 0x15a   : > { %v5638_v10 = vpop.f32.mrb[45].mxu0 }
 0x15b   : > { %v6819_v13 = vadd.f32 %v5638_v10, %v5637_v9  ;;  %v5640_v14 = vpop.f32.mrb[46].mxu0  ;;  %v6327_v10 = vld [vmem:[%s6568_s26 + $0x220] ss:$24 sps:$4 sm:$0xff]  }
 0x15c   : > { %v5641_v17 = vpop.f32.mrb[47].mxu0 }
 0x15d   : > { %v6822_v18 = vadd.f32 %v5641_v17, %v5640_v14  ;;  %v6328_v17 = vld [vmem:[%s6568_s26 + $0x254] ss:$24 sps:$4 sm:$0xff]  }
 0x15e   : > { %1645 = vmatmul.mubr.bf16.gmra.mrb[152].mxu0 %v6312_v12  ;;  %v1279_v12 = vadd.f32 %v6747_v42, %v6854_v5  ;;  %v6330_v42 = vld [vmem:[%s6568_s26 + $0x250] ss:$24 sps:$4 sm:$0xff]  }
 0x15f   : > { %5256 = vmatprep.mubr.msk.bf16.mxu0 %vm1195_vm0, %v6313_v16 }
 0x161   : > { %v5643_v20 = vpop.f32.mrb[48].mxu0 }
 0x162   : > { %v5644_v21 = vpop.f32.mrb[49].mxu0 }
 0x163   : > { %v6826_v25 = vadd.f32 %v5644_v21, %v5643_v20  ;;  %v5646_v26 = vpop.f32.mrb[50].mxu0  ;;  %v1282_v21 = vadd.f32 %v6750_v46, %v6854_v5 }
 0x164   : > { %v5647_v29 = vpop.f32.mrb[51].mxu0 }
 0x165   : > { %v6829_v30 = vadd.f32 %v5647_v29, %v5646_v26 }
 0x166   : > { %1653 = vmatmul.mubr.bf16.gmra.mrb[156].mxu0 %v6315_v22 }
 0x167   : > { %5257 = vmatprep.mubr.msk.bf16.mxu0 %vm1195_vm0, %v6316_v27 }
 0x169   : > { %v5649_v31 = vpop.f32.mrb[52].mxu0 }
 0x16a   : > { %v5650_v33 = vpop.f32.mrb[53].mxu0 }
 0x16b   : > { %v6833_v35 = vadd.f32 %v5650_v33, %v5649_v31  ;;  %v5652_v37 = vpop.f32.mrb[54].mxu0  ;;  %v1287_v33 = vadd.f32 %v6753_v50, %v6854_v5  ;;  %v6333_v50 = vld [vmem:[%s6568_s26 + $0x280] ss:$24 sps:$4 sm:$0xff]  }
 0x16c   : > { %v5653_v39 = vpop.f32.mrb[55].mxu0 }
 0x16d   : > { %v6836_v41 = vadd.f32 %v5653_v39, %v5652_v37  ;;  %v1290_v39 = vadd.f32 %v6756_v54, %v6854_v5 }
 0x16e   : > { %1661 = vmatmul.mubr.bf16.gmra.mrb[160].mxu0 %v6318_v34 }
 0x16f   : > { %5258 = vmatprep.mubr.msk.bf16.mxu0 %vm1195_vm0, %v6319_v38  ;;  %v6331_v38 = vld [vmem:[%s6568_s26 + $0x284] ss:$24 sps:$4 sm:$0xff]  }
 0x171   : > { %v5655_v43 = vpop.f32.mrb[56].mxu0 }
 0x172   : > { %v5656_v44 = vpop.f32.mrb[57].mxu0 }
 0x173   : > { %v6840_v48 = vadd.f32 %v5656_v44, %v5655_v43  ;;  %v5658_v49 = vpop.f32.mrb[58].mxu0 }
 0x174   : > { %v5659_v53 = vpop.f32.mrb[59].mxu0 }
 0x175   : > { %v6843_v55 = vadd.f32 %v5659_v53, %v5658_v49  ;;  %v1295_v53 = vadd.f32 %v6759_v58, %v6854_v5  ;;  %v1303_v58 = vadd.f32 %v6766_v3, %v6854_v5  ;;  %v1311_v3 = vadd.f32 %v6770_v11, %v6854_v5 }
 0x176   : > { %1669 = vmatmul.mubr.bf16.gmra.mrb[164].mxu0 %v6321_v47 }
 0x177   : > { %5259 = vmatprep.mubr.msk.bf16.mxu0 %vm1195_vm0, %v6322_v52 }
 0x179   : > { %v5661_v57 = vpop.f32.mrb[60].mxu0 }
 0x17a   : > { %v5662_v59 = vpop.f32.mrb[61].mxu0 }
 0x17b   : > { %v6847_v63 = vadd.f32 %v5662_v59, %v5661_v57  ;;  %v5664_v0 = vpop.f32.mrb[62].mxu0 }
 0x17c   : > { %v5665_v4 = vpop.f32.mrb[63].mxu0  ;;  %v1298_v0 = vadd.f32 %v6762_v62, %v6854_v5  ;;  %v1306_v62 = vadd.f32 %v6768_v7, %v6854_v5  ;;  %v1314_v7 = vadd.f32 %v6773_v15, %v6854_v5 }
 0x17e   : > { %1677 = vmatmul.mubr.bf16.gmra.mrb[168].mxu0 %v6324_v60  ;;  %v6334_v60 = vld [vmem:[%s6568_s26 + $0x2b4] ss:$24 sps:$4 sm:$0xff]  }
 0x17f   : > { %5260 = vmatprep.mubr.msk.bf16.mxu0 %vm1195_vm0, %v6325_v1 }
 0x181   : > { %v5683_v6 = vpop.f32.mrb[64].mxu0 }
 0x182   : > { %v5684_v9 = vpop.f32.mrb[65].mxu0 }
 0x183   : > { %v5685_v14 = vadd.f32 %v5684_v9, %v5683_v6  ;;  %v5686_v16 = vpop.f32.mrb[66].mxu0  ;;  %v372_v9 = vld [vmem:[%s6568_s26 + $0x2e0] sm:$0x11] }
 0x184   : > { %v5687_v20 = vpop.f32.mrb[67].mxu0 }
 0x185   : > { %v5688_v22 = vadd.f32 %v5687_v20, %v5686_v16  ;;  %v6862_v26 = vadd.f32 %v5685_v14, %v1279_v12  ;;  %v6336_v14 = vld [vmem:[%s6568_s26 + $0x2b0] ss:$24 sps:$4 sm:$0xff]   ;;  %v5203_v20 = vcombine.high %v372_v9, %v372_v9  ;;  %s6486_s26 = smov 64  }
 0x186   : > { %1685 = vmatmul.mubr.bf16.gmra.mrb[172].mxu0 %v6327_v10 }
 0x187   : > { %5261 = vmatprep.mubr.msk.bf16.mxu0 %vm1195_vm0, %v6328_v17  ;;  %v6865_v27 = vadd.f32 %v5688_v22, %v1282_v21 }
 0x189   : > { %v5689_v29 = vpop.f32.mrb[68].mxu0 }
 0x18a   : > { %v5690_v31 = vpop.f32.mrb[69].mxu0 }
 0x18b   : > { %v5691_v34 = vadd.f32 %v5690_v31, %v5689_v29  ;;  %v5692_v37 = vpop.f32.mrb[70].mxu0 }
 0x18c   : > { %v5693_v46 = vpop.f32.mrb[71].mxu0 }
 0x18d   : > { %v5694_v43 = vadd.f32 %v5693_v46, %v5692_v37  ;;  %v6873_v44 = vadd.f32 %v5691_v34, %v1287_v33  ;;  %v5202_v34 = vcombine.low %v372_v9, %v372_v9 }
 0x18e   : > { %1693 = vmatmul.mubr.bf16.gmra.mrb[176].mxu0 %v6330_v42 }
 0x18f   : > { %5262 = vmatprep.mubr.msk.bf16.mxu0 %vm1195_vm0, %v6331_v38  ;;  %v6876_v47 = vadd.f32 %v5694_v43, %v1290_v39 }
 0x191   : > { %v5695_v49 = vpop.f32.mrb[72].mxu0 }
 0x192   : > { %v5696_v52 = vpop.f32.mrb[73].mxu0 }
 0x193   : > { %v5697_v57 = vadd.f32 %v5696_v52, %v5695_v49  ;;  %v5698_v59 = vpop.f32.mrb[74].mxu0 }
 0x194   : > { %v5699_v54 = vpop.f32.mrb[75].mxu0 }
 0x195   : > { %v5700_v1 = vadd.f32 %v5699_v54, %v5698_v59  ;;  %v6884_v4 = vadd.f32 %v5697_v57, %v1295_v53  ;;  %v1319_v53 = vadd.f32 %v6777_v19, %v6854_v5  ;;  %v1330_v19 = vadd.f32 %v6787_v32, %v6854_v5 }
 0x196   : > { %1701 = vmatmul.mubr.bf16.gmra.mrb[180].mxu0 %v6333_v50 }
 0x197   : > { %5263 = vmatprep.mubr.msk.bf16.mxu0 %vm1195_vm0, %v6334_v60  ;;  %v6887_v6 = vadd.f32 %v5700_v1, %v1298_v0  ;;  %v1322_v60 = vadd.f32 %v6780_v23, %v6854_v5 }
 0x199   : > { %v5701_v10 = vpop.f32.mrb[76].mxu0 }
 0x19a   : > { %v5702_v12 = vpop.f32.mrb[77].mxu0 }
 0x19b   : > { %v5703_v16 = vadd.f32 %v5702_v12, %v5701_v10  ;;  %v5704_v17 = vpop.f32.mrb[78].mxu0  ;;  %v1327_v10 = vadd.f32 %v6784_v28, %v6854_v5  ;;  %v1338_v28 = vadd.f32 %v6794_v40, %v6854_v5 }
 0x19c   : > { %v5705_v21 = vpop.f32.mrb[79].mxu0 }
 0x19d   : > { %v5706_v22 = vadd.f32 %v5705_v21, %v5704_v17  ;;  %v6895_v29 = vadd.f32 %v5703_v16, %v1303_v58 }
 0x19e   : > { %1709 = vmatmul.mubr.bf16.gmra.mrb[184].mxu0 %v6336_v14 }
 0x19f   : > { %5264 = vmatprep.mubr.msk.bf16.mxu0 %vm1195_vm0, %v5203_v20  ;;  %v6898_v31 = vadd.f32 %v5706_v22, %v1306_v62  ;;  %v1335_v62 = vadd.f32 %v6791_v36, %v6854_v5  ;;  %v1346_v36 = vadd.f32 %v6801_v51, %v6854_v5 }
 0x1a1   : > { %v5707_v42 = vpop.f32.mrb[80].mxu0 }
 0x1a2   : > { %v5708_v33 = vpop.f32.mrb[81].mxu0 }
 0x1a3   : > { %v5709_v37 = vadd.f32 %v5708_v33, %v5707_v42  ;;  %v5710_v38 = vpop.f32.mrb[82].mxu0 }
 0x1a4   : > { %v5711_v46 = vpop.f32.mrb[83].mxu0 }
 0x1a5   : > { %v5712_v39 = vadd.f32 %v5711_v46, %v5710_v38  ;;  %v6904_v43 = vadd.f32 %v5709_v37, %v1311_v3  ;;  %v1343_v46 = vadd.f32 %v6798_v45, %v6854_v5  ;;  %v1354_v45 = vadd.f32 %v6808_v61, %v6854_v5 }
 0x1a6   : > { %1717 = vmatmul.mubr.bf16.gmra.mrb[188].mxu0 %v5202_v34 }
 0x1a7   : > { %v6906_v49 = vadd.f32 %v5712_v39, %v1314_v7  ;;  %4407 = vmatprep.mubr.bf16.mxu0 %v6485_v24 }
 0x1a9   : > { %v5713_v52 = vpop.f32.mrb[84].mxu0 }
 0x1aa   : > { %v5714_v50 = vpop.f32.mrb[85].mxu0 }
 0x1ab   : > { %v5715_v11 = vadd.f32 %v5714_v50, %v5713_v52  ;;  %v5716_v57 = vpop.f32.mrb[86].mxu0 }
 0x1ac   : > { %v5717_v59 = vpop.f32.mrb[87].mxu0 }
 0x1ad   : > { %v5718_v15 = vadd.f32 %v5717_v59, %v5716_v57  ;;  %v6913_v54 = vadd.f32 %v5715_v11, %v1319_v53  ;;  %v1351_v59 = vadd.f32 %v6805_v56, %v6854_v5  ;;  %v1362_v56 = vadd.f32 %v6815_v8, %v6854_v5 }
 0x1af   : > { %v6915_v0 = vadd.f32 %v5718_v15, %v1322_v60 }
 0x1b1   : > { %v5719_v1 = vpop.f32.mrb[88].mxu0 }
 0x1b2   : > { %v5720_v9 = vpop.f32.mrb[89].mxu0 }
 0x1b3   : > { %v5721_v12 = vadd.f32 %v5720_v9, %v5719_v1  ;;  %v5722_v14 = vpop.f32.mrb[90].mxu0 }
 0x1b4   : > { %v5723_v58 = vpop.f32.mrb[91].mxu0 }
 0x1b5   : > { %v5724_v16 = vadd.f32 %v5723_v58, %v5722_v14  ;;  %v6921_v17 = vadd.f32 %v5721_v12, %v1327_v10  ;;  %v1359_v58 = vadd.f32 %v6812_v2, %v6854_v5  ;;  %v1370_v2 = vadd.f32 %v6822_v18, %v6854_v5 }
 0x1b7   : > { %v6923_v23 = vadd.f32 %v5724_v16, %v1330_v19 }
 0x1b9   : > { %v5725_v20 = vpop.f32.mrb[92].mxu0 }
 0x1ba   : > { %v5726_v21 = vpop.f32.mrb[93].mxu0 }
 0x1bb   : > { %v5727_v22 = vadd.f32 %v5726_v21, %v5725_v20  ;;  %v5728_v42 = vpop.f32.mrb[94].mxu0 }
 0x1bc   : > { %v5729_v33 = vpop.f32.mrb[95].mxu0 }
 0x1bd   : > { %v5730_v34 = vadd.f32 %v5729_v33, %v5728_v42  ;;  %v6929_v3 = vadd.f32 %v5727_v22, %v1335_v62  ;;  %v1367_v33 = vadd.f32 %v6819_v13, %v6854_v5  ;;  %v1378_v13 = vadd.f32 %v6829_v30, %v6854_v5 }
 0x1bf   : > { %v6931_v32 = vadd.f32 %v5730_v34, %v1338_v28 }
 0x1c1   : > { %v5731_v37 = vpop.f32.mrb[96].mxu0 }
 0x1c2   : > { %v5732_v38 = vpop.f32.mrb[97].mxu0 }
 0x1c3   : > { %v5733_v7 = vadd.f32 %v5732_v38, %v5731_v37  ;;  %v5734_v39 = vpop.f32.mrb[98].mxu0 }
 0x1c4   : > { %v5735_v52 = vpop.f32.mrb[99].mxu0 }
 0x1c5   : > { %v5736_v50 = vadd.f32 %v5735_v52, %v5734_v39  ;;  %v6937_v53 = vadd.f32 %v5733_v7, %v1343_v46  ;;  %v1375_v52 = vadd.f32 %v6826_v25, %v6854_v5  ;;  %v1386_v25 = vadd.f32 %v6836_v41, %v6854_v5 }
 0x1c7   : > { %v6939_v40 = vadd.f32 %v5736_v50, %v1346_v36 }
 0x1c9   : > { %v5737_v11 = vpop.f32.mrb[100].mxu0 }
 0x1ca   : > { %v5738_v57 = vpop.f32.mrb[101].mxu0 }
 0x1cb   : > { %v5739_v60 = vadd.f32 %v5738_v57, %v5737_v11  ;;  %v5740_v15 = vpop.f32.mrb[102].mxu0 }
 0x1cc   : > { %v5741_v1 = vpop.f32.mrb[103].mxu0 }
 0x1cd   : > { %v5742_v9 = vadd.f32 %v5741_v1, %v5740_v15  ;;  %v6945_v10 = vadd.f32 %v5739_v60, %v1351_v59  ;;  %v1383_v1 = vadd.f32 %v6833_v35, %v6854_v5  ;;  %v1394_v35 = vadd.f32 %v6843_v55, %v6854_v5 }
 0x1cf   : > { %v6947_v51 = vadd.f32 %v5742_v9, %v1354_v45 }
 0x1d1   : > { %v5743_v12 = vpop.f32.mrb[104].mxu0 }
 0x1d2   : > { %v5744_v14 = vpop.f32.mrb[105].mxu0 }
 0x1d3   : > { %v5745_v19 = vadd.f32 %v5744_v14, %v5743_v12  ;;  %v5746_v16 = vpop.f32.mrb[106].mxu0 }
 0x1d4   : > { %v5747_v20 = vpop.f32.mrb[107].mxu0 }
 0x1d5   : > { %v5748_v21 = vadd.f32 %v5747_v20, %v5746_v16  ;;  %v6953_v62 = vadd.f32 %v5745_v19, %v1359_v58  ;;  %v1391_v20 = vadd.f32 %v6840_v48, %v6854_v5 }
 0x1d7   : > { %v6955_v61 = vadd.f32 %v5748_v21, %v1362_v56 }
 0x1d9   : > { %v5749_v22 = vpop.f32.mrb[108].mxu0 }
 0x1da   : > { %v5750_v42 = vpop.f32.mrb[109].mxu0 }
 0x1db   : > { %v5751_v28 = vadd.f32 %v5750_v42, %v5749_v22  ;;  %v5752_v34 = vpop.f32.mrb[110].mxu0 }
 0x1dc   : > { %v5753_v37 = vpop.f32.mrb[111].mxu0 }
 0x1dd   : > { %v5754_v38 = vadd.f32 %v5753_v37, %v5752_v34  ;;  %v6961_v46 = vadd.f32 %v5751_v28, %v1367_v33  ;;  %v1399_v37 = vadd.f32 %v6847_v63, %v6854_v5 }
 0x1df   : > { %v6963_v8 = vadd.f32 %v5754_v38, %v1370_v2 }
 0x1e1   : > { %v5755_v7 = vpop.f32.mrb[112].mxu0 }
 0x1e2   : > { %v5756_v39 = vpop.f32.mrb[113].mxu0 }
 0x1e3   : > { %v5757_v36 = vadd.f32 %v5756_v39, %v5755_v7  ;;  %v5758_v50 = vpop.f32.mrb[114].mxu0 }
 0x1e4   : > { %v5759_v11 = vpop.f32.mrb[115].mxu0 }
 0x1e5   : > { %v5760_v57 = vadd.f32 %v5759_v11, %v5758_v50  ;;  %v6969_v59 = vadd.f32 %v5757_v36, %v1375_v52 }
 0x1e7   : > { %v6971_v18 = vadd.f32 %v5760_v57, %v1378_v13 }
 0x1e9   : > { %v5761_v60 = vpop.f32.mrb[116].mxu0 }
 0x1ea   : > { %v5762_v15 = vpop.f32.mrb[117].mxu0 }
 0x1eb   : > { %v5763_v45 = vadd.f32 %v5762_v15, %v5761_v60  ;;  %v5764_v9 = vpop.f32.mrb[118].mxu0 }
 0x1ec   : > { %v5765_v12 = vpop.f32.mrb[119].mxu0 }
 0x1ed   : > { %v5766_v14 = vadd.f32 %v5765_v12, %v5764_v9  ;;  %v6977_v58 = vadd.f32 %v5763_v45, %v1383_v1 }
 0x1ef   : > { %v6979_v30 = vadd.f32 %v5766_v14, %v1386_v25 }
 0x1f1   : > { %v5767_v19 = vpop.f32.mrb[120].mxu0 }
 0x1f2   : > { %v5768_v16 = vpop.f32.mrb[121].mxu0 }
 0x1f3   : > { %v5769_v56 = vadd.f32 %v5768_v16, %v5767_v19  ;;  %v5770_v21 = vpop.f32.mrb[122].mxu0 }
 0x1f4   : > { %v5771_v22 = vpop.f32.mrb[123].mxu0 }
 0x1f5   : > { %v5772_v42 = vadd.f32 %v5771_v22, %v5770_v21  ;;  %v6985_v33 = vadd.f32 %v5769_v56, %v1391_v20 }
 0x1f7   : > { %v6987_v41 = vadd.f32 %v5772_v42, %v1394_v35 }
 0x1f9   : > { %v5773_v28 = vpop.f32.mrb[124].mxu0 }
 0x1fa   : > { %v5774_v34 = vpop.f32.mrb[125].mxu0 }
 0x1fb   : > { %v5775_v2 = vadd.f32 %v5774_v34, %v5773_v28  ;;  %v5776_v38 = vpop.f32.mrb[126].mxu0 }
 0x1fc   : > { %v5777_v7 = vpop.f32.mrb[127].mxu0 }
 0x1fd   : > { %v6991_v48 = vadd.f32 %v5775_v2, %v1399_v37 }
 0x201   : > { %v1598_v39 = vpop.f32.mrb[128].mxu0 }
 0x202   : > { %v1599_v52 = vadd.f32 %v1598_v39, %v6862_v26  ;;  %v1600_v36 = vpop.f32.mrb[129].mxu0 }
 0x203   : > { %v1601_v55 = vpop.f32.mrb[130].mxu0 }
 0x204   : > { %v1602_v50 = vadd.f32 %v1601_v55, %v6865_v27  ;;  %v1603_v11 = vpop.f32.mrb[131].mxu0  ;;  %vm1724_vm2 = vcmp.ge.f32.partialorder %v1599_v52, 0.0 }
 0x206   : > { %vm1725_vm1 = vcmp.ge.f32.partialorder %v1602_v50, 0.0 }
 0x209   : > { %v1606_v13 = vpop.f32.mrb[132].mxu0 }
 0x20a   : > { %v1607_v57 = vadd.f32 %v1606_v13, %v6873_v44  ;;  %v1608_v60 = vpop.f32.mrb[133].mxu0  ;;  %v1756_v13 = vmul.f32 0.01, %v1602_v50 }
 0x20b   : > { %v1609_v15 = vpop.f32.mrb[134].mxu0 }
 0x20c   : > { %v6997_v63 = vadd.f32 %v1609_v15, %v6876_v47  ;;  %v1611_v5 = vpop.f32.mrb[135].mxu0  ;;  %vm1726_vm3 = vcmp.ge.f32.partialorder %v1607_v57, 0.0 }
 0x20d   : > { %v1757_v5 = vmul.f32 0.01, %v1607_v57 }
 0x20e   : > { %vm1727_vm4 = vcmp.ge.f32.partialorder %v6997_v63, 0.0 }
 0x211   : > { %v1614_v1 = vpop.f32.mrb[136].mxu0 }
 0x212   : > { %v7000_v45 = vadd.f32 %v1614_v1, %v6884_v4  ;;  %v1616_v9 = vpop.f32.mrb[137].mxu0 }
 0x213   : > { %v1617_v26 = vpop.f32.mrb[138].mxu0 }
 0x214   : > { %v7003_v12 = vadd.f32 %v1617_v26, %v6887_v6  ;;  %v1619_v27 = vpop.f32.mrb[139].mxu0  ;;  %v7041_v26 = vsel %vm1725_vm1, %v1602_v50, %v1756_v13  ;;  %vm1728_vm5 = vcmp.ge.f32.partialorder %v7000_v45, 0.0 }
 0x215   : > { %v7045_v27 = vsel %vm1726_vm3, %v1607_v57, %v1757_v5 }
 0x216   : > { %vm1729_vm6 = vcmp.ge.f32.partialorder %v7003_v12, 0.0 }
 0x219   : > { %v1622_v25 = vpop.f32.mrb[140].mxu0 }
 0x21a   : > { %v7006_v14 = vadd.f32 %v1622_v25, %v6895_v29  ;;  %v1624_v44 = vpop.f32.mrb[141].mxu0  ;;  %v1758_v25 = vmul.f32 0.01, %v6997_v63 }
 0x21b   : > { %v1625_v19 = vpop.f32.mrb[142].mxu0  ;;  %v1759_v44 = vmul.f32 0.01, %v7000_v45 }
 0x21c   : > { %v7009_v47 = vadd.f32 %v1625_v19, %v6898_v31  ;;  %v1627_v16 = vpop.f32.mrb[143].mxu0  ;;  %v7058_v57 = vsel %vm1727_vm4, %v6997_v63, %v1758_v25  ;;  %vm1730_vm7 = vcmp.ge.f32.partialorder %v7006_v14, 0.0 }
 0x21e   : > { %vm1731_vm8 = vcmp.ge.f32.partialorder %v7009_v47, 0.0 }
 0x221   : > { %v1630_v20 = vpop.f32.mrb[144].mxu0 }
 0x222   : > { %v7012_v4 = vadd.f32 %v1630_v20, %v6904_v43  ;;  %v1632_v56 = vpop.f32.mrb[145].mxu0 }
 0x223   : > { %v1633_v21 = vpop.f32.mrb[146].mxu0 }
 0x224   : > { %v7015_v6 = vadd.f32 %v1633_v21, %v6906_v49  ;;  %v1635_v22 = vpop.f32.mrb[147].mxu0  ;;  %v7064_v21 = vsel %vm1728_vm5, %v7000_v45, %v1759_v44  ;;  %vm1732_vm9 = vcmp.ge.f32.partialorder %v7012_v4, 0.0 }
 0x225   : > { %v1760_v22 = vmul.f32 0.01, %v7003_v12 }
 0x226   : > { %vm1733_vm10 = vcmp.ge.f32.partialorder %v7015_v6, 0.0 }
 0x227   : > { %v7073_v63 = vsel %vm1729_vm6, %v7003_v12, %v1760_v22 }
 0x229   : > { %v1638_v35 = vpop.f32.mrb[148].mxu0 }
 0x22a   : > { %v7018_v29 = vadd.f32 %v1638_v35, %v6913_v54  ;;  %v1640_v42 = vpop.f32.mrb[149].mxu0 }
 0x22b   : > { %v1641_v28 = vpop.f32.mrb[150].mxu0 }
 0x22c   : > { %v7021_v31 = vadd.f32 %v1641_v28, %v6915_v0  ;;  %v1643_v34 = vpop.f32.mrb[151].mxu0  ;;  %vm1734_vm11 = vcmp.ge.f32.partialorder %v7018_v29, 0.0 }
 0x22e   : > { %vm1735_vm12 = vcmp.ge.f32.partialorder %v7021_v31, 0.0 }
 0x231   : > { %v1646_v37 = vpop.f32.mrb[152].mxu0 }
 0x232   : > { %v7024_v43 = vadd.f32 %v1646_v37, %v6921_v17  ;;  %v1648_v2 = vpop.f32.mrb[153].mxu0  ;;  %v1762_v37 = vmul.f32 0.01, %v7009_v47 }
 0x233   : > { %v1649_v38 = vpop.f32.mrb[154].mxu0 }
 0x234   : > { %v7027_v49 = vadd.f32 %v1649_v38, %v6923_v23  ;;  %v1651_v7 = vpop.f32.mrb[155].mxu0  ;;  %v1755_v23 = vmul.f32 0.01, %v1599_v52  ;;  %vm1736_vm13 = vcmp.ge.f32.partialorder %v7024_v43, 0.0 }
 0x236   : > { %v1768_v22 = vmul.f32 0.01, %v7027_v49  ;;  %vm1737_vm14 = vcmp.ge.f32.partialorder %v7027_v49, 0.0 }
 0x239   : > { %v1654_v39 = vpop.f32.mrb[156].mxu0 }
 0x23a   : > { %v7030_v54 = vadd.f32 %v1654_v39, %v6929_v3  ;;  %v1656_v36 = vpop.f32.mrb[157].mxu0  ;;  %v1763_v39 = vmul.f32 0.01, %v7012_v4 }
 0x23b   : > { %v1657_v55 = vpop.f32.mrb[158].mxu0 }
 0x23c   : > { %v7033_v0 = vadd.f32 %v1657_v55, %v6931_v32  ;;  %v1659_v11 = vpop.f32.mrb[159].mxu0  ;;  %v7043_v32 = vsel %vm1724_vm2, %v1599_v52, %v1755_v23  ;;  %v7094_v36 = vsel %vm1732_vm9, %v7012_v4, %v1763_v39  ;;  %v1764_v55 = vmul.f32 0.01, %v7015_v6 }
 0x23d   : > { %vm1738_vm15 = vcmp.ge.f32.partialorder %v7030_v54, 0.0 }
 0x23e   : > { %vm1739_vm0 = vcmp.ge.f32.partialorder %v7033_v0, 0.0 }
 0x241   : > { %v1662_v60 = vpop.f32.mrb[160].mxu0 }
 0x242   : > { %v7036_v17 = vadd.f32 %v1662_v60, %v6937_v53  ;;  %v1664_v15 = vpop.f32.mrb[161].mxu0  ;;  %v1817_v53 = vadd.f32 %v7041_v26, %v7043_v32 }
 0x243   : > { %v1665_v1 = vpop.f32.mrb[162].mxu0  ;;  %v1765_v15 = vmul.f32 0.01, %v7018_v29 }
 0x244   : > { %v7039_v3 = vadd.f32 %v1665_v1, %v6939_v40  ;;  %v1667_v9 = vpop.f32.mrb[163].mxu0  ;;  %v1818_v40 = vadd.f32 %v1817_v53, %v7045_v27  ;;  %v7109_v1 = vsel %vm1733_vm10, %v7015_v6, %v1764_v55  ;;  %v1767_v53 = vmul.f32 0.01, %v7024_v43 }
 0x245   : > { %v7112_v9 = vsel %vm1734_vm11, %v7018_v29, %v1765_v15  ;;  %vm1740_vm1 = vcmp.ge.f32.partialorder %v7036_v17, 0.0 }
 0x246   : > { %v1819_v35 = vadd.f32 %v1818_v40, %v7058_v57  ;;  %vm1741_vm2 = vcmp.ge.f32.partialorder %v7039_v3, 0.0 }
 0x248   : > { %v1820_v42 = vadd.f32 %v1819_v35, %v7064_v21 }
 0x249   : > { %v1670_v19 = vpop.f32.mrb[164].mxu0 }
 0x24a   : > { %v7055_v50 = vadd.f32 %v1670_v19, %v6945_v10  ;;  %v1672_v52 = vpop.f32.mrb[165].mxu0  ;;  %v1761_v10 = vmul.f32 0.01, %v7006_v14  ;;  %v1821_v38 = vadd.f32 %v1820_v42, %v7073_v63 }
 0x24b   : > { %v1673_v16 = vpop.f32.mrb[166].mxu0 }
 0x24c   : > { %v7061_v20 = vadd.f32 %v1673_v16, %v6947_v51  ;;  %v1675_v56 = vpop.f32.mrb[167].mxu0  ;;  %v7079_v34 = vsel %vm1730_vm7, %v7006_v14, %v1761_v10  ;;  %v7091_v14 = vsel %vm1731_vm8, %v7009_v47, %v1762_v37  ;;  %vm1742_vm3 = vcmp.ge.f32.partialorder %v7055_v50, 0.0 }
 0x24d   : > { %v7130_v56 = vsel %vm1736_vm13, %v7024_v43, %v1767_v53 }
 0x24e   : > { %vm1743_vm4 = vcmp.ge.f32.partialorder %v7061_v20, 0.0 }
 0x251   : > { %v1678_v51 = vpop.f32.mrb[168].mxu0 }
 0x252   : > { %v7076_v28 = vadd.f32 %v1678_v51, %v6953_v62  ;;  %v1680_v45 = vpop.f32.mrb[169].mxu0  ;;  %v1822_v62 = vadd.f32 %v1821_v38, %v7079_v34 }
 0x253   : > { %v1681_v2 = vpop.f32.mrb[170].mxu0  ;;  %v1770_v45 = vmul.f32 0.01, %v7033_v0 }
 0x254   : > { %v7085_v7 = vadd.f32 %v1681_v2, %v6955_v61  ;;  %v1683_v12 = vpop.f32.mrb[171].mxu0  ;;  %v1823_v13 = vadd.f32 %v1822_v62, %v7091_v14  ;;  %v1772_v62 = vmul.f32 0.01, %v7039_v3  ;;  %vm1744_vm5 = vcmp.ge.f32.partialorder %v7076_v28, 0.0 }
 0x255   : > { %v1771_v12 = vmul.f32 0.01, %v7036_v17 }
 0x256   : > { %v1824_v47 = vadd.f32 %v1823_v13, %v7094_v36  ;;  %vm1745_vm7 = vcmp.ge.f32.partialorder %v7085_v7, 0.0 }
 0x257   : > { %v7160_v39 = vsel %vm1740_vm1, %v7036_v17, %v1771_v12  ;;  %vm1863_vm1 = vcmask 516096  }
 0x258   : > { %v1825_v25 = vadd.f32 %v1824_v47, %v7109_v1  ;;  %v7171_v47 = vsel %vm1741_vm2, %v7039_v3, %v1772_v62  ;;  %vm4248_vm2 = vcmask 1045504  }
 0x259   : > { %v1686_v11 = vpop.f32.mrb[172].mxu0 }
 0x25a   : > { %v7100_v61 = vadd.f32 %v1686_v11, %v6961_v46  ;;  %v1688_v60 = vpop.f32.mrb[173].mxu0  ;;  %v1766_v46 = vmul.f32 0.01, %v7021_v31  ;;  %v1826_v19 = vadd.f32 %v1825_v25, %v7112_v9  ;;  %v1775_v25 = vmul.f32 0.01, %v7076_v28 }
 0x25b   : > { %v1689_v23 = vpop.f32.mrb[174].mxu0  ;;  %v1773_v60 = vmul.f32 0.01, %v7055_v50 }
 0x25c   : > { %v7106_v4 = vadd.f32 %v1689_v23, %v6963_v8  ;;  %v1691_v5 = vpop.f32.mrb[175].mxu0  ;;  %v7124_v29 = vsel %vm1735_vm12, %v7021_v31, %v1766_v46  ;;  %v7139_v31 = vsel %vm1737_vm14, %v7027_v49, %v1768_v22  ;;  %v1774_v46 = vmul.f32 0.01, %v7061_v20 }
 0x25d   : > { %v1827_v35 = vadd.f32 %v1826_v19, %v7124_v29  ;;  %v7174_v5 = vsel %vm1742_vm3, %v7055_v50, %v1773_v60  ;;  %v1776_v22 = vmul.f32 0.01, %v7085_v7  ;;  %vm1746_vm8 = vcmp.ge.f32.partialorder %v7100_v61, 0.0 }
 0x25e   : > { %v7184_v19 = vsel %vm1743_vm4, %v7061_v20, %v1774_v46  ;;  %vm1747_vm9 = vcmp.ge.f32.partialorder %v7106_v4, 0.0  ;;  %vm2592_vm3 = vsmask.f32 7424  ;;  %vm3202_vm4 = vcmask 1046528  }
 0x25f   : > { %v1828_v10 = vadd.f32 %v1827_v35, %v7130_v56 }
 0x261   : > { %v1694_v44 = vpop.f32.mrb[176].mxu0  ;;  %v1829_v2 = vadd.f32 %v1828_v10, %v7139_v31 }
 0x262   : > { %v7121_v8 = vadd.f32 %v1694_v44, %v6969_v59  ;;  %v1696_v6 = vpop.f32.mrb[177].mxu0  ;;  %v1769_v59 = vmul.f32 0.01, %v7030_v54 }
 0x263   : > { %v1697_v40 = vpop.f32.mrb[178].mxu0 }
 0x264   : > { %v7127_v52 = vadd.f32 %v1697_v40, %v6971_v18  ;;  %v1699_v16 = vpop.f32.mrb[179].mxu0  ;;  %v7145_v51 = vsel %vm1738_vm15, %v7030_v54, %v1769_v59  ;;  %v7157_v54 = vsel %vm1739_vm0, %v7033_v0, %v1770_v45  ;;  %vm1748_vm10 = vcmp.ge.f32.partialorder %v7121_v8, 0.0 }
 0x265   : > { %v7187_v16 = vsel %vm1744_vm5, %v7076_v28, %v1775_v25  ;;  %vm1846_vm0 = vcmask 1041408   ;;  %vm3707_vm5 = vsmask.f32 6400 }
 0x266   : > { %vm1749_vm11 = vcmp.ge.f32.partialorder %v7127_v52, 0.0 }
 0x269   : > { %v1702_v18 = vpop.f32.mrb[180].mxu0 }
 0x26a   : > { %v7142_v42 = vadd.f32 %v1702_v18, %v6977_v58  ;;  %v1704_v43 = vpop.f32.mrb[181].mxu0  ;;  %v1830_v58 = vadd.f32 %v1829_v2, %v7145_v51  ;;  %v7199_v18 = vsel %vm1745_vm7, %v7085_v7, %v1776_v22 }
 0x26b   : > { %v1705_v37 = vpop.f32.mrb[182].mxu0  ;;  %v1778_v43 = vmul.f32 0.01, %v7106_v4 }
 0x26c   : > { %v7151_v38 = vadd.f32 %v1705_v37, %v6979_v30  ;;  %v1707_v49 = vpop.f32.mrb[183].mxu0  ;;  %v1831_v11 = vadd.f32 %v1830_v58, %v7157_v54  ;;  %v1779_v37 = vmul.f32 0.01, %v7121_v8  ;;  %v1781_v58 = vmul.f32 0.01, %v7142_v42 }
 0x26d   : > { %v7212_v7 = vsel %vm1747_vm9, %v7106_v4, %v1778_v43  ;;  %vm1750_vm12 = vcmp.ge.f32.partialorder %v7142_v42, 0.0 }
 0x26e   : > { %v1832_v23 = vadd.f32 %v1831_v11, %v7160_v39  ;;  %v7215_v49 = vsel %vm1748_vm10, %v7121_v8, %v1779_v37  ;;  %v7227_v4 = vsel %vm1750_vm12, %v7142_v42, %v1781_v58  ;;  %v1782_v8 = vmul.f32 0.01, %v7151_v38 }
 0x26f   : > { %vm1751_vm13 = vcmp.ge.f32.partialorder %v7151_v38, 0.0 }
 0x271   : > { %v1710_v55 = vpop.f32.mrb[184].mxu0 }
 0x272   : > { %v1711_v30 = vadd.f32 %v1710_v55, %v6985_v33  ;;  %v1712_v13 = vpop.f32.mrb[185].mxu0  ;;  %v1833_v33 = vadd.f32 %v1832_v23, %v7171_v47 }
 0x273   : > { %v1713_v15 = vpop.f32.mrb[186].mxu0 }
 0x274   : > { %v1714_v0 = vadd.f32 %v1713_v15, %v6987_v41  ;;  %v1715_v17 = vpop.f32.mrb[187].mxu0  ;;  %v1834_v44 = vadd.f32 %v1833_v33, %v7174_v5  ;;  %v1783_v13 = vmul.f32 0.01, %v1711_v30  ;;  %vm1752_vm14 = vcmp.ge.f32.partialorder %v1711_v30, 0.0 }
 0x275   : > { %v7234_v15 = vsel %vm1751_vm13, %v7151_v38, %v1782_v8 }
 0x276   : > { %v1835_v35 = vadd.f32 %v1834_v44, %v7184_v19  ;;  %v7236_v23 = vsel %vm1752_vm14, %v1711_v30, %v1783_v13  ;;  %vm1753_vm15 = vcmp.ge.f32.partialorder %v1714_v0, 0.0 }
 0x278   : > { %v1836_v10 = vadd.f32 %v1835_v35, %v7187_v16 }
 0x279   : > { %v1718_v53 = vpop.f32.mrb[188].mxu0 }
 0x27a   : > { %v1719_v41 = vadd.f32 %v1718_v53, %v6991_v48  ;;  %v1720_v3 = vpop.f32.mrb[189].mxu0  ;;  %v1777_v48 = vmul.f32 0.01, %v7100_v61  ;;  %v1837_v45 = vadd.f32 %v1836_v10, %v7199_v18 }
 0x27b   : > { %v1721_v50 = vpop.f32.mrb[190].mxu0 }
 0x27c   : > { %vm1754_vm6 = vcmp.ge.f32.partialorder %v1719_v41, 0.0  ;;  %v1785_v6 = vmul.f32 0.01, %v1719_v41  ;;  %v1722_v40 = vpop.f32.mrb[191].mxu0  ;;  %v7203_v28 = vsel %vm1746_vm8, %v7100_v61, %v1777_v48  ;;  %v1780_v61 = vmul.f32 0.01, %v7127_v52 }
 0x27d   : > { %v1838_v2 = vadd.f32 %v1837_v45, %v7203_v28 }
 0x27e   : > { %v7192_v59 = vsel %vm1754_vm6, %v1719_v41, %v1785_v6  ;;  %v7224_v55 = vsel %vm1749_vm11, %v7127_v52, %v1780_v61  ;;  %v1784_v52 = vmul.f32 0.01, %v1714_v0 }
 0x27f   : > { %v1859_v20 = vrot.slane %v7192_v59, 1  ;;  %v1839_v12 = vadd.f32 %v1838_v2, %v7212_v7  ;;  %v1847_v33 = vsel %vm1846_vm0, %v7192_v59, 0.0 }
 0x280   : > { %v7240_v46 = vsel %vm1753_vm15, %v1714_v0, %v1784_v52 }
 0x281   : > { %1860 = vrot.lane.b32.xlu0 %v1859_v20, %s6486_s26  ;;  %v1840_v62 = vadd.f32 %v1839_v12, %v7215_v49 }
 0x283   : > { %v1841_v11 = vadd.f32 %v1840_v62, %v7224_v55 }
 0x285   : > { %v1842_v60 = vadd.f32 %v1841_v11, %v7227_v4 }
 0x287   : > { %v1843_v17 = vadd.f32 %v1842_v60, %v7234_v15 }
 0x289   : > { %v1844_v42 = vadd.f32 %v1843_v17, %v7236_v23 }
 0x28b   : > { %v1845_v25 = vadd.f32 %v1844_v42, %v7240_v46 }
 0x28d   : > { %v1848_v53 = vadd.f32 %v1847_v33, %v1845_v25 }
 0x2a0   : > { %1849 = vadd.xlane.f32.xlu0 %v1848_v53 }
 0x2f3   : > { %v1861_v38 = vpop.permute.xlu0 %1860 }
 0x2f4   : > { %v1864_v30 = vsel %vm1863_vm1, %v1861_v38, 0.0 }
 0x2f5   : > { %1865 = vadd.xlane.f32.xlu1 %v1864_v30 }
 0x32d   : > { %v1850_v44 = vpop.xlane.xlu0 %1849 }
 0x32e   : > { %v1851_v41 = vrot.slane %v1850_v44, 4 }
 0x330   : > { %v1852_v3 = vadd.f32 %v1851_v41, %v1850_v44 }
 0x332   : > { %v1853_v50 = vrot.slane %v1852_v3, 2 }
 0x334   : > { %v1854_v6 = vadd.f32 %v1853_v50, %v1852_v3 }
 0x336   : > { %v1855_v40 = vrot.slane %v1854_v6, 1 }
 0x338   : > { %v1856_v0 = vadd.f32 %v1855_v40, %v1854_v6 }
 0x33a   : > { %6133 = vpush %v1856_v0 }
 0x36b   : > { %s6134_s18 = spop %6133 }
 0x382   : > { %v1866_v22 = vpop.xlane.xlu1 %1865 }
 0x383   : > { %v1867_v35 = vrot.slane %v1866_v22, 4 }
 0x385   : > { %v1868_v48 = vadd.f32 %v1867_v35, %v1866_v22 }
 0x387   : > { %v1869_v20 = vrot.slane %v1868_v48, 2 }
 0x389   : > { %v1870_v10 = vadd.f32 %v1869_v20, %v1868_v48 }
 0x38b   : > { %v1871_v43 = vrot.slane %v1870_v10, 1 }
 0x38d   : > { %v1872_v45 = vadd.f32 %v1871_v43, %v1870_v10 }
 0x38f   : > { %6135 = vpush %v1872_v45 }
 0x3c0   : > { %s6136_s19 = spop %6135 }
 0x3c1   : > { %s1874_s20 = ssub.f32 %s6134_s18, %s6136_s19 }
 0x3c3   : > { %s1877_s21 = smul.f32 3.2349897e-05, %s1874_s20 }
 0x3c5   : > { %v7246_v37 = vstv %s1877_s21 }
 0x3c6   : > { %v7250_v2 = vsub.f32 %v7192_v59, %v7246_v37  ;;  %v7260_v58 = vsub.f32 %v7043_v32, %v7246_v37  ;;  %v7264_v62 = vsub.f32 %v7041_v26, %v7246_v37  ;;  %v7268_v59 = vsub.f32 %v7045_v27, %v7246_v37 }
 0x3c7   : > { %v7276_v13 = vsub.f32 %v7058_v57, %v7246_v37  ;;  %v7280_v32 = vsub.f32 %v7064_v21, %v7246_v37  ;;  %v7286_v27 = vsub.f32 %v7073_v63, %v7246_v37  ;;  %v7292_v57 = vsub.f32 %v7079_v34, %v7246_v37 }
 0x3c8   : > { %v7254_v61 = vmul.f32 %v7250_v2, %v7250_v2  ;;  %v1910_v8 = vmul.f32 %v7260_v58, %v7260_v58  ;;  %v1911_v11 = vmul.f32 %v7264_v62, %v7264_v62  ;;  %v1912_v26 = vmul.f32 %v7268_v59, %v7268_v59 }
 0x3c9   : > { %v1913_v52 = vmul.f32 %v7276_v13, %v7276_v13  ;;  %v1914_v21 = vmul.f32 %v7280_v32, %v7280_v32  ;;  %v7298_v33 = vsub.f32 %v7091_v14, %v7246_v37  ;;  %v1915_v63 = vmul.f32 %v7286_v27, %v7286_v27 }
 0x3ca   : > { %v1982_v12 = vrot.slane %v7254_v61, 1  ;;  %v1941_v60 = vadd.f32 %v1911_v11, %v1910_v8  ;;  %v7304_v53 = vsub.f32 %v7094_v36, %v7246_v37  ;;  %v1916_v34 = vmul.f32 %v7292_v57, %v7292_v57 }
 0x3cb   : > { %v7310_v30 = vsub.f32 %v7109_v1, %v7246_v37  ;;  %v1917_v14 = vmul.f32 %v7298_v33, %v7298_v33  ;;  %v7316_v41 = vsub.f32 %v7112_v9, %v7246_v37  ;;  %v7322_v50 = vsub.f32 %v7124_v29, %v7246_v37 }
 0x3cc   : > { %1983 = vrot.lane.b32.xlu1 %v1982_v12, %s6486_s26  ;;  %v1942_v17 = vadd.f32 %v1941_v60, %v1912_v26  ;;  %v1918_v36 = vmul.f32 %v7304_v53, %v7304_v53  ;;  %v7328_v40 = vsub.f32 %v7130_v56, %v7246_v37  ;;  %v7334_v22 = vsub.f32 %v7139_v31, %v7246_v37 }
 0x3cd   : > { %v1919_v1 = vmul.f32 %v7310_v30, %v7310_v30  ;;  %v1920_v9 = vmul.f32 %v7316_v41, %v7316_v41  ;;  %v1921_v29 = vmul.f32 %v7322_v50, %v7322_v50  ;;  %v7340_v48 = vsub.f32 %v7145_v51, %v7246_v37 }
 0x3ce   : > { %v1943_v42 = vadd.f32 %v1942_v17, %v1913_v52  ;;  %v1922_v56 = vmul.f32 %v7328_v40, %v7328_v40  ;;  %v7346_v10 = vsub.f32 %v7157_v54, %v7246_v37  ;;  %v1923_v31 = vmul.f32 %v7334_v22, %v7334_v22 }
 0x3cf   : > { %v7352_v45 = vsub.f32 %v7160_v39, %v7246_v37  ;;  %v1924_v51 = vmul.f32 %v7340_v48, %v7340_v48  ;;  %v7358_v8 = vsub.f32 %v7171_v47, %v7246_v37  ;;  %v7364_v26 = vsub.f32 %v7174_v5, %v7246_v37 }
 0x3d0   : > { %v1944_v25 = vadd.f32 %v1943_v42, %v1914_v21  ;;  %v1925_v54 = vmul.f32 %v7346_v10, %v7346_v10  ;;  %v7370_v52 = vsub.f32 %v7184_v19, %v7246_v37  ;;  %v7376_v21 = vsub.f32 %v7187_v16, %v7246_v37 }
 0x3d1   : > { %v1926_v39 = vmul.f32 %v7352_v45, %v7352_v45  ;;  %v1927_v47 = vmul.f32 %v7358_v8, %v7358_v8  ;;  %v1928_v5 = vmul.f32 %v7364_v26, %v7364_v26 }
 0x3d2   : > { %v1945_v38 = vadd.f32 %v1944_v25, %v1915_v63  ;;  %v7382_v63 = vsub.f32 %v7199_v18, %v7246_v37  ;;  %v1929_v19 = vmul.f32 %v7370_v52, %v7370_v52  ;;  %v1930_v16 = vmul.f32 %v7376_v21, %v7376_v21 }
 0x3d4   : > { %v1946_v44 = vadd.f32 %v1945_v38, %v1916_v34  ;;  %v7388_v34 = vsub.f32 %v7203_v28, %v7246_v37  ;;  %v1931_v18 = vmul.f32 %v7382_v63, %v7382_v63 }
 0x3d6   : > { %v1947_v3 = vadd.f32 %v1946_v44, %v1917_v14  ;;  %v7394_v14 = vsub.f32 %v7212_v7, %v7246_v37  ;;  %v1932_v28 = vmul.f32 %v7388_v34, %v7388_v34 }
 0x3d8   : > { %v1948_v6 = vadd.f32 %v1947_v3, %v1918_v36  ;;  %v7400_v36 = vsub.f32 %v7215_v49, %v7246_v37  ;;  %v1933_v7 = vmul.f32 %v7394_v14, %v7394_v14 }
 0x3da   : > { %v1949_v0 = vadd.f32 %v1948_v6, %v1919_v1  ;;  %v7406_v1 = vsub.f32 %v7224_v55, %v7246_v37  ;;  %v1934_v49 = vmul.f32 %v7400_v36, %v7400_v36 }
 0x3dc   : > { %v1950_v35 = vadd.f32 %v1949_v0, %v1920_v9  ;;  %v7412_v9 = vsub.f32 %v7227_v4, %v7246_v37  ;;  %v1935_v55 = vmul.f32 %v7406_v1, %v7406_v1 }
 0x3de   : > { %v1951_v20 = vadd.f32 %v1950_v35, %v1921_v29  ;;  %v7418_v29 = vsub.f32 %v7234_v15, %v7246_v37  ;;  %v1936_v4 = vmul.f32 %v7412_v9, %v7412_v9 }
 0x3e0   : > { %v1952_v43 = vadd.f32 %v1951_v20, %v1922_v56  ;;  %v7424_v56 = vsub.f32 %v7236_v23, %v7246_v37  ;;  %v1937_v15 = vmul.f32 %v7418_v29, %v7418_v29 }
 0x3e2   : > { %v1953_v12 = vadd.f32 %v1952_v43, %v1923_v31  ;;  %v7430_v31 = vsub.f32 %v7240_v46, %v7246_v37 }
 0x3e4   : > { %v1954_v11 = vadd.f32 %v1953_v12, %v1924_v51  ;;  %v1938_v51 = vmul.f32 %v7424_v56, %v7424_v56  ;;  %v1939_v23 = vmul.f32 %v7430_v31, %v7430_v31 }
 0x3e6   : > { %v1955_v60 = vadd.f32 %v1954_v11, %v1925_v54 }
 0x3e8   : > { %v1956_v17 = vadd.f32 %v1955_v60, %v1926_v39  ;;  %v1970_v39 = vsel %vm1846_vm0, %v7254_v61, 0.0 }
 0x3ea   : > { %v1957_v42 = vadd.f32 %v1956_v17, %v1927_v47  ;;  %v6339_v17 = vld [vmem:[%s8735_s5 + $0x4] ss:$8 sps:$4 sm:$0xff]  }
 0x3eb   : > { %2272 = vmatprep.subr.bf16.mxu1 %v6339_v17  ;;  %v6374_v17 = vld [vmem:[%s8735_s5 + $0x254] ss:$8 sps:$4 sm:$0xff]  }
 0x3ec   : > { %v1958_v25 = vadd.f32 %v1957_v42, %v1928_v5  ;;  %v6341_v5 = vld [vmem:[%s8735_s5] ss:$8 sps:$4 sm:$0xff]  }
 0x3ed   : > { %v6342_v42 = vld [vmem:[%s8735_s5 + $0x200] ss:$8 sps:$4 sm:$0xff]   ;;  %2273 = vmatpush1.bf16.msra.mxu1 %v6341_v5  ;;  %v6375_v5 = vld [vmem:[%s8735_s5 + $0x64] ss:$8 sps:$4 sm:$0xff]  }
 0x3ee   : > { %v1959_v38 = vadd.f32 %v1958_v25, %v1929_v19  ;;  %v6344_v19 = vld [vmem:[%s8735_s5 + $0x204] ss:$8 sps:$4 sm:$0xff]   ;;  %v6345_v25 = vld [vmem:[%s8735_s5 + $0x14] ss:$8 sps:$4 sm:$0xff]  }
 0x3ef   : > { %4375 = vmatprep.subr.bf16.mxu0 %v6344_v19  ;;  %2274 = vmatprep.subr.bf16.mxu1 %v6345_v25  ;;  %v6381_v25 = vld [vmem:[%s8735_s5 + $0x74] ss:$8 sps:$4 sm:$0xff]  }
 0x3f0   : > { %v1960_v44 = vadd.f32 %v1959_v38, %v1930_v16  ;;  %v6350_v16 = vld [vmem:[%s8735_s5 + $0x214] ss:$8 sps:$4 sm:$0xff]   ;;  %4376 = vmatpush1.bf16.msra.mxu0 %v6342_v42  ;;  %v6377_v42 = vld [vmem:[%s8735_s5 + $0x60] ss:$8 sps:$4 sm:$0xff]  }
 0x3f1   : > { %4377 = vmatprep.subr.bf16.mxu0 %v6350_v16  ;;  %v6378_v16 = vld [vmem:[%s8735_s5 + $0x260] ss:$8 sps:$4 sm:$0xff]  }
 0x3f2   : > { %v1961_v3 = vadd.f32 %v1960_v44, %v1931_v18  ;;  %v6347_v18 = vld [vmem:[%s8735_s5 + $0x10] ss:$8 sps:$4 sm:$0xff]  }
 0x3f3   : > { %v6348_v44 = vld [vmem:[%s8735_s5 + $0x210] ss:$8 sps:$4 sm:$0xff]   ;;  %2275 = vmatpush1.bf16.msra.mxu1 %v6347_v18 }
 0x3f4   : > { %v1962_v6 = vadd.f32 %v1961_v3, %v1932_v28  ;;  %v6351_v28 = vld [vmem:[%s8735_s5 + $0x24] ss:$8 sps:$4 sm:$0xff]   ;;  %4378 = vmatpush1.bf16.msra.mxu0 %v6348_v44  ;;  %v6386_v44 = vld [vmem:[%s8735_s5 + $0x274] ss:$8 sps:$4 sm:$0xff]  }
 0x3f5   : > { %2276 = vmatprep.subr.bf16.mxu1 %v6351_v28 }
 0x3f6   : > { %v1963_v0 = vadd.f32 %v1962_v6, %v1933_v7  ;;  %v6356_v7 = vld [vmem:[%s8735_s5 + $0x224] ss:$8 sps:$4 sm:$0xff]  }
 0x3f7   : > { %4379 = vmatprep.subr.bf16.mxu0 %v6356_v7 }
 0x3f8   : > { %v1964_v35 = vadd.f32 %v1963_v0, %v1934_v49  ;;  %v6353_v49 = vld [vmem:[%s8735_s5 + $0x20] ss:$8 sps:$4 sm:$0xff]  }
 0x3f9   : > { %v6354_v0 = vld [vmem:[%s8735_s5 + $0x220] ss:$8 sps:$4 sm:$0xff]   ;;  %2277 = vmatpush1.bf16.msra.mxu1 %v6353_v49 }
 0x3fa   : > { %v1965_v20 = vadd.f32 %v1964_v35, %v1935_v55  ;;  %v6357_v55 = vld [vmem:[%s8735_s5 + $0x34] ss:$8 sps:$4 sm:$0xff]   ;;  %4380 = vmatpush1.bf16.msra.mxu0 %v6354_v0 }
 0x3fb   : > { %2278 = vmatprep.subr.bf16.mxu1 %v6357_v55  ;;  %v2036_v55 = vld [vmem:[%s8733_s3] sm:$0xff] }
 0x3fc   : > { %v1966_v43 = vadd.f32 %v1965_v20, %v1936_v4  ;;  %v6362_v4 = vld [vmem:[%s8735_s5 + $0x234] ss:$8 sps:$4 sm:$0xff]  }
 0x3fd   : > { %4381 = vmatprep.subr.bf16.mxu0 %v6362_v4  ;;  %v2037_v4 = vld [vmem:[%s8733_s3 + $0x8] sm:$0xff] }
 0x3fe   : > { %v1967_v12 = vadd.f32 %v1966_v43, %v1937_v15  ;;  %v6359_v15 = vld [vmem:[%s8735_s5 + $0x30] ss:$8 sps:$4 sm:$0xff]  }
 0x3ff   : > { %v6360_v43 = vld [vmem:[%s8735_s5 + $0x230] ss:$8 sps:$4 sm:$0xff]   ;;  %2279 = vmatpush1.bf16.msra.mxu1 %v6359_v15 }
 0x400   : > { %v1968_v54 = vadd.f32 %v1967_v12, %v1938_v51  ;;  %v6363_v51 = vld [vmem:[%s8735_s5 + $0x44] ss:$8 sps:$4 sm:$0xff]   ;;  %4382 = vmatpush1.bf16.msra.mxu0 %v6360_v43  ;;  %v2039_v15 = vld [vmem:[%s8733_s3 + $0x18] sm:$0xff] }
 0x401   : > { %v6368_v12 = vld [vmem:[%s8735_s5 + $0x244] ss:$8 sps:$4 sm:$0xff]   ;;  %2280 = vmatprep.subr.bf16.mxu1 %v6363_v51 }
 0x402   : > { %v1969_v11 = vadd.f32 %v1968_v54, %v1939_v23  ;;  %v6365_v23 = vld [vmem:[%s8735_s5 + $0x40] ss:$8 sps:$4 sm:$0xff]   ;;  %4383 = vmatprep.subr.bf16.mxu0 %v6368_v12 }
 0x403   : > { %v6366_v54 = vld [vmem:[%s8735_s5 + $0x240] ss:$8 sps:$4 sm:$0xff]   ;;  %2281 = vmatpush1.bf16.msra.mxu1 %v6365_v23 }
 0x404   : > { %v1971_v60 = vadd.f32 %v1970_v39, %v1969_v11  ;;  %v6369_v11 = vld [vmem:[%s8735_s5 + $0x54] ss:$8 sps:$4 sm:$0xff]   ;;  %v6371_v39 = vld [vmem:[%s8735_s5 + $0x50] ss:$8 sps:$4 sm:$0xff]   ;;  %4384 = vmatpush1.bf16.msra.mxu0 %v6366_v54  ;;  %v2098_v12 = vld [vmem:[%s8734_s4] sm:$0xff] }
 0x405   : > { %2282 = vmatprep.subr.bf16.mxu1 %v6369_v11  ;;  %4385 = vmatprep.subr.bf16.mxu0 %v6374_v17  ;;  %v2040_v11 = vld [vmem:[%s8733_s3 + $0x20] sm:$0xff] }
 0x406   : > { %1972 = vadd.xlane.f32.xlu1 %v1971_v60 }
 0x407   : > { %2283 = vmatpush1.bf16.msra.mxu1 %v6371_v39  ;;  %v2100_v39 = vld [vmem:[%s8734_s4 + $0x10] sm:$0xff] }
 0x408   : > { %2284 = vmatprep.subr.bf16.mxu1 %v6375_v5  ;;  %v2102_v5 = vld [vmem:[%s8734_s4 + $0x20] sm:$0xff] }
 0x40b   : > { %2285 = vmatpush1.bf16.msra.mxu1 %v6377_v42  ;;  %v2103_v42 = vld [vmem:[%s8734_s4 + $0x28] sm:$0xff] }
 0x40c   : > { %2286 = vmatprep.subr.bf16.mxu1 %v6381_v25 }
 0x43e   : > { %v1984_v46 = vpop.permute.xlu1 %1983 }
 0x43f   : > { %v1986_v37 = vsel %vm1863_vm1, %v1984_v46, 0.0 }
 0x440   : > { %1987 = vadd.xlane.f32.xlu0 %v1986_v37 }
 0x493   : > { %v1973_v47 = vpop.xlane.xlu1 %1972 }
 0x494   : > { %v1974_v61 = vrot.slane %v1973_v47, 4 }
 0x496   : > { %v1975_v38 = vadd.f32 %v1974_v61, %v1973_v47  ;;  %v6372_v47 = vld [vmem:[%s8735_s5 + $0x250] ss:$8 sps:$4 sm:$0xff]   ;;  %v6380_v61 = vld [vmem:[%s8735_s5 + $0x264] ss:$8 sps:$4 sm:$0xff]  }
 0x497   : > { %4386 = vmatpush1.bf16.msra.mxu0 %v6372_v47 }
 0x498   : > { %v1976_v3 = vrot.slane %v1975_v38, 2  ;;  %4387 = vmatprep.subr.bf16.mxu0 %v6380_v61 }
 0x49a   : > { %v1977_v6 = vadd.f32 %v1976_v3, %v1975_v38  ;;  %v6383_v38 = vld [vmem:[%s8735_s5 + $0x70] ss:$8 sps:$4 sm:$0xff]  }
 0x49b   : > { %4388 = vmatpush1.bf16.msra.mxu0 %v6378_v16  ;;  %2287 = vmatpush1.bf16.msra.mxu1 %v6383_v38  ;;  %v6384_v3 = vld [vmem:[%s8735_s5 + $0x270] ss:$8 sps:$4 sm:$0xff]  }
 0x49c   : > { %v1978_v35 = vrot.slane %v1977_v6, 1  ;;  %4389 = vmatprep.subr.bf16.mxu0 %v6386_v44  ;;  %v2042_v44 = vld [vmem:[%s8733_s3 + $0x30] sm:$0xff] }
 0x49e   : > { %v1979_v20 = vadd.f32 %v1978_v35, %v1977_v6  ;;  %v6389_v6 = vld [vmem:[%s8735_s5 + $0x84] ss:$8 sps:$4 sm:$0xff]  }
 0x49f   : > { %2807 = vmatprep.subr.bf16.mxu1 %v6389_v6  ;;  %4390 = vmatpush1.bf16.msra.mxu0 %v6384_v3 }
 0x4a0   : > { %6137 = vpush %v1979_v20  ;;  %v2038_v20 = vld [vmem:[%s8733_s3 + $0x10] sm:$0xff] }
 0x4cd   : > { %v1988_v60 = vpop.xlane.xlu0 %1987 }
 0x4ce   : > { %v1989_v46 = vrot.slane %v1988_v60, 4 }
 0x4d0   : > { %v1990_v37 = vadd.f32 %v1989_v46, %v1988_v60 }
 0x4d1   : > { %s6138_s28 = spop %6137 }
 0x4d2   : > { %v1991_v19 = vrot.slane %v1990_v37, 2 }
 0x4d4   : > { %v1992_v18 = vadd.f32 %v1991_v19, %v1990_v37 }
 0x4d6   : > { %v1993_v28 = vrot.slane %v1992_v18, 1 }
 0x4d8   : > { %v1994_v7 = vadd.f32 %v1993_v28, %v1992_v18  ;;  %v6387_v28 = vld [vmem:[%s8735_s5 + $0x80] ss:$8 sps:$4 sm:$0xff]  }
 0x4da   : > { %6139 = vpush %v1994_v7 }
 0x50b   : > { %s6140_s29 = spop %6139 }
 0x50c   : > { %s1996_s30 = ssub.f32 %s6138_s28, %s6140_s29 }
 0x50e   : > { %s1999_s8 = smul.f32 3.2349897e-05, %s1996_s30 }
 0x510   : > { %s2000_s9 = sadd.f32 1e-05, %s1999_s8 }
 0x512   : > { %v2001_v49 = vstv %s2000_s9 }
 0x513   : > { %6459 = vrsqrt.f32 %v2001_v49  ;;  %v6392_v49 = vld [vmem:[%s8735_s5 + $0x94] ss:$8 sps:$4 sm:$0xff]  }
 0x51d   : > { %v6460_v0 = vpop.eup %6459 }
 0x51e   : > { %6141 = vpush %v6460_v0 }
 0x54f   : > { %s6142_s10 = spop %6141 }
 0x550   : > { %v7543_v35 = vstv %s6142_s10 }
 0x551   : > { %v2005_v43 = vmul.f32 %v7543_v35, %v7260_v58  ;;  %v2006_v51 = vmul.f32 %v7543_v35, %v7264_v62  ;;  %v2007_v23 = vmul.f32 %v7543_v35, %v7268_v59  ;;  %v2008_v54 = vmul.f32 %v7543_v35, %v7276_v13  ;;  %v2041_v58 = vld [vmem:[%s8733_s3 + $0x28] sm:$0xff]  ;;  %v2101_v59 = vld [vmem:[%s8734_s4 + $0x18] sm:$0xff] }
 0x552   : > { %v2099_v62 = vld [vmem:[%s8734_s4 + $0x8] sm:$0xff]  ;;  %v2009_v13 = vmul.f32 %v7543_v35, %v7280_v32  ;;  %v2010_v60 = vmul.f32 %v7543_v35, %v7286_v27  ;;  %v2011_v32 = vmul.f32 %v7543_v35, %v7292_v57  ;;  %v2012_v27 = vmul.f32 %v7543_v35, %v7298_v33  ;;  %v2043_v57 = vld [vmem:[%s8733_s3 + $0x38] sm:$0xff] }
 0x553   : > { %v2067_v46 = vmul.f32 %v2036_v55, %v2005_v43  ;;  %v2068_v37 = vmul.f32 %v2037_v4, %v2006_v51  ;;  %v2069_v47 = vmul.f32 %v2038_v20, %v2007_v23  ;;  %v2070_v17 = vmul.f32 %v2039_v15, %v2008_v54  ;;  %v2044_v20 = vld [vmem:[%s8733_s3 + $0x40] sm:$0xff]  ;;  %v2045_v15 = vld [vmem:[%s8733_s3 + $0x48] sm:$0xff]  ;;  %v6390_v23 = vld [vmem:[%s8735_s5 + $0x90] ss:$8 sps:$4 sm:$0xff]  }
 0x554   : > { %v2071_v61 = vmul.f32 %v2040_v11, %v2009_v13  ;;  %v2072_v19 = vmul.f32 %v2041_v58, %v2010_v60  ;;  %v2013_v0 = vmul.f32 %v7543_v35, %v7304_v53  ;;  %v2014_v55 = vmul.f32 %v7543_v35, %v7310_v30  ;;  %v2104_v30 = vld [vmem:[%s8734_s4 + $0x30] sm:$0xff]  ;;  %v2105_v54 = vld [vmem:[%s8734_s4 + $0x38] sm:$0xff]  ;;  %v6395_v13 = vld [vmem:[%s8735_s5 + $0xa4] ss:$8 sps:$4 sm:$0xff]  }
 0x555   : > { %v2129_v25 = vadd.f32 %v2098_v12, %v2067_v46  ;;  %v2130_v16 = vadd.f32 %v2099_v62, %v2068_v37  ;;  %v2131_v38 = vadd.f32 %v2100_v39, %v2069_v47  ;;  %v2132_v18 = vadd.f32 %v2101_v59, %v2070_v17  ;;  %v2046_v58 = vld [vmem:[%s8733_s3 + $0x50] sm:$0xff]  ;;  %v2047_v60 = vld [vmem:[%s8733_s3 + $0x58] sm:$0xff]  ;;  %v2107_v46 = vld [vmem:[%s8734_s4 + $0x48] sm:$0xff] }
 0x556   : > { %v2133_v3 = vadd.f32 %v2102_v5, %v2071_v61  ;;  %v2134_v7 = vadd.f32 %v2103_v42, %v2072_v19  ;;  %v2073_v4 = vmul.f32 %v2042_v44, %v2011_v32  ;;  %v2074_v53 = vmul.f32 %v2043_v57, %v2012_v27  ;;  %v6393_v5 = vld [vmem:[%s8735_s5 + $0xa0] ss:$8 sps:$4 sm:$0xff]   ;;  %v2108_v61 = vld [vmem:[%s8734_s4 + $0x50] sm:$0xff]  ;;  %v2109_v19 = vld [vmem:[%s8734_s4 + $0x58] sm:$0xff] }
 0x557   : > { %v7603_v6 = vpack.c.bf16 %v2130_v16, %v2129_v25  ;;  %v7605_v33 = vpack.c.bf16 %v2132_v18, %v2131_v38  ;;  %v2015_v12 = vmul.f32 %v7543_v35, %v7316_v41  ;;  %v2016_v11 = vmul.f32 %v7543_v35, %v7322_v50  ;;  %v2106_v50 = vld [vmem:[%s8734_s4 + $0x40] sm:$0xff]  ;;  %v2049_v44 = vld [vmem:[%s8733_s3 + $0x68] sm:$0xff] }
 0x558   : > { %v7641_v62 = vpack.c.bf16 %v2134_v7, %v2133_v3  ;;  %v2075_v39 = vmul.f32 %v2044_v20, %v2013_v0  ;;  %v2076_v59 = vmul.f32 %v2045_v15, %v2014_v55  ;;  %v2135_v37 = vadd.f32 %v2104_v30, %v2073_v4  ;;  %v2048_v18 = vld [vmem:[%s8733_s3 + $0x60] sm:$0xff]  ;;  %v2050_v3 = vld [vmem:[%s8733_s3 + $0x70] sm:$0xff]  ;;  %v2111_v30 = vld [vmem:[%s8734_s4 + $0x68] sm:$0xff] }
 0x559   : > { %2305 = vmatmul.mubr.bf16.vlgmr.msra.gmra.mrb[0].mxu1 %v7603_v6  ;;  %v4249_v43 = vrot.slane %v7603_v6, 2  ;;  %v4250_v51 = vrot.slane %v7605_v33, 2  ;;  %v2136_v47 = vadd.f32 %v2105_v54, %v2074_v53  ;;  %v2077_v17 = vmul.f32 %v2046_v58, %v2015_v12  ;;  %v6396_v20 = vld [vmem:[%s8735_s5 + $0xb0] ss:$8 sps:$4 sm:$0xff]   ;;  %v2110_v53 = vld [vmem:[%s8734_s4 + $0x60] sm:$0xff] }
 0x55a   : > { %2808 = vmatpush1.bf16.msra.mxu1 %v6387_v28  ;;  %2314 = vmatprep.mubr.bf16.mxu1 %v6485_v24  ;;  %v2078_v42 = vmul.f32 %v2047_v60, %v2016_v11  ;;  %v2017_v32 = vmul.f32 %v7543_v35, %v7328_v40  ;;  %v2018_v27 = vmul.f32 %v7543_v35, %v7334_v22  ;;  %v4252_v25 = vrot.slane %v7641_v62, 2  ;;  %v6398_v40 = vld [vmem:[%s8735_s5 + $0xb4] ss:$8 sps:$4 sm:$0xff]   ;;  %v6401_v12 = vld [vmem:[%s8735_s5 + $0xc4] ss:$8 sps:$4 sm:$0xff]  }
 0x55b   : > { %v4251_v41 = vsel %vm4248_vm2, %v4249_v43, %v4250_v51  ;;  %2809 = vmatprep.subr.bf16.mxu1 %v6392_v49  ;;  %v2137_v16 = vadd.f32 %v2106_v50, %v2075_v39  ;;  %v2138_v38 = vadd.f32 %v2107_v46, %v2076_v59  ;;  %v2019_v22 = vmul.f32 %v7543_v35, %v7340_v48  ;;  %v2051_v48 = vld [vmem:[%s8733_s3 + $0x78] sm:$0xff]  ;;  %v2114_v39 = vld [vmem:[%s8734_s4 + $0x80] sm:$0xff]  ;;  %v2115_v59 = vld [vmem:[%s8734_s4 + $0x88] sm:$0xff] }
 0x55c   : > { %4408 = vmatmul.mubr.bf16.vlgmr.msra.gmra.mrb[192].mxu0 %v4251_v41  ;;  %v2020_v28 = vmul.f32 %v7543_v35, %v7346_v10  ;;  %v2021_v7 = vmul.f32 %v7543_v35, %v7352_v45  ;;  %v2022_v57 = vmul.f32 %v7543_v35, %v7358_v8  ;;  %v7691_v49 = vpack.c.bf16 %v2136_v47, %v2135_v37  ;;  %v2052_v10 = vld [vmem:[%s8733_s3 + $0x80] sm:$0xff]  ;;  %v2053_v45 = vld [vmem:[%s8733_s3 + $0x88] sm:$0xff]  ;;  %v2113_v11 = vld [vmem:[%s8734_s4 + $0x78] sm:$0xff] }
 0x55d   : > { %4417 = vmatprep.mubr.bf16.mxu0 %v6485_v24  ;;  %v2139_v0 = vadd.f32 %v2108_v61, %v2077_v17  ;;  %v2140_v8 = vadd.f32 %v2109_v19, %v2078_v42  ;;  %v2079_v55 = vmul.f32 %v2048_v18, %v2017_v32  ;;  %v2080_v4 = vmul.f32 %v2049_v44, %v2018_v27  ;;  %v2054_v50 = vld [vmem:[%s8733_s3 + $0x90] sm:$0xff]  ;;  %v2055_v46 = vld [vmem:[%s8733_s3 + $0x98] sm:$0xff]  ;;  %v6399_v42 = vld [vmem:[%s8735_s5 + $0xc0] ss:$8 sps:$4 sm:$0xff]  }
 0x55e   : > { %2810 = vmatpush1.bf16.msra.mxu1 %v6390_v23  ;;  %v4253_v15 = vsel %vm4248_vm2, %v4250_v51, %v4252_v25  ;;  %v7709_v43 = vpack.c.bf16 %v2138_v38, %v2137_v16  ;;  %v2081_v23 = vmul.f32 %v2050_v3, %v2019_v22  ;;  %v2082_v54 = vmul.f32 %v2051_v48, %v2020_v28  ;;  %v2112_v51 = vld [vmem:[%s8734_s4 + $0x70] sm:$0xff]  ;;  %v2056_v61 = vld [vmem:[%s8733_s3 + $0xa0] sm:$0xff]  ;;  %v2059_v22 = vld [vmem:[%s8733_s3 + $0xb8] sm:$0xff] }
 0x55f   : > { %2811 = vmatprep.subr.bf16.mxu1 %v6395_v13  ;;  %v2083_v58 = vmul.f32 %v2052_v10, %v2021_v7  ;;  %v2084_v41 = vmul.f32 %v2053_v45, %v2022_v57  ;;  %v2023_v13 = vmul.f32 %v7543_v35, %v7364_v26  ;;  %v2024_v60 = vmul.f32 %v7543_v35, %v7370_v52  ;;  %v6404_v19 = vld [vmem:[%s8735_s5 + $0xd4] ss:$8 sps:$4 sm:$0xff]   ;;  %v6402_v45 = vld [vmem:[%s8735_s5 + $0xd0] ss:$8 sps:$4 sm:$0xff]  }
 0x560   : > { %v2025_v37 = vmul.f32 %v7543_v35, %v7376_v21  ;;  %v2026_v47 = vmul.f32 %v7543_v35, %v7382_v63  ;;  %v4254_v17 = vrot.slane %v7691_v49, 2  ;;  %v7748_v26 = vpack.c.bf16 %v2140_v8, %v2139_v0  ;;  %v2057_v21 = vld [vmem:[%s8733_s3 + $0xa8] sm:$0xff]  ;;  %v2118_v8 = vld [vmem:[%s8734_s4 + $0xa0] sm:$0xff] }
 0x561   : > { %2315 = vmatmul.mubr.bf16.gmra.mrb[4].mxu1 %v7605_v33  ;;  %v2142_v52 = vadd.f32 %v2111_v30, %v2080_v4  ;;  %v4256_v63 = vrot.slane %v7709_v43, 2  ;;  %v2027_v32 = vmul.f32 %v7543_v35, %v7388_v34  ;;  %v2028_v27 = vmul.f32 %v7543_v35, %v7394_v14  ;;  %v2116_v34 = vld [vmem:[%s8734_s4 + $0x90] sm:$0xff]  ;;  %v2117_v14 = vld [vmem:[%s8734_s4 + $0x98] sm:$0xff] }
 0x562   : > { %2324 = vmatprep.mubr.bf16.mxu1 %v6485_v24  ;;  %2812 = vmatpush1.bf16.msra.mxu1 %v6393_v5  ;;  %v2141_v5 = vadd.f32 %v2110_v53, %v2079_v55  ;;  %v2143_v16 = vadd.f32 %v2112_v51, %v2081_v23  ;;  %v2144_v38 = vadd.f32 %v2113_v11, %v2082_v54  ;;  %v4258_v48 = vrot.slane %v7748_v26, 2  ;;  %v2119_v55 = vld [vmem:[%s8734_s4 + $0xa8] sm:$0xff]  ;;  %v2120_v54 = vld [vmem:[%s8734_s4 + $0xb0] sm:$0xff]  ;;  %v2121_v51 = vld [vmem:[%s8734_s4 + $0xb8] sm:$0xff] }
 0x563   : > { %2813 = vmatprep.subr.bf16.mxu1 %v6398_v40  ;;  %v2145_v18 = vadd.f32 %v2114_v39, %v2083_v58  ;;  %v2146_v44 = vadd.f32 %v2115_v59, %v2084_v41  ;;  %v2058_v40 = vld [vmem:[%s8733_s3 + $0xb0] sm:$0xff]  ;;  %v2085_v28 = vmul.f32 %v2054_v50, %v2023_v13  ;;  %v2086_v3 = vmul.f32 %v2055_v46, %v2024_v60  ;;  %v6405_v60 = vld [vmem:[%s8735_s5 + $0xe0] ss:$8 sps:$4 sm:$0xff]  }
 0x564   : > { %4418 = vmatmul.mubr.bf16.gmra.mrb[196].mxu0 %v4253_v15  ;;  %v2087_v7 = vmul.f32 %v2056_v61, %v2025_v37  ;;  %v2088_v57 = vmul.f32 %v2057_v21, %v2026_v47  ;;  %v4255_v0 = vsel %vm4248_vm2, %v4252_v25, %v4254_v17  ;;  %v7785_v10 = vpack.c.bf16 %v2142_v52, %v2141_v5  ;;  %v6410_v52 = vld [vmem:[%s8735_s5 + $0xf4] ss:$8 sps:$4 sm:$0xff]  }
 0x565   : > { %4427 = vmatprep.mubr.bf16.mxu0 %v6485_v24  ;;  %v2089_v25 = vmul.f32 %v2058_v40, %v2027_v32  ;;  %v2090_v4 = vmul.f32 %v2059_v22, %v2028_v27  ;;  %v2029_v15 = vmul.f32 %v7543_v35, %v7400_v36  ;;  %v2596_v53 = vshll.u32 %v7603_v6, 16  ;;  %v2060_v36 = vld [vmem:[%s8733_s3 + $0xc0] sm:$0xff] }
 0x566   : > { %2814 = vmatpush1.bf16.msra.mxu1 %v6396_v20  ;;  %v6407_v20 = vld [vmem:[%s8735_s5 + $0xe4] ss:$8 sps:$4 sm:$0xff]   ;;  %v4257_v30 = vsel %vm4248_vm2, %v4254_v17, %v4256_v63  ;;  %v7805_v23 = vpack.c.bf16 %v2146_v44, %v2145_v18  ;;  %v2147_v11 = vadd.f32 %v2116_v34, %v2085_v28  ;;  %v2148_v58 = vadd.f32 %v2117_v14, %v2086_v3  ;;  %v6408_v44 = vld [vmem:[%s8735_s5 + $0xf0] ss:$8 sps:$4 sm:$0xff]  }
 0x567   : > { %2815 = vmatprep.subr.bf16.mxu1 %v6401_v12  ;;  %v7803_v12 = vpack.c.bf16 %v2144_v38, %v2143_v16  ;;  %v2149_v41 = vadd.f32 %v2118_v8, %v2087_v7  ;;  %v2150_v39 = vadd.f32 %v2119_v55, %v2088_v57  ;;  %v7820_v59 = vsel %vm4248_vm2, %v4256_v63, %v4258_v48  ;;  %v2061_v17 = vld [vmem:[%s8733_s3 + $0xc8] sm:$0xff]  ;;  %v2062_v38 = vld [vmem:[%s8733_s3 + $0xd0] sm:$0xff] }
 0x568   : > { %v4260_v13 = vrot.slane %v7785_v10, 2  ;;  %v2030_v50 = vmul.f32 %v7543_v35, %v7406_v1  ;;  %v2594_v46 = vshrl.u32 %v7603_v6, 16  ;;  %v2151_v37 = vadd.f32 %v2120_v54, %v2089_v25  ;;  %v2122_v1 = vld [vmem:[%s8734_s4 + $0xc0] sm:$0xff]  ;;  %v2123_v34 = vld [vmem:[%s8734_s4 + $0xc8] sm:$0xff] }
 0x569   : > { %2325 = vmatmul.mubr.bf16.gmra.mrb[8].mxu1 %v7641_v62  ;;  %v2152_v47 = vadd.f32 %v2121_v51, %v2090_v4  ;;  %v2091_v5 = vmul.f32 %v2060_v36, %v2029_v15  ;;  %v4262_v61 = vrot.slane %v7803_v12, 2  ;;  %v2031_v21 = vmul.f32 %v7543_v35, %v7412_v9  ;;  %v2063_v9 = vld [vmem:[%s8733_s3 + $0xd8] sm:$0xff]  ;;  %v6413_v57 = vld [vmem:[%s8735_s5 + $0x104] ss:$8 sps:$4 sm:$0xff]  }
 0x56a   : > { %2334 = vmatprep.mubr.bf16.mxu1 %v6485_v24  ;;  %2816 = vmatpush1.bf16.msra.mxu1 %v6399_v42  ;;  %v2598_v42 = vrot.slane %v2596_v53, 1  ;;  %v2032_v63 = vmul.f32 %v7543_v35, %v7418_v29  ;;  %v8745_v32 = vrot.slane %v7805_v23, 2  ;;  %v7848_v27 = vpack.c.bf16 %v2148_v58, %v2147_v11  ;;  %v2064_v51 = vld [vmem:[%s8733_s3 + $0xe0] sm:$0xff] }
 0x56b   : > { %2817 = vmatprep.subr.bf16.mxu1 %v6404_v19  ;;  %v2601_v19 = vshll.u32 %v7605_v33, 16  ;;  %v7850_v16 = vpack.c.bf16 %v2150_v39, %v2149_v41  ;;  %v2092_v18 = vmul.f32 %v2061_v17, %v2030_v50  ;;  %v2605_v22 = vshrl.u32 %v7605_v33, 16 }
 0x56c   : > { %4428 = vmatmul.mubr.bf16.gmra.mrb[200].mxu0 %v4255_v0  ;;  %v2599_v29 = vor.u32 %v2598_v42, %v2594_v46  ;;  %v2609_v28 = vshll.u32 %v7641_v62, 16  ;;  %v7868_v3 = vpack.c.bf16 %v2152_v47, %v2151_v37  ;;  %v7873_v14 = vadd.f32 %v2122_v1, %v2091_v5 }
 0x56d   : > { %4437 = vmatprep.mubr.bf16.mxu0 %v6485_v24  ;;  %v2603_v40 = vrot.slane %v2601_v19, 1  ;;  %v2033_v7 = vmul.f32 %v7543_v35, %v7424_v56  ;;  %v2617_v0 = vshll.u32 %v7691_v49, 16  ;;  %v2094_v8 = vmul.f32 %v2063_v9, %v2032_v63 }
 0x56e   : > { %2818 = vmatpush1.bf16.msra.mxu1 %v6402_v45  ;;  %v2093_v45 = vmul.f32 %v2062_v38, %v2031_v21  ;;  %v2611_v56 = vrot.slane %v2609_v28, 1  ;;  %v2613_v4 = vshrl.u32 %v7641_v62, 16  ;;  %v2621_v15 = vshrl.u32 %v7691_v49, 16 }
 0x56f   : > { %2819 = vmatprep.subr.bf16.mxu1 %v6407_v20  ;;  %v7882_v55 = vsel %vm2592_vm3, %v2599_v29, %v2603_v40  ;;  %v2607_v25 = vor.u32 %v2605_v22, %v2603_v40  ;;  %v2619_v20 = vrot.slane %v2617_v0, 1  ;;  %v2034_v54 = vmul.f32 %v7543_v35, %v7430_v31 }
 0x570   : > { %v2625_v36 = vshll.u32 %v7709_v43, 16  ;;  %v2633_v11 = vshll.u32 %v7748_v26, 16  ;;  %v2615_v41 = vor.u32 %v2613_v4, %v2611_v56  ;;  %v2629_v31 = vshrl.u32 %v7709_v43, 16 }
 0x571   : > { %2335 = vmatmul.mubr.bf16.gmra.mrb[12].mxu1 %v7691_v49  ;;  %v7903_v58 = vsel %vm2592_vm3, %v2607_v25, %v2611_v56  ;;  %v2623_v39 = vor.u32 %v2621_v15, %v2619_v20  ;;  %v2637_v47 = vshrl.u32 %v7748_v26, 16  ;;  %v8741_v17 = vshll.u32 %v7785_v10, 16  ;;  %v2124_v56 = vld [vmem:[%s8734_s4 + $0xd0] sm:$0xff] }
 0x572   : > { %2344 = vmatprep.mubr.bf16.mxu1 %v6485_v24  ;;  %2820 = vmatpush1.bf16.msra.mxu1 %v6405_v60  ;;  %v2065_v60 = vld [vmem:[%s8733_s3 + $0xe8] sm:$0xff]  ;;  %v2627_v50 = vrot.slane %v2625_v36, 1  ;;  %v2635_v37 = vrot.slane %v2633_v11, 1  ;;  %v2095_v5 = vmul.f32 %v2064_v51, %v2033_v7  ;;  %v8743_v42 = vshrl.u32 %v7785_v10, 16 }
 0x573   : > { %2821 = vmatprep.subr.bf16.mxu1 %v6410_v52  ;;  %v7921_v52 = vsel %vm2592_vm3, %v2615_v41, %v2619_v20  ;;  %v8739_v1 = vshll.u32 %v7803_v12, 16  ;;  %v2643_v9 = vrot.slane %v8741_v17, 1  ;;  %v2096_v29 = vmul.f32 %v2065_v60, %v2034_v54  ;;  %v2126_v20 = vld [vmem:[%s8734_s4 + $0xe0] sm:$0xff]  ;;  %v2127_v60 = vld [vmem:[%s8734_s4 + $0xe8] sm:$0xff] }
 0x574   : > { %4438 = vmatmul.mubr.bf16.gmra.mrb[204].mxu0 %v4257_v30  ;;  %v7893_v30 = vadd.f32 %v2123_v34, %v2092_v18  ;;  %v7927_v21 = vsel %vm2592_vm3, %v2623_v39, %v2627_v50  ;;  %v2631_v63 = vor.u32 %v2629_v31, %v2627_v50  ;;  %v2639_v38 = vor.u32 %v2637_v47, %v2635_v37 }
 0x575   : > { %4447 = vmatprep.mubr.bf16.mxu0 %v6485_v24  ;;  %v2651_v18 = vrot.slane %v8739_v1, 1  ;;  %v8738_v40 = vshll.u32 %v7805_v23, 16  ;;  %v8742_v25 = vshll.u32 %v7848_v27, 16  ;;  %v2661_v41 = vshrl.u32 %v7805_v23, 16 }
 0x576   : > { %2822 = vmatpush1.bf16.msra.mxu1 %v6408_v44  ;;  %v8740_v44 = vshrl.u32 %v7803_v12, 16  ;;  %v7941_v34 = vsel %vm2592_vm3, %v2631_v63, %v2635_v37  ;;  %v7944_v7 = vsel %vm2592_vm3, %v2639_v38, %v2643_v9  ;;  %v8744_v39 = vshll.u32 %v7850_v16, 16 }
 0x577   : > { %3327 = vmatprep.subr.bf16.mxu1 %v6413_v57  ;;  %v2647_v57 = vor.u32 %v8743_v42, %v2643_v9  ;;  %v2659_v51 = vrot.slane %v8738_v40, 1  ;;  %v2667_v37 = vrot.slane %v8742_v25, 1  ;;  %v8748_v63 = vshrl.u32 %v7848_v27, 16 }
 0x578   : > { %v2655_v54 = vor.u32 %v8740_v44, %v2651_v18  ;;  %v8746_v38 = vshll.u32 %v7868_v3, 16  ;;  %v2675_v1 = vrot.slane %v8744_v39, 1  ;;  %v8747_v44 = vshrl.u32 %v7850_v16, 16 }
 0x579   : > { %2345 = vmatmul.mubr.bf16.gmra.mrb[16].mxu1 %v7709_v43  ;;  %v7969_v50 = vsel %vm2592_vm3, %v2647_v57, %v2651_v18  ;;  %v2663_v40 = vor.u32 %v2661_v41, %v2659_v51  ;;  %v2155_v18 = vadd.f32 %v2124_v56, %v2093_v45  ;;  %v2157_v17 = vadd.f32 %v2126_v20, %v2095_v5 }
 0x57a   : > { %2354 = vmatprep.mubr.bf16.mxu1 %v6485_v24  ;;  %v7976_v9 = vsel %vm2592_vm3, %v2655_v54, %v2659_v51  ;;  %v2671_v25 = vor.u32 %v8748_v63, %v2667_v37  ;;  %v2158_v42 = vadd.f32 %v2127_v60, %v2096_v29  ;;  %v2679_v51 = vor.u32 %v8747_v44, %v2675_v1 }
 0x57b   : > { %v7987_v54 = vsel %vm2592_vm3, %v2663_v40, %v2667_v37  ;;  %v7993_v39 = vrot.slane %v8746_v38, 1  ;;  %v4261_v45 = vsel %vm4248_vm2, %v4258_v48, %v4260_v13  ;;  %v4263_v5 = vsel %vm4248_vm2, %v4260_v13, %v4262_v61 }
 0x57c   : > { %4448 = vmatmul.mubr.bf16.gmra.mrb[208].mxu0 %v7820_v59  ;;  %v2125_v59 = vld [vmem:[%s8734_s4 + $0xd8] sm:$0xff]  ;;  %v8011_v29 = vpack.c.bf16 %v7893_v30, %v7873_v14  ;;  %v3203_v48 = vrot.slane %v7603_v6, 1  ;;  %v3204_v14 = vrot.slane %v7605_v33, 1  ;;  %v8030_v30 = vpack.c.bf16 %v2158_v42, %v2157_v17 }
 0x57d   : > { %4457 = vmatprep.mubr.bf16.mxu0 %v6485_v24  ;;  %v2156_v57 = vadd.f32 %v2125_v59, %v2094_v8  ;;  %v8002_v8 = vsel %vm2592_vm3, %v2671_v25, %v2675_v1  ;;  %v8015_v40 = vsel %vm2592_vm3, %v2679_v51, %v7993_v39  ;;  %v8023_v1 = vsel %vm4248_vm2, %v4262_v61, %v8745_v32 }
 0x57e   : > { %v3711_v56 = vrot.slane %v2605_v22, 1  ;;  %v3206_v59 = vrot.slane %v7641_v62, 1  ;;  %v3208_v20 = vrot.slane %v7691_v49, 1  ;;  %v8038_v60 = vsel %vm3202_vm4, %v3203_v48, %v3204_v14 }
 0x57f   : > { %v8026_v25 = vpack.c.bf16 %v2156_v57, %v2155_v18  ;;  %v3210_v37 = vrot.slane %v7709_v43, 1  ;;  %v2035_v18 = vmul.f32 %v7543_v35, %v7250_v2  ;;  %v3212_v57 = vrot.slane %v7748_v26, 1 }
 0x580   : > { %v8045_v42 = vsel %vm3202_vm4, %v3204_v14, %v3206_v59  ;;  %v8048_v22 = vsel %vm3202_vm4, %v3206_v59, %v3208_v20  ;;  %v3216_v48 = vrot.slane %v7803_v12, 1  ;;  %v3218_v32 = vrot.slane %v7805_v23, 1 }
 0x581   : > { %2355 = vmatmul.mubr.bf16.gmra.mrb[20].mxu1 %v7748_v26  ;;  %v8052_v51 = vsel %vm3202_vm4, %v3208_v20, %v3210_v37  ;;  %v8750_v2 = vshrl.u32 %v8030_v30, 16  ;;  %v8060_v35 = vsel %vm3202_vm4, %v3210_v37, %v3212_v57  ;;  %v3220_v14 = vrot.slane %v7848_v27, 1 }
 0x582   : > { %2364 = vmatprep.mubr.bf16.mxu1 %v6485_v24  ;;  %v3222_v59 = vrot.slane %v7850_v16, 1  ;;  %v8072_v17 = vsel %vm3202_vm4, %v3216_v48, %v3218_v32  ;;  %v8749_v38 = vrot.slane %v7868_v3, 1  ;;  %v3708_v61 = vrot.slane %v2594_v46, 1 }
 0x583   : > { %v8078_v44 = vsel %vm3202_vm4, %v3218_v32, %v3220_v14  ;;  %v3709_v32 = vrot.slane %v2596_v53, 2  ;;  %v3716_v46 = vrot.slane %v2609_v28, 2  ;;  %v3719_v6 = vrot.slane %v2621_v15, 1 }
 0x584   : > { %4458 = vmatmul.mubr.bf16.gmra.mrb[212].mxu0 %v4261_v45  ;;  %v3214_v45 = vrot.slane %v7785_v10, 1  ;;  %v8081_v63 = vsel %vm3202_vm4, %v3220_v14, %v3222_v59  ;;  %v3720_v14 = vrot.slane %v2617_v0, 2  ;;  %v3724_v33 = vrot.slane %v2625_v36, 2 }
 0x585   : > { %4467 = vmatprep.mubr.bf16.mxu0 %v6485_v24  ;;  %v3728_v62 = vrot.slane %v2633_v11, 2  ;;  %v8751_v28 = vshrl.u32 %v7785_v10, 16  ;;  %v8752_v43 = vshll.u32 %v7785_v10, 16  ;;  %v8753_v11 = vshrl.u32 %v7803_v12, 16 }
 0x586   : > { %v8066_v20 = vsel %vm3202_vm4, %v3212_v57, %v3214_v45  ;;  %v8069_v13 = vsel %vm3202_vm4, %v3214_v45, %v3216_v48  ;;  %v2066_v57 = vld [vmem:[%s8733_s3 + $0xf0] sm:$0x3]  ;;  %v8090_v48 = vsel %vm3202_vm4, %v3222_v59, %v8749_v38  ;;  %v3712_v45 = vrot.slane %v2601_v19, 2 }
 0x587   : > { %v3715_v59 = vrot.slane %v2613_v4, 1  ;;  %v3710_v38 = vor.u32 %v3709_v32, %v3708_v61  ;;  %v2097_v53 = vmul.f32 %v2066_v57, %v2035_v18  ;;  %v3727_v4 = vrot.slane %v2637_v47, 1 }
 0x588   : > { %v3713_v37 = vor.u32 %v3712_v45, %v3711_v56  ;;  %v3731_v15 = vrot.slane %v8751_v28, 1  ;;  %v3721_v0 = vor.u32 %v3720_v14, %v3719_v6  ;;  %v3732_v36 = vrot.slane %v8752_v43, 2 }
 0x589   : > { %2365 = vmatmul.mubr.bf16.gmra.mrb[24].mxu1 %v7785_v10  ;;  %v3717_v19 = vor.u32 %v3716_v46, %v3715_v59  ;;  %v3729_v26 = vor.u32 %v3728_v62, %v3727_v4  ;;  %v3735_v56 = vrot.slane %v8753_v11, 1  ;;  %v8754_v61 = vshll.u32 %v7803_v12, 16 }
 0x58a   : > { %2374 = vmatprep.mubr.bf16.mxu1 %v6485_v24  ;;  %v8124_v49 = vsel %vm3707_vm5, %v3710_v38, %v3713_v37  ;;  %v3733_v10 = vor.u32 %v3732_v36, %v3731_v15  ;;  %v3739_v57 = vrot.slane %v2661_v41, 1  ;;  %v8755_v32 = vshll.u32 %v7805_v23, 16 }
 0x58b   : > { %v8130_v47 = vsel %vm3707_vm5, %v3713_v37, %v3717_v19  ;;  %v3736_v18 = vrot.slane %v8754_v61, 2  ;;  %v8137_v38 = vsel %vm3707_vm5, %v3717_v19, %v3721_v0  ;;  %v8756_v14 = vshrl.u32 %v7848_v27, 16 }
 0x58c   : > { %4468 = vmatmul.mubr.bf16.gmra.mrb[216].mxu0 %v4263_v5  ;;  %v8100_v5 = vrot.slane %v8750_v2, 1  ;;  %v3723_v2 = vrot.slane %v2629_v31, 1  ;;  %v8154_v46 = vsel %vm3707_vm5, %v3729_v26, %v3733_v10  ;;  %v8757_v6 = vshll.u32 %v7848_v27, 16 }
 0x58d   : > { %4477 = vmatprep.mubr.bf16.mxu0 %v6485_v24  ;;  %v3737_v45 = vor.u32 %v3736_v18, %v3735_v56  ;;  %v3743_v59 = vrot.slane %v8756_v14, 1  ;;  %v8759_v19 = vshll.u32 %v7850_v16, 16  ;;  %v8760_v15 = vshrl.u32 %v7868_v3, 16 }
 0x58e   : > { %v3725_v31 = vor.u32 %v3724_v33, %v3723_v2  ;;  %v3744_v41 = vrot.slane %v8757_v6, 2  ;;  %v8762_v11 = vshrl.u32 %v8011_v29, 16  ;;  %v8763_v61 = vshll.u32 %v8011_v29, 16 }
 0x58f   : > { %v3748_v4 = vrot.slane %v8759_v19, 2  ;;  %v8163_v62 = vsel %vm3707_vm5, %v3733_v10, %v3737_v45  ;;  %v2128_v10 = vld [vmem:[%s8734_s4 + $0xf0] sm:$0x3]  ;;  %v8766_v19 = vshll.u32 %v8030_v30, 16 }
 0x590   : > { %v8140_v2 = vsel %vm3707_vm5, %v3721_v0, %v3725_v31  ;;  %v8146_v37 = vsel %vm3707_vm5, %v3725_v31, %v3729_v26  ;;  %v3751_v0 = vrot.slane %v8760_v15, 1  ;;  %v8761_v31 = vshll.u32 %v7868_v3, 16 }
 0x591   : > { %2375 = vmatmul.mubr.bf16.gmra.mrb[28].mxu1 %v7803_v12  ;;  %v3740_v12 = vrot.slane %v8755_v32, 2  ;;  %v3745_v36 = vor.u32 %v3744_v41, %v3743_v59  ;;  %v3755_v56 = vrot.slane %v8762_v11, 1  ;;  %v3756_v18 = vrot.slane %v8763_v61, 2 }
 0x592   : > { %2384 = vmatprep.mubr.bf16.mxu1 %v6485_v24  ;;  %v3752_v43 = vrot.slane %v8761_v31, 2  ;;  %v8765_v59 = vshll.u32 %v8026_v25, 16  ;;  %v8767_v31 = vrot.slane %v7848_v27, 2 }
 0x593   : > { %v3741_v28 = vor.u32 %v3740_v12, %v3739_v57  ;;  %v8764_v12 = vshrl.u32 %v8026_v25, 16 }
 0x594   : > { %4478 = vmatmul.mubr.bf16.gmra.mrb[220].mxu0 %v8023_v1  ;;  %v8758_v1 = vshrl.u32 %v7850_v16, 16  ;;  %v3753_v32 = vor.u32 %v3752_v43, %v3751_v0  ;;  %v3760_v6 = vrot.slane %v8765_v59, 2  ;;  %v2159_v0 = vadd.f32 %v2128_v10, %v2097_v53 }
 0x595   : > { %4487 = vmatprep.mubr.bf16.mxu0 %v6485_v24  ;;  %v8177_v57 = vsel %vm3707_vm5, %v3737_v45, %v3741_v28  ;;  %v3759_v14 = vrot.slane %v8764_v12, 1  ;;  %v8185_v41 = vsel %vm3707_vm5, %v3741_v28, %v3745_v36  ;;  %v3764_v45 = vrot.slane %v8766_v19, 2 }
 0x596   : > { %v3747_v33 = vrot.slane %v8758_v1, 1  ;;  %v8768_v43 = vrot.slane %v7805_v23, 2  ;;  %v4268_v10 = vrot.slane %v7850_v16, 2  ;;  %v4272_v19 = vrot.slane %v8011_v29, 2 }
 0x597   : > { %v3761_v15 = vor.u32 %v3760_v6, %v3759_v14  ;;  %v3765_v11 = vor.u32 %v3764_v45, %v8100_v5  ;;  %v8769_v14 = vmov %v8767_v31  ;;  %v4270_v6 = vrot.slane %v7868_v3, 2 }
 0x598   : > { %v3749_v26 = vor.u32 %v3748_v4, %v3747_v33  ;;  %v3757_v33 = vor.u32 %v3756_v18, %v3755_v56  ;;  %v4267_v28 = vsel %vm4248_vm2, %v8768_v43, %v8767_v31  ;;  %v4276_v56 = vrot.slane %v8030_v30, 2  ;;  %v6416_v31 = vld [vmem:[%s8735_s5 + $0x114] ss:$8 sps:$4 sm:$0xff]   ;;  %v6414_v43 = vld [vmem:[%s8735_s5 + $0x110] ss:$8 sps:$4 sm:$0xff]  }
 0x599   : > { %2385 = vmatmul.mubr.bf16.gmra.mrb[32].mxu1 %v7805_v23  ;;  %v8211_v53 = vsel %vm3707_vm5, %v3761_v15, %v3765_v11  ;;  %v4269_v59 = vsel %vm4248_vm2, %v8769_v14, %v4268_v10  ;;  %v6432_v14 = vld [vmem:[%s8735_s5 + $0x170] ss:$8 sps:$4 sm:$0xff]  }
 0x59a   : > { %v8188_v1 = vsel %vm3707_vm5, %v3745_v36, %v3749_v26  ;;  %2394 = vmatprep.mubr.bf16.mxu1 %v6485_v24  ;;  %v8194_v4 = vsel %vm3707_vm5, %v3749_v26, %v3753_v32  ;;  %v8202_v36 = vsel %vm3707_vm5, %v3753_v32, %v3757_v33  ;;  %v8207_v61 = vsel %vm3707_vm5, %v3757_v33, %v3761_v15 }
 0x59b   : > { %v2175_v26 = vpack.c.bf16 %v2159_v0, %v2159_v0  ;;  %v4271_v33 = vsel %vm4248_vm2, %v4268_v10, %v4270_v6  ;;  %v6411_v0 = vld [vmem:[%s8735_s5 + $0x100] ss:$8 sps:$4 sm:$0xff]   ;;  %v6431_v10 = vld [vmem:[%s8735_s5 + $0x164] ss:$8 sps:$4 sm:$0xff]  }
 0x59c   : > { %4488 = vmatmul.mubr.bf16.gmra.mrb[224].mxu0 %v4267_v28  ;;  %v6419_v28 = vld [vmem:[%s8735_s5 + $0x124] ss:$8 sps:$4 sm:$0xff]  }
 0x59d   : > { %4497 = vmatprep.mubr.bf16.mxu0 %v6485_v24  ;;  %v3768_v23 = vshll.u32 %v2175_v26, 16  ;;  %v4278_v18 = vrot.slane %v2175_v26, 2  ;;  %v6425_v26 = vld [vmem:[%s8735_s5 + $0x144] ss:$8 sps:$4 sm:$0xff]  }
 0x59f   : > { %v3770_v32 = vrot.slane %v3768_v23, 2  ;;  %v8215_v12 = vsel %vm4248_vm2, %v4276_v56, %v4278_v18  ;;  %v6423_v23 = vld [vmem:[%s8735_s5 + $0x140] ss:$8 sps:$4 sm:$0xff]   ;;  %v6426_v18 = vld [vmem:[%s8735_s5 + $0x150] ss:$8 sps:$4 sm:$0xff]  }
 0x5a1   : > { %2395 = vmatmul.mubr.bf16.gmra.mrb[36].mxu1 %v7848_v27  ;;  %v8220_v5 = vsel %vm3707_vm5, %v3765_v11, %v3770_v32  ;;  %v4273_v27 = vsel %vm4248_vm2, %v4270_v6, %v4272_v19  ;;  %v6417_v11 = vld [vmem:[%s8735_s5 + $0x120] ss:$8 sps:$4 sm:$0xff]   ;;  %v8773_v6 = vshll.u32 %v8026_v25, 16 }
 0x5a2   : > { %2404 = vmatprep.mubr.bf16.mxu1 %v6485_v24  ;;  %v6429_v32 = vld [vmem:[%s8735_s5 + $0x160] ss:$8 sps:$4 sm:$0xff]  }
 0x5a4   : > { %4498 = vmatmul.mubr.bf16.gmra.mrb[228].mxu0 %v4269_v59  ;;  %v6437_v59 = vld [vmem:[%s8735_s5 + $0x184] ss:$8 sps:$4 sm:$0xff]  }
 0x5a5   : > { %4507 = vmatprep.mubr.bf16.mxu0 %v6485_v24 }
 0x5a9   : > { %2405 = vmatmul.mubr.bf16.gmra.mrb[40].mxu1 %v7850_v16  ;;  %v4274_v16 = vrot.slane %v8026_v25, 2 }
 0x5aa   : > { %2414 = vmatprep.mubr.bf16.mxu1 %v6485_v24 }
 0x5ab   : > { %v4275_v45 = vsel %vm4248_vm2, %v4272_v19, %v4274_v16  ;;  %v4277_v15 = vsel %vm4248_vm2, %v4274_v16, %v4276_v56  ;;  %v6420_v56 = vld [vmem:[%s8735_s5 + $0x130] ss:$8 sps:$4 sm:$0xff]  }
 0x5ac   : > { %4508 = vmatmul.mubr.bf16.gmra.mrb[232].mxu0 %v4271_v33 }
 0x5ad   : > { %4517 = vmatprep.mubr.bf16.mxu0 %v6485_v24 }
 0x5b1   : > { %2415 = vmatmul.mubr.bf16.gmra.mrb[44].mxu1 %v7868_v3 }
 0x5b2   : > { %2424 = vmatprep.mubr.bf16.mxu1 %v6485_v24 }
 0x5b4   : > { %4518 = vmatmul.mubr.bf16.gmra.mrb[236].mxu0 %v4273_v27 }
 0x5b5   : > { %4527 = vmatprep.mubr.bf16.mxu0 %v6485_v24 }
 0x5b9   : > { %2425 = vmatmul.mubr.bf16.gmra.mrb[48].mxu1 %v8011_v29 }
 0x5ba   : > { %2434 = vmatprep.mubr.bf16.mxu1 %v6485_v24 }
 0x5bc   : > { %4528 = vmatmul.mubr.bf16.gmra.mrb[240].mxu0 %v4275_v45  ;;  %v8774_v45 = vshrl.u32 %v8026_v25, 16 }
 0x5bd   : > { %4537 = vmatprep.mubr.bf16.mxu0 %v6485_v24 }
 0x5c1   : > { %2435 = vmatmul.mubr.bf16.gmra.mrb[52].mxu1 %v8026_v25 }
 0x5c2   : > { %2444 = vmatprep.mubr.bf16.mxu1 %v6485_v24 }
 0x5c4   : > { %4538 = vmatmul.mubr.bf16.gmra.mrb[244].mxu0 %v4277_v15 }
 0x5c9   : > { %2445 = vmatmul.mubr.bf16.gmra.mrb[56].mxu1 %v8030_v30 }
 0x5ca   : > { %2839 = vmatprep.mubr.bf16.mxu1 %v6485_v24 }
 0x5d1   : > { %2840 = vmatmul.mubr.bf16.vlgmr.msra.gmra.mrb[0].mxu1 %v7882_v55  ;;  %v6422_v55 = vld [vmem:[%s8735_s5 + $0x134] ss:$8 sps:$4 sm:$0xff]  }
 0x5d2   : > { %3328 = vmatpush1.bf16.msra.mxu1 %v6411_v0  ;;  %2849 = vmatprep.mubr.bf16.mxu1 %v6485_v24  ;;  %v8775_v0 = vshll.u32 %v8030_v30, 16 }
 0x5d3   : > { %3329 = vmatprep.subr.bf16.mxu1 %v6416_v31 }
 0x5d4   : > { %v2707_v31 = vrot.slane %v8775_v0, 1 }
 0x5d6   : > { %3330 = vmatpush1.bf16.msra.mxu1 %v6414_v43 }
 0x5d7   : > { %3331 = vmatprep.subr.bf16.mxu1 %v6419_v28 }
 0x5d9   : > { %2850 = vmatmul.mubr.bf16.gmra.mrb[4].mxu1 %v7903_v58  ;;  %v6428_v58 = vld [vmem:[%s8735_s5 + $0x154] ss:$8 sps:$4 sm:$0xff]  }
 0x5da   : > { %2859 = vmatprep.mubr.bf16.mxu1 %v6485_v24  ;;  %3332 = vmatpush1.bf16.msra.mxu1 %v6417_v11 }
 0x5db   : > { %3333 = vmatprep.subr.bf16.mxu1 %v6422_v55 }
 0x5de   : > { %3334 = vmatpush1.bf16.msra.mxu1 %v6420_v56 }
 0x5df   : > { %3335 = vmatprep.subr.bf16.mxu1 %v6425_v26 }
 0x5e1   : > { %2860 = vmatmul.mubr.bf16.gmra.mrb[8].mxu1 %v7921_v52  ;;  %v6434_v52 = vld [vmem:[%s8735_s5 + $0x174] ss:$8 sps:$4 sm:$0xff]  }
 0x5e2   : > { %2869 = vmatprep.mubr.bf16.mxu1 %v6485_v24  ;;  %3336 = vmatpush1.bf16.msra.mxu1 %v6423_v23  ;;  %v8776_v23 = vshrl.u32 %v8030_v30, 16 }
 0x5e3   : > { %3337 = vmatprep.subr.bf16.mxu1 %v6428_v58 }
 0x5e4   : > { %v2711_v58 = vor.u32 %v8776_v23, %v2707_v31 }
 0x5e6   : > { %3338 = vmatpush1.bf16.msra.mxu1 %v6426_v18 }
 0x5e7   : > { %3339 = vmatprep.subr.bf16.mxu1 %v6431_v10 }
 0x5e9   : > { %2870 = vmatmul.mubr.bf16.gmra.mrb[12].mxu1 %v7927_v21  ;;  %v8770_v21 = vshrl.u32 %v7868_v3, 16 }
 0x5ea   : > { %2879 = vmatprep.mubr.bf16.mxu1 %v6485_v24  ;;  %3340 = vmatpush1.bf16.msra.mxu1 %v6429_v32 }
 0x5eb   : > { %3341 = vmatprep.subr.bf16.mxu1 %v6434_v52  ;;  %v6435_v52 = vld [vmem:[%s8735_s5 + $0x180] ss:$8 sps:$4 sm:$0xff]  }
 0x5ee   : > { %3342 = vmatpush1.bf16.msra.mxu1 %v6432_v14 }
 0x5ef   : > { %3867 = vmatprep.subr.bf16.mxu1 %v6437_v59  ;;  %v6440_v59 = vld [vmem:[%s8735_s5 + $0x194] ss:$8 sps:$4 sm:$0xff]  }
 0x5f1   : > { %2880 = vmatmul.mubr.bf16.gmra.mrb[16].mxu1 %v7941_v34  ;;  %v2687_v34 = vor.u32 %v8770_v21, %v7993_v39 }
 0x5f2   : > { %2889 = vmatprep.mubr.bf16.mxu1 %v6485_v24 }
 0x5f9   : > { %2890 = vmatmul.mubr.bf16.gmra.mrb[20].mxu1 %v7944_v7  ;;  %v8771_v7 = vshll.u32 %v8011_v29, 16 }
 0x5fa   : > { %2899 = vmatprep.mubr.bf16.mxu1 %v6485_v24 }
 0x601   : > { %2900 = vmatmul.mubr.bf16.gmra.mrb[24].mxu1 %v7969_v50  ;;  %v2691_v50 = vrot.slane %v8771_v7, 1 }
 0x602   : > { %2909 = vmatprep.mubr.bf16.mxu1 %v6485_v24 }
 0x609   : > { %2910 = vmatmul.mubr.bf16.gmra.mrb[28].mxu1 %v7976_v9  ;;  %v2692_v9 = vsel %vm2592_vm3, %v2687_v34, %v2691_v50 }
 0x60a   : > { %2919 = vmatprep.mubr.bf16.mxu1 %v6485_v24 }
 0x611   : > { %2920 = vmatmul.mubr.bf16.gmra.mrb[32].mxu1 %v7987_v54  ;;  %v8772_v54 = vshrl.u32 %v8011_v29, 16 }
 0x612   : > { %2929 = vmatprep.mubr.bf16.mxu1 %v6485_v24 }
 0x619   : > { %2930 = vmatmul.mubr.bf16.gmra.mrb[36].mxu1 %v8002_v8  ;;  %v2695_v8 = vor.u32 %v8772_v54, %v2691_v50  ;;  %v6438_v50 = vld [vmem:[%s8735_s5 + $0x190] ss:$8 sps:$4 sm:$0xff]  }
 0x61a   : > { %2939 = vmatprep.mubr.bf16.mxu1 %v6485_v24 }
 0x621   : > { %2940 = vmatmul.mubr.bf16.gmra.mrb[40].mxu1 %v8015_v40  ;;  %v2699_v40 = vrot.slane %v8773_v6, 1 }
 0x622   : > { %2949 = vmatprep.mubr.bf16.mxu1 %v6485_v24 }
 0x623   : > { %v2700_v39 = vsel %vm2592_vm3, %v2695_v8, %v2699_v40  ;;  %v2703_v15 = vor.u32 %v8774_v45, %v2699_v40  ;;  %v6446_v8 = vld [vmem:[%s8735_s5 + $0x1b4] ss:$8 sps:$4 sm:$0xff]   ;;  %v6444_v45 = vld [vmem:[%s8735_s5 + $0x1b0] ss:$8 sps:$4 sm:$0xff]  }
 0x625   : > { %v2708_v11 = vsel %vm2592_vm3, %v2703_v15, %v2707_v31  ;;  %v6449_v15 = vld [vmem:[%s8735_s5 + $0x1c4] ss:$8 sps:$4 sm:$0xff]   ;;  %v6452_v31 = vld [vmem:[%s8735_s5 + $0x1d4] ss:$8 sps:$4 sm:$0xff]  }
 0x629   : > { %2950 = vmatmul.mubr.bf16.gmra.mrb[44].mxu1 %v2692_v9  ;;  %v6443_v9 = vld [vmem:[%s8735_s5 + $0x1a4] ss:$8 sps:$4 sm:$0xff]  }
 0x62a   : > { %2959 = vmatprep.mubr.bf16.mxu1 %v6485_v24 }
 0x62f   : > { %v8327_v33 = vpop.f32.mrb[192].mxu0 }
 0x630   : > { %v8329_v19 = vpop.f32.mrb[193].mxu0 }
 0x631   : > { %2960 = vmatmul.mubr.bf16.gmra.mrb[48].mxu1 %v2700_v39  ;;  %v8332_v27 = vpop.f32.mrb[194].mxu0 }
 0x632   : > { %v8334_v16 = vpop.f32.mrb[195].mxu0  ;;  %2969 = vmatprep.mubr.bf16.mxu1 %v6485_v24 }
 0x637   : > { %v8341_v43 = vpop.f32.mrb[196].mxu0 }
 0x638   : > { %v8343_v28 = vpop.f32.mrb[197].mxu0 }
 0x639   : > { %2970 = vmatmul.mubr.bf16.gmra.mrb[52].mxu1 %v2708_v11  ;;  %v8346_v55 = vpop.f32.mrb[198].mxu0 }
 0x63a   : > { %v8348_v56 = vpop.f32.mrb[199].mxu0  ;;  %2979 = vmatprep.mubr.bf16.mxu1 %v6485_v24 }
 0x63f   : > { %v8351_v26 = vpop.f32.mrb[200].mxu0 }
 0x640   : > { %v8355_v18 = vpop.f32.mrb[201].mxu0 }
 0x641   : > { %2980 = vmatmul.mubr.bf16.gmra.mrb[60].mxu1 %v2711_v58  ;;  %v8357_v10 = vpop.f32.mrb[202].mxu0 }
 0x642   : > { %v8359_v32 = vpop.f32.mrb[203].mxu0  ;;  %3359 = vmatprep.mubr.bf16.mxu1 %v6485_v24 }
 0x647   : > { %v8365_v14 = vpop.f32.mrb[204].mxu0 }
 0x648   : > { %v8370_v21 = vpop.f32.mrb[205].mxu0 }
 0x649   : > { %3360 = vmatmul.mubr.bf16.vlgmr.msra.gmra.mrb[0].mxu1 %v8038_v60  ;;  %v8373_v34 = vpop.f32.mrb[206].mxu0  ;;  %v6441_v60 = vld [vmem:[%s8735_s5 + $0x1a0] ss:$8 sps:$4 sm:$0xff]  }
 0x64a   : > { %3868 = vmatpush1.bf16.msra.mxu1 %v6435_v52  ;;  %v8375_v7 = vpop.f32.mrb[207].mxu0  ;;  %3369 = vmatprep.mubr.bf16.mxu1 %v6485_v24  ;;  %v6450_v52 = vld [vmem:[%s8735_s5 + $0x1d0] ss:$8 sps:$4 sm:$0xff]  }
 0x64b   : > { %3869 = vmatprep.subr.bf16.mxu1 %v6440_v59  ;;  %v6455_v59 = vld [vmem:[%s8735_s5 + $0x1e4] ss:$8 sps:$4 sm:$0xff]  }
 0x64e   : > { %3870 = vmatpush1.bf16.msra.mxu1 %v6438_v50 }
 0x64f   : > { %v8387_v54 = vpop.f32.mrb[208].mxu0  ;;  %3871 = vmatprep.subr.bf16.mxu1 %v6443_v9  ;;  %v6458_v9 = vld [vmem:[%s8735_s5 + $0x1f4] ss:$8 sps:$4 sm:$0xff]  }
 0x650   : > { %v8392_v6 = vpop.f32.mrb[209].mxu0 }
 0x651   : > { %3370 = vmatmul.mubr.bf16.gmra.mrb[4].mxu1 %v8045_v42  ;;  %v8395_v40 = vpop.f32.mrb[210].mxu0  ;;  %v6447_v42 = vld [vmem:[%s8735_s5 + $0x1c0] ss:$8 sps:$4 sm:$0xff]  }
 0x652   : > { %v8397_v39 = vpop.f32.mrb[211].mxu0  ;;  %3379 = vmatprep.mubr.bf16.mxu1 %v6485_v24  ;;  %3872 = vmatpush1.bf16.msra.mxu1 %v6441_v60 }
 0x653   : > { %3873 = vmatprep.subr.bf16.mxu1 %v6446_v8 }
 0x656   : > { %3874 = vmatpush1.bf16.msra.mxu1 %v6444_v45 }
 0x657   : > { %v8409_v0 = vpop.f32.mrb[212].mxu0  ;;  %3875 = vmatprep.subr.bf16.mxu1 %v6449_v15  ;;  %v6456_v15 = vld [vmem:[%s8735_s5 + $0x1f0] ss:$8 sps:$4 sm:$0xff]  }
 0x658   : > { %v8414_v11 = vpop.f32.mrb[213].mxu0 }
 0x659   : > { %3380 = vmatmul.mubr.bf16.gmra.mrb[8].mxu1 %v8048_v22  ;;  %v8417_v23 = vpop.f32.mrb[214].mxu0  ;;  %v6453_v22 = vld [vmem:[%s8735_s5 + $0x1e0] ss:$8 sps:$4 sm:$0xff]  }
 0x65a   : > { %v8419_v58 = vpop.f32.mrb[215].mxu0  ;;  %3389 = vmatprep.mubr.bf16.mxu1 %v6485_v24  ;;  %3876 = vmatpush1.bf16.msra.mxu1 %v6447_v42 }
 0x65b   : > { %3877 = vmatprep.subr.bf16.mxu1 %v6452_v31  ;;  %v6461_v31 = vld [vmem:[%s8735_s5 + $0x204] ss:$8 sps:$4 sm:$0xff]  }
 0x65e   : > { %3878 = vmatpush1.bf16.msra.mxu1 %v6450_v52 }
 0x65f   : > { %v8431_v50 = vpop.f32.mrb[216].mxu0  ;;  %3879 = vmatprep.subr.bf16.mxu1 %v6455_v59 }
 0x660   : > { %v8436_v60 = vpop.f32.mrb[217].mxu0 }
 0x661   : > { %3390 = vmatmul.mubr.bf16.gmra.mrb[12].mxu1 %v8052_v51  ;;  %v8439_v8 = vpop.f32.mrb[218].mxu0 }
 0x662   : > { %v8441_v45 = vpop.f32.mrb[219].mxu0  ;;  %3399 = vmatprep.mubr.bf16.mxu1 %v6485_v24  ;;  %3880 = vmatpush1.bf16.msra.mxu1 %v6453_v22 }
 0x663   : > { %3881 = vmatprep.subr.bf16.mxu1 %v6458_v9 }
 0x666   : > { %3882 = vmatpush1.bf16.msra.mxu1 %v6456_v15 }
 0x667   : > { %v8447_v42 = vpop.f32.mrb[220].mxu0  ;;  %5779 = vmatprep.subr.bf16.mxu1 %v6461_v31 }
 0x668   : > { %8777 = vst [vmem:[#allocation3_spill] sm:$0xff] %v8447_v42  ;;  %v8452_v51 = vpop.f32.mrb[221].mxu0 }
 0x669   : > { %3400 = vmatmul.mubr.bf16.gmra.mrb[16].mxu1 %v8060_v35  ;;  %v8455_v52 = vpop.f32.mrb[222].mxu0 }
 0x66a   : > { %8778 = vst [vmem:[#allocation4_spill] sm:$0xff] %v8455_v52  ;;  %v8457_v59 = vpop.f32.mrb[223].mxu0  ;;  %3409 = vmatprep.mubr.bf16.mxu1 %v6485_v24 }
 0x66b   : > { %8779 = vst [vmem:[#allocation5_spill] sm:$0xff] %v8457_v59 }
 0x66f   : > { %v8460_v22 = vpop.f32.mrb[224].mxu0 }
 0x670   : > { %v8462_v9 = vpop.f32.mrb[225].mxu0 }
 0x671   : > { %8780 = vst [vmem:[#allocation6_spill] sm:$0xff] %v8462_v9  ;;  %3410 = vmatmul.mubr.bf16.gmra.mrb[20].mxu1 %v8066_v20  ;;  %v8465_v15 = vpop.f32.mrb[226].mxu0 }
 0x672   : > { %8781 = vst [vmem:[#allocation7_spill] sm:$0xff] %v8465_v15  ;;  %v8467_v42 = vpop.f32.mrb[227].mxu0  ;;  %3419 = vmatprep.mubr.bf16.mxu1 %v6485_v24 }
 0x673   : > { %8782 = vst [vmem:[#allocation8_spill] sm:$0xff] %v8467_v42 }
 0x677   : > { %v8470_v31 = vpop.f32.mrb[228].mxu0 }
 0x678   : > { %v8472_v35 = vpop.f32.mrb[229].mxu0 }
 0x679   : > { %8783 = vst [vmem:[#allocation9_spill] sm:$0xff] %v8472_v35  ;;  %3420 = vmatmul.mubr.bf16.gmra.mrb[24].mxu1 %v8069_v13  ;;  %v8475_v59 = vpop.f32.mrb[230].mxu0 }
 0x67a   : > { %8784 = vst [vmem:[#allocation10_spill] sm:$0xff] %v8475_v59  ;;  %v8477_v52 = vpop.f32.mrb[231].mxu0  ;;  %3429 = vmatprep.mubr.bf16.mxu1 %v6485_v24 }
 0x67b   : > { %8785 = vst [vmem:[#allocation11_spill] sm:$0xff] %v8477_v52 }
 0x67f   : > { %v8480_v9 = vpop.f32.mrb[232].mxu0 }
 0x680   : > { %v8482_v20 = vpop.f32.mrb[233].mxu0 }
 0x681   : > { %8786 = vst [vmem:[#allocation12_spill] sm:$0xff] %v8482_v20  ;;  %3430 = vmatmul.mubr.bf16.gmra.mrb[28].mxu1 %v8072_v17  ;;  %v8485_v42 = vpop.f32.mrb[234].mxu0 }
 0x682   : > { %8787 = vst [vmem:[#allocation13_spill] sm:$0xff] %v8485_v42  ;;  %v8487_v15 = vpop.f32.mrb[235].mxu0  ;;  %3439 = vmatprep.mubr.bf16.mxu1 %v6485_v24 }
 0x683   : > { %8788 = vst [vmem:[#allocation14_spill] sm:$0xff] %v8487_v15 }
 0x687   : > { %v8490_v35 = vpop.f32.mrb[236].mxu0 }
 0x688   : > { %v8492_v13 = vpop.f32.mrb[237].mxu0 }
 0x689   : > { %8789 = vst [vmem:[#allocation15_spill] sm:$0xff] %v8492_v13  ;;  %3440 = vmatmul.mubr.bf16.gmra.mrb[32].mxu1 %v8078_v44  ;;  %v8495_v52 = vpop.f32.mrb[238].mxu0 }
 0x68a   : > { %8790 = vst [vmem:[#allocation16_spill] sm:$0xff] %v8495_v52  ;;  %v8497_v59 = vpop.f32.mrb[239].mxu0  ;;  %3449 = vmatprep.mubr.bf16.mxu1 %v6485_v24 }
 0x68b   : > { %8791 = vst [vmem:[#allocation17_spill] sm:$0xff] %v8497_v59 }
 0x68f   : > { %v8500_v20 = vpop.f32.mrb[240].mxu0 }
 0x690   : > { %8792 = vst [vmem:[#allocation18_spill] sm:$0xff] %v8500_v20  ;;  %v8502_v17 = vpop.f32.mrb[241].mxu0 }
 0x691   : > { %8793 = vst [vmem:[#allocation19_spill] sm:$0xff] %v8502_v17  ;;  %3450 = vmatmul.mubr.bf16.gmra.mrb[36].mxu1 %v8081_v63  ;;  %v8505_v15 = vpop.f32.mrb[242].mxu0  ;;  %v3226_v63 = vrot.slane %v8011_v29, 1  ;;  %v3230_v29 = vrot.slane %v8030_v30, 1  ;;  %v6464_v30 = vld [vmem:[%s8735_s5 + $0x210] ss:$8 sps:$4 sm:$0xff]  }
 0x692   : > { %8794 = vst [vmem:[#allocation20_spill] sm:$0xff] %v8505_v15  ;;  %v8507_v42 = vpop.f32.mrb[243].mxu0  ;;  %3459 = vmatprep.mubr.bf16.mxu1 %v6485_v24 }
 0x693   : > { %8795 = vst [vmem:[#allocation21_spill] sm:$0xff] %v8507_v42 }
 0x697   : > { %v8510_v13 = vpop.f32.mrb[244].mxu0 }
 0x698   : > { %v8512_v44 = vpop.f32.mrb[245].mxu0 }
 0x699   : > { %8796 = vst [vmem:[#allocation22_spill] sm:$0xff] %v8512_v44  ;;  %3460 = vmatmul.mubr.bf16.gmra.mrb[40].mxu1 %v8090_v48  ;;  %v8515_v59 = vpop.f32.mrb[246].mxu0  ;;  %v8799_v44 = vrot.slane %v7868_v3, 1  ;;  %v6462_v3 = vld [vmem:[%s8735_s5 + $0x200] ss:$8 sps:$4 sm:$0xff]  }
 0x69a   : > { %8797 = vst [vmem:[#allocation23_spill] sm:$0xff] %v8515_v59  ;;  %v8517_v52 = vpop.f32.mrb[247].mxu0  ;;  %3469 = vmatprep.mubr.bf16.mxu1 %v6485_v24 }
 0x69b   : > { %8798 = vst [vmem:[#allocation24_spill] sm:$0xff] %v8517_v52  ;;  %v3227_v48 = vsel %vm3202_vm4, %v8799_v44, %v3226_v63  ;;  %v3228_v52 = vrot.slane %v8026_v25, 1  ;;  %v6463_v25 = vld [vmem:[%s8735_s5 + $0x214] ss:$8 sps:$4 sm:$0xff]   ;;  %v6470_v44 = vld [vmem:[%s8735_s5 + $0x240] ss:$8 sps:$4 sm:$0xff]  }
 0x69c   : > { %v8520_v17 = vpop.f32.mrb[56].mxu1 }
 0x69d   : > { %v8523_v15 = vpop.f32.mrb[57].mxu1  ;;  %v3229_v59 = vsel %vm3202_vm4, %v3226_v63, %v3228_v52  ;;  %v6471_v63 = vld [vmem:[%s8735_s5 + $0x254] ss:$8 sps:$4 sm:$0xff]  }
 0x69e   : > { %v2450_v42 = vpop.f32.mrb[58].mxu1 }
 0x69f   : > { %2513 = vst [vmem:[#allocation2 + $0x1d0] sm:$0x3f] %v2450_v42  ;;  %v2452_v20 = vpop.f32.mrb[59].mxu1  ;;  %v3231_v42 = vsel %vm3202_vm4, %v3228_v52, %v3230_v29  ;;  %v6466_v52 = vld [vmem:[%s8735_s5 + $0x220] ss:$8 sps:$4 sm:$0xff]  }
 0x6a0   : > { %2514 = vst [vmem:[#allocation2 + $0x1d8] sm:$0x3f] %v2452_v20  ;;  %v6468_v20 = vld [vmem:[%s8735_s5 + $0x230] ss:$8 sps:$4 sm:$0xff]  }
 0x6a1   : > { %3470 = vmatmul.mubr.bf16.gmra.mrb[44].mxu1 %v3227_v48  ;;  %v6472_v48 = vld [vmem:[%s8735_s5 + $0x250] ss:$8 sps:$4 sm:$0xff]  }
 0x6a2   : > { %3479 = vmatprep.mubr.bf16.mxu1 %v6485_v24 }
 0x6a9   : > { %3480 = vmatmul.mubr.bf16.gmra.mrb[48].mxu1 %v3229_v59  ;;  %v6467_v59 = vld [vmem:[%s8735_s5 + $0x234] ss:$8 sps:$4 sm:$0xff]  }
 0x6aa   : > { %3489 = vmatprep.mubr.bf16.mxu1 %v6485_v24 }
 0x6b1   : > { %3490 = vmatmul.mubr.bf16.gmra.mrb[52].mxu1 %v3231_v42  ;;  %v6475_v42 = vld [vmem:[%s8735_s5 + $0x274] ss:$8 sps:$4 sm:$0xff]  }
 0x6b2   : > { %3499 = vmatprep.mubr.bf16.mxu1 %v6485_v24 }
 0x6b9   : > { %3500 = vmatmul.mubr.bf16.gmra.mrb[64].mxu1 %v3230_v29  ;;  %v6474_v29 = vld [vmem:[%s8735_s5 + $0x260] ss:$8 sps:$4 sm:$0xff]  }
 0x6ba   : > { %3899 = vmatprep.mubr.bf16.mxu1 %v6485_v24 }
 0x6c1   : > { %3900 = vmatmul.mubr.bf16.vlgmr.msra.gmra.mrb[0].mxu1 %v8124_v49  ;;  %v6465_v49 = vld [vmem:[%s8735_s5 + $0x224] ss:$8 sps:$4 sm:$0xff]  }
 0x6c2   : > { %5787 = vmatpush1.bf16.msra.mxu1 %v6462_v3  ;;  %3909 = vmatprep.mubr.bf16.mxu1 %v6485_v24  ;;  %v6476_v3 = vld [vmem:[%s8735_s5 + $0x270] ss:$8 sps:$4 sm:$0xff]  }
 0x6c3   : > { %5780 = vmatprep.subr.bf16.mxu1 %v6463_v25 }
 0x6c6   : > { %5788 = vmatpush1.bf16.msra.mxu1 %v6464_v30 }
 0x6c7   : > { %5781 = vmatprep.subr.bf16.mxu1 %v6465_v49 }
 0x6c9   : > { %3910 = vmatmul.mubr.bf16.gmra.mrb[4].mxu1 %v8130_v47  ;;  %v6469_v47 = vld [vmem:[%s8735_s5 + $0x244] ss:$8 sps:$4 sm:$0xff]  }
 0x6ca   : > { %3919 = vmatprep.mubr.bf16.mxu1 %v6485_v24  ;;  %5789 = vmatpush1.bf16.msra.mxu1 %v6466_v52 }
 0x6cb   : > { %5782 = vmatprep.subr.bf16.mxu1 %v6467_v59 }
 0x6ce   : > { %5790 = vmatpush1.bf16.msra.mxu1 %v6468_v20 }
 0x6cf   : > { %5783 = vmatprep.subr.bf16.mxu1 %v6469_v47 }
 0x6d1   : > { %3920 = vmatmul.mubr.bf16.gmra.mrb[8].mxu1 %v8137_v38  ;;  %v6473_v38 = vld [vmem:[%s8735_s5 + $0x264] ss:$8 sps:$4 sm:$0xff]  }
 0x6d2   : > { %3929 = vmatprep.mubr.bf16.mxu1 %v6485_v24  ;;  %5791 = vmatpush1.bf16.msra.mxu1 %v6470_v44 }
 0x6d3   : > { %5784 = vmatprep.subr.bf16.mxu1 %v6471_v63 }
 0x6d6   : > { %5792 = vmatpush1.bf16.msra.mxu1 %v6472_v48  ;;  %v8619_v48 = vld [vmem:[%s8736_s6] ss:$0 sm:$0xff] }
 0x6d7   : > { %5785 = vmatprep.subr.bf16.mxu1 %v6473_v38 }
 0x6d9   : > { %3930 = vmatmul.mubr.bf16.gmra.mrb[12].mxu1 %v8140_v2 }
 0x6da   : > { %3939 = vmatprep.mubr.bf16.mxu1 %v6485_v24  ;;  %5793 = vmatpush1.bf16.msra.mxu1 %v6474_v29 }
 0x6db   : > { %5786 = vmatprep.subr.bf16.mxu1 %v6475_v42 }
 0x6de   : > { %5794 = vmatpush1.bf16.msra.mxu1 %v6476_v3 }
 0x6e1   : > { %3940 = vmatmul.mubr.bf16.gmra.mrb[16].mxu1 %v8146_v37 }
 0x6e2   : > { %3949 = vmatprep.mubr.bf16.mxu1 %v6485_v24 }
 0x6e9   : > { %3950 = vmatmul.mubr.bf16.gmra.mrb[20].mxu1 %v8154_v46 }
 0x6ea   : > { %3959 = vmatprep.mubr.bf16.mxu1 %v6485_v24 }
 0x6f1   : > { %3960 = vmatmul.mubr.bf16.gmra.mrb[24].mxu1 %v8163_v62 }
 0x6f2   : > { %3969 = vmatprep.mubr.bf16.mxu1 %v6485_v24 }
 0x6f9   : > { %3970 = vmatmul.mubr.bf16.gmra.mrb[28].mxu1 %v8177_v57  ;;  %v2573_v57 = vld [vmem:[#allocation2 + $0x1d0] sm:$0x3f] }
 0x6fa   : > { %3979 = vmatprep.mubr.bf16.mxu1 %v6485_v24 }
 0x701   : > { %3980 = vmatmul.mubr.bf16.gmra.mrb[32].mxu1 %v8185_v41  ;;  %v2574_v41 = vld [vmem:[#allocation2 + $0x1d8] sm:$0x3f] }
 0x702   : > { %3989 = vmatprep.mubr.bf16.mxu1 %v6485_v24 }
 0x709   : > { %3990 = vmatmul.mubr.bf16.gmra.mrb[36].mxu1 %v8188_v1 }
 0x70a   : > { %3999 = vmatprep.mubr.bf16.mxu1 %v6485_v24 }
 0x711   : > { %4000 = vmatmul.mubr.bf16.gmra.mrb[40].mxu1 %v8194_v4 }
 0x712   : > { %4009 = vmatprep.mubr.bf16.mxu1 %v6485_v24 }
 0x714   : > { %v2981_v2 = vpop.f32.mrb[60].mxu1 }
 0x715   : > { %v3046_v37 = vadd.f32 %v2981_v2, %v8520_v17  ;;  %v2983_v46 = vpop.f32.mrb[61].mxu1 }
 0x716   : > { %v3047_v62 = vadd.f32 %v2983_v46, %v8523_v15  ;;  %v2985_v25 = vpop.f32.mrb[62].mxu1 }
 0x717   : > { %v3048_v30 = vadd.f32 %v2985_v25, %v2573_v57  ;;  %v2987_v49 = vpop.f32.mrb[63].mxu1 }
 0x718   : > { %v3049_v52 = vadd.f32 %v2987_v49, %v2574_v41 }
 0x719   : > { %3108 = vst [vmem:[#allocation2 + $0x1d0] sm:$0x3f] %v3048_v30  ;;  %4010 = vmatmul.mubr.bf16.gmra.mrb[44].mxu1 %v8202_v36 }
 0x71a   : > { %3109 = vst [vmem:[#allocation2 + $0x1d8] sm:$0x3f] %v3049_v52  ;;  %4019 = vmatprep.mubr.bf16.mxu1 %v6485_v24 }
 0x720   : > { %v3168_v17 = vld [vmem:[#allocation2 + $0x1d0] sm:$0x3f] }
 0x721   : > { %4020 = vmatmul.mubr.bf16.gmra.mrb[48].mxu1 %v8207_v61  ;;  %v3169_v20 = vld [vmem:[#allocation2 + $0x1d8] sm:$0x3f] }
 0x722   : > { %4029 = vmatprep.mubr.bf16.mxu1 %v6485_v24 }
 0x729   : > { %4030 = vmatmul.mubr.bf16.gmra.mrb[52].mxu1 %v8211_v53 }
 0x72a   : > { %4039 = vmatprep.mubr.bf16.mxu1 %v6485_v24 }
 0x731   : > { %4040 = vmatmul.mubr.bf16.gmra.mrb[68].mxu1 %v8220_v5 }
 0x732   : > { %4547 = vmatprep.mubr.bf16.mxu1 %v6485_v24 }
 0x739   : > { %4548 = vmatmul.mubr.bf16.vlgmr.msra.gmra.mrb[72].mxu1 %v8215_v12 }
 0x78c   : > { %v3501_v1 = vpop.f32.mrb[64].mxu1 }
 0x78d   : > { %v3566_v4 = vadd.f32 %v3501_v1, %v3046_v37  ;;  %v3503_v36 = vpop.f32.mrb[65].mxu1 }
 0x78e   : > { %v3567_v15 = vadd.f32 %v3503_v36, %v3047_v62  ;;  %v3505_v59 = vpop.f32.mrb[66].mxu1 }
 0x78f   : > { %3626 = vst [vmem:[#allocation2 + $0x1c0] sm:$0xff] %v3566_v4  ;;  %v3568_v61 = vadd.f32 %v3505_v59, %v3168_v17  ;;  %v3507_v47 = vpop.f32.mrb[67].mxu1 }
 0x790   : > { %3627 = vst [vmem:[#allocation2 + $0x1c8] sm:$0xff] %v3567_v15  ;;  %v3569_v53 = vadd.f32 %v3507_v47, %v3169_v20 }
 0x791   : > { %3628 = vst [vmem:[#allocation2 + $0x1d0] sm:$0x3f] %v3568_v61 }
 0x792   : > { %3629 = vst [vmem:[#allocation2 + $0x1d8] sm:$0x3f] %v3569_v53 }
 0x794   : > { %v3901_v5 = vpop.f32.mrb[0].mxu1 }
 0x795   : > { %v5797_v24 = vadd.f32 %v8327_v33, %v3901_v5  ;;  %v3903_v44 = vpop.f32.mrb[1].mxu1 }
 0x796   : > { %v5800_v12 = vadd.f32 %v8329_v19, %v3903_v44  ;;  %v3905_v63 = vpop.f32.mrb[2].mxu1 }
 0x797   : > { %v5803_v38 = vadd.f32 %v8332_v27, %v3905_v63  ;;  %v3907_v29 = vpop.f32.mrb[3].mxu1 }
 0x798   : > { %v4738_v42 = vmax.f32 %v5797_v24, %v5800_v12  ;;  %v5806_v3 = vadd.f32 %v8334_v16, %v3907_v29 }
 0x79a   : > { %v4775_v2 = vadd.f32 %v8619_v48, %v4738_v42  ;;  %v4739_v37 = vmax.f32 %v5803_v38, %v5806_v3 }
 0x79c   : > { %v4835_v46 = vmul.f32 0.01, %v4775_v2  ;;  %v4776_v33 = vadd.f32 %v8619_v48, %v4739_v37  ;;  %v3911_v19 = vpop.f32.mrb[4].mxu1  ;;  %vm4805_vm6 = vcmp.ge.f32.partialorder %v4775_v2, 0.0 }
 0x79d   : > { %v5809_v62 = vadd.f32 %v8341_v43, %v3911_v19  ;;  %v3913_v57 = vpop.f32.mrb[5].mxu1 }
 0x79e   : > { %vm4806_vm7 = vcmp.ge.f32.partialorder %v4776_v33, 0.0  ;;  %v4836_v25 = vmul.f32 0.01, %v4776_v33  ;;  %v5812_v27 = vadd.f32 %v8343_v28, %v3913_v57  ;;  %v3915_v30 = vpop.f32.mrb[6].mxu1  ;;  %v4865_v49 = vsel %vm4805_vm6, %v4775_v2, %v4835_v46 }
 0x79f   : > { %v5815_v41 = vadd.f32 %v8346_v55, %v3915_v30  ;;  %v3917_v16 = vpop.f32.mrb[7].mxu1 }
 0x7a0   : > { %v4866_v52 = vsel %vm4806_vm7, %v4776_v33, %v4836_v25  ;;  %v4740_v1 = vmax.f32 %v5809_v62, %v5812_v27  ;;  %v5818_v43 = vadd.f32 %v8348_v56, %v3917_v16 }
 0x7a1   : > { %v5475_v4 = vpack.c.bf16 %v4866_v52, %v4865_v49 }
 0x7a2   : > { %v4777_v36 = vadd.f32 %v8619_v48, %v4740_v1  ;;  %v4741_v15 = vmax.f32 %v5815_v41, %v5818_v43 }
 0x7a3   : > { %5476 = vst [vmem:[%s8632_s25] sm:$0xff] %v5475_v4  }
 0x7a4   : > { %v4837_v28 = vmul.f32 0.01, %v4777_v36  ;;  %v4778_v55 = vadd.f32 %v8619_v48, %v4741_v15  ;;  %v3921_v17 = vpop.f32.mrb[8].mxu1  ;;  %vm4807_vm8 = vcmp.ge.f32.partialorder %v4777_v36, 0.0 }
 0x7a5   : > { %v5821_v59 = vadd.f32 %v8351_v26, %v3921_v17  ;;  %v3923_v61 = vpop.f32.mrb[9].mxu1 }
 0x7a6   : > { %vm4808_vm9 = vcmp.ge.f32.partialorder %v4778_v55, 0.0  ;;  %v4838_v20 = vmul.f32 0.01, %v4778_v55  ;;  %v5824_v47 = vadd.f32 %v8355_v18, %v3923_v61  ;;  %v3925_v53 = vpop.f32.mrb[10].mxu1  ;;  %v4867_v24 = vsel %vm4807_vm8, %v4777_v36, %v4837_v28 }
 0x7a7   : > { %v5827_v56 = vadd.f32 %v8357_v10, %v3925_v53  ;;  %v3927_v5 = vpop.f32.mrb[11].mxu1 }
 0x7a8   : > { %v4868_v44 = vsel %vm4808_vm9, %v4778_v55, %v4838_v20  ;;  %v4742_v12 = vmax.f32 %v5821_v59, %v5824_v47  ;;  %v5830_v63 = vadd.f32 %v8359_v32, %v3927_v5 }
 0x7a9   : > { %v5480_v38 = vpack.c.bf16 %v4868_v44, %v4867_v24 }
 0x7aa   : > { %v4779_v29 = vadd.f32 %v8619_v48, %v4742_v12  ;;  %v4743_v42 = vmax.f32 %v5827_v56, %v5830_v63 }
 0x7ab   : > { %5542 = vst [vmem:[%s8632_s25 + $0x8] sm:$0xff] %v5480_v38  }
 0x7ac   : > { %v4839_v26 = vmul.f32 0.01, %v4779_v29  ;;  %v4780_v3 = vadd.f32 %v8619_v48, %v4743_v42  ;;  %v3931_v2 = vpop.f32.mrb[12].mxu1  ;;  %vm4809_vm10 = vcmp.ge.f32.partialorder %v4779_v29, 0.0 }
 0x7ad   : > { %v5833_v18 = vadd.f32 %v8365_v14, %v3931_v2  ;;  %v3933_v10 = vpop.f32.mrb[13].mxu1 }
 0x7ae   : > { %vm4810_vm11 = vcmp.ge.f32.partialorder %v4780_v3, 0.0  ;;  %v4840_v37 = vmul.f32 0.01, %v4780_v3  ;;  %v5836_v46 = vadd.f32 %v8370_v21, %v3933_v10  ;;  %v3935_v33 = vpop.f32.mrb[14].mxu1  ;;  %v4869_v62 = vsel %vm4809_vm10, %v4779_v29, %v4839_v26 }
 0x7af   : > { %v5839_v32 = vadd.f32 %v8373_v34, %v3935_v33  ;;  %v3937_v19 = vpop.f32.mrb[15].mxu1 }
 0x7b0   : > { %v4870_v57 = vsel %vm4810_vm11, %v4780_v3, %v4840_v37  ;;  %v4744_v25 = vmax.f32 %v5833_v18, %v5836_v46  ;;  %v5842_v27 = vadd.f32 %v8375_v7, %v3937_v19 }
 0x7b1   : > { %v5485_v30 = vpack.c.bf16 %v4870_v57, %v4869_v62 }
 0x7b2   : > { %v4781_v41 = vadd.f32 %v8619_v48, %v4744_v25  ;;  %v4745_v16 = vmax.f32 %v5839_v32, %v5842_v27 }
 0x7b3   : > { %5543 = vst [vmem:[%s8632_s25 + $0x10] sm:$0xff] %v5485_v30  }
 0x7b4   : > { %v4841_v14 = vmul.f32 0.01, %v4781_v41  ;;  %v4782_v49 = vadd.f32 %v8619_v48, %v4745_v16  ;;  %v3941_v52 = vpop.f32.mrb[16].mxu1  ;;  %vm4811_vm12 = vcmp.ge.f32.partialorder %v4781_v41, 0.0 }
 0x7b5   : > { %v5845_v21 = vadd.f32 %v8387_v54, %v3941_v52  ;;  %v3943_v34 = vpop.f32.mrb[17].mxu1 }
 0x7b6   : > { %vm4812_vm13 = vcmp.ge.f32.partialorder %v4782_v49, 0.0  ;;  %v4842_v1 = vmul.f32 0.01, %v4782_v49  ;;  %v5848_v43 = vadd.f32 %v8392_v6, %v3943_v34  ;;  %v3945_v4 = vpop.f32.mrb[18].mxu1  ;;  %v4871_v15 = vsel %vm4811_vm12, %v4781_v41, %v4841_v14 }
 0x7b7   : > { %v5851_v7 = vadd.f32 %v8395_v40, %v3945_v4  ;;  %v3947_v36 = vpop.f32.mrb[19].mxu1 }
 0x7b8   : > { %v4872_v28 = vsel %vm4812_vm13, %v4782_v49, %v4842_v1  ;;  %v4746_v55 = vmax.f32 %v5845_v21, %v5848_v43  ;;  %v5854_v17 = vadd.f32 %v8397_v39, %v3947_v36  ;;  %v8802_v36 = vld [vmem:[#allocation5_spill] sm:$0xff] }
 0x7b9   : > { %v5490_v59 = vpack.c.bf16 %v4872_v28, %v4871_v15 }
 0x7ba   : > { %v4783_v61 = vadd.f32 %v8619_v48, %v4746_v55  ;;  %v4747_v20 = vmax.f32 %v5851_v7, %v5854_v17 }
 0x7bb   : > { %5544 = vst [vmem:[%s8632_s25 + $0x18] sm:$0xff] %v5490_v59  }
 0x7bc   : > { %v4843_v54 = vmul.f32 0.01, %v4783_v61  ;;  %v4784_v47 = vadd.f32 %v8619_v48, %v4747_v20  ;;  %v3951_v53 = vpop.f32.mrb[20].mxu1  ;;  %vm4813_vm14 = vcmp.ge.f32.partialorder %v4783_v61, 0.0 }
 0x7bd   : > { %v5857_v6 = vadd.f32 %v8409_v0, %v3951_v53  ;;  %v3953_v40 = vpop.f32.mrb[21].mxu1  ;;  %v8803_v53 = vld [vmem:[#allocation6_spill] sm:$0xff] }
 0x7be   : > { %vm4814_vm15 = vcmp.ge.f32.partialorder %v4784_v47, 0.0  ;;  %v4844_v56 = vmul.f32 0.01, %v4784_v47  ;;  %v5860_v5 = vadd.f32 %v8414_v11, %v3953_v40  ;;  %v3955_v24 = vpop.f32.mrb[22].mxu1  ;;  %v4873_v12 = vsel %vm4813_vm14, %v4783_v61, %v4843_v54 }
 0x7bf   : > { %v5863_v39 = vadd.f32 %v8417_v23, %v3955_v24  ;;  %v3957_v44 = vpop.f32.mrb[23].mxu1 }
 0x7c0   : > { %v4874_v63 = vsel %vm4814_vm15, %v4784_v47, %v4844_v56  ;;  %v4748_v38 = vmax.f32 %v5857_v6, %v5860_v5  ;;  %v5866_v29 = vadd.f32 %v8419_v58, %v3957_v44  ;;  %v8804_v56 = vld [vmem:[#allocation7_spill] sm:$0xff] }
 0x7c1   : > { %v5495_v42 = vpack.c.bf16 %v4874_v63, %v4873_v12  ;;  %v8805_v63 = vld [vmem:[#allocation8_spill] sm:$0xff] }
 0x7c2   : > { %v4785_v26 = vadd.f32 %v8619_v48, %v4748_v38  ;;  %v4749_v3 = vmax.f32 %v5863_v39, %v5866_v29 }
 0x7c3   : > { %5545 = vst [vmem:[%s8632_s25 + $0x20] sm:$0xff] %v5495_v42  }
 0x7c4   : > { %v4845_v0 = vmul.f32 0.01, %v4785_v26  ;;  %v4786_v2 = vadd.f32 %v8619_v48, %v4749_v3  ;;  %v3961_v18 = vpop.f32.mrb[24].mxu1  ;;  %vm4815_vm0 = vcmp.ge.f32.partialorder %v4785_v26, 0.0 }
 0x7c5   : > { %v5869_v11 = vadd.f32 %v8431_v50, %v3961_v18  ;;  %v3963_v23 = vpop.f32.mrb[25].mxu1 }
 0x7c6   : > { %vm4816_vm1 = vcmp.ge.f32.partialorder %v4786_v2, 0.0  ;;  %v4846_v10 = vmul.f32 0.01, %v4786_v2  ;;  %v5872_v37 = vadd.f32 %v8436_v60, %v3963_v23  ;;  %v3965_v46 = vpop.f32.mrb[26].mxu1  ;;  %v4875_v32 = vsel %vm4815_vm0, %v4785_v26, %v4845_v0  ;;  %v8800_v60 = vld [vmem:[#allocation3_spill] sm:$0xff]  ;;  %v8806_v23 = vld [vmem:[#allocation9_spill] sm:$0xff] }
 0x7c7   : > { %v5875_v58 = vadd.f32 %v8439_v8, %v3965_v46  ;;  %v3967_v33 = vpop.f32.mrb[27].mxu1  ;;  %v8807_v46 = vld [vmem:[#allocation10_spill] sm:$0xff] }
 0x7c8   : > { %v4876_v19 = vsel %vm4816_vm1, %v4786_v2, %v4846_v10  ;;  %v4750_v62 = vmax.f32 %v5869_v11, %v5872_v37  ;;  %v5878_v57 = vadd.f32 %v8441_v45, %v3967_v33  ;;  %v8801_v45 = vld [vmem:[#allocation4_spill] sm:$0xff] }
 0x7c9   : > { %v5500_v25 = vpack.c.bf16 %v4876_v19, %v4875_v32 }
 0x7ca   : > { %v4787_v27 = vadd.f32 %v8619_v48, %v4750_v62  ;;  %v4751_v30 = vmax.f32 %v5875_v58, %v5878_v57  ;;  %v8808_v57 = vld [vmem:[#allocation11_spill] sm:$0xff] }
 0x7cb   : > { %5546 = vst [vmem:[%s8632_s25 + $0x28] sm:$0xff] %v5500_v25  }
 0x7cc   : > { %v4847_v50 = vmul.f32 0.01, %v4787_v27  ;;  %v4788_v41 = vadd.f32 %v8619_v48, %v4751_v30  ;;  %v3971_v16 = vpop.f32.mrb[28].mxu1  ;;  %vm4817_vm2 = vcmp.ge.f32.partialorder %v4787_v27, 0.0 }
 0x7cd   : > { %v5881_v14 = vadd.f32 %v8800_v60, %v3971_v16  ;;  %v3973_v8 = vpop.f32.mrb[29].mxu1 }
 0x7ce   : > { %vm4818_vm3 = vcmp.ge.f32.partialorder %v4788_v41, 0.0  ;;  %v4848_v49 = vmul.f32 0.01, %v4788_v41  ;;  %v5884_v52 = vadd.f32 %v8452_v51, %v3973_v8  ;;  %v3975_v21 = vpop.f32.mrb[30].mxu1  ;;  %v4877_v43 = vsel %vm4817_vm2, %v4787_v27, %v4847_v50 }
 0x7cf   : > { %v5887_v34 = vadd.f32 %v8801_v45, %v3975_v21  ;;  %v3977_v1 = vpop.f32.mrb[31].mxu1  ;;  %v8810_v45 = vld [vmem:[#allocation13_spill] sm:$0xff] }
 0x7d0   : > { %v4878_v4 = vsel %vm4818_vm3, %v4788_v41, %v4848_v49  ;;  %v4752_v7 = vmax.f32 %v5881_v14, %v5884_v52  ;;  %v5890_v15 = vadd.f32 %v8802_v36, %v3977_v1  ;;  %v8809_v49 = vld [vmem:[#allocation12_spill] sm:$0xff]  ;;  %v8811_v36 = vld [vmem:[#allocation14_spill] sm:$0xff] }
 0x7d1   : > { %v5505_v28 = vpack.c.bf16 %v4878_v4, %v4877_v43 }
 0x7d2   : > { %v4789_v55 = vadd.f32 %v8619_v48, %v4752_v7  ;;  %v4753_v17 = vmax.f32 %v5887_v34, %v5890_v15 }
 0x7d3   : > { %5547 = vst [vmem:[%s8632_s25 + $0x30] sm:$0xff] %v5505_v28  }
 0x7d4   : > { %v4849_v59 = vmul.f32 0.01, %v4789_v55  ;;  %v4790_v61 = vadd.f32 %v8619_v48, %v4753_v17  ;;  %v3981_v20 = vpop.f32.mrb[32].mxu1  ;;  %vm4819_vm4 = vcmp.ge.f32.partialorder %v4789_v55, 0.0 }
 0x7d5   : > { %v5893_v51 = vadd.f32 %v8460_v22, %v3981_v20  ;;  %v3983_v54 = vpop.f32.mrb[33].mxu1 }
 0x7d6   : > { %vm4820_vm5 = vcmp.ge.f32.partialorder %v4790_v61, 0.0  ;;  %v4850_v47 = vmul.f32 0.01, %v4790_v61  ;;  %v5896_v6 = vadd.f32 %v8803_v53, %v3983_v54  ;;  %v3985_v40 = vpop.f32.mrb[34].mxu1  ;;  %v4879_v39 = vsel %vm4819_vm4, %v4789_v55, %v4849_v59 }
 0x7d7   : > { %v5899_v5 = vadd.f32 %v8804_v56, %v3985_v40  ;;  %v3987_v24 = vpop.f32.mrb[35].mxu1  ;;  %v8813_v40 = vld [vmem:[#allocation16_spill] sm:$0xff] }
 0x7d8   : > { %v4880_v44 = vsel %vm4820_vm5, %v4790_v61, %v4850_v47  ;;  %v4754_v12 = vmax.f32 %v5893_v51, %v5896_v6  ;;  %v5902_v38 = vadd.f32 %v8805_v63, %v3987_v24  ;;  %v8812_v47 = vld [vmem:[#allocation15_spill] sm:$0xff] }
 0x7d9   : > { %v5510_v29 = vpack.c.bf16 %v4880_v44, %v4879_v39 }
 0x7da   : > { %v4791_v42 = vadd.f32 %v8619_v48, %v4754_v12  ;;  %v4755_v26 = vmax.f32 %v5899_v5, %v5902_v38  ;;  %v8814_v12 = vld [vmem:[#allocation17_spill] sm:$0xff] }
 0x7db   : > { %5548 = vst [vmem:[%s8632_s25 + $0x38] sm:$0xff] %v5510_v29  }
 0x7dc   : > { %v4851_v22 = vmul.f32 0.01, %v4791_v42  ;;  %v4792_v3 = vadd.f32 %v8619_v48, %v4755_v26  ;;  %v3991_v0 = vpop.f32.mrb[36].mxu1  ;;  %vm4821_vm6 = vcmp.ge.f32.partialorder %v4791_v42, 0.0 }
 0x7dd   : > { %v5905_v2 = vadd.f32 %v8470_v31, %v3991_v0  ;;  %v3993_v18 = vpop.f32.mrb[37].mxu1 }
 0x7de   : > { %vm4822_vm7 = vcmp.ge.f32.partialorder %v4792_v3, 0.0  ;;  %v4852_v11 = vmul.f32 0.01, %v4792_v3  ;;  %v5908_v10 = vadd.f32 %v8806_v23, %v3993_v18  ;;  %v3995_v37 = vpop.f32.mrb[38].mxu1  ;;  %v4881_v32 = vsel %vm4821_vm6, %v4791_v42, %v4851_v22 }
 0x7df   : > { %v5911_v58 = vadd.f32 %v8807_v46, %v3995_v37  ;;  %v3997_v33 = vpop.f32.mrb[39].mxu1  ;;  %v8817_v37 = vld [vmem:[#allocation20_spill] sm:$0xff] }
 0x7e0   : > { %v4882_v19 = vsel %vm4822_vm7, %v4792_v3, %v4852_v11  ;;  %v4756_v62 = vmax.f32 %v5905_v2, %v5908_v10  ;;  %v5914_v25 = vadd.f32 %v8808_v57, %v3997_v33  ;;  %v8815_v3 = vld [vmem:[#allocation18_spill] sm:$0xff]  ;;  %v8816_v11 = vld [vmem:[#allocation19_spill] sm:$0xff] }
 0x7e1   : > { %v5515_v27 = vpack.c.bf16 %v4882_v19, %v4881_v32 }
 0x7e2   : > { %v4793_v30 = vadd.f32 %v8619_v48, %v4756_v62  ;;  %v4757_v50 = vmax.f32 %v5911_v58, %v5914_v25  ;;  %v8818_v62 = vld [vmem:[#allocation21_spill] sm:$0xff] }
 0x7e3   : > { %5549 = vst [vmem:[%s8632_s25 + $0x40] sm:$0xff] %v5515_v27  }
 0x7e4   : > { %v4853_v31 = vmul.f32 0.01, %v4793_v30  ;;  %v4794_v41 = vadd.f32 %v8619_v48, %v4757_v50  ;;  %v4001_v16 = vpop.f32.mrb[40].mxu1  ;;  %vm4823_vm8 = vcmp.ge.f32.partialorder %v4793_v30, 0.0 }
 0x7e5   : > { %v5917_v60 = vadd.f32 %v8480_v9, %v4001_v16  ;;  %v4003_v14 = vpop.f32.mrb[41].mxu1 }
 0x7e6   : > { %vm4824_vm9 = vcmp.ge.f32.partialorder %v4794_v41, 0.0  ;;  %v4854_v8 = vmul.f32 0.01, %v4794_v41  ;;  %v5920_v52 = vadd.f32 %v8809_v49, %v4003_v14  ;;  %v4005_v21 = vpop.f32.mrb[42].mxu1  ;;  %v4883_v43 = vsel %vm4823_vm8, %v4793_v30, %v4853_v31 }
 0x7e7   : > { %v5923_v34 = vadd.f32 %v8810_v45, %v4005_v21  ;;  %v4007_v1 = vpop.f32.mrb[43].mxu1  ;;  %v8820_v21 = vld [vmem:[#allocation23_spill] sm:$0xff] }
 0x7e8   : > { %v4884_v4 = vsel %vm4824_vm9, %v4794_v41, %v4854_v8  ;;  %v4758_v7 = vmax.f32 %v5917_v60, %v5920_v52  ;;  %v5926_v15 = vadd.f32 %v8811_v36, %v4007_v1  ;;  %v8819_v8 = vld [vmem:[#allocation22_spill] sm:$0xff] }
 0x7e9   : > { %v5520_v28 = vpack.c.bf16 %v4884_v4, %v4883_v43 }
 0x7ea   : > { %v4795_v55 = vadd.f32 %v8619_v48, %v4758_v7  ;;  %v4759_v17 = vmax.f32 %v5923_v34, %v5926_v15  ;;  %v8821_v7 = vld [vmem:[#allocation24_spill] sm:$0xff] }
 0x7eb   : > { %5550 = vst [vmem:[%s8632_s25 + $0x48] sm:$0xff] %v5520_v28  }
 0x7ec   : > { %v4855_v9 = vmul.f32 0.01, %v4795_v55  ;;  %v4796_v59 = vadd.f32 %v8619_v48, %v4759_v17  ;;  %v4011_v61 = vpop.f32.mrb[44].mxu1  ;;  %vm4825_vm10 = vcmp.ge.f32.partialorder %v4795_v55, 0.0 }
 0x7ed   : > { %v5929_v20 = vadd.f32 %v8490_v35, %v4011_v61  ;;  %v4013_v51 = vpop.f32.mrb[45].mxu1 }
 0x7ee   : > { %vm4826_vm11 = vcmp.ge.f32.partialorder %v4796_v59, 0.0  ;;  %v4856_v54 = vmul.f32 0.01, %v4796_v59  ;;  %v5932_v53 = vadd.f32 %v8812_v47, %v4013_v51  ;;  %v4015_v6 = vpop.f32.mrb[46].mxu1  ;;  %v4885_v24 = vsel %vm4825_vm10, %v4795_v55, %v4855_v9  ;;  %v3689_v47 = vld [vmem:[#allocation2 + $0x1d8] sm:$0x3f] }
 0x7ef   : > { %v5935_v56 = vadd.f32 %v8813_v40, %v4015_v6  ;;  %v4017_v5 = vpop.f32.mrb[47].mxu1 }
 0x7f0   : > { %v4886_v39 = vsel %vm4826_vm11, %v4796_v59, %v4856_v54  ;;  %v4760_v44 = vmax.f32 %v5929_v20, %v5932_v53  ;;  %v5938_v63 = vadd.f32 %v8814_v12, %v4017_v5  ;;  %v3688_v20 = vld [vmem:[#allocation2 + $0x1d0] sm:$0x3f] }
 0x7f1   : > { %v5525_v38 = vpack.c.bf16 %v4886_v39, %v4885_v24  ;;  %v3686_v24 = vld [vmem:[#allocation2 + $0x1c0] sm:$0xff] }
 0x7f2   : > { %v4797_v29 = vadd.f32 %v8619_v48, %v4760_v44  ;;  %v4761_v42 = vmax.f32 %v5935_v56, %v5938_v63  ;;  %v3687_v44 = vld [vmem:[#allocation2 + $0x1c8] sm:$0xff] }
 0x7f3   : > { %5551 = vst [vmem:[%s8632_s25 + $0x50] sm:$0xff] %v5525_v38  }
 0x7f4   : > { %v4857_v35 = vmul.f32 0.01, %v4797_v29  ;;  %v4798_v26 = vadd.f32 %v8619_v48, %v4761_v42  ;;  %v4021_v22 = vpop.f32.mrb[48].mxu1  ;;  %vm4827_vm12 = vcmp.ge.f32.partialorder %v4797_v29, 0.0 }
 0x7f5   : > { %v5941_v0 = vadd.f32 %v8815_v3, %v4021_v22  ;;  %v4023_v2 = vpop.f32.mrb[49].mxu1 }
 0x7f6   : > { %vm4828_vm13 = vcmp.ge.f32.partialorder %v4798_v26, 0.0  ;;  %v4858_v18 = vmul.f32 0.01, %v4798_v26  ;;  %v5944_v23 = vadd.f32 %v8816_v11, %v4023_v2  ;;  %v4025_v10 = vpop.f32.mrb[50].mxu1  ;;  %v4887_v33 = vsel %vm4827_vm12, %v4797_v29, %v4857_v35 }
 0x7f7   : > { %v5947_v46 = vadd.f32 %v8817_v37, %v4025_v10  ;;  %v4027_v58 = vpop.f32.mrb[51].mxu1 }
 0x7f8   : > { %v4888_v32 = vsel %vm4828_vm13, %v4798_v26, %v4858_v18  ;;  %v4762_v19 = vmax.f32 %v5941_v0, %v5944_v23  ;;  %v5950_v57 = vadd.f32 %v8818_v62, %v4027_v58 }
 0x7f9   : > { %v5530_v25 = vpack.c.bf16 %v4888_v32, %v4887_v33 }
 0x7fa   : > { %v4799_v27 = vadd.f32 %v8619_v48, %v4762_v19  ;;  %v4763_v30 = vmax.f32 %v5947_v46, %v5950_v57 }
 0x7fb   : > { %5552 = vst [vmem:[%s8632_s25 + $0x58] sm:$0xff] %v5530_v25  }
 0x7fc   : > { %v4859_v50 = vmul.f32 0.01, %v4799_v27  ;;  %v4800_v31 = vadd.f32 %v8619_v48, %v4763_v30  ;;  %v4031_v41 = vpop.f32.mrb[52].mxu1  ;;  %vm4829_vm14 = vcmp.ge.f32.partialorder %v4799_v27, 0.0 }
 0x7fd   : > { %v5953_v16 = vadd.f32 %v8510_v13, %v4031_v41  ;;  %v4033_v60 = vpop.f32.mrb[53].mxu1 }
 0x7fe   : > { %vm4830_vm15 = vcmp.ge.f32.partialorder %v4800_v31, 0.0  ;;  %v4860_v14 = vmul.f32 0.01, %v4800_v31  ;;  %v5956_v49 = vadd.f32 %v8819_v8, %v4033_v60  ;;  %v4035_v52 = vpop.f32.mrb[54].mxu1  ;;  %v4889_v1 = vsel %vm4829_vm14, %v4799_v27, %v4859_v50 }
 0x7ff   : > { %v5959_v45 = vadd.f32 %v8820_v21, %v4035_v52  ;;  %v4037_v34 = vpop.f32.mrb[55].mxu1 }
 0x800   : > { %v4890_v43 = vsel %vm4830_vm15, %v4800_v31, %v4860_v14  ;;  %v4764_v4 = vmax.f32 %v5953_v16, %v5956_v49  ;;  %v5962_v36 = vadd.f32 %v8821_v7, %v4037_v34 }
 0x801   : > { %v5535_v15 = vpack.c.bf16 %v4890_v43, %v4889_v1 }
 0x802   : > { %v4801_v28 = vadd.f32 %v8619_v48, %v4764_v4  ;;  %v4765_v55 = vmax.f32 %v5959_v45, %v5962_v36 }
 0x803   : > { %5553 = vst [vmem:[%s8632_s25 + $0x60] sm:$0xff] %v5535_v15  }
 0x804   : > { %v4861_v13 = vmul.f32 0.01, %v4801_v28  ;;  %v4802_v17 = vadd.f32 %v8619_v48, %v4765_v55  ;;  %v4041_v9 = vpop.f32.mrb[68].mxu1  ;;  %vm4831_vm0 = vcmp.ge.f32.partialorder %v4801_v28, 0.0 }
 0x805   : > { %v4043_v59 = vpop.f32.mrb[69].mxu1  ;;  %v4106_v39 = vadd.f32 %v4041_v9, %v3686_v24 }
 0x806   : > { %vm4832_vm1 = vcmp.ge.f32.partialorder %v4802_v17, 0.0  ;;  %v4862_v61 = vmul.f32 0.01, %v4802_v17  ;;  %v4045_v51 = vpop.f32.mrb[70].mxu1  ;;  %v4891_v6 = vsel %vm4831_vm0, %v4801_v28, %v4861_v13  ;;  %v4107_v12 = vadd.f32 %v4043_v59, %v3687_v44 }
 0x807   : > { %v4108_v54 = vadd.f32 %v4045_v51, %v3688_v20  ;;  %v4047_v53 = vpop.f32.mrb[71].mxu1 }
 0x808   : > { %v4892_v40 = vsel %vm4832_vm1, %v4802_v17, %v4862_v61  ;;  %v4109_v56 = vadd.f32 %v4047_v53, %v3689_v47 }
 0x809   : > { %v5540_v5 = vpack.c.bf16 %v4892_v40, %v4891_v6  ;;  %4168 = vst [vmem:[#allocation2 + $0x1d0] sm:$0x3f] %v4108_v54 }
 0x80a   : > { %4169 = vst [vmem:[#allocation2 + $0x1d8] sm:$0x3f] %v4109_v56 }
 0x80b   : > { %5554 = vst [vmem:[%s8632_s25 + $0x68] sm:$0xff] %v5540_v5  }
 0x80c   : > { %v4549_v63 = vpop.f32.mrb[72].mxu1 }
 0x80d   : > { %v4614_v38 = vadd.f32 %v4549_v63, %v4106_v39  ;;  %v4551_v29 = vpop.f32.mrb[73].mxu1 }
 0x80e   : > { %v4615_v42 = vadd.f32 %v4551_v29, %v4107_v12  ;;  %v4553_v35 = vpop.f32.mrb[74].mxu1 }
 0x80f   : > { %4674 = vst [vmem:[#allocation2 + $0x1c0] sm:$0xff] %v4614_v38  ;;  %v4555_v26 = vpop.f32.mrb[75].mxu1 }
 0x810   : > { %4675 = vst [vmem:[#allocation2 + $0x1c8] sm:$0xff] %v4615_v42  ;;  %v4766_v22 = vmax.f32 %v4614_v38, %v4615_v42  ;;  %v4228_v3 = vld [vmem:[#allocation2 + $0x1d0] sm:$0x3f] }
 0x811   : > { %v4616_v0 = vadd.f32 %v4553_v35, %v4228_v3  ;;  %v4229_v2 = vld [vmem:[#allocation2 + $0x1d8] sm:$0x3f] }
 0x812   : > { %v4803_v18 = vadd.f32 %v8619_v48, %v4766_v22  ;;  %v4617_v11 = vadd.f32 %v4555_v26, %v4229_v2 }
 0x813   : > { %4676 = vst [vmem:[#allocation2 + $0x1d0] sm:$0x3f] %v4616_v0 }
 0x814   : > { %vm4833_vm2 = vcmp.ge.f32.partialorder %v4803_v18, 0.0  ;;  %v4863_v23 = vmul.f32 0.01, %v4803_v18  ;;  %4677 = vst [vmem:[#allocation2 + $0x1d8] sm:$0x3f] %v4617_v11 }
 0x816   : > { %v4893_v10 = vsel %vm4833_vm2, %v4803_v18, %v4863_v23 }
 0x817   : > { %v5470_v37 = vpack.c.bf16 %v4893_v10, %v4893_v10 }
 0x819   : > { %5043 = vst [vmem:[%s8632_s25 + $0x70] sm:$0xf] %v5470_v37 }
 0x81a   : > { %v4736_v46 = vld [vmem:[#allocation2 + $0x1d0] sm:$0x3f] }
 0x81b   : > { %v4737_v58 = vld [vmem:[#allocation2 + $0x1d8] sm:$0x3f] }
 0x81c   : > { %v4767_v33 = vmax.f32 %v4736_v46, %v4737_v58 }
 0x81e   : > { %v4804_v32 = vadd.f32 %v8619_v48, %v4767_v33 }
 0x820   : > { %vm4834_vm3 = vcmp.ge.f32.partialorder %v4804_v32, 0.0  ;;  %v4864_v19 = vmul.f32 0.01, %v4804_v32 }
 0x822   : > { %v4894_v62 = vsel %vm4834_vm3, %v4804_v32, %v4864_v19 }
 0x823   : > { %v5471_v57 = vpack.c.bf16 %v4894_v62, %v4894_v62 }
 0x825   : > { %5044 = vst [vmem:[%s8632_s25 + $0x74] sm:$0x7] %v5471_v57 }
 0x826 PF: > { %s17_s24 = sadd.s32 1, %s6483_s24  }
 0x827   : > { %p14_p4 = scmp.ge.s32.totalorder %s17_s24, 4  }
 0x829   :  { %16 = sbr.rel (!%p14_p4) target bundleno = 1 (0x1), region = 82 }

// kernel: cnn2d_forward.3
= control target key start
LH: loop header
LB: loop body
LE: loop exit
PB: predicated region body
PF: predicated region fallthrough
CT: control target
= control target key end

     0   :  { %s14812_s15 = smov 0   ;;  %s14814_s16 = smov 0   ;;  %s16118_s0 = inlined_call_operand.vmem [shape: bf16[2,30464], index: 0, kind: input, shape index: {}]   ;;  %s16119_s1 = inlined_call_operand.vmem [shape: bf16[1,30464,128], index: 1, kind: input, shape index: {}]   ;;  %s16120_s2 = inlined_call_operand.vmem [shape: f32[1,1,128], index: 2, kind: input, shape index: {}]   ;;  %s16121_s3 = inlined_call_operand.vmem [shape: f32[1,128,10], index: 3, kind: input, shape index: {}]   ;;  %s16122_s4 = inlined_call_operand.vmem [shape: f32[1,2,10], index: 4, kind: output, shape index: {}]  }
   0x1   :  { %s14816_s17 = smov 0  }
   0x2 LB: > { %s23_s18 = sadd.s32 1, %s14774_s16  ;;  %p11395_p0 = scmp.ge.s32.totalorder %s14778_s17, 1  ;;  %s14778_s17 = sphi %s14816_s17, %s14_s17   ;;  %s14774_s16 = sphi %s14814_s16, %s16124_s16   ;;  %s14770_s15 = sphi %s14812_s15, %s16123_s15  }
   0x3   : > { %p24_p1 = scmp.ge.s32.totalorder %s23_s18, 2  ;;  %p209_p2 = scmp.lt.s32.totalorder %s14778_s17, 3 }
   0x5   : > { %s16126_s18 = smov (%p24_p1, %s23_s18), 0  ;;  %p210_p3 = pnand %p11395_p0, %p209_p2 }
   0x6   : > { %s250_s19 = smul.u32 (!%p210_p3), 119, %s14770_s15  ;;  %p11397_p6 = scmp.ne.s32.totalorder (!%p210_p3), %s14770_s15, 0 }
   0x7   : > { %213 = sbr.rel (%p210_p3) target bundleno = 1432 (0x598), region = 36 }
   0x8   : > { %s255_s20 = smul.u32 (!%p210_p3), 1904, %s14770_s15  ;;  %p251_p4 = scmp.lt.s32.totalorder (!%p210_p3), %s250_s19, 237 }
   0xa   : > { %p258_p5 = scmp.lt.s32.totalorder (!%p210_p3), %s255_s20, 3807 }
   0xe   : > { %s16128_s19 = smov (!%p251_p4, %s250_s19), 237  ;;  %s16130_s20 = smov (!%p258_p5, %s255_s20), 3807 }
   0xf   : > { %s14837_s23 = scalar_lea.vmem %s16118_s0, %s16128_s19  ;;  %s11396_s24 = sshll.u32 %s16130_s20, 2  ;;  %v14780_v0 = vmov (!%p11397_p6), 0.0  }
  0x10   : > { %s14842_s27 = scalar_lea.vmem %s16119_s1, %s11396_s24  ;;  %281 = sbr.rel (%p11397_p6) target bundleno = 23 (0x17), region = 40  ;;  %282 = vst [vmem:[#allocation2] sm:$0x3] (!%p11397_p6), %v14780_v0 }
  0x17 PF: > { %v13789_v1 = vld [vmem:[%s14842_s27 + $0x40] sm:$0xff]   ;;  %v13793_v5 = vld [vmem:[%s14842_s27 + $0x48] sm:$0xff]   ;;  %v13797_v9 = vld [vmem:[%s14842_s27 + $0x50] sm:$0xff]   ;;  %v2222_v30 = vlaneseq  ;;  %v14781_v36 = vmov 1966171168   ;;  %vm14783_vm0 = vmmov 0  }
  0x18   : > { %v13790_v2 = vld [vmem:[%s14842_s27 + $0xc0] sm:$0xff]   ;;  %12355 = vmatprep.subr.bf16.mxu0 %v13789_v1  ;;  %v13794_v6 = vld [vmem:[%s14842_s27 + $0xc8] sm:$0xff]   ;;  %v13798_v10 = vld [vmem:[%s14842_s27 + $0xd0] sm:$0xff]   ;;  %v2220_v37 = vunpack.c.l.s4 %v14781_v36  ;;  %p12350_p7 = scmp.ne.s32.totalorder %s14770_s15, 1 }
  0x19   : > { %v13791_v3 = vld [vmem:[%s14842_s27] sm:$0xff]   ;;  %12377 = vmatprep.subr.bf16.mxu1 %v13790_v2  ;;  %v13795_v7 = vld [vmem:[%s14842_s27 + $0x8] sm:$0xff]   ;;  %v13799_v11 = vld [vmem:[%s14842_s27 + $0x10] sm:$0xff]   ;;  %v2223_v34 = vshrl.u32 %v2222_v30, 7  ;;  %vm14785_vm1 = vmmov (!%p12350_p7), 0   ;;  %vm11287_vm3 = vcmask (!%p12350_p7), 74752  }
  0x1a   : > { %v13792_v4 = vld [vmem:[%s14842_s27 + $0x80] sm:$0xff]   ;;  %12356 = vmatpush3.bf16.msra.mxu0 %v13791_v3  ;;  %v13796_v8 = vld [vmem:[%s14842_s27 + $0x88] sm:$0xff]   ;;  %v13800_v12 = vld [vmem:[%s14842_s27 + $0x90] sm:$0xff]   ;;  %v2221_v40 = vunpack.c.0.s8 %v2220_v37 }
  0x1b   : > { %12378 = vmatpush3.bf16.msra.mxu1 %v13792_v4  ;;  %12357 = vmatprep.subr.bf16.mxu0 %v13793_v5  ;;  %v13801_v13 = vld [vmem:[%s14842_s27 + $0x58] sm:$0xff]   ;;  %v13805_v17 = vld [vmem:[%s14842_s27 + $0x60] sm:$0xff]   ;;  %v13809_v21 = vld [vmem:[%s14842_s27 + $0x68] sm:$0xff]  }
  0x1c   : > { %12379 = vmatprep.subr.bf16.mxu1 %v13794_v6  ;;  %v13802_v14 = vld [vmem:[%s14842_s27 + $0xd8] sm:$0xff]   ;;  %v13806_v18 = vld [vmem:[%s14842_s27 + $0xe0] sm:$0xff]   ;;  %v13810_v22 = vld [vmem:[%s14842_s27 + $0xe8] sm:$0xff]   ;;  %v14880_v42 = vsub.s32 %v2221_v40, %v2223_v34 }
  0x1d   : > { %v13803_v15 = vld [vmem:[%s14842_s27 + $0x18] sm:$0xff]   ;;  %v13807_v19 = vld [vmem:[%s14842_s27 + $0x20] sm:$0xff]   ;;  %v13811_v23 = vld [vmem:[%s14842_s27 + $0x28] sm:$0xff]  }
  0x1e   : > { %12358 = vmatpush3.bf16.msra.mxu0 %v13795_v7  ;;  %v13804_v16 = vld [vmem:[%s14842_s27 + $0x98] sm:$0xff]   ;;  %v13808_v20 = vld [vmem:[%s14842_s27 + $0xa0] sm:$0xff]   ;;  %v13812_v24 = vld [vmem:[%s14842_s27 + $0xa8] sm:$0xff]  }
  0x1f   : > { %12380 = vmatpush3.bf16.msra.mxu1 %v13796_v8  ;;  %12359 = vmatprep.subr.bf16.mxu0 %v13797_v9  ;;  %v13813_v25 = vld [vmem:[%s14842_s27 + $0x70] sm:$0xff]   ;;  %v13817_v29 = vld [vmem:[%s14842_s27 + $0x78] sm:$0xff]   ;;  %v13822_v35 = vld [vmem:[%s14842_s27 + $0x140] sm:$0xff]  }
  0x20   : > { %12381 = vmatprep.subr.bf16.mxu1 %v13798_v10  ;;  %v13814_v26 = vld [vmem:[%s14842_s27 + $0xf0] sm:$0xff]   ;;  %v13818_v31 = vld [vmem:[%s14842_s27 + $0xf8] sm:$0xff]   ;;  %v284_v38 = vld [vmem:[%s14837_s23] sm:$0xff] }
  0x21   : > { %v13815_v27 = vld [vmem:[%s14842_s27 + $0x30] sm:$0xff]   ;;  %v13819_v32 = vld [vmem:[%s14842_s27 + $0x38] sm:$0xff]   ;;  %v2218_v39 = vcombine.high %v284_v38, %v284_v38  ;;  %v13824_v41 = vld [vmem:[%s14842_s27 + $0x1c0] sm:$0xff]   ;;  %v2225_v43 = vrot.slane %v284_v38, %v14880_v42 }
  0x22   : > { %12360 = vmatpush3.bf16.msra.mxu0 %v13799_v11  ;;  %v13816_v28 = vld [vmem:[%s14842_s27 + $0xb0] sm:$0xff]   ;;  %v13820_v33 = vld [vmem:[%s14842_s27 + $0xb8] sm:$0xff]   ;;  %v13823_v48 = vld [vmem:[%s14842_s27 + $0x100] sm:$0xff]  }
  0x23   : > { %12382 = vmatpush3.bf16.msra.mxu1 %v13800_v12  ;;  %12361 = vmatprep.subr.bf16.mxu0 %v13801_v13  ;;  %v14884_v44 = vrot.slane %v2218_v39, %v14880_v42  ;;  %v2233_v45 = vcombine.high %v2225_v43, %v2225_v43  ;;  %v2241_v46 = vrot.slane %v2225_v43, %v14880_v42  ;;  %v13825_v50 = vld [vmem:[%s14842_s27 + $0x180] sm:$0xff]   ;;  %v13826_v53 = vld [vmem:[%s14842_s27 + $0x148] sm:$0xff]   ;;  %v13830_v59 = vld [vmem:[%s14842_s27 + $0x150] sm:$0xff]  }
  0x24   : > { %12383 = vmatprep.subr.bf16.mxu1 %v13802_v14  ;;  %v13827_v55 = vld [vmem:[%s14842_s27 + $0x108] sm:$0xff]   ;;  %v13831_v60 = vld [vmem:[%s14842_s27 + $0x110] sm:$0xff]   ;;  %v13834_v63 = vld [vmem:[%s14842_s27 + $0x158] sm:$0xff]  }
  0x25   : > { %v2234_v47 = vcombine.high %v14884_v44, %v14884_v44  ;;  %v2255_v49 = vrot.slane %v2233_v45, %v14880_v42  ;;  %v2263_v52 = vcombine.high %v2241_v46, %v2241_v46  ;;  %v13828_v56 = vld [vmem:[%s14842_s27 + $0x1c8] sm:$0xff]   ;;  %v13832_v61 = vld [vmem:[%s14842_s27 + $0x1d0] sm:$0xff]   ;;  %v13835_v0 = vld [vmem:[%s14842_s27 + $0x118] sm:$0xff]  }
  0x26   : > { %12362 = vmatpush3.bf16.msra.mxu0 %v13803_v15  ;;  %v13829_v58 = vld [vmem:[%s14842_s27 + $0x188] sm:$0xff]   ;;  %v13833_v62 = vld [vmem:[%s14842_s27 + $0x190] sm:$0xff]   ;;  %v13836_v1 = vld [vmem:[%s14842_s27 + $0x1d8] sm:$0xff]  }
  0x27   : > { %12384 = vmatpush3.bf16.msra.mxu1 %v13804_v16  ;;  %12363 = vmatprep.subr.bf16.mxu0 %v13805_v17  ;;  %v2262_v51 = vrot.slane %v2234_v47, %v14880_v42  ;;  %v2265_v54 = vcombine.high %v2255_v49, %v2255_v49  ;;  %v13837_v2 = vld [vmem:[%s14842_s27 + $0x198] sm:$0xff]   ;;  %v13838_v3 = vld [vmem:[%s14842_s27 + $0x160] sm:$0xff]   ;;  %v13842_v7 = vld [vmem:[%s14842_s27 + $0x168] sm:$0xff]  }
  0x28   : > { %12385 = vmatprep.subr.bf16.mxu1 %v13806_v18  ;;  %8815 = vmatprep.mubr.bf16.mxu0 %v2255_v49  ;;  %v13839_v4 = vld [vmem:[%s14842_s27 + $0x120] sm:$0xff]   ;;  %v13843_v8 = vld [vmem:[%s14842_s27 + $0x128] sm:$0xff]   ;;  %v13846_v11 = vld [vmem:[%s14842_s27 + $0x170] sm:$0xff]  }
  0x29   : > { %v2266_v57 = vcombine.high %v2262_v51, %v2262_v51  ;;  %8855 = vmatprep.mubr.bf16.mxu1 %v2265_v54  ;;  %v13840_v5 = vld [vmem:[%s14842_s27 + $0x1e0] sm:$0xff]   ;;  %v13844_v9 = vld [vmem:[%s14842_s27 + $0x1e8] sm:$0xff]   ;;  %v13847_v12 = vld [vmem:[%s14842_s27 + $0x130] sm:$0xff]  }
  0x2a   : > { %12364 = vmatpush3.bf16.msra.mxu0 %v13807_v19  ;;  %v13841_v6 = vld [vmem:[%s14842_s27 + $0x1a0] sm:$0xff]   ;;  %v13845_v10 = vld [vmem:[%s14842_s27 + $0x1a8] sm:$0xff]   ;;  %v13848_v13 = vld [vmem:[%s14842_s27 + $0x1f0] sm:$0xff]   ;;  %v2248_v19 = vrot.slane %v14884_v44, %v14880_v42 }
  0x2b   : > { %12386 = vmatpush3.bf16.msra.mxu1 %v13808_v20  ;;  %12365 = vmatprep.subr.bf16.mxu0 %v13809_v21  ;;  %v13849_v14 = vld [vmem:[%s14842_s27 + $0x1b0] sm:$0xff]   ;;  %v13850_v15 = vld [vmem:[%s14842_s27 + $0x178] sm:$0xff]   ;;  %v13854_v20 = vld [vmem:[%s14842_s27 + $0x240] sm:$0xff]  }
  0x2c   : > { %12387 = vmatprep.subr.bf16.mxu1 %v13810_v22  ;;  %v13851_v16 = vld [vmem:[%s14842_s27 + $0x138] sm:$0xff]   ;;  %v13855_v21 = vld [vmem:[%s14842_s27 + $0x200] sm:$0xff]   ;;  %v13863_v30 = vld [vmem:[%s14842_s27 + $0x210] sm:$0xff]  }
  0x2d   : > { %v13852_v17 = vld [vmem:[%s14842_s27 + $0x1f8] sm:$0xff]   ;;  %v13856_v22 = vld [vmem:[%s14842_s27 + $0x2c0] sm:$0xff]   ;;  %v13875_v43 = vld [vmem:[%s14842_s27 + $0x228] sm:$0xff]  }
  0x2e   : > { %12366 = vmatpush3.bf16.msra.mxu0 %v13811_v23  ;;  %v13853_v18 = vld [vmem:[%s14842_s27 + $0x1b8] sm:$0xff]   ;;  %v13857_v23 = vld [vmem:[%s14842_s27 + $0x280] sm:$0xff]   ;;  %v13876_v44 = vld [vmem:[%s14842_s27 + $0x2e8] sm:$0xff]  }
  0x2f   : > { %12388 = vmatpush3.bf16.msra.mxu1 %v13812_v24  ;;  %12367 = vmatprep.subr.bf16.mxu0 %v13813_v25  ;;  %v2264_v24 = vcombine.high %v2248_v19, %v2248_v19  ;;  %v13858_v25 = vld [vmem:[%s14842_s27 + $0x248] sm:$0xff]   ;;  %v13867_v34 = vld [vmem:[%s14842_s27 + $0x218] sm:$0xff]   ;;  %v13870_v37 = vld [vmem:[%s14842_s27 + $0x260] sm:$0xff]  }
  0x30   : > { %12389 = vmatprep.subr.bf16.mxu1 %v13814_v26  ;;  %v13859_v26 = vld [vmem:[%s14842_s27 + $0x208] sm:$0xff]   ;;  %v13869_v36 = vld [vmem:[%s14842_s27 + $0x298] sm:$0xff]   ;;  %v13871_v38 = vld [vmem:[%s14842_s27 + $0x220] sm:$0xff]  }
  0x31   : > { %v13872_v39 = vld [vmem:[%s14842_s27 + $0x2e0] sm:$0xff]   ;;  %v13877_v45 = vld [vmem:[%s14842_s27 + $0x2a8] sm:$0xff]   ;;  %v13878_v47 = vld [vmem:[%s14842_s27 + $0x270] sm:$0xff]  }
  0x32   : > { %12368 = vmatpush3.bf16.msra.mxu0 %v13815_v27  ;;  %v13860_v27 = vld [vmem:[%s14842_s27 + $0x2c8] sm:$0xff]   ;;  %v13873_v40 = vld [vmem:[%s14842_s27 + $0x2a0] sm:$0xff]   ;;  %v13881_v54 = vld [vmem:[%s14842_s27 + $0x2b0] sm:$0xff]  }
  0x33   : > { %12390 = vmatpush3.bf16.msra.mxu1 %v13816_v28  ;;  %12369 = vmatprep.subr.bf16.mxu0 %v13817_v29  ;;  %v13861_v28 = vld [vmem:[%s14842_s27 + $0x288] sm:$0xff]   ;;  %v13862_v29 = vld [vmem:[%s14842_s27 + $0x250] sm:$0xff]  }
  0x34   : > { %12391 = vmatprep.subr.bf16.mxu1 %v13818_v31  ;;  %v13864_v31 = vld [vmem:[%s14842_s27 + $0x2d0] sm:$0xff]  }
  0x36   : > { %12370 = vmatpush3.bf16.msra.mxu0 %v13819_v32  ;;  %v13865_v32 = vld [vmem:[%s14842_s27 + $0x290] sm:$0xff]  }
  0x37   : > { %12392 = vmatpush3.bf16.msra.mxu1 %v13820_v33  ;;  %12399 = vmatprep.subr.bf16.mxu0 %v13822_v35  ;;  %v13866_v33 = vld [vmem:[%s14842_s27 + $0x258] sm:$0xff]  }
  0x38   : > { %12421 = vmatprep.subr.bf16.mxu1 %v13824_v41  ;;  %v13868_v35 = vld [vmem:[%s14842_s27 + $0x2d8] sm:$0xff]   ;;  %v13874_v41 = vld [vmem:[%s14842_s27 + $0x268] sm:$0xff]  }
  0x39   : > { %8816 = vmatmul.mubr.bf16.vlgmr.msra.gmra.mrb[0].mxu0 %v2241_v46  ;;  %v285_v46 = vld [vmem:[%s14837_s23 + $0x8] sm:$0xff] }
  0x3a   : > { %12400 = vmatpush3.bf16.msra.mxu0 %v13823_v48  ;;  %8856 = vmatmul.mubr.bf16.vlgmr.msra.gmra.mrb[0].mxu1 %v2263_v52  ;;  %v2274_v48 = vrot.slane %v285_v46, %v14880_v42  ;;  %v2267_v49 = vcombine.high %v285_v46, %v285_v46  ;;  %v13928_v46 = vld [vmem:[%s14842_s27 + $0x410] sm:$0xff]  }
  0x3b   : > { %12401 = vmatprep.subr.bf16.mxu0 %v13826_v53  ;;  %12422 = vmatpush3.bf16.msra.mxu1 %v13825_v50  ;;  %v13879_v50 = vld [vmem:[%s14842_s27 + $0x230] sm:$0xff]  }
  0x3c   : > { %8895 = vmatprep.mubr.bf16.mxu0 %v2262_v51  ;;  %12423 = vmatprep.subr.bf16.mxu1 %v13828_v56  ;;  %v13880_v51 = vld [vmem:[%s14842_s27 + $0x2f0] sm:$0xff]   ;;  %v2282_v52 = vcombine.high %v2274_v48, %v2274_v48  ;;  %v14953_v53 = vrot.slane %v2267_v49, %v14880_v42  ;;  %v13931_v49 = vld [vmem:[%s14842_s27 + $0x458] sm:$0xff]  }
  0x3d   : > { %8935 = vmatprep.mubr.bf16.mxu1 %v2266_v57  ;;  %v13883_v57 = vld [vmem:[%s14842_s27 + $0x238] sm:$0xff]  }
  0x3e   : > { %12402 = vmatpush3.bf16.msra.mxu0 %v13827_v55  ;;  %v13882_v55 = vld [vmem:[%s14842_s27 + $0x278] sm:$0xff]   ;;  %v2304_v56 = vrot.slane %v2282_v52, %v14880_v42 }
  0x3f   : > { %12403 = vmatprep.subr.bf16.mxu0 %v13830_v59  ;;  %12424 = vmatpush3.bf16.msra.mxu1 %v13829_v58  ;;  %v2283_v58 = vcombine.high %v14953_v53, %v14953_v53  ;;  %v13884_v59 = vld [vmem:[%s14842_s27 + $0x2f8] sm:$0xff]  }
  0x40   : > { %12425 = vmatprep.subr.bf16.mxu1 %v13832_v61  ;;  %v13885_v61 = vld [vmem:[%s14842_s27 + $0x2b8] sm:$0xff]  }
  0x41   : > { %v13934_v52 = vld [vmem:[%s14842_s27 + $0x498] sm:$0xff]  }
  0x42   : > { %12404 = vmatpush3.bf16.msra.mxu0 %v13831_v60  ;;  %v2314_v60 = vcombine.high %v2304_v56, %v2304_v56 }
  0x43   : > { %12405 = vmatprep.subr.bf16.mxu0 %v13834_v63  ;;  %12426 = vmatpush3.bf16.msra.mxu1 %v13833_v62  ;;  %v2290_v62 = vrot.slane %v2274_v48, %v14880_v42  ;;  %v13886_v63 = vld [vmem:[%s14842_s27 + $0x340] sm:$0xff]   ;;  %v13930_v48 = vld [vmem:[%s14842_s27 + $0x490] sm:$0xff]  }
  0x44   : > { %12427 = vmatprep.subr.bf16.mxu1 %v13836_v1  ;;  %v2311_v1 = vrot.slane %v2283_v58, %v14880_v42  ;;  %v13940_v58 = vld [vmem:[%s14842_s27 + $0x428] sm:$0xff]  }
  0x46   : > { %12406 = vmatpush3.bf16.msra.mxu0 %v13835_v0  ;;  %v13887_v0 = vld [vmem:[%s14842_s27 + $0x300] sm:$0xff]  }
  0x47   : > { %12407 = vmatprep.subr.bf16.mxu0 %v13838_v3  ;;  %12428 = vmatpush3.bf16.msra.mxu1 %v13837_v2  ;;  %v13888_v2 = vld [vmem:[%s14842_s27 + $0x3c0] sm:$0xff]  }
  0x48   : > { %12429 = vmatprep.subr.bf16.mxu1 %v13840_v5  ;;  %v13889_v3 = vld [vmem:[%s14842_s27 + $0x380] sm:$0xff]   ;;  %v13890_v5 = vld [vmem:[%s14842_s27 + $0x348] sm:$0xff]  }
  0x4a   : > { %12408 = vmatpush3.bf16.msra.mxu0 %v13839_v4  ;;  %v2312_v4 = vcombine.high %v2290_v62, %v2290_v62 }
  0x4b   : > { %12409 = vmatprep.subr.bf16.mxu0 %v13842_v7  ;;  %12430 = vmatpush3.bf16.msra.mxu1 %v13841_v6  ;;  %v13891_v6 = vld [vmem:[%s14842_s27 + $0x308] sm:$0xff]   ;;  %v2315_v7 = vcombine.high %v2311_v1, %v2311_v1 }
  0x4c   : > { %12431 = vmatprep.subr.bf16.mxu1 %v13844_v9  ;;  %v13893_v9 = vld [vmem:[%s14842_s27 + $0x388] sm:$0xff]  }
  0x4e   : > { %12410 = vmatpush3.bf16.msra.mxu0 %v13843_v8  ;;  %v13892_v8 = vld [vmem:[%s14842_s27 + $0x3c8] sm:$0xff]  }
  0x4f   : > { %12411 = vmatprep.subr.bf16.mxu0 %v13846_v11  ;;  %12432 = vmatpush3.bf16.msra.mxu1 %v13845_v10  ;;  %v13894_v10 = vld [vmem:[%s14842_s27 + $0x350] sm:$0xff]  }
  0x50   : > { %12433 = vmatprep.subr.bf16.mxu1 %v13848_v13  ;;  %v13895_v11 = vld [vmem:[%s14842_s27 + $0x310] sm:$0xff]  }
  0x51   : > { %v13897_v13 = vld [vmem:[%s14842_s27 + $0x390] sm:$0xff]  }
  0x52   : > { %12412 = vmatpush3.bf16.msra.mxu0 %v13847_v12  ;;  %v13896_v12 = vld [vmem:[%s14842_s27 + $0x3d0] sm:$0xff]  }
  0x53   : > { %12413 = vmatprep.subr.bf16.mxu0 %v13850_v15  ;;  %12434 = vmatpush3.bf16.msra.mxu1 %v13849_v14  ;;  %v13898_v14 = vld [vmem:[%s14842_s27 + $0x358] sm:$0xff]  }
  0x54   : > { %12435 = vmatprep.subr.bf16.mxu1 %v13852_v17  ;;  %v13899_v15 = vld [vmem:[%s14842_s27 + $0x318] sm:$0xff]  }
  0x55   : > { %v13901_v17 = vld [vmem:[%s14842_s27 + $0x398] sm:$0xff]  }
  0x56   : > { %12414 = vmatpush3.bf16.msra.mxu0 %v13851_v16  ;;  %v13900_v16 = vld [vmem:[%s14842_s27 + $0x3d8] sm:$0xff]  }
  0x57   : > { %12443 = vmatprep.subr.bf16.mxu0 %v13854_v20  ;;  %12436 = vmatpush3.bf16.msra.mxu1 %v13853_v18  ;;  %v13902_v18 = vld [vmem:[%s14842_s27 + $0x360] sm:$0xff]  }
  0x58   : > { %12465 = vmatprep.subr.bf16.mxu1 %v13856_v22  ;;  %v13904_v20 = vld [vmem:[%s14842_s27 + $0x3e0] sm:$0xff]   ;;  %v13906_v22 = vld [vmem:[%s14842_s27 + $0x368] sm:$0xff]  }
  0x59   : > { %8896 = vmatmul.mubr.bf16.vlgmr.msra.gmra.mrb[4].mxu0 %v2248_v19  ;;  %v13903_v19 = vld [vmem:[%s14842_s27 + $0x320] sm:$0xff]  }
  0x5a   : > { %12444 = vmatpush3.bf16.msra.mxu0 %v13855_v21  ;;  %8936 = vmatmul.mubr.bf16.vlgmr.msra.gmra.mrb[4].mxu1 %v2264_v24  ;;  %v13905_v21 = vld [vmem:[%s14842_s27 + $0x3a0] sm:$0xff]   ;;  %v13908_v24 = vld [vmem:[%s14842_s27 + $0x3e8] sm:$0xff]  }
  0x5b   : > { %12445 = vmatprep.subr.bf16.mxu0 %v13858_v25  ;;  %12466 = vmatpush3.bf16.msra.mxu1 %v13857_v23  ;;  %v13907_v23 = vld [vmem:[%s14842_s27 + $0x328] sm:$0xff]  }
  0x5c   : > { %12467 = vmatprep.subr.bf16.mxu1 %v13860_v27  ;;  %8975 = vmatprep.mubr.bf16.mxu0 %v2304_v56  ;;  %v13909_v25 = vld [vmem:[%s14842_s27 + $0x3a8] sm:$0xff]   ;;  %v13911_v27 = vld [vmem:[%s14842_s27 + $0x330] sm:$0xff]   ;;  %v13938_v56 = vld [vmem:[%s14842_s27 + $0x4a0] sm:$0xff]  }
  0x5d   : > { %9015 = vmatprep.mubr.bf16.mxu1 %v2314_v60  ;;  %v13942_v60 = vld [vmem:[%s14842_s27 + $0x4a8] sm:$0xff]  }
  0x5e   : > { %12446 = vmatpush3.bf16.msra.mxu0 %v13859_v26  ;;  %v13910_v26 = vld [vmem:[%s14842_s27 + $0x370] sm:$0xff]  }
  0x5f   : > { %12447 = vmatprep.subr.bf16.mxu0 %v13862_v29  ;;  %12468 = vmatpush3.bf16.msra.mxu1 %v13861_v28  ;;  %v13912_v28 = vld [vmem:[%s14842_s27 + $0x3f0] sm:$0xff]  }
  0x60   : > { %12469 = vmatprep.subr.bf16.mxu1 %v13864_v31  ;;  %v13913_v29 = vld [vmem:[%s14842_s27 + $0x3b0] sm:$0xff]   ;;  %v13915_v31 = vld [vmem:[%s14842_s27 + $0x338] sm:$0xff]  }
  0x62   : > { %12448 = vmatpush3.bf16.msra.mxu0 %v13863_v30  ;;  %v13914_v30 = vld [vmem:[%s14842_s27 + $0x378] sm:$0xff]  }
  0x63   : > { %12449 = vmatprep.subr.bf16.mxu0 %v13866_v33  ;;  %12470 = vmatpush3.bf16.msra.mxu1 %v13865_v32  ;;  %v13916_v32 = vld [vmem:[%s14842_s27 + $0x3f8] sm:$0xff]  }
  0x64   : > { %12471 = vmatprep.subr.bf16.mxu1 %v13868_v35  ;;  %v13918_v33 = vld [vmem:[%s14842_s27 + $0x3b8] sm:$0xff]   ;;  %v13919_v35 = vld [vmem:[%s14842_s27 + $0x440] sm:$0xff]  }
  0x66   : > { %12450 = vmatpush3.bf16.msra.mxu0 %v13867_v34  ;;  %v2297_v34 = vrot.slane %v14953_v53, %v14880_v42  ;;  %v13935_v53 = vld [vmem:[%s14842_s27 + $0x460] sm:$0xff]  }
  0x67   : > { %12451 = vmatprep.subr.bf16.mxu0 %v13870_v37  ;;  %12472 = vmatpush3.bf16.msra.mxu1 %v13869_v36  ;;  %v13920_v36 = vld [vmem:[%s14842_s27 + $0x400] sm:$0xff]  }
  0x68   : > { %12473 = vmatprep.subr.bf16.mxu1 %v13872_v39  ;;  %v13921_v37 = vld [vmem:[%s14842_s27 + $0x4c0] sm:$0xff]   ;;  %v2313_v39 = vcombine.high %v2297_v34, %v2297_v34 }
  0x6a   : > { %12452 = vmatpush3.bf16.msra.mxu0 %v13871_v38  ;;  %v13922_v38 = vld [vmem:[%s14842_s27 + $0x480] sm:$0xff]  }
  0x6b   : > { %12453 = vmatprep.subr.bf16.mxu0 %v13874_v41  ;;  %12474 = vmatpush3.bf16.msra.mxu1 %v13873_v40  ;;  %v13923_v40 = vld [vmem:[%s14842_s27 + $0x448] sm:$0xff]  }
  0x6c   : > { %12475 = vmatprep.subr.bf16.mxu1 %v13876_v44  ;;  %v13924_v41 = vld [vmem:[%s14842_s27 + $0x408] sm:$0xff]  }
  0x6d   : > { %v13926_v44 = vld [vmem:[%s14842_s27 + $0x488] sm:$0xff]  }
  0x6e   : > { %12454 = vmatpush3.bf16.msra.mxu0 %v13875_v43  ;;  %v13925_v43 = vld [vmem:[%s14842_s27 + $0x4c8] sm:$0xff]  }
  0x6f   : > { %12455 = vmatprep.subr.bf16.mxu0 %v13878_v47  ;;  %12476 = vmatpush3.bf16.msra.mxu1 %v13877_v45  ;;  %v13927_v45 = vld [vmem:[%s14842_s27 + $0x450] sm:$0xff]  }
  0x70   : > { %12477 = vmatprep.subr.bf16.mxu1 %v13880_v51  ;;  %v13929_v47 = vld [vmem:[%s14842_s27 + $0x4d0] sm:$0xff]   ;;  %v13933_v51 = vld [vmem:[%s14842_s27 + $0x4d8] sm:$0xff]  }
  0x72   : > { %12456 = vmatpush3.bf16.msra.mxu0 %v13879_v50  ;;  %v13932_v50 = vld [vmem:[%s14842_s27 + $0x418] sm:$0xff]  }
  0x73   : > { %12457 = vmatprep.subr.bf16.mxu0 %v13882_v55  ;;  %12478 = vmatpush3.bf16.msra.mxu1 %v13881_v54  ;;  %v13936_v54 = vld [vmem:[%s14842_s27 + $0x420] sm:$0xff]  }
  0x74   : > { %12479 = vmatprep.subr.bf16.mxu1 %v13884_v59  ;;  %v13937_v55 = vld [vmem:[%s14842_s27 + $0x4e0] sm:$0xff]   ;;  %v13941_v59 = vld [vmem:[%s14842_s27 + $0x4e8] sm:$0xff]  }
  0x76   : > { %12458 = vmatpush3.bf16.msra.mxu0 %v13883_v57  ;;  %v13939_v57 = vld [vmem:[%s14842_s27 + $0x468] sm:$0xff]  }
  0x77   : > { %12487 = vmatprep.subr.bf16.mxu0 %v13886_v63  ;;  %12480 = vmatpush3.bf16.msra.mxu1 %v13885_v61  ;;  %v286_v61 = vld [vmem:[%s14837_s23 + $0x10] sm:$0xff] }
  0x78   : > { %12509 = vmatprep.subr.bf16.mxu1 %v13888_v2  ;;  %v2323_v63 = vrot.slane %v286_v61, %v14880_v42  ;;  %v13945_v2 = vld [vmem:[%s14842_s27 + $0x4f0] sm:$0xff]  }
  0x79   : > { %8976 = vmatmul.mubr.bf16.vlgmr.msra.gmra.mrb[8].mxu0 %v2290_v62  ;;  %v13943_v62 = vld [vmem:[%s14842_s27 + $0x470] sm:$0xff]  }
  0x7a   : > { %12488 = vmatpush3.bf16.msra.mxu0 %v13887_v0  ;;  %9055 = vmatprep.mubr.bf16.mxu0 %v2311_v1  ;;  %v2316_v0 = vcombine.high %v286_v61, %v286_v61  ;;  %v13944_v1 = vld [vmem:[%s14842_s27 + $0x430] sm:$0xff]  }
  0x7b   : > { %9016 = vmatmul.mubr.bf16.vlgmr.msra.gmra.mrb[8].mxu1 %v2312_v4  ;;  %12489 = vmatprep.subr.bf16.mxu0 %v13890_v5  ;;  %v13946_v5 = vld [vmem:[%s14842_s27 + $0x4b0] sm:$0xff]  }
  0x7c   : > { %12510 = vmatpush3.bf16.msra.mxu1 %v13889_v3  ;;  %9095 = vmatprep.mubr.bf16.mxu1 %v2315_v7  ;;  %v2331_v3 = vcombine.high %v2323_v63, %v2323_v63  ;;  %v15029_v4 = vrot.slane %v2316_v0, %v14880_v42  ;;  %v13993_v61 = vld [vmem:[%s14842_s27 + $0x610] sm:$0xff]   ;;  %v13996_v0 = vld [vmem:[%s14842_s27 + $0x658] sm:$0xff]  }
  0x7d   : > { %12511 = vmatprep.subr.bf16.mxu1 %v13892_v8  ;;  %v13948_v8 = vld [vmem:[%s14842_s27 + $0x438] sm:$0xff]  }
  0x7e   : > { %12490 = vmatpush3.bf16.msra.mxu0 %v13891_v6  ;;  %v13947_v6 = vld [vmem:[%s14842_s27 + $0x478] sm:$0xff]   ;;  %v2353_v7 = vrot.slane %v2331_v3, %v14880_v42 }
  0x7f   : > { %12491 = vmatprep.subr.bf16.mxu0 %v13894_v10  ;;  %v13949_v10 = vld [vmem:[%s14842_s27 + $0x4f8] sm:$0xff]  }
  0x80   : > { %12512 = vmatpush3.bf16.msra.mxu1 %v13893_v9  ;;  %v2332_v9 = vcombine.high %v15029_v4, %v15029_v4  ;;  %v13999_v3 = vld [vmem:[%s14842_s27 + $0x698] sm:$0xff]  }
  0x81   : > { %12513 = vmatprep.subr.bf16.mxu1 %v13896_v12  ;;  %v13950_v12 = vld [vmem:[%s14842_s27 + $0x4b8] sm:$0xff]  }
  0x82   : > { %12492 = vmatpush3.bf16.msra.mxu0 %v13895_v11  ;;  %v2363_v11 = vcombine.high %v2353_v7, %v2353_v7 }
  0x83   : > { %12493 = vmatprep.subr.bf16.mxu0 %v13898_v14  ;;  %v13951_v14 = vld [vmem:[%s14842_s27 + $0x540] sm:$0xff]  }
  0x84   : > { %12514 = vmatpush3.bf16.msra.mxu1 %v13897_v13  ;;  %v2339_v13 = vrot.slane %v2323_v63, %v14880_v42  ;;  %v13995_v63 = vld [vmem:[%s14842_s27 + $0x690] sm:$0xff]  }
  0x85   : > { %12515 = vmatprep.subr.bf16.mxu1 %v13900_v16  ;;  %v2360_v16 = vrot.slane %v2332_v9, %v14880_v42  ;;  %v14005_v9 = vld [vmem:[%s14842_s27 + $0x628] sm:$0xff]  }
  0x86   : > { %12494 = vmatpush3.bf16.msra.mxu0 %v13899_v15  ;;  %v13952_v15 = vld [vmem:[%s14842_s27 + $0x500] sm:$0xff]  }
  0x87   : > { %12495 = vmatprep.subr.bf16.mxu0 %v13902_v18  ;;  %v13954_v18 = vld [vmem:[%s14842_s27 + $0x580] sm:$0xff]  }
  0x88   : > { %12516 = vmatpush3.bf16.msra.mxu1 %v13901_v17  ;;  %v13953_v17 = vld [vmem:[%s14842_s27 + $0x5c0] sm:$0xff]  }
  0x89   : > { %12517 = vmatprep.subr.bf16.mxu1 %v13904_v20  ;;  %v13955_v20 = vld [vmem:[%s14842_s27 + $0x548] sm:$0xff]  }
  0x8a   : > { %12496 = vmatpush3.bf16.msra.mxu0 %v13903_v19  ;;  %v2361_v19 = vcombine.high %v2339_v13, %v2339_v13 }
  0x8b   : > { %12497 = vmatprep.subr.bf16.mxu0 %v13906_v22  ;;  %v2364_v22 = vcombine.high %v2360_v16, %v2360_v16 }
  0x8c   : > { %12518 = vmatpush3.bf16.msra.mxu1 %v13905_v21  ;;  %v13956_v21 = vld [vmem:[%s14842_s27 + $0x508] sm:$0xff]  }
  0x8d   : > { %12519 = vmatprep.subr.bf16.mxu1 %v13908_v24  ;;  %v13958_v24 = vld [vmem:[%s14842_s27 + $0x588] sm:$0xff]  }
  0x8e   : > { %12498 = vmatpush3.bf16.msra.mxu0 %v13907_v23  ;;  %v13957_v23 = vld [vmem:[%s14842_s27 + $0x5c8] sm:$0xff]  }
  0x8f   : > { %12499 = vmatprep.subr.bf16.mxu0 %v13910_v26  ;;  %v13960_v26 = vld [vmem:[%s14842_s27 + $0x510] sm:$0xff]  }
  0x90   : > { %12520 = vmatpush3.bf16.msra.mxu1 %v13909_v25  ;;  %v13959_v25 = vld [vmem:[%s14842_s27 + $0x550] sm:$0xff]  }
  0x91   : > { %12521 = vmatprep.subr.bf16.mxu1 %v13912_v28  ;;  %v13962_v28 = vld [vmem:[%s14842_s27 + $0x590] sm:$0xff]  }
  0x92   : > { %12500 = vmatpush3.bf16.msra.mxu0 %v13911_v27  ;;  %v13961_v27 = vld [vmem:[%s14842_s27 + $0x5d0] sm:$0xff]  }
  0x93   : > { %12501 = vmatprep.subr.bf16.mxu0 %v13914_v30  ;;  %v13964_v30 = vld [vmem:[%s14842_s27 + $0x518] sm:$0xff]  }
  0x94   : > { %12522 = vmatpush3.bf16.msra.mxu1 %v13913_v29  ;;  %v13963_v29 = vld [vmem:[%s14842_s27 + $0x558] sm:$0xff]  }
  0x95   : > { %12523 = vmatprep.subr.bf16.mxu1 %v13916_v32  ;;  %v13966_v32 = vld [vmem:[%s14842_s27 + $0x598] sm:$0xff]  }
  0x96   : > { %12502 = vmatpush3.bf16.msra.mxu0 %v13915_v31  ;;  %v13965_v31 = vld [vmem:[%s14842_s27 + $0x5d8] sm:$0xff]  }
  0x97   : > { %12531 = vmatprep.subr.bf16.mxu0 %v13919_v35  ;;  %v13969_v35 = vld [vmem:[%s14842_s27 + $0x5e0] sm:$0xff]  }
  0x98   : > { %12524 = vmatpush3.bf16.msra.mxu1 %v13918_v33  ;;  %v13967_v33 = vld [vmem:[%s14842_s27 + $0x560] sm:$0xff]  }
  0x99   : > { %9056 = vmatmul.mubr.bf16.vlgmr.msra.gmra.mrb[12].mxu0 %v2297_v34  ;;  %12553 = vmatprep.subr.bf16.mxu1 %v13921_v37  ;;  %v13968_v34 = vld [vmem:[%s14842_s27 + $0x520] sm:$0xff]   ;;  %v13971_v37 = vld [vmem:[%s14842_s27 + $0x568] sm:$0xff]  }
  0x9a   : > { %12532 = vmatpush3.bf16.msra.mxu0 %v13920_v36  ;;  %9135 = vmatprep.mubr.bf16.mxu0 %v2353_v7  ;;  %v13970_v36 = vld [vmem:[%s14842_s27 + $0x5a0] sm:$0xff]  }
  0x9b   : > { %9096 = vmatmul.mubr.bf16.vlgmr.msra.gmra.mrb[12].mxu1 %v2313_v39  ;;  %12533 = vmatprep.subr.bf16.mxu0 %v13923_v40  ;;  %v13973_v39 = vld [vmem:[%s14842_s27 + $0x5e8] sm:$0xff]   ;;  %v14003_v7 = vld [vmem:[%s14842_s27 + $0x6a0] sm:$0xff]  }
  0x9c   : > { %12554 = vmatpush3.bf16.msra.mxu1 %v13922_v38  ;;  %9175 = vmatprep.mubr.bf16.mxu1 %v2363_v11  ;;  %v13972_v38 = vld [vmem:[%s14842_s27 + $0x528] sm:$0xff]  }
  0x9d   : > { %12555 = vmatprep.subr.bf16.mxu1 %v13925_v43  ;;  %v13974_v40 = vld [vmem:[%s14842_s27 + $0x5a8] sm:$0xff]   ;;  %v13976_v43 = vld [vmem:[%s14842_s27 + $0x530] sm:$0xff]  }
  0x9e   : > { %12534 = vmatpush3.bf16.msra.mxu0 %v13924_v41  ;;  %v13975_v41 = vld [vmem:[%s14842_s27 + $0x570] sm:$0xff]   ;;  %v14007_v11 = vld [vmem:[%s14842_s27 + $0x6a8] sm:$0xff]  }
  0x9f   : > { %12535 = vmatprep.subr.bf16.mxu0 %v13927_v45  ;;  %v13978_v45 = vld [vmem:[%s14842_s27 + $0x5b0] sm:$0xff]  }
  0xa0   : > { %12556 = vmatpush3.bf16.msra.mxu1 %v13926_v44  ;;  %v13977_v44 = vld [vmem:[%s14842_s27 + $0x5f0] sm:$0xff]  }
  0xa1   : > { %12557 = vmatprep.subr.bf16.mxu1 %v13929_v47  ;;  %v13980_v47 = vld [vmem:[%s14842_s27 + $0x538] sm:$0xff]  }
  0xa2   : > { %12536 = vmatpush3.bf16.msra.mxu0 %v13928_v46  ;;  %v13979_v46 = vld [vmem:[%s14842_s27 + $0x578] sm:$0xff]  }
  0xa3   : > { %12537 = vmatprep.subr.bf16.mxu0 %v13931_v49  ;;  %v13983_v49 = vld [vmem:[%s14842_s27 + $0x5b8] sm:$0xff]  }
  0xa4   : > { %12558 = vmatpush3.bf16.msra.mxu1 %v13930_v48  ;;  %v13981_v48 = vld [vmem:[%s14842_s27 + $0x5f8] sm:$0xff]  }
  0xa5   : > { %12559 = vmatprep.subr.bf16.mxu1 %v13933_v51  ;;  %v13984_v51 = vld [vmem:[%s14842_s27 + $0x640] sm:$0xff]  }
  0xa6   : > { %12538 = vmatpush3.bf16.msra.mxu0 %v13932_v50  ;;  %v2346_v50 = vrot.slane %v15029_v4, %v14880_v42  ;;  %v14000_v4 = vld [vmem:[%s14842_s27 + $0x660] sm:$0xff]  }
  0xa7   : > { %12539 = vmatprep.subr.bf16.mxu0 %v13935_v53  ;;  %v13986_v53 = vld [vmem:[%s14842_s27 + $0x6c0] sm:$0xff]  }
  0xa8   : > { %12560 = vmatpush3.bf16.msra.mxu1 %v13934_v52  ;;  %v13985_v52 = vld [vmem:[%s14842_s27 + $0x600] sm:$0xff]  }
  0xa9   : > { %12561 = vmatprep.subr.bf16.mxu1 %v13937_v55  ;;  %v2362_v55 = vcombine.high %v2346_v50, %v2346_v50 }
  0xaa   : > { %12540 = vmatpush3.bf16.msra.mxu0 %v13936_v54  ;;  %v13987_v54 = vld [vmem:[%s14842_s27 + $0x680] sm:$0xff]  }
  0xab   : > { %12541 = vmatprep.subr.bf16.mxu0 %v13939_v57  ;;  %v13989_v57 = vld [vmem:[%s14842_s27 + $0x608] sm:$0xff]  }
  0xac   : > { %12562 = vmatpush3.bf16.msra.mxu1 %v13938_v56  ;;  %v13988_v56 = vld [vmem:[%s14842_s27 + $0x648] sm:$0xff]  }
  0xad   : > { %12563 = vmatprep.subr.bf16.mxu1 %v13941_v59  ;;  %v13991_v59 = vld [vmem:[%s14842_s27 + $0x688] sm:$0xff]  }
  0xae   : > { %12542 = vmatpush3.bf16.msra.mxu0 %v13940_v58  ;;  %v13990_v58 = vld [vmem:[%s14842_s27 + $0x6c8] sm:$0xff]  }
  0xaf   : > { %12543 = vmatprep.subr.bf16.mxu0 %v13943_v62  ;;  %v13994_v62 = vld [vmem:[%s14842_s27 + $0x6d0] sm:$0xff]  }
  0xb0   : > { %12564 = vmatpush3.bf16.msra.mxu1 %v13942_v60  ;;  %v13992_v60 = vld [vmem:[%s14842_s27 + $0x650] sm:$0xff]  }
  0xb1   : > { %12565 = vmatprep.subr.bf16.mxu1 %v13945_v2  ;;  %v13998_v2 = vld [vmem:[%s14842_s27 + $0x6d8] sm:$0xff]  }
  0xb2   : > { %12544 = vmatpush3.bf16.msra.mxu0 %v13944_v1  ;;  %v13997_v1 = vld [vmem:[%s14842_s27 + $0x618] sm:$0xff]  }
  0xb3   : > { %12545 = vmatprep.subr.bf16.mxu0 %v13947_v6  ;;  %v14002_v6 = vld [vmem:[%s14842_s27 + $0x6e0] sm:$0xff]  }
  0xb4   : > { %12566 = vmatpush3.bf16.msra.mxu1 %v13946_v5  ;;  %v14001_v5 = vld [vmem:[%s14842_s27 + $0x620] sm:$0xff]  }
  0xb5   : > { %12567 = vmatprep.subr.bf16.mxu1 %v13949_v10  ;;  %v14006_v10 = vld [vmem:[%s14842_s27 + $0x6e8] sm:$0xff]  }
  0xb6   : > { %12546 = vmatpush3.bf16.msra.mxu0 %v13948_v8  ;;  %v14004_v8 = vld [vmem:[%s14842_s27 + $0x668] sm:$0xff]  }
  0xb7   : > { %12575 = vmatprep.subr.bf16.mxu0 %v13951_v14  ;;  %v14009_v14 = vld [vmem:[%s14842_s27 + $0x630] sm:$0xff]  }
  0xb8   : > { %12568 = vmatpush3.bf16.msra.mxu1 %v13950_v12  ;;  %v14008_v12 = vld [vmem:[%s14842_s27 + $0x670] sm:$0xff]  }
  0xb9   : > { %9136 = vmatmul.mubr.bf16.vlgmr.msra.gmra.mrb[16].mxu0 %v2339_v13  ;;  %12597 = vmatprep.subr.bf16.mxu1 %v13953_v17  ;;  %v287_v13 = vld [vmem:[%s14837_s23 + $0x18] sm:$0xff]  ;;  %v14010_v17 = vld [vmem:[%s14842_s27 + $0x6f0] sm:$0xff]  }
  0xba   : > { %12576 = vmatpush3.bf16.msra.mxu0 %v13952_v15  ;;  %9215 = vmatprep.mubr.bf16.mxu0 %v2360_v16  ;;  %v2372_v15 = vrot.slane %v287_v13, %v14880_v42  ;;  %v2365_v16 = vcombine.high %v287_v13, %v287_v13  ;;  %v14049_v13 = vld [vmem:[%s14842_s27 + $0x840] sm:$0xff]  }
  0xbb   : > { %9176 = vmatmul.mubr.bf16.vlgmr.msra.gmra.mrb[16].mxu1 %v2361_v19  ;;  %12577 = vmatprep.subr.bf16.mxu0 %v13955_v20 }
  0xbc   : > { %12598 = vmatpush3.bf16.msra.mxu1 %v13954_v18  ;;  %9255 = vmatprep.mubr.bf16.mxu1 %v2364_v22  ;;  %v14011_v18 = vld [vmem:[%s14842_s27 + $0x6b0] sm:$0xff]   ;;  %v2380_v19 = vcombine.high %v2372_v15, %v2372_v15  ;;  %v15106_v20 = vrot.slane %v2365_v16, %v14880_v42  ;;  %v14013_v22 = vld [vmem:[%s14842_s27 + $0x638] sm:$0xff]   ;;  %v14052_v16 = vld [vmem:[%s14842_s27 + $0x880] sm:$0xff]  }
  0xbd   : > { %12599 = vmatprep.subr.bf16.mxu1 %v13957_v23 }
  0xbe   : > { %12578 = vmatpush3.bf16.msra.mxu0 %v13956_v21  ;;  %v14012_v21 = vld [vmem:[%s14842_s27 + $0x678] sm:$0xff]   ;;  %v2402_v23 = vrot.slane %v2380_v19, %v14880_v42  ;;  %v14054_v19 = vld [vmem:[%s14842_s27 + $0x808] sm:$0xff]  }
  0xbf   : > { %12579 = vmatprep.subr.bf16.mxu0 %v13959_v25  ;;  %v14014_v25 = vld [vmem:[%s14842_s27 + $0x6f8] sm:$0xff]  }
  0xc0   : > { %12600 = vmatpush3.bf16.msra.mxu1 %v13958_v24  ;;  %v2381_v24 = vcombine.high %v15106_v20, %v15106_v20 }
  0xc1   : > { %12601 = vmatprep.subr.bf16.mxu1 %v13961_v27  ;;  %v2412_v27 = vcombine.high %v2402_v23, %v2402_v23 }
  0xc2   : > { %12580 = vmatpush3.bf16.msra.mxu0 %v13960_v26  ;;  %v14015_v26 = vld [vmem:[%s14842_s27 + $0x6b8] sm:$0xff]  }
  0xc3   : > { %12581 = vmatprep.subr.bf16.mxu0 %v13963_v29  ;;  %v14016_v29 = vld [vmem:[%s14842_s27 + $0x740] sm:$0xff]  }
  0xc4   : > { %12602 = vmatpush3.bf16.msra.mxu1 %v13962_v28  ;;  %v2388_v28 = vrot.slane %v2372_v15, %v14880_v42  ;;  %v14051_v15 = vld [vmem:[%s14842_s27 + $0x8c0] sm:$0xff]  }
  0xc5   : > { %12603 = vmatprep.subr.bf16.mxu1 %v13965_v31  ;;  %v2409_v31 = vrot.slane %v2381_v24, %v14880_v42  ;;  %v14059_v24 = vld [vmem:[%s14842_s27 + $0x8d0] sm:$0xff]  }
  0xc6   : > { %12582 = vmatpush3.bf16.msra.mxu0 %v13964_v30  ;;  %v14017_v30 = vld [vmem:[%s14842_s27 + $0x700] sm:$0xff]  }
  0xc7   : > { %12583 = vmatprep.subr.bf16.mxu0 %v13967_v33  ;;  %v14019_v33 = vld [vmem:[%s14842_s27 + $0x780] sm:$0xff]  }
  0xc8   : > { %12604 = vmatpush3.bf16.msra.mxu1 %v13966_v32  ;;  %v14018_v32 = vld [vmem:[%s14842_s27 + $0x7c0] sm:$0xff]  }
  0xc9   : > { %12605 = vmatprep.subr.bf16.mxu1 %v13969_v35  ;;  %v14020_v35 = vld [vmem:[%s14842_s27 + $0x748] sm:$0xff]  }
  0xca   : > { %12584 = vmatpush3.bf16.msra.mxu0 %v13968_v34  ;;  %v2410_v34 = vcombine.high %v2388_v28, %v2388_v28 }
  0xcb   : > { %12585 = vmatprep.subr.bf16.mxu0 %v13971_v37  ;;  %v2413_v37 = vcombine.high %v2409_v31, %v2409_v31 }
  0xcc   : > { %12606 = vmatpush3.bf16.msra.mxu1 %v13970_v36  ;;  %v14021_v36 = vld [vmem:[%s14842_s27 + $0x708] sm:$0xff]  }
  0xcd   : > { %12607 = vmatprep.subr.bf16.mxu1 %v13973_v39  ;;  %v14023_v39 = vld [vmem:[%s14842_s27 + $0x788] sm:$0xff]  }
  0xce   : > { %12586 = vmatpush3.bf16.msra.mxu0 %v13972_v38  ;;  %v14022_v38 = vld [vmem:[%s14842_s27 + $0x7c8] sm:$0xff]  }
  0xcf   : > { %12587 = vmatprep.subr.bf16.mxu0 %v13975_v41  ;;  %v14025_v41 = vld [vmem:[%s14842_s27 + $0x710] sm:$0xff]  }
  0xd0   : > { %12608 = vmatpush3.bf16.msra.mxu1 %v13974_v40  ;;  %v14024_v40 = vld [vmem:[%s14842_s27 + $0x750] sm:$0xff]  }
  0xd1   : > { %12609 = vmatprep.subr.bf16.mxu1 %v13977_v44  ;;  %v14027_v44 = vld [vmem:[%s14842_s27 + $0x790] sm:$0xff]  }
  0xd2   : > { %12588 = vmatpush3.bf16.msra.mxu0 %v13976_v43  ;;  %v14026_v43 = vld [vmem:[%s14842_s27 + $0x7d0] sm:$0xff]  }
  0xd3   : > { %12589 = vmatprep.subr.bf16.mxu0 %v13979_v46  ;;  %v14029_v46 = vld [vmem:[%s14842_s27 + $0x718] sm:$0xff]  }
  0xd4   : > { %12610 = vmatpush3.bf16.msra.mxu1 %v13978_v45  ;;  %v14028_v45 = vld [vmem:[%s14842_s27 + $0x758] sm:$0xff]  }
  0xd5   : > { %12611 = vmatprep.subr.bf16.mxu1 %v13981_v48  ;;  %v14031_v48 = vld [vmem:[%s14842_s27 + $0x798] sm:$0xff]  }
  0xd6   : > { %12590 = vmatpush3.bf16.msra.mxu0 %v13980_v47  ;;  %v14030_v47 = vld [vmem:[%s14842_s27 + $0x7d8] sm:$0xff]  }
  0xd7   : > { %12619 = vmatprep.subr.bf16.mxu0 %v13984_v51  ;;  %v14034_v51 = vld [vmem:[%s14842_s27 + $0x7e0] sm:$0xff]  }
  0xd8   : > { %12612 = vmatpush3.bf16.msra.mxu1 %v13983_v49  ;;  %v14032_v49 = vld [vmem:[%s14842_s27 + $0x760] sm:$0xff]  }
  0xd9   : > { %9216 = vmatmul.mubr.bf16.vlgmr.msra.gmra.mrb[20].mxu0 %v2346_v50  ;;  %12641 = vmatprep.subr.bf16.mxu1 %v13986_v53  ;;  %v14033_v50 = vld [vmem:[%s14842_s27 + $0x720] sm:$0xff]   ;;  %v14036_v53 = vld [vmem:[%s14842_s27 + $0x768] sm:$0xff]  }
  0xda   : > { %12620 = vmatpush3.bf16.msra.mxu0 %v13985_v52  ;;  %9295 = vmatprep.mubr.bf16.mxu0 %v2402_v23  ;;  %v14035_v52 = vld [vmem:[%s14842_s27 + $0x7a0] sm:$0xff]   ;;  %v14058_v23 = vld [vmem:[%s14842_s27 + $0x810] sm:$0xff]  }
  0xdb   : > { %9256 = vmatmul.mubr.bf16.vlgmr.msra.gmra.mrb[20].mxu1 %v2362_v55  ;;  %12621 = vmatprep.subr.bf16.mxu0 %v13988_v56  ;;  %v14038_v55 = vld [vmem:[%s14842_s27 + $0x7e8] sm:$0xff]  }
  0xdc   : > { %12642 = vmatpush3.bf16.msra.mxu1 %v13987_v54  ;;  %9335 = vmatprep.mubr.bf16.mxu1 %v2412_v27  ;;  %v14037_v54 = vld [vmem:[%s14842_s27 + $0x728] sm:$0xff]   ;;  %v14062_v27 = vld [vmem:[%s14842_s27 + $0x818] sm:$0xff]  }
  0xdd   : > { %12643 = vmatprep.subr.bf16.mxu1 %v13990_v58  ;;  %v14039_v56 = vld [vmem:[%s14842_s27 + $0x7a8] sm:$0xff]  }
  0xde   : > { %12622 = vmatpush3.bf16.msra.mxu0 %v13989_v57  ;;  %v14040_v57 = vld [vmem:[%s14842_s27 + $0x770] sm:$0xff]  }
  0xdf   : > { %12623 = vmatprep.subr.bf16.mxu0 %v13992_v60 }
  0xe0   : > { %12644 = vmatpush3.bf16.msra.mxu1 %v13991_v59  ;;  %v14041_v59 = vld [vmem:[%s14842_s27 + $0x730] sm:$0xff]  }
  0xe1   : > { %12645 = vmatprep.subr.bf16.mxu1 %v13994_v62 }
  0xe2   : > { %12624 = vmatpush3.bf16.msra.mxu0 %v13993_v61  ;;  %v14042_v61 = vld [vmem:[%s14842_s27 + $0x7f0] sm:$0xff]  }
  0xe3   : > { %12625 = vmatprep.subr.bf16.mxu0 %v13996_v0 }
  0xe4   : > { %12646 = vmatpush3.bf16.msra.mxu1 %v13995_v63 }
  0xe5   : > { %12647 = vmatprep.subr.bf16.mxu1 %v13998_v2  ;;  %v14044_v2 = vld [vmem:[%s14842_s27 + $0x778] sm:$0xff]  }
  0xe6   : > { %12626 = vmatpush3.bf16.msra.mxu0 %v13997_v1  ;;  %v14043_v1 = vld [vmem:[%s14842_s27 + $0x7b0] sm:$0xff]  }
  0xe7   : > { %12627 = vmatprep.subr.bf16.mxu0 %v14000_v4 }
  0xe8   : > { %12648 = vmatpush3.bf16.msra.mxu1 %v13999_v3 }
  0xe9   : > { %12649 = vmatprep.subr.bf16.mxu1 %v14002_v6 }
  0xea   : > { %12628 = vmatpush3.bf16.msra.mxu0 %v14001_v5 }
  0xeb   : > { %12629 = vmatprep.subr.bf16.mxu0 %v14004_v8 }
  0xec   : > { %12650 = vmatpush3.bf16.msra.mxu1 %v14003_v7  ;;  %v14045_v7 = vld [vmem:[%s14842_s27 + $0x738] sm:$0xff]  }
  0xed   : > { %12651 = vmatprep.subr.bf16.mxu1 %v14006_v10 }
  0xee   : > { %12630 = vmatpush3.bf16.msra.mxu0 %v14005_v9  ;;  %v14046_v9 = vld [vmem:[%s14842_s27 + $0x7f8] sm:$0xff]  }
  0xef   : > { %12631 = vmatprep.subr.bf16.mxu0 %v14008_v12  ;;  %v2395_v12 = vrot.slane %v15106_v20, %v14880_v42  ;;  %v14055_v20 = vld [vmem:[%s14842_s27 + $0x8c8] sm:$0xff]  }
  0xf0   : > { %12652 = vmatpush3.bf16.msra.mxu1 %v14007_v11  ;;  %v14048_v11 = vld [vmem:[%s14842_s27 + $0x7b8] sm:$0xff]  }
  0xf1   : > { %12653 = vmatprep.subr.bf16.mxu1 %v14010_v17  ;;  %v2411_v17 = vcombine.high %v2395_v12, %v2395_v12 }
  0xf2   : > { %12632 = vmatpush3.bf16.msra.mxu0 %v14009_v14  ;;  %v14050_v14 = vld [vmem:[%s14842_s27 + $0x800] sm:$0xff]  }
  0xf3   : > { %12633 = vmatprep.subr.bf16.mxu0 %v14012_v21  ;;  %v14056_v21 = vld [vmem:[%s14842_s27 + $0x888] sm:$0xff]  }
  0xf4   : > { %12654 = vmatpush3.bf16.msra.mxu1 %v14011_v18  ;;  %v14053_v18 = vld [vmem:[%s14842_s27 + $0x848] sm:$0xff]  }
  0xf5   : > { %12655 = vmatprep.subr.bf16.mxu1 %v14014_v25  ;;  %v14060_v25 = vld [vmem:[%s14842_s27 + $0x890] sm:$0xff]  }
  0xf6   : > { %12634 = vmatpush3.bf16.msra.mxu0 %v14013_v22  ;;  %v14057_v22 = vld [vmem:[%s14842_s27 + $0x850] sm:$0xff]  }
  0xf7   : > { %12663 = vmatprep.subr.bf16.mxu0 %v14016_v29  ;;  %v14064_v29 = vld [vmem:[%s14842_s27 + $0x898] sm:$0xff]  }
  0xf8   : > { %12656 = vmatpush3.bf16.msra.mxu1 %v14015_v26  ;;  %v14061_v26 = vld [vmem:[%s14842_s27 + $0x858] sm:$0xff]  }
  0xf9   : > { %9296 = vmatmul.mubr.bf16.vlgmr.msra.gmra.mrb[24].mxu0 %v2388_v28  ;;  %12685 = vmatprep.subr.bf16.mxu1 %v14018_v32  ;;  %v14063_v28 = vld [vmem:[%s14842_s27 + $0x8d8] sm:$0xff]   ;;  %v14067_v32 = vld [vmem:[%s14842_s27 + $0x8e0] sm:$0xff]  }
  0xfa   : > { %12664 = vmatpush3.bf16.msra.mxu0 %v14017_v30  ;;  %9375 = vmatprep.mubr.bf16.mxu0 %v2409_v31  ;;  %v14065_v30 = vld [vmem:[%s14842_s27 + $0x860] sm:$0xff]  }
  0xfb   : > { %9336 = vmatmul.mubr.bf16.vlgmr.msra.gmra.mrb[24].mxu1 %v2410_v34  ;;  %12665 = vmatprep.subr.bf16.mxu0 %v14020_v35  ;;  %v14066_v31 = vld [vmem:[%s14842_s27 + $0x820] sm:$0xff]   ;;  %v14069_v34 = vld [vmem:[%s14842_s27 + $0x868] sm:$0xff]  }
  0xfc   : > { %12686 = vmatpush3.bf16.msra.mxu1 %v14019_v33  ;;  %9415 = vmatprep.mubr.bf16.mxu1 %v2413_v37  ;;  %v14068_v33 = vld [vmem:[%s14842_s27 + $0x8a0] sm:$0xff]   ;;  %v14070_v35 = vld [vmem:[%s14842_s27 + $0x828] sm:$0xff]  }
  0xfd   : > { %12687 = vmatprep.subr.bf16.mxu1 %v14022_v38  ;;  %v14072_v37 = vld [vmem:[%s14842_s27 + $0x8a8] sm:$0xff]   ;;  %v14073_v38 = vld [vmem:[%s14842_s27 + $0x870] sm:$0xff]  }
  0xfe   : > { %12666 = vmatpush3.bf16.msra.mxu0 %v14021_v36  ;;  %v14071_v36 = vld [vmem:[%s14842_s27 + $0x8e8] sm:$0xff]  }
  0xff   : > { %12667 = vmatprep.subr.bf16.mxu0 %v14024_v40 }
 0x100   : > { %12688 = vmatpush3.bf16.msra.mxu1 %v14023_v39  ;;  %v288_v39 = vld [vmem:[%s14837_s23 + $0x20] sm:$0xff] }
 0x101   : > { %12689 = vmatprep.subr.bf16.mxu1 %v14026_v43  ;;  %v2421_v43 = vrot.slane %v288_v39, %v14880_v42 }
 0x102   : > { %12668 = vmatpush3.bf16.msra.mxu0 %v14025_v41  ;;  %v14074_v41 = vld [vmem:[%s14842_s27 + $0x830] sm:$0xff]  }
 0x103   : > { %12669 = vmatprep.subr.bf16.mxu0 %v14028_v45 }
 0x104   : > { %12690 = vmatpush3.bf16.msra.mxu1 %v14027_v44  ;;  %v2414_v44 = vcombine.high %v288_v39, %v288_v39  ;;  %v14108_v39 = vld [vmem:[%s14842_s27 + $0x9b0] sm:$0xff]  }
 0x105   : > { %12691 = vmatprep.subr.bf16.mxu1 %v14030_v47 }
 0x106   : > { %12670 = vmatpush3.bf16.msra.mxu0 %v14029_v46  ;;  %v14075_v46 = vld [vmem:[%s14842_s27 + $0x8f0] sm:$0xff]  }
 0x107   : > { %12671 = vmatprep.subr.bf16.mxu0 %v14032_v49 }
 0x108   : > { %12692 = vmatpush3.bf16.msra.mxu1 %v14031_v48 }
 0x109   : > { %12693 = vmatprep.subr.bf16.mxu1 %v14034_v51  ;;  %v15183_v51 = vrot.slane %v2414_v44, %v14880_v42 }
 0x10a   : > { %12672 = vmatpush3.bf16.msra.mxu0 %v14033_v50  ;;  %v2429_v50 = vcombine.high %v2421_v43, %v2421_v43 }
 0x10b   : > { %12673 = vmatprep.subr.bf16.mxu0 %v14036_v53 }
 0x10c   : > { %v12371_v58 = vpop.f32.mrb[0].mxu0  ;;  %12694 = vmatpush3.bf16.msra.mxu1 %v14035_v52 }
 0x10d   : > { %v12372_v60 = vpop.f32.mrb[1].mxu0  ;;  %12695 = vmatprep.subr.bf16.mxu1 %v14038_v55  ;;  %v12393_v62 = vpop.f32.mrb[0].mxu1  ;;  %v14077_v55 = vld [vmem:[%s14842_s27 + $0x878] sm:$0xff]  }
 0x10e   : > { %v12373_v63 = vadd.f32 %v12372_v60, %v12371_v58  ;;  %v12374_v0 = vpop.f32.mrb[2].mxu0  ;;  %12674 = vmatpush3.bf16.msra.mxu0 %v14037_v54  ;;  %v12394_v3 = vpop.f32.mrb[1].mxu1  ;;  %v14076_v54 = vld [vmem:[%s14842_s27 + $0x8b0] sm:$0xff]   ;;  %v2451_v60 = vrot.slane %v2429_v50, %v14880_v42 }
 0x10f   : > { %v12375_v4 = vpop.f32.mrb[3].mxu0  ;;  %12675 = vmatprep.subr.bf16.mxu0 %v14040_v57  ;;  %v12395_v5 = vadd.f32 %v12394_v3, %v12393_v62  ;;  %v12396_v6 = vpop.f32.mrb[2].mxu1  ;;  %v14079_v62 = vld [vmem:[%s14842_s27 + $0x8f8] sm:$0xff]   ;;  %v2437_v3 = vrot.slane %v2421_v43, %v14880_v42 }
 0x110   : > { %12696 = vmatpush3.bf16.msra.mxu1 %v14039_v56  ;;  %v12397_v8 = vpop.f32.mrb[3].mxu1  ;;  %v14081_v4 = vld [vmem:[%s14842_s27 + $0x940] sm:$0xff]  }
 0x111   : > { %12697 = vmatprep.subr.bf16.mxu1 %v14042_v61  ;;  %v15148_v10 = vadd.f32 %v12395_v5, %v12373_v63  ;;  %v2430_v63 = vcombine.high %v15183_v51, %v15183_v51  ;;  %v14082_v5 = vld [vmem:[%s14842_s27 + $0x900] sm:$0xff]  }
 0x112   : > { %12676 = vmatpush3.bf16.msra.mxu0 %v14041_v59  ;;  %v14078_v59 = vld [vmem:[%s14842_s27 + $0x838] sm:$0xff]   ;;  %v14084_v8 = vld [vmem:[%s14842_s27 + $0x980] sm:$0xff]  }
 0x113   : > { %12677 = vmatprep.subr.bf16.mxu0 %v14044_v2  ;;  %v2461_v2 = vcombine.high %v2451_v60, %v2451_v60  ;;  %v2458_v6 = vrot.slane %v2430_v63, %v14880_v42  ;;  %v14123_v63 = vld [vmem:[%s14842_s27 + $0xa10] sm:$0xff]  }
 0x114   : > { %12698 = vmatpush3.bf16.msra.mxu1 %v14043_v1  ;;  %v14080_v1 = vld [vmem:[%s14842_s27 + $0x8b8] sm:$0xff]  }
 0x115   : > { %12699 = vmatprep.subr.bf16.mxu1 %v14046_v9  ;;  %v2459_v9 = vcombine.high %v2437_v3, %v2437_v3 }
 0x116   : > { %12678 = vmatpush3.bf16.msra.mxu0 %v14045_v7  ;;  %v14083_v7 = vld [vmem:[%s14842_s27 + $0x9c0] sm:$0xff]  }
 0x117   : > { %12707 = vmatprep.subr.bf16.mxu0 %v14049_v13  ;;  %v14087_v13 = vld [vmem:[%s14842_s27 + $0x9c8] sm:$0xff]  }
 0x118   : > { %12700 = vmatpush3.bf16.msra.mxu1 %v14048_v11  ;;  %v14086_v11 = vld [vmem:[%s14842_s27 + $0x908] sm:$0xff]  }
 0x119   : > { %9376 = vmatmul.mubr.bf16.vlgmr.msra.gmra.mrb[28].mxu0 %v2395_v12  ;;  %12729 = vmatprep.subr.bf16.mxu1 %v14051_v15  ;;  %v2462_v12 = vcombine.high %v2458_v6, %v2458_v6  ;;  %v14089_v15 = vld [vmem:[%s14842_s27 + $0x950] sm:$0xff]  }
 0x11a   : > { %12708 = vmatpush3.bf16.msra.mxu0 %v14050_v14  ;;  %9455 = vmatprep.mubr.bf16.mxu0 %v2451_v60  ;;  %v14088_v14 = vld [vmem:[%s14842_s27 + $0x988] sm:$0xff]  }
 0x11b   : > { %9416 = vmatmul.mubr.bf16.vlgmr.msra.gmra.mrb[28].mxu1 %v2411_v17  ;;  %12709 = vmatprep.subr.bf16.mxu0 %v14053_v18  ;;  %v14091_v17 = vld [vmem:[%s14842_s27 + $0x9d0] sm:$0xff]   ;;  %v14119_v60 = vld [vmem:[%s14842_s27 + $0xa08] sm:$0xff]  }
 0x11c   : > { %12730 = vmatpush3.bf16.msra.mxu1 %v14052_v16  ;;  %9495 = vmatprep.mubr.bf16.mxu1 %v2461_v2  ;;  %v14090_v16 = vld [vmem:[%s14842_s27 + $0x910] sm:$0xff]   ;;  %v14126_v2 = vld [vmem:[%s14842_s27 + $0xa58] sm:$0xff]  }
 0x11d   : > { %12731 = vmatprep.subr.bf16.mxu1 %v14055_v20  ;;  %v14092_v18 = vld [vmem:[%s14842_s27 + $0x990] sm:$0xff]   ;;  %v14094_v20 = vld [vmem:[%s14842_s27 + $0x918] sm:$0xff]  }
 0x11e   : > { %12710 = vmatpush3.bf16.msra.mxu0 %v14054_v19  ;;  %v14093_v19 = vld [vmem:[%s14842_s27 + $0x958] sm:$0xff]  }
 0x11f   : > { %12711 = vmatprep.subr.bf16.mxu0 %v14057_v22  ;;  %v14096_v22 = vld [vmem:[%s14842_s27 + $0x998] sm:$0xff]  }
 0x120   : > { %12732 = vmatpush3.bf16.msra.mxu1 %v14056_v21  ;;  %v14095_v21 = vld [vmem:[%s14842_s27 + $0x9d8] sm:$0xff]  }
 0x121   : > { %12733 = vmatprep.subr.bf16.mxu1 %v14059_v24  ;;  %v14098_v24 = vld [vmem:[%s14842_s27 + $0x920] sm:$0xff]  }
 0x122   : > { %12712 = vmatpush3.bf16.msra.mxu0 %v14058_v23  ;;  %v14097_v23 = vld [vmem:[%s14842_s27 + $0x960] sm:$0xff]  }
 0x123   : > { %12713 = vmatprep.subr.bf16.mxu0 %v14061_v26  ;;  %v14100_v26 = vld [vmem:[%s14842_s27 + $0x9a0] sm:$0xff]  }
 0x124   : > { %12734 = vmatpush3.bf16.msra.mxu1 %v14060_v25  ;;  %v14099_v25 = vld [vmem:[%s14842_s27 + $0x9e0] sm:$0xff]  }
 0x125   : > { %12735 = vmatprep.subr.bf16.mxu1 %v14063_v28  ;;  %v14102_v28 = vld [vmem:[%s14842_s27 + $0x928] sm:$0xff]  }
 0x126   : > { %12714 = vmatpush3.bf16.msra.mxu0 %v14062_v27  ;;  %v14101_v27 = vld [vmem:[%s14842_s27 + $0x968] sm:$0xff]  }
 0x127   : > { %12715 = vmatprep.subr.bf16.mxu0 %v14065_v30  ;;  %v14104_v30 = vld [vmem:[%s14842_s27 + $0x9a8] sm:$0xff]  }
 0x128   : > { %12736 = vmatpush3.bf16.msra.mxu1 %v14064_v29  ;;  %v14103_v29 = vld [vmem:[%s14842_s27 + $0x9e8] sm:$0xff]  }
 0x129   : > { %12737 = vmatprep.subr.bf16.mxu1 %v14067_v32 }
 0x12a   : > { %12716 = vmatpush3.bf16.msra.mxu0 %v14066_v31  ;;  %v14105_v31 = vld [vmem:[%s14842_s27 + $0x970] sm:$0xff]  }
 0x12b   : > { %12717 = vmatprep.subr.bf16.mxu0 %v14069_v34 }
 0x12c   : > { %v12415_v40 = vpop.f32.mrb[4].mxu0  ;;  %12738 = vmatpush3.bf16.msra.mxu1 %v14068_v33  ;;  %v14106_v33 = vld [vmem:[%s14842_s27 + $0x930] sm:$0xff]  }
 0x12d   : > { %v12416_v45 = vpop.f32.mrb[5].mxu0  ;;  %12739 = vmatprep.subr.bf16.mxu1 %v14071_v36  ;;  %v12437_v49 = vpop.f32.mrb[4].mxu1 }
 0x12e   : > { %v12417_v47 = vadd.f32 %v12416_v45, %v12415_v40  ;;  %v12418_v48 = vpop.f32.mrb[6].mxu0  ;;  %12718 = vmatpush3.bf16.msra.mxu0 %v14070_v35  ;;  %v12438_v53 = vpop.f32.mrb[5].mxu1  ;;  %v14107_v35 = vld [vmem:[%s14842_s27 + $0x9f0] sm:$0xff]   ;;  %v14109_v40 = vld [vmem:[%s14842_s27 + $0x978] sm:$0xff]  }
 0x12f   : > { %v12419_v52 = vpop.f32.mrb[7].mxu0  ;;  %12719 = vmatprep.subr.bf16.mxu0 %v14073_v38  ;;  %v12439_v57 = vadd.f32 %v12438_v53, %v12437_v49  ;;  %v12440_v58 = vpop.f32.mrb[6].mxu1  ;;  %v14111_v49 = vld [vmem:[%s14842_s27 + $0x9f8] sm:$0xff]   ;;  %v2444_v53 = vrot.slane %v15183_v51, %v14880_v42  ;;  %v14120_v51 = vld [vmem:[%s14842_s27 + $0xac8] sm:$0xff]  }
 0x130   : > { %v8898_v56 = vadd.f32 %v12417_v47, %v15148_v10  ;;  %12740 = vmatpush3.bf16.msra.mxu1 %v14072_v37  ;;  %v12441_v61 = vpop.f32.mrb[7].mxu1  ;;  %v14085_v10 = vld [vmem:[%s14842_s27 + $0x948] sm:$0xff]   ;;  %v14110_v47 = vld [vmem:[%s14842_s27 + $0x938] sm:$0xff]  }
 0x131   : > { %12741 = vmatprep.subr.bf16.mxu1 %v14075_v46  ;;  %v14113_v52 = vld [vmem:[%s14842_s27 + $0x9b8] sm:$0xff]   ;;  %v2460_v58 = vcombine.high %v2444_v53, %v2444_v53  ;;  %v14121_v61 = vld [vmem:[%s14842_s27 + $0xa88] sm:$0xff]  }
 0x132   : > { %v15193_v0 = vadd.f32 %v12439_v57, %v8898_v56  ;;  %12720 = vmatpush3.bf16.msra.mxu0 %v14074_v41  ;;  %v14116_v56 = vld [vmem:[%s14842_s27 + $0xac0] sm:$0xff]  }
 0x133   : > { %12721 = vmatprep.subr.bf16.mxu0 %v14077_v55  ;;  %v14115_v55 = vld [vmem:[%s14842_s27 + $0xa00] sm:$0xff]  }
 0x134   : > { %12742 = vmatpush3.bf16.msra.mxu1 %v14076_v54  ;;  %v14114_v54 = vld [vmem:[%s14842_s27 + $0xa40] sm:$0xff]  }
 0x135   : > { %12743 = vmatprep.subr.bf16.mxu1 %v14079_v62  ;;  %v14117_v57 = vld [vmem:[%s14842_s27 + $0xa80] sm:$0xff]   ;;  %v14122_v62 = vld [vmem:[%s14842_s27 + $0xa50] sm:$0xff]  }
 0x136   : > { %12722 = vmatpush3.bf16.msra.mxu0 %v14078_v59  ;;  %v14118_v59 = vld [vmem:[%s14842_s27 + $0xa48] sm:$0xff]  }
 0x137   : > { %12751 = vmatprep.subr.bf16.mxu0 %v14081_v4  ;;  %v14128_v4 = vld [vmem:[%s14842_s27 + $0xad8] sm:$0xff]  }
 0x138   : > { %12744 = vmatpush3.bf16.msra.mxu1 %v14080_v1  ;;  %v14125_v1 = vld [vmem:[%s14842_s27 + $0xa90] sm:$0xff]  }
 0x139   : > { %9456 = vmatmul.mubr.bf16.vlgmr.msra.gmra.mrb[32].mxu0 %v2437_v3  ;;  %12773 = vmatprep.subr.bf16.mxu1 %v14083_v7  ;;  %v14127_v3 = vld [vmem:[%s14842_s27 + $0xa18] sm:$0xff]   ;;  %v14131_v7 = vld [vmem:[%s14842_s27 + $0xa20] sm:$0xff]  }
 0x13a   : > { %12752 = vmatpush3.bf16.msra.mxu0 %v14082_v5  ;;  %9535 = vmatprep.mubr.bf16.mxu0 %v2458_v6  ;;  %v14129_v5 = vld [vmem:[%s14842_s27 + $0xa98] sm:$0xff]   ;;  %v14130_v6 = vld [vmem:[%s14842_s27 + $0xa60] sm:$0xff]  }
 0x13b   : > { %9496 = vmatmul.mubr.bf16.vlgmr.msra.gmra.mrb[32].mxu1 %v2459_v9  ;;  %12753 = vmatprep.subr.bf16.mxu0 %v14085_v10  ;;  %v14133_v9 = vld [vmem:[%s14842_s27 + $0xaa0] sm:$0xff]   ;;  %v14134_v10 = vld [vmem:[%s14842_s27 + $0xa68] sm:$0xff]  }
 0x13c   : > { %12774 = vmatpush3.bf16.msra.mxu1 %v14084_v8  ;;  %9575 = vmatprep.mubr.bf16.mxu1 %v2462_v12  ;;  %v14132_v8 = vld [vmem:[%s14842_s27 + $0xae0] sm:$0xff]   ;;  %v14136_v12 = vld [vmem:[%s14842_s27 + $0xae8] sm:$0xff]  }
 0x13d   : > { %12775 = vmatprep.subr.bf16.mxu1 %v14087_v13  ;;  %v14137_v13 = vld [vmem:[%s14842_s27 + $0xaa8] sm:$0xff]  }
 0x13e   : > { %12754 = vmatpush3.bf16.msra.mxu0 %v14086_v11  ;;  %v14135_v11 = vld [vmem:[%s14842_s27 + $0xa28] sm:$0xff]  }
 0x13f   : > { %12755 = vmatprep.subr.bf16.mxu0 %v14089_v15 }
 0x140   : > { %12776 = vmatpush3.bf16.msra.mxu1 %v14088_v14  ;;  %v14138_v14 = vld [vmem:[%s14842_s27 + $0xa70] sm:$0xff]  }
 0x141   : > { %12777 = vmatprep.subr.bf16.mxu1 %v14091_v17  ;;  %v289_v17 = vld [vmem:[%s14837_s23 + $0x28] sm:$0xff] }
 0x142   : > { %12756 = vmatpush3.bf16.msra.mxu0 %v14090_v16  ;;  %v14139_v16 = vld [vmem:[%s14842_s27 + $0xa30] sm:$0xff]  }
 0x143   : > { %12757 = vmatprep.subr.bf16.mxu0 %v14093_v19  ;;  %v14140_v19 = vld [vmem:[%s14842_s27 + $0xaf0] sm:$0xff]  }
 0x144   : > { %12778 = vmatpush3.bf16.msra.mxu1 %v14092_v18 }
 0x145   : > { %12779 = vmatprep.subr.bf16.mxu1 %v14095_v21  ;;  %v2463_v21 = vcombine.high %v289_v17, %v289_v17 }
 0x146   : > { %12758 = vmatpush3.bf16.msra.mxu0 %v14094_v20  ;;  %v2470_v20 = vrot.slane %v289_v17, %v14880_v42 }
 0x147   : > { %12759 = vmatprep.subr.bf16.mxu0 %v14097_v23 }
 0x148   : > { %12780 = vmatpush3.bf16.msra.mxu1 %v14096_v22 }
 0x149   : > { %12781 = vmatprep.subr.bf16.mxu1 %v14099_v25 }
 0x14a   : > { %12760 = vmatpush3.bf16.msra.mxu0 %v14098_v24 }
 0x14b   : > { %12761 = vmatprep.subr.bf16.mxu0 %v14101_v27  ;;  %v14141_v27 = vld [vmem:[%s14842_s27 + $0xab0] sm:$0xff]  }
 0x14c   : > { %v12459_v32 = vpop.f32.mrb[8].mxu0  ;;  %12782 = vmatpush3.bf16.msra.mxu1 %v14100_v26 }
 0x14d   : > { %v12460_v34 = vpop.f32.mrb[9].mxu0  ;;  %12783 = vmatprep.subr.bf16.mxu1 %v14103_v29  ;;  %v2478_v29 = vcombine.high %v2470_v20, %v2470_v20 }
 0x14e   : > { %v12461_v36 = vadd.f32 %v12460_v34, %v12459_v32  ;;  %v12462_v37 = vpop.f32.mrb[10].mxu0  ;;  %v12481_v38 = vpop.f32.mrb[8].mxu1  ;;  %12762 = vmatpush3.bf16.msra.mxu0 %v14102_v28  ;;  %v14142_v28 = vld [vmem:[%s14842_s27 + $0xa78] sm:$0xff]  }
 0x14f   : > { %v12463_v41 = vpop.f32.mrb[11].mxu0  ;;  %v12482_v43 = vpop.f32.mrb[9].mxu1  ;;  %12763 = vmatprep.subr.bf16.mxu0 %v14105_v31  ;;  %v14143_v34 = vld [vmem:[%s14842_s27 + $0xa38] sm:$0xff]   ;;  %v2500_v37 = vrot.slane %v2478_v29, %v14880_v42  ;;  %v14180_v29 = vld [vmem:[%s14842_s27 + $0xc00] sm:$0xff]  }
 0x150   : > { %v8978_v44 = vadd.f32 %v12461_v36, %v15193_v0  ;;  %v12483_v45 = vadd.f32 %v12482_v43, %v12481_v38  ;;  %12784 = vmatpush3.bf16.msra.mxu1 %v14104_v30  ;;  %v12484_v46 = vpop.f32.mrb[10].mxu1  ;;  %v14124_v0 = vld [vmem:[%s14842_s27 + $0xad0] sm:$0xff]   ;;  %v15267_v30 = vrot.slane %v2463_v21, %v14880_v42  ;;  %v14144_v36 = vld [vmem:[%s14842_s27 + $0xaf8] sm:$0xff]   ;;  %v2486_v41 = vrot.slane %v2470_v20, %v14880_v42  ;;  %v14146_v43 = vld [vmem:[%s14842_s27 + $0xb40] sm:$0xff]  }
 0x151   : > { %v12485_v48 = vpop.f32.mrb[11].mxu1  ;;  %12785 = vmatprep.subr.bf16.mxu1 %v14107_v35 }
 0x152   : > { %v15230_v50 = vadd.f32 %v12483_v45, %v8978_v44  ;;  %12764 = vmatpush3.bf16.msra.mxu0 %v14106_v33  ;;  %v2479_v38 = vcombine.high %v15267_v30, %v15267_v30  ;;  %v2510_v44 = vcombine.high %v2500_v37, %v2500_v37  ;;  %v14147_v45 = vld [vmem:[%s14842_s27 + $0xb00] sm:$0xff]  }
 0x153   : > { %12765 = vmatprep.subr.bf16.mxu0 %v14109_v40  ;;  %v14145_v40 = vld [vmem:[%s14842_s27 + $0xab8] sm:$0xff]   ;;  %v14149_v48 = vld [vmem:[%s14842_s27 + $0xb80] sm:$0xff]  }
 0x154   : > { %12786 = vmatpush3.bf16.msra.mxu1 %v14108_v39  ;;  %v2507_v46 = vrot.slane %v2479_v38, %v14880_v42  ;;  %v14188_v38 = vld [vmem:[%s14842_s27 + $0xc10] sm:$0xff]  }
 0x155   : > { %12787 = vmatprep.subr.bf16.mxu1 %v14111_v49  ;;  %v2508_v49 = vcombine.high %v2486_v41, %v2486_v41 }
 0x156   : > { %12766 = vmatpush3.bf16.msra.mxu0 %v14110_v47  ;;  %v14148_v47 = vld [vmem:[%s14842_s27 + $0xbc0] sm:$0xff]  }
 0x157   : > { %12795 = vmatprep.subr.bf16.mxu0 %v14114_v54  ;;  %v14152_v54 = vld [vmem:[%s14842_s27 + $0xbc8] sm:$0xff]  }
 0x158   : > { %12788 = vmatpush3.bf16.msra.mxu1 %v14113_v52  ;;  %v14151_v52 = vld [vmem:[%s14842_s27 + $0xb08] sm:$0xff]  }
 0x159   : > { %9536 = vmatmul.mubr.bf16.vlgmr.msra.gmra.mrb[36].mxu0 %v2444_v53  ;;  %12817 = vmatprep.subr.bf16.mxu1 %v14116_v56  ;;  %v2511_v53 = vcombine.high %v2507_v46, %v2507_v46  ;;  %v14154_v56 = vld [vmem:[%s14842_s27 + $0xb50] sm:$0xff]  }
 0x15a   : > { %12796 = vmatpush3.bf16.msra.mxu0 %v14115_v55  ;;  %9615 = vmatprep.mubr.bf16.mxu0 %v2500_v37  ;;  %v14153_v55 = vld [vmem:[%s14842_s27 + $0xb88] sm:$0xff]   ;;  %v14187_v37 = vld [vmem:[%s14842_s27 + $0xc50] sm:$0xff]  }
 0x15b   : > { %9576 = vmatmul.mubr.bf16.vlgmr.msra.gmra.mrb[36].mxu1 %v2460_v58  ;;  %12797 = vmatprep.subr.bf16.mxu0 %v14118_v59  ;;  %v14156_v58 = vld [vmem:[%s14842_s27 + $0xbd0] sm:$0xff]  }
 0x15c   : > { %12818 = vmatpush3.bf16.msra.mxu1 %v14117_v57  ;;  %9655 = vmatprep.mubr.bf16.mxu1 %v2510_v44  ;;  %v14155_v57 = vld [vmem:[%s14842_s27 + $0xb10] sm:$0xff]   ;;  %v14193_v44 = vld [vmem:[%s14842_s27 + $0xcd8] sm:$0xff]  }
 0x15d   : > { %12819 = vmatprep.subr.bf16.mxu1 %v14120_v51  ;;  %v14157_v59 = vld [vmem:[%s14842_s27 + $0xb90] sm:$0xff]   ;;  %v14159_v51 = vld [vmem:[%s14842_s27 + $0xb18] sm:$0xff]  }
 0x15e   : > { %12798 = vmatpush3.bf16.msra.mxu0 %v14119_v60  ;;  %v14158_v60 = vld [vmem:[%s14842_s27 + $0xb58] sm:$0xff]  }
 0x15f   : > { %12799 = vmatprep.subr.bf16.mxu0 %v14122_v62  ;;  %v14161_v62 = vld [vmem:[%s14842_s27 + $0xb98] sm:$0xff]  }
 0x160   : > { %12820 = vmatpush3.bf16.msra.mxu1 %v14121_v61  ;;  %v14160_v61 = vld [vmem:[%s14842_s27 + $0xbd8] sm:$0xff]  }
 0x161   : > { %12821 = vmatprep.subr.bf16.mxu1 %v14124_v0  ;;  %v14163_v0 = vld [vmem:[%s14842_s27 + $0xb20] sm:$0xff]  }
 0x162   : > { %12800 = vmatpush3.bf16.msra.mxu0 %v14123_v63  ;;  %v14162_v63 = vld [vmem:[%s14842_s27 + $0xb60] sm:$0xff]  }
 0x163   : > { %12801 = vmatprep.subr.bf16.mxu0 %v14126_v2  ;;  %v14165_v2 = vld [vmem:[%s14842_s27 + $0xba0] sm:$0xff]  }
 0x164   : > { %12822 = vmatpush3.bf16.msra.mxu1 %v14125_v1  ;;  %v14164_v1 = vld [vmem:[%s14842_s27 + $0xbe0] sm:$0xff]  }
 0x165   : > { %12823 = vmatprep.subr.bf16.mxu1 %v14128_v4  ;;  %v14167_v4 = vld [vmem:[%s14842_s27 + $0xb28] sm:$0xff]  }
 0x166   : > { %12802 = vmatpush3.bf16.msra.mxu0 %v14127_v3  ;;  %v14166_v3 = vld [vmem:[%s14842_s27 + $0xb68] sm:$0xff]  }
 0x167   : > { %12803 = vmatprep.subr.bf16.mxu0 %v14130_v6  ;;  %v14169_v6 = vld [vmem:[%s14842_s27 + $0xba8] sm:$0xff]  }
 0x168   : > { %12824 = vmatpush3.bf16.msra.mxu1 %v14129_v5  ;;  %v14168_v5 = vld [vmem:[%s14842_s27 + $0xbe8] sm:$0xff]  }
 0x169   : > { %12825 = vmatprep.subr.bf16.mxu1 %v14132_v8 }
 0x16a   : > { %12804 = vmatpush3.bf16.msra.mxu0 %v14131_v7  ;;  %v14170_v7 = vld [vmem:[%s14842_s27 + $0xb70] sm:$0xff]  }
 0x16b   : > { %12805 = vmatprep.subr.bf16.mxu0 %v14134_v10 }
 0x16c   : > { %v12503_v15 = vpop.f32.mrb[12].mxu0  ;;  %12826 = vmatpush3.bf16.msra.mxu1 %v14133_v9  ;;  %v14171_v9 = vld [vmem:[%s14842_s27 + $0xb30] sm:$0xff]  }
 0x16d   : > { %v12504_v18 = vpop.f32.mrb[13].mxu0  ;;  %12827 = vmatprep.subr.bf16.mxu1 %v14136_v12 }
 0x16e   : > { %v12505_v22 = vadd.f32 %v12504_v18, %v12503_v15  ;;  %v12506_v23 = vpop.f32.mrb[14].mxu0  ;;  %v12525_v24 = vpop.f32.mrb[12].mxu1  ;;  %12806 = vmatpush3.bf16.msra.mxu0 %v14135_v11  ;;  %v14172_v11 = vld [vmem:[%s14842_s27 + $0xbf0] sm:$0xff]  }
 0x16f   : > { %v12507_v25 = vpop.f32.mrb[15].mxu0  ;;  %v12526_v26 = vpop.f32.mrb[13].mxu1  ;;  %12807 = vmatprep.subr.bf16.mxu0 %v14138_v14  ;;  %v14173_v15 = vld [vmem:[%s14842_s27 + $0xbb0] sm:$0xff]  }
 0x170   : > { %v9058_v31 = vadd.f32 %v12505_v22, %v15230_v50  ;;  %v12527_v32 = vadd.f32 %v12526_v26, %v12525_v24  ;;  %12828 = vmatpush3.bf16.msra.mxu1 %v14137_v13  ;;  %v12528_v33 = vpop.f32.mrb[14].mxu1  ;;  %v14150_v50 = vld [vmem:[%s14842_s27 + $0xb48] sm:$0xff]   ;;  %v14175_v22 = vld [vmem:[%s14842_s27 + $0xb38] sm:$0xff]  }
 0x171   : > { %v12529_v35 = vpop.f32.mrb[15].mxu1  ;;  %12829 = vmatprep.subr.bf16.mxu1 %v14140_v19  ;;  %v14176_v24 = vld [vmem:[%s14842_s27 + $0xbf8] sm:$0xff]  }
 0x172   : > { %v15275_v39 = vadd.f32 %v12527_v32, %v9058_v31  ;;  %12808 = vmatpush3.bf16.msra.mxu0 %v14139_v16  ;;  %v14174_v16 = vld [vmem:[%s14842_s27 + $0xb78] sm:$0xff]   ;;  %v14181_v31 = vld [vmem:[%s14842_s27 + $0xcc0] sm:$0xff]   ;;  %v14184_v35 = vld [vmem:[%s14842_s27 + $0xc08] sm:$0xff]  }
 0x173   : > { %12809 = vmatprep.subr.bf16.mxu0 %v14142_v28  ;;  %v14178_v26 = vld [vmem:[%s14842_s27 + $0xbb8] sm:$0xff]   ;;  %v14179_v28 = vld [vmem:[%s14842_s27 + $0xc40] sm:$0xff]  }
 0x174   : > { %12830 = vmatpush3.bf16.msra.mxu1 %v14141_v27  ;;  %v2493_v27 = vrot.slane %v15267_v30, %v14880_v42  ;;  %v14182_v32 = vld [vmem:[%s14842_s27 + $0xc80] sm:$0xff]   ;;  %v14185_v30 = vld [vmem:[%s14842_s27 + $0xcc8] sm:$0xff]  }
 0x175   : > { %12831 = vmatprep.subr.bf16.mxu1 %v14144_v36  ;;  %v14186_v36 = vld [vmem:[%s14842_s27 + $0xc88] sm:$0xff]  }
 0x176   : > { %12810 = vmatpush3.bf16.msra.mxu0 %v14143_v34  ;;  %v2509_v33 = vcombine.high %v2493_v27, %v2493_v27  ;;  %v14183_v34 = vld [vmem:[%s14842_s27 + $0xc48] sm:$0xff]  }
 0x177   : > { %12839 = vmatprep.subr.bf16.mxu0 %v14146_v43  ;;  %v14192_v43 = vld [vmem:[%s14842_s27 + $0xc18] sm:$0xff]  }
 0x178   : > { %12832 = vmatpush3.bf16.msra.mxu1 %v14145_v40  ;;  %v14190_v40 = vld [vmem:[%s14842_s27 + $0xc90] sm:$0xff]  }
 0x179   : > { %9616 = vmatmul.mubr.bf16.vlgmr.msra.gmra.mrb[40].mxu0 %v2486_v41  ;;  %12861 = vmatprep.subr.bf16.mxu1 %v14148_v47  ;;  %v14191_v41 = vld [vmem:[%s14842_s27 + $0xc58] sm:$0xff]   ;;  %v14196_v47 = vld [vmem:[%s14842_s27 + $0xc20] sm:$0xff]  }
 0x17a   : > { %12840 = vmatpush3.bf16.msra.mxu0 %v14147_v45  ;;  %9695 = vmatprep.mubr.bf16.mxu0 %v2507_v46  ;;  %v14194_v45 = vld [vmem:[%s14842_s27 + $0xc98] sm:$0xff]   ;;  %v14195_v46 = vld [vmem:[%s14842_s27 + $0xc60] sm:$0xff]  }
 0x17b   : > { %9656 = vmatmul.mubr.bf16.vlgmr.msra.gmra.mrb[40].mxu1 %v2508_v49  ;;  %12841 = vmatprep.subr.bf16.mxu0 %v14150_v50  ;;  %v14198_v49 = vld [vmem:[%s14842_s27 + $0xca0] sm:$0xff]   ;;  %v14199_v50 = vld [vmem:[%s14842_s27 + $0xc68] sm:$0xff]  }
 0x17c   : > { %12862 = vmatpush3.bf16.msra.mxu1 %v14149_v48  ;;  %9735 = vmatprep.mubr.bf16.mxu1 %v2511_v53  ;;  %v14197_v48 = vld [vmem:[%s14842_s27 + $0xce0] sm:$0xff]   ;;  %v14201_v53 = vld [vmem:[%s14842_s27 + $0xce8] sm:$0xff]  }
 0x17d   : > { %12863 = vmatprep.subr.bf16.mxu1 %v14152_v54  ;;  %v14202_v54 = vld [vmem:[%s14842_s27 + $0xca8] sm:$0xff]  }
 0x17e   : > { %12842 = vmatpush3.bf16.msra.mxu0 %v14151_v52  ;;  %v14200_v52 = vld [vmem:[%s14842_s27 + $0xc28] sm:$0xff]  }
 0x17f   : > { %12843 = vmatprep.subr.bf16.mxu0 %v14154_v56 }
 0x180   : > { %12864 = vmatpush3.bf16.msra.mxu1 %v14153_v55  ;;  %v14203_v55 = vld [vmem:[%s14842_s27 + $0xc70] sm:$0xff]  }
 0x181   : > { %12865 = vmatprep.subr.bf16.mxu1 %v14156_v58 }
 0x182   : > { %12844 = vmatpush3.bf16.msra.mxu0 %v14155_v57  ;;  %v14204_v57 = vld [vmem:[%s14842_s27 + $0xc30] sm:$0xff]  }
 0x183   : > { %12845 = vmatprep.subr.bf16.mxu0 %v14158_v60  ;;  %v290_v60 = vld [vmem:[%s14837_s23 + $0x30] sm:$0xff] }
 0x184   : > { %12866 = vmatpush3.bf16.msra.mxu1 %v14157_v59  ;;  %v14205_v59 = vld [vmem:[%s14842_s27 + $0xcf0] sm:$0xff]  }
 0x185   : > { %12867 = vmatprep.subr.bf16.mxu1 %v14160_v61 }
 0x186   : > { %12846 = vmatpush3.bf16.msra.mxu0 %v14159_v51 }
 0x187   : > { %12847 = vmatprep.subr.bf16.mxu0 %v14162_v63  ;;  %v2519_v63 = vrot.slane %v290_v60, %v14880_v42 }
 0x188   : > { %12868 = vmatpush3.bf16.msra.mxu1 %v14161_v62 }
 0x189   : > { %12869 = vmatprep.subr.bf16.mxu1 %v14164_v1 }
 0x18a   : > { %12848 = vmatpush3.bf16.msra.mxu0 %v14163_v0  ;;  %v2512_v0 = vcombine.high %v290_v60, %v290_v60 }
 0x18b   : > { %12849 = vmatprep.subr.bf16.mxu0 %v14166_v3  ;;  %v14206_v3 = vld [vmem:[%s14842_s27 + $0xcb0] sm:$0xff]  }
 0x18c   : > { %v12547_v8 = vpop.f32.mrb[16].mxu0  ;;  %12870 = vmatpush3.bf16.msra.mxu1 %v14165_v2 }
 0x18d   : > { %v12548_v10 = vpop.f32.mrb[17].mxu0  ;;  %12871 = vmatprep.subr.bf16.mxu1 %v14168_v5 }
 0x18e   : > { %v12549_v12 = vadd.f32 %v12548_v10, %v12547_v8  ;;  %v12550_v13 = vpop.f32.mrb[18].mxu0  ;;  %v12569_v14 = vpop.f32.mrb[16].mxu1  ;;  %12850 = vmatpush3.bf16.msra.mxu0 %v14167_v4  ;;  %v14207_v4 = vld [vmem:[%s14842_s27 + $0xc78] sm:$0xff]  }
 0x18f   : > { %v12551_v17 = vpop.f32.mrb[19].mxu0  ;;  %v12570_v18 = vpop.f32.mrb[17].mxu1  ;;  %12851 = vmatprep.subr.bf16.mxu0 %v14170_v7  ;;  %v14208_v8 = vld [vmem:[%s14842_s27 + $0xc38] sm:$0xff]  }
 0x190   : > { %v9138_v19 = vadd.f32 %v12549_v12, %v15275_v39  ;;  %v12571_v20 = vadd.f32 %v12570_v18, %v12569_v14  ;;  %12872 = vmatpush3.bf16.msra.mxu1 %v14169_v6  ;;  %v12572_v21 = vpop.f32.mrb[18].mxu1  ;;  %v14189_v39 = vld [vmem:[%s14842_s27 + $0xcd0] sm:$0xff]   ;;  %v15352_v12 = vrot.slane %v2512_v0, %v14880_v42  ;;  %v14211_v17 = vld [vmem:[%s14842_s27 + $0xd40] sm:$0xff]   ;;  %v14241_v0 = vld [vmem:[%s14842_s27 + $0xdf8] sm:$0xff]  }
 0x191   : > { %v12573_v23 = vpop.f32.mrb[19].mxu1  ;;  %12873 = vmatprep.subr.bf16.mxu1 %v14172_v11  ;;  %v14209_v11 = vld [vmem:[%s14842_s27 + $0xcf8] sm:$0xff]   ;;  %v14213_v21 = vld [vmem:[%s14842_s27 + $0xdc0] sm:$0xff]  }
 0x192   : > { %v15312_v25 = vadd.f32 %v12571_v20, %v9138_v19  ;;  %12852 = vmatpush3.bf16.msra.mxu0 %v14171_v9  ;;  %v2527_v9 = vcombine.high %v2519_v63, %v2519_v63  ;;  %v2528_v18 = vcombine.high %v15352_v12, %v15352_v12  ;;  %v14212_v20 = vld [vmem:[%s14842_s27 + $0xd00] sm:$0xff]  }
 0x193   : > { %12853 = vmatprep.subr.bf16.mxu0 %v14174_v16  ;;  %v2535_v16 = vrot.slane %v2519_v63, %v14880_v42  ;;  %v14214_v23 = vld [vmem:[%s14842_s27 + $0xd80] sm:$0xff]  }
 0x194   : > { %12874 = vmatpush3.bf16.msra.mxu1 %v14173_v15  ;;  %v2549_v14 = vrot.slane %v2527_v9, %v14880_v42  ;;  %v14210_v15 = vld [vmem:[%s14842_s27 + $0xcb8] sm:$0xff]   ;;  %v14248_v9 = vld [vmem:[%s14842_s27 + $0xe48] sm:$0xff]  }
 0x195   : > { %12875 = vmatprep.subr.bf16.mxu1 %v14176_v24  ;;  %v2557_v24 = vcombine.high %v2535_v16, %v2535_v16 }
 0x196   : > { %12854 = vmatpush3.bf16.msra.mxu0 %v14175_v22  ;;  %v2559_v19 = vcombine.high %v2549_v14, %v2549_v14  ;;  %v2556_v22 = vrot.slane %v2528_v18, %v14880_v42  ;;  %v14257_v18 = vld [vmem:[%s14842_s27 + $0xe18] sm:$0xff]  }
 0x197   : > { %12883 = vmatprep.subr.bf16.mxu0 %v14179_v28  ;;  %v14217_v28 = vld [vmem:[%s14842_s27 + $0xdc8] sm:$0xff]  }
 0x198   : > { %12876 = vmatpush3.bf16.msra.mxu1 %v14178_v26  ;;  %v14216_v26 = vld [vmem:[%s14842_s27 + $0xd08] sm:$0xff]  }
 0x199   : > { %9696 = vmatmul.mubr.bf16.vlgmr.msra.gmra.mrb[44].mxu0 %v2493_v27  ;;  %12905 = vmatprep.subr.bf16.mxu1 %v14181_v31  ;;  %v2560_v27 = vcombine.high %v2556_v22, %v2556_v22  ;;  %v14219_v31 = vld [vmem:[%s14842_s27 + $0xd50] sm:$0xff]  }
 0x19a   : > { %12884 = vmatpush3.bf16.msra.mxu0 %v14180_v29  ;;  %9775 = vmatprep.mubr.bf16.mxu0 %v2549_v14  ;;  %v14218_v29 = vld [vmem:[%s14842_s27 + $0xd88] sm:$0xff]   ;;  %v14253_v14 = vld [vmem:[%s14842_s27 + $0xe10] sm:$0xff]  }
 0x19b   : > { %9736 = vmatmul.mubr.bf16.vlgmr.msra.gmra.mrb[44].mxu1 %v2509_v33  ;;  %12885 = vmatprep.subr.bf16.mxu0 %v14183_v34  ;;  %v14221_v33 = vld [vmem:[%s14842_s27 + $0xdd0] sm:$0xff]  }
 0x19c   : > { %12906 = vmatpush3.bf16.msra.mxu1 %v14182_v32  ;;  %9815 = vmatprep.mubr.bf16.mxu1 %v2559_v19  ;;  %v14220_v32 = vld [vmem:[%s14842_s27 + $0xd10] sm:$0xff]   ;;  %v14258_v19 = vld [vmem:[%s14842_s27 + $0xed8] sm:$0xff]  }
 0x19d   : > { %12907 = vmatprep.subr.bf16.mxu1 %v14185_v30  ;;  %v14222_v34 = vld [vmem:[%s14842_s27 + $0xd90] sm:$0xff]   ;;  %v14224_v30 = vld [vmem:[%s14842_s27 + $0xd18] sm:$0xff]  }
 0x19e   : > { %12886 = vmatpush3.bf16.msra.mxu0 %v14184_v35  ;;  %v14223_v35 = vld [vmem:[%s14842_s27 + $0xd58] sm:$0xff]  }
 0x19f   : > { %12887 = vmatprep.subr.bf16.mxu0 %v14187_v37  ;;  %v14226_v37 = vld [vmem:[%s14842_s27 + $0xd98] sm:$0xff]  }
 0x1a0   : > { %12908 = vmatpush3.bf16.msra.mxu1 %v14186_v36  ;;  %v14225_v36 = vld [vmem:[%s14842_s27 + $0xdd8] sm:$0xff]  }
 0x1a1   : > { %12909 = vmatprep.subr.bf16.mxu1 %v14189_v39  ;;  %v14228_v39 = vld [vmem:[%s14842_s27 + $0xd20] sm:$0xff]  }
 0x1a2   : > { %12888 = vmatpush3.bf16.msra.mxu0 %v14188_v38  ;;  %v14227_v38 = vld [vmem:[%s14842_s27 + $0xd60] sm:$0xff]  }
 0x1a3   : > { %12889 = vmatprep.subr.bf16.mxu0 %v14191_v41  ;;  %v14230_v41 = vld [vmem:[%s14842_s27 + $0xda0] sm:$0xff]  }
 0x1a4   : > { %12910 = vmatpush3.bf16.msra.mxu1 %v14190_v40  ;;  %v14229_v40 = vld [vmem:[%s14842_s27 + $0xde0] sm:$0xff]  }
 0x1a5   : > { %12911 = vmatprep.subr.bf16.mxu1 %v14193_v44  ;;  %v14232_v44 = vld [vmem:[%s14842_s27 + $0xd28] sm:$0xff]  }
 0x1a6   : > { %12890 = vmatpush3.bf16.msra.mxu0 %v14192_v43  ;;  %v14231_v43 = vld [vmem:[%s14842_s27 + $0xd68] sm:$0xff]  }
 0x1a7   : > { %12891 = vmatprep.subr.bf16.mxu0 %v14195_v46  ;;  %v14234_v46 = vld [vmem:[%s14842_s27 + $0xda8] sm:$0xff]  }
 0x1a8   : > { %12912 = vmatpush3.bf16.msra.mxu1 %v14194_v45  ;;  %v14233_v45 = vld [vmem:[%s14842_s27 + $0xde8] sm:$0xff]  }
 0x1a9   : > { %12913 = vmatprep.subr.bf16.mxu1 %v14197_v48 }
 0x1aa   : > { %12892 = vmatpush3.bf16.msra.mxu0 %v14196_v47  ;;  %v14235_v47 = vld [vmem:[%s14842_s27 + $0xd70] sm:$0xff]  }
 0x1ab   : > { %12893 = vmatprep.subr.bf16.mxu0 %v14199_v50 }
 0x1ac   : > { %v12591_v56 = vpop.f32.mrb[20].mxu0  ;;  %12914 = vmatpush3.bf16.msra.mxu1 %v14198_v49  ;;  %v14236_v49 = vld [vmem:[%s14842_s27 + $0xd30] sm:$0xff]  }
 0x1ad   : > { %v12592_v58 = vpop.f32.mrb[21].mxu0  ;;  %12915 = vmatprep.subr.bf16.mxu1 %v14201_v53 }
 0x1ae   : > { %v12593_v51 = vadd.f32 %v12592_v58, %v12591_v56  ;;  %v12594_v61 = vpop.f32.mrb[22].mxu0  ;;  %v12613_v62 = vpop.f32.mrb[20].mxu1  ;;  %12894 = vmatpush3.bf16.msra.mxu0 %v14200_v52  ;;  %v14237_v52 = vld [vmem:[%s14842_s27 + $0xdf0] sm:$0xff]  }
 0x1af   : > { %v12595_v1 = vpop.f32.mrb[23].mxu0  ;;  %v12614_v2 = vpop.f32.mrb[21].mxu1  ;;  %12895 = vmatprep.subr.bf16.mxu0 %v14203_v55  ;;  %v14238_v56 = vld [vmem:[%s14842_s27 + $0xdb0] sm:$0xff]  }
 0x1b0   : > { %v9218_v5 = vadd.f32 %v12593_v51, %v15312_v25  ;;  %v12615_v6 = vadd.f32 %v12614_v2, %v12613_v62  ;;  %12916 = vmatpush3.bf16.msra.mxu1 %v14202_v54  ;;  %v12616_v7 = vpop.f32.mrb[22].mxu1  ;;  %v14215_v25 = vld [vmem:[%s14842_s27 + $0xd48] sm:$0xff]   ;;  %v14240_v62 = vld [vmem:[%s14842_s27 + $0xd38] sm:$0xff]  }
 0x1b1   : > { %v12617_v10 = vpop.f32.mrb[23].mxu1  ;;  %12917 = vmatprep.subr.bf16.mxu1 %v14205_v59  ;;  %v14243_v2 = vld [vmem:[%s14842_s27 + $0xdb8] sm:$0xff]   ;;  %v14247_v7 = vld [vmem:[%s14842_s27 + $0xe80] sm:$0xff]  }
 0x1b2   : > { %v15354_v13 = vadd.f32 %v12615_v6, %v9218_v5  ;;  %12896 = vmatpush3.bf16.msra.mxu0 %v14204_v57  ;;  %v14239_v57 = vld [vmem:[%s14842_s27 + $0xd78] sm:$0xff]   ;;  %v14245_v5 = vld [vmem:[%s14842_s27 + $0xe00] sm:$0xff]   ;;  %v14249_v10 = vld [vmem:[%s14842_s27 + $0xe08] sm:$0xff]  }
 0x1b3   : > { %12897 = vmatprep.subr.bf16.mxu0 %v14207_v4  ;;  %v14244_v4 = vld [vmem:[%s14842_s27 + $0xe40] sm:$0xff]  }
 0x1b4   : > { %12918 = vmatpush3.bf16.msra.mxu1 %v14206_v3  ;;  %v2542_v3 = vrot.slane %v15352_v12, %v14880_v42  ;;  %v14246_v6 = vld [vmem:[%s14842_s27 + $0xec0] sm:$0xff]   ;;  %v14251_v12 = vld [vmem:[%s14842_s27 + $0xe88] sm:$0xff]  }
 0x1b5   : > { %12919 = vmatprep.subr.bf16.mxu1 %v14209_v11  ;;  %v14250_v11 = vld [vmem:[%s14842_s27 + $0xec8] sm:$0xff]  }
 0x1b6   : > { %12898 = vmatpush3.bf16.msra.mxu0 %v14208_v8  ;;  %v2558_v8 = vcombine.high %v2542_v3, %v2542_v3 }
 0x1b7   : > { %12927 = vmatprep.subr.bf16.mxu0 %v14211_v17  ;;  %v14256_v17 = vld [vmem:[%s14842_s27 + $0xe58] sm:$0xff]  }
 0x1b8   : > { %12920 = vmatpush3.bf16.msra.mxu1 %v14210_v15  ;;  %v14254_v15 = vld [vmem:[%s14842_s27 + $0xed0] sm:$0xff]  }
 0x1b9   : > { %9776 = vmatmul.mubr.bf16.vlgmr.msra.gmra.mrb[48].mxu0 %v2535_v16  ;;  %12949 = vmatprep.subr.bf16.mxu1 %v14213_v21  ;;  %v14255_v16 = vld [vmem:[%s14842_s27 + $0xe90] sm:$0xff]   ;;  %v14260_v21 = vld [vmem:[%s14842_s27 + $0xe60] sm:$0xff]  }
 0x1ba   : > { %12928 = vmatpush3.bf16.msra.mxu0 %v14212_v20  ;;  %9855 = vmatprep.mubr.bf16.mxu0 %v2556_v22  ;;  %v14259_v20 = vld [vmem:[%s14842_s27 + $0xe98] sm:$0xff]   ;;  %v14261_v22 = vld [vmem:[%s14842_s27 + $0xe20] sm:$0xff]  }
 0x1bb   : > { %9816 = vmatmul.mubr.bf16.vlgmr.msra.gmra.mrb[48].mxu1 %v2557_v24  ;;  %12929 = vmatprep.subr.bf16.mxu0 %v14215_v25  ;;  %v14263_v24 = vld [vmem:[%s14842_s27 + $0xea0] sm:$0xff]   ;;  %v14264_v25 = vld [vmem:[%s14842_s27 + $0xe68] sm:$0xff]  }
 0x1bc   : > { %12950 = vmatpush3.bf16.msra.mxu1 %v14214_v23  ;;  %9895 = vmatprep.mubr.bf16.mxu1 %v2560_v27  ;;  %v14262_v23 = vld [vmem:[%s14842_s27 + $0xee0] sm:$0xff]   ;;  %v14266_v27 = vld [vmem:[%s14842_s27 + $0xee8] sm:$0xff]  }
 0x1bd   : > { %12951 = vmatprep.subr.bf16.mxu1 %v14217_v28  ;;  %v14267_v28 = vld [vmem:[%s14842_s27 + $0xea8] sm:$0xff]  }
 0x1be   : > { %12930 = vmatpush3.bf16.msra.mxu0 %v14216_v26  ;;  %v14265_v26 = vld [vmem:[%s14842_s27 + $0xe28] sm:$0xff]  }
 0x1bf   : > { %12931 = vmatprep.subr.bf16.mxu0 %v14219_v31 }
 0x1c0   : > { %12952 = vmatpush3.bf16.msra.mxu1 %v14218_v29  ;;  %v14268_v29 = vld [vmem:[%s14842_s27 + $0xe70] sm:$0xff]  }
 0x1c1   : > { %12953 = vmatprep.subr.bf16.mxu1 %v14221_v33 }
 0x1c2   : > { %12932 = vmatpush3.bf16.msra.mxu0 %v14220_v32  ;;  %v14269_v32 = vld [vmem:[%s14842_s27 + $0xe30] sm:$0xff]  }
 0x1c3   : > { %12933 = vmatprep.subr.bf16.mxu0 %v14223_v35 }
 0x1c4   : > { %12954 = vmatpush3.bf16.msra.mxu1 %v14222_v34  ;;  %v14270_v34 = vld [vmem:[%s14842_s27 + $0xef0] sm:$0xff]  }
 0x1c5   : > { %12955 = vmatprep.subr.bf16.mxu1 %v14225_v36 }
 0x1c6   : > { %12934 = vmatpush3.bf16.msra.mxu0 %v14224_v30 }
 0x1c7   : > { %12935 = vmatprep.subr.bf16.mxu0 %v14227_v38  ;;  %v14272_v38 = vld [vmem:[%s14842_s27 + $0xe78] sm:$0xff]  }
 0x1c8   : > { %12956 = vmatpush3.bf16.msra.mxu1 %v14226_v37  ;;  %v14271_v37 = vld [vmem:[%s14842_s27 + $0xeb0] sm:$0xff]  }
 0x1c9   : > { %12957 = vmatprep.subr.bf16.mxu1 %v14229_v40 }
 0x1ca   : > { %12936 = vmatpush3.bf16.msra.mxu0 %v14228_v39  ;;  %v291_v39 = vld [vmem:[%s14837_s23 + $0x38] sm:$0xff] }
 0x1cb   : > { %12937 = vmatprep.subr.bf16.mxu0 %v14231_v43  ;;  %v2568_v43 = vrot.slane %v291_v39, %v14880_v42 }
 0x1cc   : > { %v12635_v48 = vpop.f32.mrb[24].mxu0  ;;  %12958 = vmatpush3.bf16.msra.mxu1 %v14230_v41 }
 0x1cd   : > { %v12636_v50 = vpop.f32.mrb[25].mxu0  ;;  %12959 = vmatprep.subr.bf16.mxu1 %v14233_v45 }
 0x1ce   : > { %v12637_v53 = vadd.f32 %v12636_v50, %v12635_v48  ;;  %v12638_v54 = vpop.f32.mrb[26].mxu0  ;;  %v12657_v55 = vpop.f32.mrb[24].mxu1  ;;  %12938 = vmatpush3.bf16.msra.mxu0 %v14232_v44  ;;  %v2561_v44 = vcombine.high %v291_v39, %v291_v39  ;;  %v14273_v48 = vld [vmem:[%s14842_s27 + $0xe38] sm:$0xff]  }
 0x1cf   : > { %v12639_v58 = vpop.f32.mrb[27].mxu0  ;;  %v12658_v59 = vpop.f32.mrb[25].mxu1  ;;  %12939 = vmatprep.subr.bf16.mxu0 %v14235_v47  ;;  %v14274_v50 = vld [vmem:[%s14842_s27 + $0xef8] sm:$0xff]  }
 0x1d0   : > { %v9298_v60 = vadd.f32 %v12637_v53, %v15354_v13  ;;  %v12659_v51 = vadd.f32 %v12658_v59, %v12657_v55  ;;  %12960 = vmatpush3.bf16.msra.mxu1 %v14234_v46  ;;  %v12660_v61 = vpop.f32.mrb[26].mxu1  ;;  %v14252_v13 = vld [vmem:[%s14842_s27 + $0xe50] sm:$0xff]   ;;  %v15434_v53 = vrot.slane %v2561_v44, %v14880_v42  ;;  %v14275_v55 = vld [vmem:[%s14842_s27 + $0xeb8] sm:$0xff]   ;;  %v14276_v58 = vld [vmem:[%s14842_s27 + $0xf40] sm:$0xff]  }
 0x1d1   : > { %v12661_v63 = vpop.f32.mrb[27].mxu1  ;;  %12961 = vmatprep.subr.bf16.mxu1 %v14237_v52  ;;  %v2576_v52 = vcombine.high %v2568_v43, %v2568_v43  ;;  %v14278_v61 = vld [vmem:[%s14842_s27 + $0xfc0] sm:$0xff]   ;;  %v14306_v39 = vld [vmem:[%s14842_s27 + $0xff8] sm:$0xff]  }
 0x1d2   : > { %v15394_v1 = vadd.f32 %v12659_v51, %v9298_v60  ;;  %12940 = vmatpush3.bf16.msra.mxu0 %v14236_v49  ;;  %v2577_v59 = vcombine.high %v15434_v53, %v15434_v53  ;;  %v14277_v60 = vld [vmem:[%s14842_s27 + $0xf00] sm:$0xff]  }
 0x1d3   : > { %12941 = vmatprep.subr.bf16.mxu0 %v14239_v57  ;;  %v2584_v57 = vrot.slane %v2568_v43, %v14880_v42  ;;  %v14279_v63 = vld [vmem:[%s14842_s27 + $0xf80] sm:$0xff]   ;;  %v2591_v43 = vrot.slane %v15434_v53, %v14880_v42  ;;  %v14316_v53 = vld [vmem:[%s14842_s27 + $0x1088] sm:$0xff]  }
 0x1d4   : > { %12962 = vmatpush3.bf16.msra.mxu1 %v14238_v56  ;;  %v2598_v56 = vrot.slane %v2576_v52, %v14880_v42  ;;  %v14309_v44 = vld [vmem:[%s14842_s27 + $0x1040] sm:$0xff]   ;;  %v14315_v52 = vld [vmem:[%s14842_s27 + $0x10c8] sm:$0xff]  }
 0x1d5   : > { %12963 = vmatprep.subr.bf16.mxu1 %v14241_v0  ;;  %v2606_v0 = vcombine.high %v2584_v57, %v2584_v57 }
 0x1d6   : > { %12942 = vmatpush3.bf16.msra.mxu0 %v14240_v62  ;;  %v2608_v51 = vcombine.high %v2598_v56, %v2598_v56  ;;  %v2605_v62 = vrot.slane %v2577_v59, %v14880_v42  ;;  %v14322_v59 = vld [vmem:[%s14842_s27 + $0x1018] sm:$0xff]  }
 0x1d7   : > { %12971 = vmatprep.subr.bf16.mxu0 %v14244_v4  ;;  %v14282_v4 = vld [vmem:[%s14842_s27 + $0xfc8] sm:$0xff]  }
 0x1d8   : > { %12964 = vmatpush3.bf16.msra.mxu1 %v14243_v2  ;;  %v14281_v2 = vld [vmem:[%s14842_s27 + $0xf08] sm:$0xff]  }
 0x1d9   : > { %9856 = vmatmul.mubr.bf16.vlgmr.msra.gmra.mrb[52].mxu0 %v2542_v3  ;;  %12993 = vmatprep.subr.bf16.mxu1 %v14246_v6  ;;  %v2609_v3 = vcombine.high %v2605_v62, %v2605_v62  ;;  %v14284_v6 = vld [vmem:[%s14842_s27 + $0xf50] sm:$0xff]  }
 0x1da   : > { %12972 = vmatpush3.bf16.msra.mxu0 %v14245_v5  ;;  %9935 = vmatprep.mubr.bf16.mxu0 %v2598_v56  ;;  %v14283_v5 = vld [vmem:[%s14842_s27 + $0xf88] sm:$0xff]   ;;  %v14319_v56 = vld [vmem:[%s14842_s27 + $0x10d0] sm:$0xff]  }
 0x1db   : > { %9896 = vmatmul.mubr.bf16.vlgmr.msra.gmra.mrb[52].mxu1 %v2558_v8  ;;  %12973 = vmatprep.subr.bf16.mxu0 %v14248_v9  ;;  %v14286_v8 = vld [vmem:[%s14842_s27 + $0xfd0] sm:$0xff]  }
 0x1dc   : > { %12994 = vmatpush3.bf16.msra.mxu1 %v14247_v7  ;;  %9975 = vmatprep.mubr.bf16.mxu1 %v2608_v51  ;;  %v14285_v7 = vld [vmem:[%s14842_s27 + $0xf10] sm:$0xff]   ;;  %v14324_v51 = vld [vmem:[%s14842_s27 + $0x1098] sm:$0xff]  }
 0x1dd   : > { %12995 = vmatprep.subr.bf16.mxu1 %v14250_v11  ;;  %v14287_v9 = vld [vmem:[%s14842_s27 + $0xf90] sm:$0xff]   ;;  %v14289_v11 = vld [vmem:[%s14842_s27 + $0xf18] sm:$0xff]  }
 0x1de   : > { %12974 = vmatpush3.bf16.msra.mxu0 %v14249_v10  ;;  %v14288_v10 = vld [vmem:[%s14842_s27 + $0xf58] sm:$0xff]  }
 0x1df   : > { %12975 = vmatprep.subr.bf16.mxu0 %v14252_v13  ;;  %v14291_v13 = vld [vmem:[%s14842_s27 + $0xf98] sm:$0xff]  }
 0x1e0   : > { %12996 = vmatpush3.bf16.msra.mxu1 %v14251_v12  ;;  %v14290_v12 = vld [vmem:[%s14842_s27 + $0xfd8] sm:$0xff]  }
 0x1e1   : > { %12997 = vmatprep.subr.bf16.mxu1 %v14254_v15  ;;  %v14293_v15 = vld [vmem:[%s14842_s27 + $0xf20] sm:$0xff]  }
 0x1e2   : > { %12976 = vmatpush3.bf16.msra.mxu0 %v14253_v14  ;;  %v14292_v14 = vld [vmem:[%s14842_s27 + $0xf60] sm:$0xff]  }
 0x1e3   : > { %12977 = vmatprep.subr.bf16.mxu0 %v14256_v17  ;;  %v14295_v17 = vld [vmem:[%s14842_s27 + $0xfa0] sm:$0xff]  }
 0x1e4   : > { %12998 = vmatpush3.bf16.msra.mxu1 %v14255_v16  ;;  %v14294_v16 = vld [vmem:[%s14842_s27 + $0xfe0] sm:$0xff]  }
 0x1e5   : > { %12999 = vmatprep.subr.bf16.mxu1 %v14258_v19  ;;  %v14297_v19 = vld [vmem:[%s14842_s27 + $0xf28] sm:$0xff]  }
 0x1e6   : > { %12978 = vmatpush3.bf16.msra.mxu0 %v14257_v18  ;;  %v14296_v18 = vld [vmem:[%s14842_s27 + $0xf68] sm:$0xff]  }
 0x1e7   : > { %12979 = vmatprep.subr.bf16.mxu0 %v14260_v21  ;;  %v14299_v21 = vld [vmem:[%s14842_s27 + $0xfa8] sm:$0xff]  }
 0x1e8   : > { %13000 = vmatpush3.bf16.msra.mxu1 %v14259_v20  ;;  %v14298_v20 = vld [vmem:[%s14842_s27 + $0xfe8] sm:$0xff]  }
 0x1e9   : > { %13001 = vmatprep.subr.bf16.mxu1 %v14262_v23 }
 0x1ea   : > { %12980 = vmatpush3.bf16.msra.mxu0 %v14261_v22  ;;  %v14300_v22 = vld [vmem:[%s14842_s27 + $0xf70] sm:$0xff]  }
 0x1eb   : > { %12981 = vmatprep.subr.bf16.mxu0 %v14264_v25 }
 0x1ec   : > { %v12679_v31 = vpop.f32.mrb[28].mxu0  ;;  %13002 = vmatpush3.bf16.msra.mxu1 %v14263_v24  ;;  %v14301_v24 = vld [vmem:[%s14842_s27 + $0xf30] sm:$0xff]  }
 0x1ed   : > { %v12680_v33 = vpop.f32.mrb[29].mxu0  ;;  %13003 = vmatprep.subr.bf16.mxu1 %v14266_v27 }
 0x1ee   : > { %v12681_v35 = vadd.f32 %v12680_v33, %v12679_v31  ;;  %v12682_v30 = vpop.f32.mrb[30].mxu0  ;;  %v12701_v36 = vpop.f32.mrb[28].mxu1  ;;  %12982 = vmatpush3.bf16.msra.mxu0 %v14265_v26  ;;  %v14302_v26 = vld [vmem:[%s14842_s27 + $0xff0] sm:$0xff]  }
 0x1ef   : > { %v12683_v40 = vpop.f32.mrb[31].mxu0  ;;  %v12702_v41 = vpop.f32.mrb[29].mxu1  ;;  %12983 = vmatprep.subr.bf16.mxu0 %v14268_v29  ;;  %v14303_v31 = vld [vmem:[%s14842_s27 + $0xfb0] sm:$0xff]  }
 0x1f0   : > { %v9378_v45 = vadd.f32 %v12681_v35, %v15394_v1  ;;  %v12703_v46 = vadd.f32 %v12702_v41, %v12701_v36  ;;  %13004 = vmatpush3.bf16.msra.mxu1 %v14267_v28  ;;  %v12704_v47 = vpop.f32.mrb[30].mxu1  ;;  %v14280_v1 = vld [vmem:[%s14842_s27 + $0xf48] sm:$0xff]   ;;  %v14308_v41 = vld [vmem:[%s14842_s27 + $0xfb8] sm:$0xff]  }
 0x1f1   : > { %v12705_v49 = vpop.f32.mrb[31].mxu1  ;;  %13005 = vmatprep.subr.bf16.mxu1 %v14270_v34  ;;  %v14312_v47 = vld [vmem:[%s14842_s27 + $0x1080] sm:$0xff]  }
 0x1f2   : > { %v15436_v54 = vadd.f32 %v12703_v46, %v9378_v45  ;;  %12984 = vmatpush3.bf16.msra.mxu0 %v14269_v32  ;;  %v14304_v32 = vld [vmem:[%s14842_s27 + $0xf78] sm:$0xff]   ;;  %v14310_v45 = vld [vmem:[%s14842_s27 + $0x1000] sm:$0xff]   ;;  %v14313_v49 = vld [vmem:[%s14842_s27 + $0x1048] sm:$0xff]  }
 0x1f3   : > { %12985 = vmatprep.subr.bf16.mxu0 %v14272_v38  ;;  %v14311_v46 = vld [vmem:[%s14842_s27 + $0x10c0] sm:$0xff]  }
 0x1f4   : > { %13006 = vmatpush3.bf16.msra.mxu1 %v14271_v37  ;;  %v14305_v37 = vld [vmem:[%s14842_s27 + $0xf38] sm:$0xff]  }
 0x1f5   : > { %13007 = vmatprep.subr.bf16.mxu1 %v14274_v50  ;;  %v14314_v50 = vld [vmem:[%s14842_s27 + $0x1008] sm:$0xff]  }
 0x1f6   : > { %12986 = vmatpush3.bf16.msra.mxu0 %v14273_v48  ;;  %v2607_v48 = vcombine.high %v2591_v43, %v2591_v43 }
 0x1f7   : > { %13015 = vmatprep.subr.bf16.mxu0 %v14276_v58  ;;  %v14321_v58 = vld [vmem:[%s14842_s27 + $0x1058] sm:$0xff]  }
 0x1f8   : > { %13008 = vmatpush3.bf16.msra.mxu1 %v14275_v55  ;;  %v14318_v55 = vld [vmem:[%s14842_s27 + $0x1010] sm:$0xff]  }
 0x1f9   : > { %9936 = vmatmul.mubr.bf16.vlgmr.msra.gmra.mrb[56].mxu0 %v2584_v57  ;;  %13037 = vmatprep.subr.bf16.mxu1 %v14278_v61  ;;  %v14320_v57 = vld [vmem:[%s14842_s27 + $0x1090] sm:$0xff]   ;;  %v14325_v61 = vld [vmem:[%s14842_s27 + $0x1060] sm:$0xff]  }
 0x1fa   : > { %13016 = vmatpush3.bf16.msra.mxu0 %v14277_v60  ;;  %10015 = vmatprep.mubr.bf16.mxu0 %v2605_v62  ;;  %v14323_v60 = vld [vmem:[%s14842_s27 + $0x10d8] sm:$0xff]   ;;  %v14326_v62 = vld [vmem:[%s14842_s27 + $0x1020] sm:$0xff]  }
 0x1fb   : > { %9976 = vmatmul.mubr.bf16.vlgmr.msra.gmra.mrb[56].mxu1 %v2606_v0  ;;  %13017 = vmatprep.subr.bf16.mxu0 %v14280_v1  ;;  %v14328_v0 = vld [vmem:[%s14842_s27 + $0x10a0] sm:$0xff]   ;;  %v14329_v1 = vld [vmem:[%s14842_s27 + $0x1068] sm:$0xff]  }
 0x1fc   : > { %13038 = vmatpush3.bf16.msra.mxu1 %v14279_v63  ;;  %10055 = vmatprep.mubr.bf16.mxu1 %v2609_v3  ;;  %v14327_v63 = vld [vmem:[%s14842_s27 + $0x10e0] sm:$0xff]   ;;  %v14331_v3 = vld [vmem:[%s14842_s27 + $0x10e8] sm:$0xff]  }
 0x1fd   : > { %13039 = vmatprep.subr.bf16.mxu1 %v14282_v4  ;;  %v14332_v4 = vld [vmem:[%s14842_s27 + $0x10a8] sm:$0xff]  }
 0x1fe   : > { %13018 = vmatpush3.bf16.msra.mxu0 %v14281_v2  ;;  %v14330_v2 = vld [vmem:[%s14842_s27 + $0x1028] sm:$0xff]  }
 0x1ff   : > { %13019 = vmatprep.subr.bf16.mxu0 %v14284_v6 }
 0x200   : > { %13040 = vmatpush3.bf16.msra.mxu1 %v14283_v5  ;;  %v14333_v5 = vld [vmem:[%s14842_s27 + $0x1070] sm:$0xff]  }
 0x201   : > { %13041 = vmatprep.subr.bf16.mxu1 %v14286_v8 }
 0x202   : > { %13020 = vmatpush3.bf16.msra.mxu0 %v14285_v7  ;;  %v14334_v7 = vld [vmem:[%s14842_s27 + $0x1030] sm:$0xff]  }
 0x203   : > { %13021 = vmatprep.subr.bf16.mxu0 %v14288_v10 }
 0x204   : > { %13042 = vmatpush3.bf16.msra.mxu1 %v14287_v9  ;;  %v14335_v9 = vld [vmem:[%s14842_s27 + $0x10f0] sm:$0xff]  }
 0x205   : > { %13043 = vmatprep.subr.bf16.mxu1 %v14290_v12 }
 0x206   : > { %13022 = vmatpush3.bf16.msra.mxu0 %v14289_v11 }
 0x207   : > { %13023 = vmatprep.subr.bf16.mxu0 %v14292_v14  ;;  %v14337_v14 = vld [vmem:[%s14842_s27 + $0x1078] sm:$0xff]  }
 0x208   : > { %13044 = vmatpush3.bf16.msra.mxu1 %v14291_v13  ;;  %v14336_v13 = vld [vmem:[%s14842_s27 + $0x10b0] sm:$0xff]  }
 0x209   : > { %13045 = vmatprep.subr.bf16.mxu1 %v14294_v16 }
 0x20a   : > { %13024 = vmatpush3.bf16.msra.mxu0 %v14293_v15 }
 0x20b   : > { %13025 = vmatprep.subr.bf16.mxu0 %v14296_v18 }
 0x20c   : > { %v12723_v23 = vpop.f32.mrb[32].mxu0  ;;  %13046 = vmatpush3.bf16.msra.mxu1 %v14295_v17 }
 0x20d   : > { %v12724_v25 = vpop.f32.mrb[33].mxu0  ;;  %13047 = vmatprep.subr.bf16.mxu1 %v14298_v20  ;;  %v14338_v20 = vld [vmem:[%s14842_s27 + $0x1038] sm:$0xff]  }
 0x20e   : > { %v12725_v27 = vadd.f32 %v12724_v25, %v12723_v23  ;;  %v12726_v28 = vpop.f32.mrb[34].mxu0  ;;  %v12745_v29 = vpop.f32.mrb[32].mxu1  ;;  %13026 = vmatpush3.bf16.msra.mxu0 %v14297_v19  ;;  %v14339_v23 = vld [vmem:[%s14842_s27 + $0x10f8] sm:$0xff]  }
 0x20f   : > { %v12727_v33 = vpop.f32.mrb[35].mxu0  ;;  %v12746_v34 = vpop.f32.mrb[33].mxu1  ;;  %13027 = vmatprep.subr.bf16.mxu0 %v14300_v22 }
 0x210   : > { %v9458_v35 = vadd.f32 %v12725_v27, %v15436_v54  ;;  %v12747_v30 = vadd.f32 %v12746_v34, %v12745_v29  ;;  %13048 = vmatpush3.bf16.msra.mxu1 %v14299_v21  ;;  %v12748_v36 = vpop.f32.mrb[34].mxu1  ;;  %v14317_v54 = vld [vmem:[%s14842_s27 + $0x1050] sm:$0xff]   ;;  %v292_v21 = vld [vmem:[%s14837_s23 + $0x40] sm:$0xff]  ;;  %v14340_v27 = vld [vmem:[%s14842_s27 + $0x10b8] sm:$0xff]  }
 0x211   : > { %v12749_v38 = vpop.f32.mrb[35].mxu1  ;;  %13049 = vmatprep.subr.bf16.mxu1 %v14302_v26  ;;  %v2610_v25 = vcombine.high %v292_v21, %v292_v21  ;;  %v14342_v33 = vld [vmem:[%s14842_s27 + $0x1100] sm:$0xff]  }
 0x212   : > { %v15476_v40 = vadd.f32 %v12747_v30, %v9458_v35  ;;  %13028 = vmatpush3.bf16.msra.mxu0 %v14301_v24  ;;  %v2617_v24 = vrot.slane %v292_v21, %v14880_v42  ;;  %v14343_v35 = vld [vmem:[%s14842_s27 + $0x11c0] sm:$0xff]  }
 0x213   : > { %13029 = vmatprep.subr.bf16.mxu0 %v14304_v32  ;;  %v15521_v32 = vrot.slane %v2610_v25, %v14880_v42  ;;  %v14344_v36 = vld [vmem:[%s14842_s27 + $0x1180] sm:$0xff]   ;;  %v14379_v25 = vld [vmem:[%s14842_s27 + $0x1208] sm:$0xff]  }
 0x214   : > { %13050 = vmatpush3.bf16.msra.mxu1 %v14303_v31  ;;  %v2625_v28 = vcombine.high %v2617_v24, %v2617_v24  ;;  %v2633_v29 = vrot.slane %v2617_v24, %v14880_v42  ;;  %v14341_v31 = vld [vmem:[%s14842_s27 + $0x1140] sm:$0xff]   ;;  %v14378_v24 = vld [vmem:[%s14842_s27 + $0x1248] sm:$0xff]  }
 0x215   : > { %13051 = vmatprep.subr.bf16.mxu1 %v14306_v39  ;;  %v2626_v30 = vcombine.high %v15521_v32, %v15521_v32  ;;  %v14345_v39 = vld [vmem:[%s14842_s27 + $0x1148] sm:$0xff]   ;;  %v14376_v21 = vld [vmem:[%s14842_s27 + $0x12c0] sm:$0xff]  }
 0x216   : > { %13030 = vmatpush3.bf16.msra.mxu0 %v14305_v37  ;;  %v2647_v34 = vrot.slane %v2625_v28, %v14880_v42  ;;  %v2655_v38 = vcombine.high %v2633_v29, %v2633_v29  ;;  %v14382_v28 = vld [vmem:[%s14842_s27 + $0x1250] sm:$0xff]  }
 0x217   : > { %13059 = vmatprep.subr.bf16.mxu0 %v14309_v44 }
 0x218   : > { %13052 = vmatpush3.bf16.msra.mxu1 %v14308_v41  ;;  %v2657_v37 = vcombine.high %v2647_v34, %v2647_v34  ;;  %v14346_v41 = vld [vmem:[%s14842_s27 + $0x1108] sm:$0xff]  }
 0x219   : > { %10016 = vmatmul.mubr.bf16.vlgmr.msra.gmra.mrb[60].mxu0 %v2591_v43  ;;  %13081 = vmatprep.subr.bf16.mxu1 %v14311_v46  ;;  %v14347_v43 = vld [vmem:[%s14842_s27 + $0x11c8] sm:$0xff]   ;;  %v14349_v46 = vld [vmem:[%s14842_s27 + $0x1150] sm:$0xff]  }
 0x21a   : > { %13060 = vmatpush3.bf16.msra.mxu0 %v14310_v45  ;;  %10095 = vmatprep.mubr.bf16.mxu0 %v2647_v34  ;;  %v14348_v45 = vld [vmem:[%s14842_s27 + $0x1188] sm:$0xff]   ;;  %v14387_v34 = vld [vmem:[%s14842_s27 + $0x1218] sm:$0xff]  }
 0x21b   : > { %10056 = vmatmul.mubr.bf16.vlgmr.msra.gmra.mrb[60].mxu1 %v2607_v48  ;;  %13061 = vmatprep.subr.bf16.mxu0 %v14313_v49  ;;  %v14351_v48 = vld [vmem:[%s14842_s27 + $0x11d0] sm:$0xff]  }
 0x21c   : > { %13082 = vmatpush3.bf16.msra.mxu1 %v14312_v47  ;;  %10135 = vmatprep.mubr.bf16.mxu1 %v2657_v37  ;;  %v14350_v47 = vld [vmem:[%s14842_s27 + $0x1110] sm:$0xff]   ;;  %v14391_v37 = vld [vmem:[%s14842_s27 + $0x1220] sm:$0xff]  }
 0x21d   : > { %13083 = vmatprep.subr.bf16.mxu1 %v14315_v52  ;;  %v14352_v49 = vld [vmem:[%s14842_s27 + $0x1190] sm:$0xff]   ;;  %v14354_v52 = vld [vmem:[%s14842_s27 + $0x1118] sm:$0xff]  }
 0x21e   : > { %13062 = vmatpush3.bf16.msra.mxu0 %v14314_v50  ;;  %v14353_v50 = vld [vmem:[%s14842_s27 + $0x1158] sm:$0xff]  }
 0x21f   : > { %13063 = vmatprep.subr.bf16.mxu0 %v14317_v54  ;;  %v14356_v54 = vld [vmem:[%s14842_s27 + $0x1198] sm:$0xff]  }
 0x220   : > { %13084 = vmatpush3.bf16.msra.mxu1 %v14316_v53  ;;  %v14355_v53 = vld [vmem:[%s14842_s27 + $0x11d8] sm:$0xff]  }
 0x221   : > { %13085 = vmatprep.subr.bf16.mxu1 %v14319_v56  ;;  %v14358_v56 = vld [vmem:[%s14842_s27 + $0x1120] sm:$0xff]  }
 0x222   : > { %13064 = vmatpush3.bf16.msra.mxu0 %v14318_v55  ;;  %v14357_v55 = vld [vmem:[%s14842_s27 + $0x1160] sm:$0xff]  }
 0x223   : > { %13065 = vmatprep.subr.bf16.mxu0 %v14321_v58  ;;  %v14360_v58 = vld [vmem:[%s14842_s27 + $0x11a0] sm:$0xff]  }
 0x224   : > { %13086 = vmatpush3.bf16.msra.mxu1 %v14320_v57  ;;  %v14359_v57 = vld [vmem:[%s14842_s27 + $0x11e0] sm:$0xff]  }
 0x225   : > { %13087 = vmatprep.subr.bf16.mxu1 %v14323_v60  ;;  %v14362_v60 = vld [vmem:[%s14842_s27 + $0x1128] sm:$0xff]  }
 0x226   : > { %13066 = vmatpush3.bf16.msra.mxu0 %v14322_v59  ;;  %v14361_v59 = vld [vmem:[%s14842_s27 + $0x1168] sm:$0xff]  }
 0x227   : > { %13067 = vmatprep.subr.bf16.mxu0 %v14325_v61  ;;  %v14364_v61 = vld [vmem:[%s14842_s27 + $0x11a8] sm:$0xff]  }
 0x228   : > { %13088 = vmatpush3.bf16.msra.mxu1 %v14324_v51  ;;  %v14363_v51 = vld [vmem:[%s14842_s27 + $0x11e8] sm:$0xff]  }
 0x229   : > { %13089 = vmatprep.subr.bf16.mxu1 %v14327_v63 }
 0x22a   : > { %13068 = vmatpush3.bf16.msra.mxu0 %v14326_v62  ;;  %v14365_v62 = vld [vmem:[%s14842_s27 + $0x1170] sm:$0xff]  }
 0x22b   : > { %13069 = vmatprep.subr.bf16.mxu0 %v14329_v1 }
 0x22c   : > { %v12767_v6 = vpop.f32.mrb[36].mxu0  ;;  %13090 = vmatpush3.bf16.msra.mxu1 %v14328_v0  ;;  %v14366_v0 = vld [vmem:[%s14842_s27 + $0x1130] sm:$0xff]  }
 0x22d   : > { %v12768_v8 = vpop.f32.mrb[37].mxu0  ;;  %13091 = vmatprep.subr.bf16.mxu1 %v14331_v3 }
 0x22e   : > { %v12769_v10 = vadd.f32 %v12768_v8, %v12767_v6  ;;  %v12770_v11 = vpop.f32.mrb[38].mxu0  ;;  %v12789_v12 = vpop.f32.mrb[36].mxu1  ;;  %13070 = vmatpush3.bf16.msra.mxu0 %v14330_v2  ;;  %v14367_v2 = vld [vmem:[%s14842_s27 + $0x11f0] sm:$0xff]  }
 0x22f   : > { %v12771_v15 = vpop.f32.mrb[39].mxu0  ;;  %v12790_v16 = vpop.f32.mrb[37].mxu1  ;;  %13071 = vmatprep.subr.bf16.mxu0 %v14333_v5  ;;  %v14368_v6 = vld [vmem:[%s14842_s27 + $0x11b0] sm:$0xff]  }
 0x230   : > { %v9538_v17 = vadd.f32 %v12769_v10, %v15476_v40  ;;  %v12791_v18 = vadd.f32 %v12790_v16, %v12789_v12  ;;  %13092 = vmatpush3.bf16.msra.mxu1 %v14332_v4  ;;  %v12792_v19 = vpop.f32.mrb[38].mxu1  ;;  %v2654_v40 = vrot.slane %v2626_v30, %v14880_v42  ;;  %v14371_v15 = vld [vmem:[%s14842_s27 + $0x11f8] sm:$0xff]  }
 0x231   : > { %v12793_v22 = vpop.f32.mrb[39].mxu1  ;;  %13093 = vmatprep.subr.bf16.mxu1 %v14335_v9  ;;  %v14374_v19 = vld [vmem:[%s14842_s27 + $0x1240] sm:$0xff]   ;;  %v14389_v30 = vld [vmem:[%s14842_s27 + $0x1298] sm:$0xff]  }
 0x232   : > { %v15515_v26 = vadd.f32 %v12791_v18, %v9538_v17  ;;  %13072 = vmatpush3.bf16.msra.mxu0 %v14334_v7  ;;  %v2658_v44 = vcombine.high %v2654_v40, %v2654_v40  ;;  %v14369_v7 = vld [vmem:[%s14842_s27 + $0x1178] sm:$0xff]   ;;  %v2640_v18 = vrot.slane %v15521_v32, %v14880_v42  ;;  %v14377_v22 = vld [vmem:[%s14842_s27 + $0x1280] sm:$0xff]   ;;  %v14385_v32 = vld [vmem:[%s14842_s27 + $0x1290] sm:$0xff]  }
 0x233   : > { %13073 = vmatprep.subr.bf16.mxu0 %v14337_v14  ;;  %v14373_v17 = vld [vmem:[%s14842_s27 + $0x11b8] sm:$0xff]  }
 0x234   : > { %13094 = vmatpush3.bf16.msra.mxu1 %v14336_v13  ;;  %v14370_v13 = vld [vmem:[%s14842_s27 + $0x1138] sm:$0xff]  }
 0x235   : > { %13095 = vmatprep.subr.bf16.mxu1 %v14339_v23  ;;  %v2656_v23 = vcombine.high %v2640_v18, %v2640_v18 }
 0x236   : > { %13074 = vmatpush3.bf16.msra.mxu0 %v14338_v20  ;;  %v14375_v20 = vld [vmem:[%s14842_s27 + $0x1200] sm:$0xff]  }
 0x237   : > { %13103 = vmatprep.subr.bf16.mxu0 %v14341_v31  ;;  %v14384_v31 = vld [vmem:[%s14842_s27 + $0x12d0] sm:$0xff]  }
 0x238   : > { %13096 = vmatpush3.bf16.msra.mxu1 %v14340_v27  ;;  %v14381_v27 = vld [vmem:[%s14842_s27 + $0x1288] sm:$0xff]  }
 0x239   : > { %10096 = vmatmul.mubr.bf16.vlgmr.msra.gmra.mrb[64].mxu0 %v2633_v29  ;;  %13125 = vmatprep.subr.bf16.mxu1 %v14343_v35  ;;  %v14383_v29 = vld [vmem:[%s14842_s27 + $0x1210] sm:$0xff]   ;;  %v14388_v35 = vld [vmem:[%s14842_s27 + $0x12d8] sm:$0xff]  }
 0x23a   : > { %13104 = vmatpush3.bf16.msra.mxu0 %v14342_v33  ;;  %10175 = vmatprep.mubr.bf16.mxu0 %v2654_v40  ;;  %v14386_v33 = vld [vmem:[%s14842_s27 + $0x1258] sm:$0xff]   ;;  %v14394_v40 = vld [vmem:[%s14842_s27 + $0x1268] sm:$0xff]  }
 0x23b   : > { %10136 = vmatmul.mubr.bf16.vlgmr.msra.gmra.mrb[64].mxu1 %v2655_v38  ;;  %13105 = vmatprep.subr.bf16.mxu0 %v14345_v39  ;;  %v14392_v38 = vld [vmem:[%s14842_s27 + $0x12e0] sm:$0xff]  }
 0x23c   : > { %13126 = vmatpush3.bf16.msra.mxu1 %v14344_v36  ;;  %10215 = vmatprep.mubr.bf16.mxu1 %v2658_v44  ;;  %v14390_v36 = vld [vmem:[%s14842_s27 + $0x1260] sm:$0xff]   ;;  %v14397_v44 = vld [vmem:[%s14842_s27 + $0x12a8] sm:$0xff]  }
 0x23d   : > { %13127 = vmatprep.subr.bf16.mxu1 %v14347_v43  ;;  %v14393_v39 = vld [vmem:[%s14842_s27 + $0x12a0] sm:$0xff]   ;;  %v14396_v43 = vld [vmem:[%s14842_s27 + $0x12e8] sm:$0xff]  }
 0x23e   : > { %13106 = vmatpush3.bf16.msra.mxu0 %v14346_v41  ;;  %v14395_v41 = vld [vmem:[%s14842_s27 + $0x1228] sm:$0xff]  }
 0x23f   : > { %13107 = vmatprep.subr.bf16.mxu0 %v14349_v46 }
 0x240   : > { %13128 = vmatpush3.bf16.msra.mxu1 %v14348_v45  ;;  %v14398_v45 = vld [vmem:[%s14842_s27 + $0x1270] sm:$0xff]  }
 0x241   : > { %13129 = vmatprep.subr.bf16.mxu1 %v14351_v48 }
 0x242   : > { %13108 = vmatpush3.bf16.msra.mxu0 %v14350_v47  ;;  %v14399_v47 = vld [vmem:[%s14842_s27 + $0x1230] sm:$0xff]  }
 0x243   : > { %13109 = vmatprep.subr.bf16.mxu0 %v14353_v50 }
 0x244   : > { %13130 = vmatpush3.bf16.msra.mxu1 %v14352_v49  ;;  %v14400_v49 = vld [vmem:[%s14842_s27 + $0x12f0] sm:$0xff]  }
 0x245   : > { %13131 = vmatprep.subr.bf16.mxu1 %v14355_v53 }
 0x246   : > { %13110 = vmatpush3.bf16.msra.mxu0 %v14354_v52 }
 0x247   : > { %13111 = vmatprep.subr.bf16.mxu0 %v14357_v55  ;;  %v14402_v55 = vld [vmem:[%s14842_s27 + $0x1278] sm:$0xff]  }
 0x248   : > { %13132 = vmatpush3.bf16.msra.mxu1 %v14356_v54  ;;  %v14401_v54 = vld [vmem:[%s14842_s27 + $0x12b0] sm:$0xff]  }
 0x249   : > { %13133 = vmatprep.subr.bf16.mxu1 %v14359_v57 }
 0x24a   : > { %13112 = vmatpush3.bf16.msra.mxu0 %v14358_v56 }
 0x24b   : > { %13113 = vmatprep.subr.bf16.mxu0 %v14361_v59 }
 0x24c   : > { %v12811_v63 = vpop.f32.mrb[40].mxu0  ;;  %13134 = vmatpush3.bf16.msra.mxu1 %v14360_v58 }
 0x24d   : > { %v12812_v1 = vpop.f32.mrb[41].mxu0  ;;  %13135 = vmatprep.subr.bf16.mxu1 %v14363_v51  ;;  %v14403_v51 = vld [vmem:[%s14842_s27 + $0x1238] sm:$0xff]  }
 0x24e   : > { %v12813_v3 = vadd.f32 %v12812_v1, %v12811_v63  ;;  %v12814_v4 = vpop.f32.mrb[42].mxu0  ;;  %v12833_v5 = vpop.f32.mrb[40].mxu1  ;;  %13114 = vmatpush3.bf16.msra.mxu0 %v14362_v60  ;;  %v293_v63 = vld [vmem:[%s14837_s23 + $0x48] sm:$0xff] }
 0x24f   : > { %v12815_v8 = vpop.f32.mrb[43].mxu0  ;;  %v12834_v9 = vpop.f32.mrb[41].mxu1  ;;  %13115 = vmatprep.subr.bf16.mxu0 %v14365_v62  ;;  %v2666_v1 = vrot.slane %v293_v63, %v14880_v42  ;;  %v14406_v4 = vld [vmem:[%s14842_s27 + $0x1340] sm:$0xff]  }
 0x250   : > { %v9618_v10 = vadd.f32 %v12813_v3, %v15515_v26  ;;  %v12835_v11 = vadd.f32 %v12834_v9, %v12833_v5  ;;  %13136 = vmatpush3.bf16.msra.mxu1 %v14364_v61  ;;  %v12836_v12 = vpop.f32.mrb[42].mxu1  ;;  %v14380_v26 = vld [vmem:[%s14842_s27 + $0x12c8] sm:$0xff]   ;;  %v14404_v61 = vld [vmem:[%s14842_s27 + $0x12f8] sm:$0xff]   ;;  %v2659_v3 = vcombine.high %v293_v63, %v293_v63  ;;  %v14408_v9 = vld [vmem:[%s14842_s27 + $0x13c0] sm:$0xff]  }
 0x251   : > { %v12837_v14 = vpop.f32.mrb[43].mxu1  ;;  %13137 = vmatprep.subr.bf16.mxu1 %v14367_v2  ;;  %v14405_v2 = vld [vmem:[%s14842_s27 + $0x12b8] sm:$0xff]   ;;  %v2674_v5 = vcombine.high %v2666_v1, %v2666_v1 }
 0x252   : > { %v15558_v16 = vadd.f32 %v12835_v11, %v9618_v10  ;;  %13116 = vmatpush3.bf16.msra.mxu0 %v14366_v0  ;;  %v15604_v8 = vrot.slane %v2659_v3, %v14880_v42  ;;  %v14409_v11 = vld [vmem:[%s14842_s27 + $0x1380] sm:$0xff]   ;;  %v14410_v14 = vld [vmem:[%s14842_s27 + $0x1348] sm:$0xff]  }
 0x253   : > { %13117 = vmatprep.subr.bf16.mxu0 %v14369_v7  ;;  %v14407_v7 = vld [vmem:[%s14842_s27 + $0x1300] sm:$0xff]   ;;  %v2696_v10 = vrot.slane %v2674_v5, %v14880_v42  ;;  %v14446_v3 = vld [vmem:[%s14842_s27 + $0x1488] sm:$0xff]   ;;  %v14448_v5 = vld [vmem:[%s14842_s27 + $0x1410] sm:$0xff]  }
 0x254   : > { %13138 = vmatpush3.bf16.msra.mxu1 %v14368_v6  ;;  %v2682_v6 = vrot.slane %v2666_v1, %v14880_v42  ;;  %v2675_v12 = vcombine.high %v15604_v8, %v15604_v8  ;;  %v14444_v1 = vld [vmem:[%s14842_s27 + $0x1408] sm:$0xff]  }
 0x255   : > { %13139 = vmatprep.subr.bf16.mxu1 %v14371_v15  ;;  %v2706_v15 = vcombine.high %v2696_v10, %v2696_v10 }
 0x256   : > { %13118 = vmatpush3.bf16.msra.mxu0 %v14370_v13  ;;  %v2704_v13 = vcombine.high %v2682_v6, %v2682_v6 }
 0x257   : > { %13147 = vmatprep.subr.bf16.mxu0 %v14374_v19  ;;  %v14413_v19 = vld [vmem:[%s14842_s27 + $0x1388] sm:$0xff]  }
 0x258   : > { %13140 = vmatpush3.bf16.msra.mxu1 %v14373_v17  ;;  %v2703_v17 = vrot.slane %v2675_v12, %v14880_v42  ;;  %v14455_v12 = vld [vmem:[%s14842_s27 + $0x1460] sm:$0xff]  }
 0x259   : > { %10176 = vmatmul.mubr.bf16.vlgmr.msra.gmra.mrb[68].mxu0 %v2640_v18  ;;  %13169 = vmatprep.subr.bf16.mxu1 %v14376_v21  ;;  %v14412_v18 = vld [vmem:[%s14842_s27 + $0x13c8] sm:$0xff]   ;;  %v14414_v21 = vld [vmem:[%s14842_s27 + $0x1350] sm:$0xff]  }
 0x25a   : > { %13148 = vmatpush3.bf16.msra.mxu0 %v14375_v20  ;;  %10255 = vmatprep.mubr.bf16.mxu0 %v2696_v10  ;;  %v2707_v20 = vcombine.high %v2703_v17, %v2703_v17  ;;  %v14453_v10 = vld [vmem:[%s14842_s27 + $0x14d8] sm:$0xff]  }
 0x25b   : > { %10216 = vmatmul.mubr.bf16.vlgmr.msra.gmra.mrb[68].mxu1 %v2656_v23  ;;  %13149 = vmatprep.subr.bf16.mxu0 %v14378_v24  ;;  %v14416_v23 = vld [vmem:[%s14842_s27 + $0x13d0] sm:$0xff]  }
 0x25c   : > { %13170 = vmatpush3.bf16.msra.mxu1 %v14377_v22  ;;  %10295 = vmatprep.mubr.bf16.mxu1 %v2706_v15  ;;  %v14415_v22 = vld [vmem:[%s14842_s27 + $0x1310] sm:$0xff]   ;;  %v14458_v15 = vld [vmem:[%s14842_s27 + $0x14a0] sm:$0xff]  }
 0x25d   : > { %13171 = vmatprep.subr.bf16.mxu1 %v14380_v26  ;;  %v14417_v24 = vld [vmem:[%s14842_s27 + $0x1390] sm:$0xff]   ;;  %v14419_v26 = vld [vmem:[%s14842_s27 + $0x1318] sm:$0xff]  }
 0x25e   : > { %13150 = vmatpush3.bf16.msra.mxu0 %v14379_v25  ;;  %v14418_v25 = vld [vmem:[%s14842_s27 + $0x1358] sm:$0xff]  }
 0x25f   : > { %13151 = vmatprep.subr.bf16.mxu0 %v14382_v28  ;;  %v14421_v28 = vld [vmem:[%s14842_s27 + $0x1398] sm:$0xff]  }
 0x260   : > { %13172 = vmatpush3.bf16.msra.mxu1 %v14381_v27  ;;  %v14420_v27 = vld [vmem:[%s14842_s27 + $0x13d8] sm:$0xff]  }
 0x261   : > { %13173 = vmatprep.subr.bf16.mxu1 %v14384_v31  ;;  %v14423_v31 = vld [vmem:[%s14842_s27 + $0x1320] sm:$0xff]  }
 0x262   : > { %13152 = vmatpush3.bf16.msra.mxu0 %v14383_v29  ;;  %v14422_v29 = vld [vmem:[%s14842_s27 + $0x1360] sm:$0xff]  }
 0x263   : > { %13153 = vmatprep.subr.bf16.mxu0 %v14386_v33  ;;  %v14425_v33 = vld [vmem:[%s14842_s27 + $0x13a0] sm:$0xff]  }
 0x264   : > { %13174 = vmatpush3.bf16.msra.mxu1 %v14385_v32  ;;  %v14424_v32 = vld [vmem:[%s14842_s27 + $0x13e0] sm:$0xff]  }
 0x265   : > { %13175 = vmatprep.subr.bf16.mxu1 %v14388_v35  ;;  %v14427_v35 = vld [vmem:[%s14842_s27 + $0x1328] sm:$0xff]  }
 0x266   : > { %13154 = vmatpush3.bf16.msra.mxu0 %v14387_v34  ;;  %v14426_v34 = vld [vmem:[%s14842_s27 + $0x1368] sm:$0xff]  }
 0x267   : > { %13155 = vmatprep.subr.bf16.mxu0 %v14390_v36  ;;  %v14429_v36 = vld [vmem:[%s14842_s27 + $0x13a8] sm:$0xff]  }
 0x268   : > { %13176 = vmatpush3.bf16.msra.mxu1 %v14389_v30  ;;  %v14428_v30 = vld [vmem:[%s14842_s27 + $0x13e8] sm:$0xff]  }
 0x269   : > { %13177 = vmatprep.subr.bf16.mxu1 %v14392_v38 }
 0x26a   : > { %13156 = vmatpush3.bf16.msra.mxu0 %v14391_v37  ;;  %v14430_v37 = vld [vmem:[%s14842_s27 + $0x1370] sm:$0xff]  }
 0x26b   : > { %13157 = vmatprep.subr.bf16.mxu0 %v14394_v40 }
 0x26c   : > { %v12855_v46 = vpop.f32.mrb[44].mxu0  ;;  %13178 = vmatpush3.bf16.msra.mxu1 %v14393_v39  ;;  %v14431_v39 = vld [vmem:[%s14842_s27 + $0x1330] sm:$0xff]  }
 0x26d   : > { %v12856_v48 = vpop.f32.mrb[45].mxu0  ;;  %13179 = vmatprep.subr.bf16.mxu1 %v14396_v43 }
 0x26e   : > { %v12857_v50 = vadd.f32 %v12856_v48, %v12855_v46  ;;  %v12858_v52 = vpop.f32.mrb[46].mxu0  ;;  %v12877_v53 = vpop.f32.mrb[44].mxu1  ;;  %13158 = vmatpush3.bf16.msra.mxu0 %v14395_v41  ;;  %v14432_v41 = vld [vmem:[%s14842_s27 + $0x13f0] sm:$0xff]  }
 0x26f   : > { %v12859_v56 = vpop.f32.mrb[47].mxu0  ;;  %v12878_v57 = vpop.f32.mrb[45].mxu1  ;;  %13159 = vmatprep.subr.bf16.mxu0 %v14398_v45  ;;  %v14433_v46 = vld [vmem:[%s14842_s27 + $0x13b0] sm:$0xff]  }
 0x270   : > { %v9698_v58 = vadd.f32 %v12857_v50, %v15558_v16  ;;  %v12879_v59 = vadd.f32 %v12878_v57, %v12877_v53  ;;  %13180 = vmatpush3.bf16.msra.mxu1 %v14397_v44  ;;  %v12880_v60 = vpop.f32.mrb[46].mxu1  ;;  %v14411_v16 = vld [vmem:[%s14842_s27 + $0x1308] sm:$0xff]   ;;  %v14436_v56 = vld [vmem:[%s14842_s27 + $0x13f8] sm:$0xff]  }
 0x271   : > { %v12881_v62 = vpop.f32.mrb[47].mxu1  ;;  %13181 = vmatprep.subr.bf16.mxu1 %v14400_v49  ;;  %v14439_v60 = vld [vmem:[%s14842_s27 + $0x1440] sm:$0xff]  }
 0x272   : > { %v15596_v0 = vadd.f32 %v12879_v59, %v9698_v58  ;;  %13160 = vmatpush3.bf16.msra.mxu0 %v14399_v47  ;;  %v14434_v47 = vld [vmem:[%s14842_s27 + $0x1378] sm:$0xff]   ;;  %v2689_v59 = vrot.slane %v15604_v8, %v14880_v42  ;;  %v14442_v62 = vld [vmem:[%s14842_s27 + $0x1480] sm:$0xff]  }
 0x273   : > { %13161 = vmatprep.subr.bf16.mxu0 %v14402_v55  ;;  %v14438_v58 = vld [vmem:[%s14842_s27 + $0x13b8] sm:$0xff]  }
 0x274   : > { %13182 = vmatpush3.bf16.msra.mxu1 %v14401_v54  ;;  %v14435_v54 = vld [vmem:[%s14842_s27 + $0x1338] sm:$0xff]   ;;  %v2705_v63 = vcombine.high %v2689_v59, %v2689_v59 }
 0x275   : > { %13183 = vmatprep.subr.bf16.mxu1 %v14404_v61  ;;  %v14441_v61 = vld [vmem:[%s14842_s27 + $0x14c0] sm:$0xff]   ;;  %v14451_v8 = vld [vmem:[%s14842_s27 + $0x1458] sm:$0xff]  }
 0x276   : > { %13162 = vmatpush3.bf16.msra.mxu0 %v14403_v51  ;;  %v14440_v51 = vld [vmem:[%s14842_s27 + $0x1400] sm:$0xff]  }
 0x277   : > { %13191 = vmatprep.subr.bf16.mxu0 %v14406_v4  ;;  %v14447_v4 = vld [vmem:[%s14842_s27 + $0x1450] sm:$0xff]  }
 0x278   : > { %13184 = vmatpush3.bf16.msra.mxu1 %v14405_v2  ;;  %v14445_v2 = vld [vmem:[%s14842_s27 + $0x14c8] sm:$0xff]  }
 0x279   : > { %10256 = vmatmul.mubr.bf16.vlgmr.msra.gmra.mrb[72].mxu0 %v2682_v6  ;;  %13213 = vmatprep.subr.bf16.mxu1 %v14408_v9  ;;  %v14449_v6 = vld [vmem:[%s14842_s27 + $0x14d0] sm:$0xff]   ;;  %v14452_v9 = vld [vmem:[%s14842_s27 + $0x1418] sm:$0xff]  }
 0x27a   : > { %13192 = vmatpush3.bf16.msra.mxu0 %v14407_v7  ;;  %10335 = vmatprep.mubr.bf16.mxu0 %v2703_v17  ;;  %v14450_v7 = vld [vmem:[%s14842_s27 + $0x1490] sm:$0xff]   ;;  %v14460_v17 = vld [vmem:[%s14842_s27 + $0x1428] sm:$0xff]  }
 0x27b   : > { %10296 = vmatmul.mubr.bf16.vlgmr.msra.gmra.mrb[72].mxu1 %v2704_v13  ;;  %13193 = vmatprep.subr.bf16.mxu0 %v14410_v14  ;;  %v14456_v13 = vld [vmem:[%s14842_s27 + $0x1420] sm:$0xff]  }
 0x27c   : > { %13214 = vmatpush3.bf16.msra.mxu1 %v14409_v11  ;;  %10375 = vmatprep.mubr.bf16.mxu1 %v2707_v20  ;;  %v14454_v11 = vld [vmem:[%s14842_s27 + $0x1498] sm:$0xff]   ;;  %v14457_v14 = vld [vmem:[%s14842_s27 + $0x14e0] sm:$0xff]   ;;  %v14463_v20 = vld [vmem:[%s14842_s27 + $0x1470] sm:$0xff]  }
 0x27d   : > { %13215 = vmatprep.subr.bf16.mxu1 %v14412_v18  ;;  %v14461_v18 = vld [vmem:[%s14842_s27 + $0x14e8] sm:$0xff]  }
 0x27e   : > { %13194 = vmatpush3.bf16.msra.mxu0 %v14411_v16  ;;  %v14459_v16 = vld [vmem:[%s14842_s27 + $0x1468] sm:$0xff]  }
 0x27f   : > { %13195 = vmatprep.subr.bf16.mxu0 %v14414_v21 }
 0x280   : > { %13216 = vmatpush3.bf16.msra.mxu1 %v14413_v19  ;;  %v14462_v19 = vld [vmem:[%s14842_s27 + $0x14a8] sm:$0xff]  }
 0x281   : > { %13217 = vmatprep.subr.bf16.mxu1 %v14416_v23 }
 0x282   : > { %13196 = vmatpush3.bf16.msra.mxu0 %v14415_v22  ;;  %v14464_v22 = vld [vmem:[%s14842_s27 + $0x1430] sm:$0xff]  }
 0x283   : > { %13197 = vmatprep.subr.bf16.mxu0 %v14418_v25 }
 0x284   : > { %13218 = vmatpush3.bf16.msra.mxu1 %v14417_v24  ;;  %v14465_v24 = vld [vmem:[%s14842_s27 + $0x14f0] sm:$0xff]  }
 0x285   : > { %13219 = vmatprep.subr.bf16.mxu1 %v14420_v27 }
 0x286   : > { %13198 = vmatpush3.bf16.msra.mxu0 %v14419_v26 }
 0x287   : > { %13199 = vmatprep.subr.bf16.mxu0 %v14422_v29  ;;  %v14467_v29 = vld [vmem:[%s14842_s27 + $0x1478] sm:$0xff]  }
 0x288   : > { %13220 = vmatpush3.bf16.msra.mxu1 %v14421_v28  ;;  %v14466_v28 = vld [vmem:[%s14842_s27 + $0x14b0] sm:$0xff]  }
 0x289   : > { %13221 = vmatprep.subr.bf16.mxu1 %v14424_v32 }
 0x28a   : > { %13200 = vmatpush3.bf16.msra.mxu0 %v14423_v31 }
 0x28b   : > { %13201 = vmatprep.subr.bf16.mxu0 %v14426_v34 }
 0x28c   : > { %v12899_v38 = vpop.f32.mrb[48].mxu0  ;;  %13222 = vmatpush3.bf16.msra.mxu1 %v14425_v33 }
 0x28d   : > { %v12900_v40 = vpop.f32.mrb[49].mxu0  ;;  %13223 = vmatprep.subr.bf16.mxu1 %v14428_v30  ;;  %v14468_v30 = vld [vmem:[%s14842_s27 + $0x1438] sm:$0xff]  }
 0x28e   : > { %v12901_v43 = vadd.f32 %v12900_v40, %v12899_v38  ;;  %v12902_v44 = vpop.f32.mrb[50].mxu0  ;;  %v12921_v45 = vpop.f32.mrb[48].mxu1  ;;  %13202 = vmatpush3.bf16.msra.mxu0 %v14427_v35 }
 0x28f   : > { %v12903_v48 = vpop.f32.mrb[51].mxu0  ;;  %v12922_v49 = vpop.f32.mrb[49].mxu1  ;;  %13203 = vmatprep.subr.bf16.mxu0 %v14430_v37  ;;  %v14469_v37 = vld [vmem:[%s14842_s27 + $0x14f8] sm:$0xff]   ;;  %v14471_v44 = vld [vmem:[%s14842_s27 + $0x1540] sm:$0xff]  }
 0x290   : > { %v9778_v50 = vadd.f32 %v12901_v43, %v15596_v0  ;;  %v12923_v52 = vadd.f32 %v12922_v49, %v12921_v45  ;;  %13224 = vmatpush3.bf16.msra.mxu1 %v14429_v36  ;;  %v12924_v53 = vpop.f32.mrb[50].mxu1  ;;  %v14443_v0 = vld [vmem:[%s14842_s27 + $0x1448] sm:$0xff]   ;;  %v14473_v48 = vld [vmem:[%s14842_s27 + $0x15c0] sm:$0xff]  }
 0x291   : > { %v12925_v55 = vpop.f32.mrb[51].mxu1  ;;  %13225 = vmatprep.subr.bf16.mxu1 %v14432_v41  ;;  %v14470_v41 = vld [vmem:[%s14842_s27 + $0x14b8] sm:$0xff]  }
 0x292   : > { %v15640_v57 = vadd.f32 %v12923_v52, %v9778_v50  ;;  %13204 = vmatpush3.bf16.msra.mxu0 %v14431_v39  ;;  %v294_v39 = vld [vmem:[%s14837_s23 + $0x50] sm:$0xff]  ;;  %v14472_v50 = vld [vmem:[%s14842_s27 + $0x1500] sm:$0xff]  }
 0x293   : > { %13205 = vmatprep.subr.bf16.mxu0 %v14434_v47  ;;  %v2715_v40 = vrot.slane %v294_v39, %v14880_v42  ;;  %v2708_v43 = vcombine.high %v294_v39, %v294_v39  ;;  %v14507_v39 = vld [vmem:[%s14842_s27 + $0x1680] sm:$0xff]  }
 0x294   : > { %13226 = vmatpush3.bf16.msra.mxu1 %v14433_v46 }
 0x295   : > { %13227 = vmatprep.subr.bf16.mxu1 %v14436_v56  ;;  %v2723_v45 = vcombine.high %v2715_v40, %v2715_v40  ;;  %v2731_v46 = vrot.slane %v2715_v40, %v14880_v42  ;;  %v15685_v47 = vrot.slane %v2708_v43, %v14880_v42  ;;  %v14474_v56 = vld [vmem:[%s14842_s27 + $0x1580] sm:$0xff]   ;;  %v14510_v40 = vld [vmem:[%s14842_s27 + $0x16c8] sm:$0xff]   ;;  %v14512_v43 = vld [vmem:[%s14842_s27 + $0x1650] sm:$0xff]  }
 0x296   : > { %13206 = vmatpush3.bf16.msra.mxu0 %v14435_v54  ;;  %v14475_v54 = vld [vmem:[%s14842_s27 + $0x1548] sm:$0xff]  }
 0x297   : > { %13235 = vmatprep.subr.bf16.mxu0 %v14439_v60  ;;  %v2745_v49 = vrot.slane %v2723_v45, %v14880_v42  ;;  %v2724_v52 = vcombine.high %v15685_v47, %v15685_v47  ;;  %v2753_v53 = vcombine.high %v2731_v46, %v2731_v46  ;;  %v14514_v45 = vld [vmem:[%s14842_s27 + $0x16d0] sm:$0xff]  }
 0x298   : > { %13228 = vmatpush3.bf16.msra.mxu1 %v14438_v58  ;;  %v14477_v58 = vld [vmem:[%s14842_s27 + $0x15c8] sm:$0xff]  }
 0x299   : > { %10336 = vmatmul.mubr.bf16.vlgmr.msra.gmra.mrb[76].mxu0 %v2689_v59  ;;  %13257 = vmatprep.subr.bf16.mxu1 %v14441_v61  ;;  %v2755_v55 = vcombine.high %v2745_v49, %v2745_v49  ;;  %v14476_v59 = vld [vmem:[%s14842_s27 + $0x1508] sm:$0xff]  }
 0x29a   : > { %13236 = vmatpush3.bf16.msra.mxu0 %v14440_v51  ;;  %10415 = vmatprep.mubr.bf16.mxu0 %v2745_v49  ;;  %v14479_v51 = vld [vmem:[%s14842_s27 + $0x1550] sm:$0xff]   ;;  %v14478_v61 = vld [vmem:[%s14842_s27 + $0x1588] sm:$0xff]   ;;  %v14518_v49 = vld [vmem:[%s14842_s27 + $0x16d8] sm:$0xff]  }
 0x29b   : > { %10376 = vmatmul.mubr.bf16.vlgmr.msra.gmra.mrb[76].mxu1 %v2705_v63  ;;  %13237 = vmatprep.subr.bf16.mxu0 %v14443_v0  ;;  %v14480_v63 = vld [vmem:[%s14842_s27 + $0x1510] sm:$0xff]   ;;  %v14483_v0 = vld [vmem:[%s14842_s27 + $0x1558] sm:$0xff]  }
 0x29c   : > { %13258 = vmatpush3.bf16.msra.mxu1 %v14442_v62  ;;  %10455 = vmatprep.mubr.bf16.mxu1 %v2755_v55  ;;  %v14481_v62 = vld [vmem:[%s14842_s27 + $0x15d0] sm:$0xff]   ;;  %v14521_v55 = vld [vmem:[%s14842_s27 + $0x1620] sm:$0xff]  }
 0x29d   : > { %13259 = vmatprep.subr.bf16.mxu1 %v14445_v2  ;;  %v14485_v2 = vld [vmem:[%s14842_s27 + $0x15d8] sm:$0xff]  }
 0x29e   : > { %13238 = vmatpush3.bf16.msra.mxu0 %v14444_v1  ;;  %v14482_v1 = vld [vmem:[%s14842_s27 + $0x1590] sm:$0xff]  }
 0x29f   : > { %13239 = vmatprep.subr.bf16.mxu0 %v14447_v4  ;;  %v14487_v4 = vld [vmem:[%s14842_s27 + $0x1560] sm:$0xff]  }
 0x2a0   : > { %13260 = vmatpush3.bf16.msra.mxu1 %v14446_v3  ;;  %v14484_v3 = vld [vmem:[%s14842_s27 + $0x1518] sm:$0xff]  }
 0x2a1   : > { %13261 = vmatprep.subr.bf16.mxu1 %v14449_v6  ;;  %v14489_v6 = vld [vmem:[%s14842_s27 + $0x15e0] sm:$0xff]  }
 0x2a2   : > { %13240 = vmatpush3.bf16.msra.mxu0 %v14448_v5  ;;  %v14486_v5 = vld [vmem:[%s14842_s27 + $0x1598] sm:$0xff]  }
 0x2a3   : > { %13241 = vmatprep.subr.bf16.mxu0 %v14451_v8  ;;  %v14491_v8 = vld [vmem:[%s14842_s27 + $0x1568] sm:$0xff]  }
 0x2a4   : > { %13262 = vmatpush3.bf16.msra.mxu1 %v14450_v7  ;;  %v14488_v7 = vld [vmem:[%s14842_s27 + $0x1520] sm:$0xff]  }
 0x2a5   : > { %13263 = vmatprep.subr.bf16.mxu1 %v14453_v10  ;;  %v14493_v10 = vld [vmem:[%s14842_s27 + $0x15e8] sm:$0xff]  }
 0x2a6   : > { %13242 = vmatpush3.bf16.msra.mxu0 %v14452_v9  ;;  %v14490_v9 = vld [vmem:[%s14842_s27 + $0x15a0] sm:$0xff]  }
 0x2a7   : > { %13243 = vmatprep.subr.bf16.mxu0 %v14455_v12 }
 0x2a8   : > { %13264 = vmatpush3.bf16.msra.mxu1 %v14454_v11  ;;  %v14492_v11 = vld [vmem:[%s14842_s27 + $0x1528] sm:$0xff]  }
 0x2a9   : > { %13265 = vmatprep.subr.bf16.mxu1 %v14457_v14 }
 0x2aa   : > { %13244 = vmatpush3.bf16.msra.mxu0 %v14456_v13  ;;  %v14495_v13 = vld [vmem:[%s14842_s27 + $0x1570] sm:$0xff]  }
 0x2ab   : > { %13245 = vmatprep.subr.bf16.mxu0 %v14459_v16 }
 0x2ac   : > { %v12943_v21 = vpop.f32.mrb[52].mxu0  ;;  %13266 = vmatpush3.bf16.msra.mxu1 %v14458_v15  ;;  %v14494_v15 = vld [vmem:[%s14842_s27 + $0x15a8] sm:$0xff]  }
 0x2ad   : > { %v12944_v23 = vpop.f32.mrb[53].mxu0  ;;  %13267 = vmatprep.subr.bf16.mxu1 %v14461_v18 }
 0x2ae   : > { %v12945_v25 = vadd.f32 %v12944_v23, %v12943_v21  ;;  %v12946_v26 = vpop.f32.mrb[54].mxu0  ;;  %v12965_v27 = vpop.f32.mrb[52].mxu1  ;;  %13246 = vmatpush3.bf16.msra.mxu0 %v14460_v17 }
 0x2af   : > { %v12947_v31 = vpop.f32.mrb[55].mxu0  ;;  %v12966_v32 = vpop.f32.mrb[53].mxu1  ;;  %13247 = vmatprep.subr.bf16.mxu0 %v14463_v20  ;;  %v14497_v20 = vld [vmem:[%s14842_s27 + $0x15f0] sm:$0xff]   ;;  %v14499_v26 = vld [vmem:[%s14842_s27 + $0x1578] sm:$0xff]  }
 0x2b0   : > { %v9858_v33 = vadd.f32 %v12945_v25, %v15640_v57  ;;  %v12967_v34 = vadd.f32 %v12966_v32, %v12965_v27  ;;  %13268 = vmatpush3.bf16.msra.mxu1 %v14462_v19  ;;  %v12968_v35 = vpop.f32.mrb[54].mxu1  ;;  %v2752_v57 = vrot.slane %v2724_v52, %v14880_v42  ;;  %v14496_v19 = vld [vmem:[%s14842_s27 + $0x1530] sm:$0xff]   ;;  %v14501_v31 = vld [vmem:[%s14842_s27 + $0x15f8] sm:$0xff]   ;;  %v14520_v52 = vld [vmem:[%s14842_s27 + $0x1660] sm:$0xff]  }
 0x2b1   : > { %v12969_v36 = vpop.f32.mrb[55].mxu1  ;;  %13269 = vmatprep.subr.bf16.mxu1 %v14465_v24  ;;  %v14500_v32 = vld [vmem:[%s14842_s27 + $0x1538] sm:$0xff]  }
 0x2b2   : > { %v15677_v38 = vadd.f32 %v12967_v34, %v9858_v33  ;;  %13248 = vmatpush3.bf16.msra.mxu0 %v14464_v22  ;;  %v2756_v60 = vcombine.high %v2752_v57, %v2752_v57  ;;  %v2738_v33 = vrot.slane %v15685_v47, %v14880_v42  ;;  %v14504_v34 = vld [vmem:[%s14842_s27 + $0x1640] sm:$0xff]   ;;  %v14503_v35 = vld [vmem:[%s14842_s27 + $0x15b8] sm:$0xff]  }
 0x2b3   : > { %13249 = vmatprep.subr.bf16.mxu0 %v14467_v29  ;;  %v14505_v36 = vld [vmem:[%s14842_s27 + $0x1600] sm:$0xff]   ;;  %v14516_v47 = vld [vmem:[%s14842_s27 + $0x1658] sm:$0xff]  }
 0x2b4   : > { %13270 = vmatpush3.bf16.msra.mxu1 %v14466_v28  ;;  %v14498_v28 = vld [vmem:[%s14842_s27 + $0x15b0] sm:$0xff]  }
 0x2b5   : > { %13271 = vmatprep.subr.bf16.mxu1 %v14469_v37  ;;  %v2754_v37 = vcombine.high %v2738_v33, %v2738_v33 }
 0x2b6   : > { %13250 = vmatpush3.bf16.msra.mxu0 %v14468_v30  ;;  %v14506_v30 = vld [vmem:[%s14842_s27 + $0x16c0] sm:$0xff]  }
 0x2b7   : > { %13279 = vmatprep.subr.bf16.mxu0 %v14471_v44  ;;  %v14511_v44 = vld [vmem:[%s14842_s27 + $0x1688] sm:$0xff]  }
 0x2b8   : > { %13272 = vmatpush3.bf16.msra.mxu1 %v14470_v41  ;;  %v14509_v41 = vld [vmem:[%s14842_s27 + $0x1608] sm:$0xff]  }
 0x2b9   : > { %13301 = vmatprep.subr.bf16.mxu1 %v14473_v48  ;;  %10416 = vmatmul.mubr.bf16.vlgmr.msra.gmra.mrb[80].mxu0 %v2731_v46  ;;  %v14513_v46 = vld [vmem:[%s14842_s27 + $0x1610] sm:$0xff]  }
 0x2ba   : > { %13280 = vmatpush3.bf16.msra.mxu0 %v14472_v50  ;;  %10495 = vmatprep.mubr.bf16.mxu0 %v2752_v57  ;;  %v14515_v48 = vld [vmem:[%s14842_s27 + $0x1690] sm:$0xff]   ;;  %v14517_v50 = vld [vmem:[%s14842_s27 + $0x1618] sm:$0xff]   ;;  %v14523_v57 = vld [vmem:[%s14842_s27 + $0x16a0] sm:$0xff]  }
 0x2bb   : > { %10456 = vmatmul.mubr.bf16.vlgmr.msra.gmra.mrb[80].mxu1 %v2753_v53  ;;  %13281 = vmatprep.subr.bf16.mxu0 %v14475_v54  ;;  %v14519_v53 = vld [vmem:[%s14842_s27 + $0x1698] sm:$0xff]   ;;  %v14522_v54 = vld [vmem:[%s14842_s27 + $0x16e0] sm:$0xff]  }
 0x2bc   : > { %13302 = vmatpush3.bf16.msra.mxu1 %v14474_v56  ;;  %10535 = vmatprep.mubr.bf16.mxu1 %v2756_v60  ;;  %v14524_v56 = vld [vmem:[%s14842_s27 + $0x1668] sm:$0xff]  }
 0x2bd   : > { %13303 = vmatprep.subr.bf16.mxu1 %v14477_v58  ;;  %v14526_v58 = vld [vmem:[%s14842_s27 + $0x16e8] sm:$0xff]  }
 0x2be   : > { %13282 = vmatpush3.bf16.msra.mxu0 %v14476_v59  ;;  %v14525_v59 = vld [vmem:[%s14842_s27 + $0x1628] sm:$0xff]  }
 0x2bf   : > { %13283 = vmatprep.subr.bf16.mxu0 %v14479_v51  ;;  %v14528_v51 = vld [vmem:[%s14842_s27 + $0x1670] sm:$0xff]  }
 0x2c0   : > { %13304 = vmatpush3.bf16.msra.mxu1 %v14478_v61 }
 0x2c1   : > { %13305 = vmatprep.subr.bf16.mxu1 %v14481_v62  ;;  %v14527_v62 = vld [vmem:[%s14842_s27 + $0x16a8] sm:$0xff]  }
 0x2c2   : > { %13284 = vmatpush3.bf16.msra.mxu0 %v14480_v63 }
 0x2c3   : > { %13285 = vmatprep.subr.bf16.mxu0 %v14483_v0 }
 0x2c4   : > { %13306 = vmatpush3.bf16.msra.mxu1 %v14482_v1 }
 0x2c5   : > { %13307 = vmatprep.subr.bf16.mxu1 %v14485_v2  ;;  %v14529_v2 = vld [vmem:[%s14842_s27 + $0x1630] sm:$0xff]  }
 0x2c6   : > { %13286 = vmatpush3.bf16.msra.mxu0 %v14484_v3  ;;  %v14530_v3 = vld [vmem:[%s14842_s27 + $0x16f0] sm:$0xff]  }
 0x2c7   : > { %13287 = vmatprep.subr.bf16.mxu0 %v14487_v4 }
 0x2c8   : > { %13308 = vmatpush3.bf16.msra.mxu1 %v14486_v5 }
 0x2c9   : > { %13309 = vmatprep.subr.bf16.mxu1 %v14489_v6  ;;  %v14531_v6 = vld [vmem:[%s14842_s27 + $0x16b0] sm:$0xff]  }
 0x2ca   : > { %13288 = vmatpush3.bf16.msra.mxu0 %v14488_v7 }
 0x2cb   : > { %13289 = vmatprep.subr.bf16.mxu0 %v14491_v8 }
 0x2cc   : > { %v12987_v12 = vpop.f32.mrb[56].mxu0  ;;  %13310 = vmatpush3.bf16.msra.mxu1 %v14490_v9 }
 0x2cd   : > { %v12988_v14 = vpop.f32.mrb[57].mxu0  ;;  %13311 = vmatprep.subr.bf16.mxu1 %v14493_v10  ;;  %v14532_v10 = vld [vmem:[%s14842_s27 + $0x1678] sm:$0xff]  }
 0x2ce   : > { %v12989_v16 = vadd.f32 %v12988_v14, %v12987_v12  ;;  %v12990_v17 = vpop.f32.mrb[58].mxu0  ;;  %v13009_v18 = vpop.f32.mrb[56].mxu1  ;;  %13290 = vmatpush3.bf16.msra.mxu0 %v14492_v11  ;;  %v14533_v12 = vld [vmem:[%s14842_s27 + $0x1638] sm:$0xff]  }
 0x2cf   : > { %v12991_v21 = vpop.f32.mrb[59].mxu0  ;;  %v13010_v22 = vpop.f32.mrb[57].mxu1  ;;  %13291 = vmatprep.subr.bf16.mxu0 %v14495_v13  ;;  %v14534_v14 = vld [vmem:[%s14842_s27 + $0x16f8] sm:$0xff]  }
 0x2d0   : > { %v9938_v23 = vadd.f32 %v12989_v16, %v15677_v38  ;;  %v13011_v24 = vadd.f32 %v13010_v22, %v13009_v18  ;;  %v13012_v25 = vpop.f32.mrb[58].mxu1  ;;  %13312 = vmatpush3.bf16.msra.mxu1 %v14494_v15  ;;  %v14508_v38 = vld [vmem:[%s14842_s27 + $0x1648] sm:$0xff]   ;;  %v295_v15 = vld [vmem:[%s14837_s23 + $0x58] sm:$0xff]  ;;  %v14537_v22 = vld [vmem:[%s14842_s27 + $0x1700] sm:$0xff]  }
 0x2d1   : > { %v13013_v27 = vpop.f32.mrb[59].mxu1  ;;  %13313 = vmatprep.subr.bf16.mxu1 %v14497_v20  ;;  %v2764_v16 = vrot.slane %v295_v15, %v14880_v42  ;;  %v14535_v17 = vld [vmem:[%s14842_s27 + $0x16b8] sm:$0xff]   ;;  %v2757_v18 = vcombine.high %v295_v15, %v295_v15  ;;  %v14573_v15 = vld [vmem:[%s14842_s27 + $0x1848] sm:$0xff]  }
 0x2d2   : > { %v15720_v29 = vadd.f32 %v13011_v24, %v9938_v23  ;;  %13292 = vmatpush3.bf16.msra.mxu0 %v14496_v19  ;;  %v14536_v19 = vld [vmem:[%s14842_s27 + $0x1740] sm:$0xff]  }
 0x2d3   : > { %13293 = vmatprep.subr.bf16.mxu0 %v14499_v26  ;;  %v2772_v20 = vcombine.high %v2764_v16, %v2764_v16  ;;  %v2780_v21 = vrot.slane %v2764_v16, %v14880_v42  ;;  %v15768_v23 = vrot.slane %v2757_v18, %v14880_v42  ;;  %v14538_v24 = vld [vmem:[%s14842_s27 + $0x17c0] sm:$0xff]   ;;  %v14574_v16 = vld [vmem:[%s14842_s27 + $0x1808] sm:$0xff]  }
 0x2d4   : > { %13314 = vmatpush3.bf16.msra.mxu1 %v14498_v28  ;;  %v14539_v26 = vld [vmem:[%s14842_s27 + $0x1780] sm:$0xff]   ;;  %v14576_v18 = vld [vmem:[%s14842_s27 + $0x1888] sm:$0xff]  }
 0x2d5   : > { %13315 = vmatprep.subr.bf16.mxu1 %v14501_v31  ;;  %v2794_v25 = vrot.slane %v2772_v20, %v14880_v42  ;;  %v2773_v27 = vcombine.high %v15768_v23, %v15768_v23  ;;  %v2802_v28 = vcombine.high %v2780_v21, %v2780_v21  ;;  %v14578_v20 = vld [vmem:[%s14842_s27 + $0x1810] sm:$0xff]  }
 0x2d6   : > { %13294 = vmatpush3.bf16.msra.mxu0 %v14500_v32  ;;  %v14541_v32 = vld [vmem:[%s14842_s27 + $0x1708] sm:$0xff]  }
 0x2d7   : > { %13323 = vmatprep.subr.bf16.mxu0 %v14504_v34  ;;  %v2804_v31 = vcombine.high %v2794_v25, %v2794_v25  ;;  %v14542_v34 = vld [vmem:[%s14842_s27 + $0x17c8] sm:$0xff]  }
 0x2d8   : > { %13316 = vmatpush3.bf16.msra.mxu1 %v14503_v35  ;;  %v14543_v35 = vld [vmem:[%s14842_s27 + $0x1788] sm:$0xff]  }
 0x2d9   : > { %10496 = vmatmul.mubr.bf16.vlgmr.msra.gmra.mrb[84].mxu0 %v2738_v33  ;;  %13345 = vmatprep.subr.bf16.mxu1 %v14506_v30  ;;  %v2801_v33 = vrot.slane %v2773_v27, %v14880_v42  ;;  %v14585_v27 = vld [vmem:[%s14842_s27 + $0x1860] sm:$0xff]  }
 0x2da   : > { %13324 = vmatpush3.bf16.msra.mxu0 %v14505_v36  ;;  %10575 = vmatprep.mubr.bf16.mxu0 %v2794_v25  ;;  %v14544_v36 = vld [vmem:[%s14842_s27 + $0x1750] sm:$0xff]   ;;  %v14583_v25 = vld [vmem:[%s14842_s27 + $0x18d8] sm:$0xff]  }
 0x2db   : > { %10536 = vmatmul.mubr.bf16.vlgmr.msra.gmra.mrb[84].mxu1 %v2754_v37  ;;  %13325 = vmatprep.subr.bf16.mxu0 %v14508_v38  ;;  %v2805_v30 = vcombine.high %v2801_v33, %v2801_v33  ;;  %v14545_v37 = vld [vmem:[%s14842_s27 + $0x1710] sm:$0xff]  }
 0x2dc   : > { %13346 = vmatpush3.bf16.msra.mxu1 %v14507_v39  ;;  %10615 = vmatprep.mubr.bf16.mxu1 %v2804_v31  ;;  %v14546_v38 = vld [vmem:[%s14842_s27 + $0x17d0] sm:$0xff]   ;;  %v14588_v31 = vld [vmem:[%s14842_s27 + $0x18a0] sm:$0xff]  }
 0x2dd   : > { %13347 = vmatprep.subr.bf16.mxu1 %v14510_v40  ;;  %v14547_v39 = vld [vmem:[%s14842_s27 + $0x1790] sm:$0xff]   ;;  %v14548_v40 = vld [vmem:[%s14842_s27 + $0x1758] sm:$0xff]  }
 0x2de   : > { %13326 = vmatpush3.bf16.msra.mxu0 %v14509_v41  ;;  %v14549_v41 = vld [vmem:[%s14842_s27 + $0x1718] sm:$0xff]  }
 0x2df   : > { %13327 = vmatprep.subr.bf16.mxu0 %v14512_v43  ;;  %v14550_v43 = vld [vmem:[%s14842_s27 + $0x17d8] sm:$0xff]  }
 0x2e0   : > { %13348 = vmatpush3.bf16.msra.mxu1 %v14511_v44  ;;  %v14551_v44 = vld [vmem:[%s14842_s27 + $0x1798] sm:$0xff]  }
 0x2e1   : > { %13349 = vmatprep.subr.bf16.mxu1 %v14514_v45  ;;  %v14552_v45 = vld [vmem:[%s14842_s27 + $0x1760] sm:$0xff]  }
 0x2e2   : > { %13328 = vmatpush3.bf16.msra.mxu0 %v14513_v46  ;;  %v14553_v46 = vld [vmem:[%s14842_s27 + $0x1720] sm:$0xff]  }
 0x2e3   : > { %13329 = vmatprep.subr.bf16.mxu0 %v14516_v47  ;;  %v14554_v47 = vld [vmem:[%s14842_s27 + $0x17e0] sm:$0xff]  }
 0x2e4   : > { %13350 = vmatpush3.bf16.msra.mxu1 %v14515_v48  ;;  %v14555_v48 = vld [vmem:[%s14842_s27 + $0x17a0] sm:$0xff]  }
 0x2e5   : > { %13351 = vmatprep.subr.bf16.mxu1 %v14518_v49  ;;  %v14556_v49 = vld [vmem:[%s14842_s27 + $0x1768] sm:$0xff]  }
 0x2e6   : > { %13330 = vmatpush3.bf16.msra.mxu0 %v14517_v50  ;;  %v14557_v50 = vld [vmem:[%s14842_s27 + $0x1728] sm:$0xff]  }
 0x2e7   : > { %13331 = vmatprep.subr.bf16.mxu0 %v14520_v52  ;;  %v14558_v52 = vld [vmem:[%s14842_s27 + $0x17e8] sm:$0xff]  }
 0x2e8   : > { %13352 = vmatpush3.bf16.msra.mxu1 %v14519_v53 }
 0x2e9   : > { %13353 = vmatprep.subr.bf16.mxu1 %v14522_v54  ;;  %v14559_v54 = vld [vmem:[%s14842_s27 + $0x17a8] sm:$0xff]  }
 0x2ea   : > { %13332 = vmatpush3.bf16.msra.mxu0 %v14521_v55 }
 0x2eb   : > { %13333 = vmatprep.subr.bf16.mxu0 %v14524_v56  ;;  %v14560_v56 = vld [vmem:[%s14842_s27 + $0x1770] sm:$0xff]  }
 0x2ec   : > { %v13031_v60 = vpop.f32.mrb[60].mxu0  ;;  %13354 = vmatpush3.bf16.msra.mxu1 %v14523_v57 }
 0x2ed   : > { %v13032_v61 = vpop.f32.mrb[61].mxu0  ;;  %13355 = vmatprep.subr.bf16.mxu1 %v14526_v58 }
 0x2ee   : > { %v13033_v63 = vadd.f32 %v13032_v61, %v13031_v60  ;;  %v13034_v0 = vpop.f32.mrb[62].mxu0  ;;  %v13053_v1 = vpop.f32.mrb[60].mxu1  ;;  %13334 = vmatpush3.bf16.msra.mxu0 %v14525_v59  ;;  %v14561_v60 = vld [vmem:[%s14842_s27 + $0x1730] sm:$0xff]  }
 0x2ef   : > { %v13035_v4 = vpop.f32.mrb[63].mxu0  ;;  %v13054_v5 = vpop.f32.mrb[61].mxu1  ;;  %13335 = vmatprep.subr.bf16.mxu0 %v14528_v51  ;;  %v14562_v51 = vld [vmem:[%s14842_s27 + $0x17f0] sm:$0xff]  }
 0x2f0   : > { %v10018_v7 = vadd.f32 %v13033_v63, %v15720_v29  ;;  %v13055_v8 = vadd.f32 %v13054_v5, %v13053_v1  ;;  %v13056_v9 = vpop.f32.mrb[62].mxu1  ;;  %13356 = vmatpush3.bf16.msra.mxu1 %v14527_v62  ;;  %v14540_v29 = vld [vmem:[%s14842_s27 + $0x1748] sm:$0xff]   ;;  %v14564_v4 = vld [vmem:[%s14842_s27 + $0x1778] sm:$0xff]  }
 0x2f1   : > { %v13057_v11 = vpop.f32.mrb[63].mxu1  ;;  %13357 = vmatprep.subr.bf16.mxu1 %v14530_v3  ;;  %v2787_v9 = vrot.slane %v15768_v23, %v14880_v42  ;;  %v14581_v23 = vld [vmem:[%s14842_s27 + $0x1858] sm:$0xff]  }
 0x2f2   : > { %v15758_v13 = vadd.f32 %v13055_v8, %v10018_v7  ;;  %13336 = vmatpush3.bf16.msra.mxu0 %v14529_v2  ;;  %v14563_v2 = vld [vmem:[%s14842_s27 + $0x17b0] sm:$0xff]   ;;  %v14566_v7 = vld [vmem:[%s14842_s27 + $0x17f8] sm:$0xff]   ;;  %v14570_v11 = vld [vmem:[%s14842_s27 + $0x1800] sm:$0xff]  }
 0x2f3   : > { %13337 = vmatprep.subr.bf16.mxu0 %v14532_v10  ;;  %v14568_v8 = vld [vmem:[%s14842_s27 + $0x17b8] sm:$0xff]   ;;  %v14569_v10 = vld [vmem:[%s14842_s27 + $0x1840] sm:$0xff]  }
 0x2f4   : > { %13358 = vmatpush3.bf16.msra.mxu1 %v14531_v6  ;;  %v14565_v6 = vld [vmem:[%s14842_s27 + $0x1738] sm:$0xff]  }
 0x2f5   : > { %13359 = vmatprep.subr.bf16.mxu1 %v14534_v14  ;;  %v2803_v14 = vcombine.high %v2787_v9, %v2787_v9 }
 0x2f6   : > { %13338 = vmatpush3.bf16.msra.mxu0 %v14533_v12  ;;  %v14571_v12 = vld [vmem:[%s14842_s27 + $0x18c0] sm:$0xff]  }
 0x2f7   : > { %13367 = vmatprep.subr.bf16.mxu0 %v14536_v19  ;;  %v14577_v19 = vld [vmem:[%s14842_s27 + $0x1850] sm:$0xff]  }
 0x2f8   : > { %13360 = vmatpush3.bf16.msra.mxu1 %v14535_v17  ;;  %v14575_v17 = vld [vmem:[%s14842_s27 + $0x18c8] sm:$0xff]  }
 0x2f9   : > { %13389 = vmatprep.subr.bf16.mxu1 %v14538_v24  ;;  %10576 = vmatmul.mubr.bf16.vlgmr.msra.gmra.mrb[88].mxu0 %v2780_v21  ;;  %v14579_v21 = vld [vmem:[%s14842_s27 + $0x18d0] sm:$0xff]   ;;  %v14582_v24 = vld [vmem:[%s14842_s27 + $0x1818] sm:$0xff]  }
 0x2fa   : > { %13368 = vmatpush3.bf16.msra.mxu0 %v14537_v22  ;;  %10655 = vmatprep.mubr.bf16.mxu0 %v2801_v33  ;;  %v14580_v22 = vld [vmem:[%s14842_s27 + $0x1890] sm:$0xff]   ;;  %v14590_v33 = vld [vmem:[%s14842_s27 + $0x1828] sm:$0xff]  }
 0x2fb   : > { %10616 = vmatmul.mubr.bf16.vlgmr.msra.gmra.mrb[88].mxu1 %v2802_v28  ;;  %13369 = vmatprep.subr.bf16.mxu0 %v14540_v29  ;;  %v14586_v28 = vld [vmem:[%s14842_s27 + $0x1820] sm:$0xff]  }
 0x2fc   : > { %13390 = vmatpush3.bf16.msra.mxu1 %v14539_v26  ;;  %10695 = vmatprep.mubr.bf16.mxu1 %v2805_v30  ;;  %v14584_v26 = vld [vmem:[%s14842_s27 + $0x1898] sm:$0xff]   ;;  %v14587_v29 = vld [vmem:[%s14842_s27 + $0x18e0] sm:$0xff]   ;;  %v14592_v30 = vld [vmem:[%s14842_s27 + $0x18a8] sm:$0xff]  }
 0x2fd   : > { %13391 = vmatprep.subr.bf16.mxu1 %v14542_v34  ;;  %v14591_v34 = vld [vmem:[%s14842_s27 + $0x18e8] sm:$0xff]  }
 0x2fe   : > { %13370 = vmatpush3.bf16.msra.mxu0 %v14541_v32  ;;  %v14589_v32 = vld [vmem:[%s14842_s27 + $0x1868] sm:$0xff]  }
 0x2ff   : > { %13371 = vmatprep.subr.bf16.mxu0 %v14544_v36 }
 0x300   : > { %13392 = vmatpush3.bf16.msra.mxu1 %v14543_v35 }
 0x301   : > { %13393 = vmatprep.subr.bf16.mxu1 %v14546_v38 }
 0x302   : > { %13372 = vmatpush3.bf16.msra.mxu0 %v14545_v37  ;;  %v14593_v37 = vld [vmem:[%s14842_s27 + $0x1870] sm:$0xff]  }
 0x303   : > { %13373 = vmatprep.subr.bf16.mxu0 %v14548_v40 }
 0x304   : > { %13394 = vmatpush3.bf16.msra.mxu1 %v14547_v39 }
 0x305   : > { %13395 = vmatprep.subr.bf16.mxu1 %v14550_v43  ;;  %v14595_v43 = vld [vmem:[%s14842_s27 + $0x18f0] sm:$0xff]  }
 0x306   : > { %13374 = vmatpush3.bf16.msra.mxu0 %v14549_v41  ;;  %v14594_v41 = vld [vmem:[%s14842_s27 + $0x1830] sm:$0xff]  }
 0x307   : > { %13375 = vmatprep.subr.bf16.mxu0 %v14552_v45 }
 0x308   : > { %13396 = vmatpush3.bf16.msra.mxu1 %v14551_v44 }
 0x309   : > { %13397 = vmatprep.subr.bf16.mxu1 %v14554_v47 }
 0x30a   : > { %13376 = vmatpush3.bf16.msra.mxu0 %v14553_v46 }
 0x30b   : > { %13377 = vmatprep.subr.bf16.mxu0 %v14556_v49  ;;  %v14596_v49 = vld [vmem:[%s14842_s27 + $0x18b0] sm:$0xff]  }
 0x30c   : > { %v13075_v53 = vpop.f32.mrb[64].mxu0  ;;  %13398 = vmatpush3.bf16.msra.mxu1 %v14555_v48 }
 0x30d   : > { %v13076_v55 = vpop.f32.mrb[65].mxu0  ;;  %13399 = vmatprep.subr.bf16.mxu1 %v14558_v52  ;;  %v14597_v52 = vld [vmem:[%s14842_s27 + $0x1878] sm:$0xff]  }
 0x30e   : > { %v13077_v57 = vadd.f32 %v13076_v55, %v13075_v53  ;;  %v13078_v58 = vpop.f32.mrb[66].mxu0  ;;  %v13097_v59 = vpop.f32.mrb[64].mxu1  ;;  %13378 = vmatpush3.bf16.msra.mxu0 %v14557_v50  ;;  %v14599_v55 = vld [vmem:[%s14842_s27 + $0x18f8] sm:$0xff]  }
 0x30f   : > { %v13079_v61 = vpop.f32.mrb[67].mxu0  ;;  %v13098_v62 = vpop.f32.mrb[65].mxu1  ;;  %13379 = vmatprep.subr.bf16.mxu0 %v14560_v56  ;;  %v296_v56 = vld [vmem:[%s14837_s23 + $0x60] sm:$0xff]  ;;  %v14600_v58 = vld [vmem:[%s14842_s27 + $0x18b8] sm:$0xff]  }
 0x310   : > { %v10098_v63 = vadd.f32 %v13077_v57, %v15758_v13  ;;  %v13099_v0 = vadd.f32 %v13098_v62, %v13097_v59  ;;  %v13100_v1 = vpop.f32.mrb[66].mxu1  ;;  %13400 = vmatpush3.bf16.msra.mxu1 %v14559_v54  ;;  %v14572_v13 = vld [vmem:[%s14842_s27 + $0x1880] sm:$0xff]   ;;  %v14598_v54 = vld [vmem:[%s14842_s27 + $0x1838] sm:$0xff]   ;;  %v2813_v57 = vrot.slane %v296_v56, %v14880_v42  ;;  %v2806_v59 = vcombine.high %v296_v56, %v296_v56 }
 0x311   : > { %v13101_v3 = vpop.f32.mrb[67].mxu1  ;;  %13401 = vmatprep.subr.bf16.mxu1 %v14562_v51  ;;  %v14602_v1 = vld [vmem:[%s14842_s27 + $0x1900] sm:$0xff]  }
 0x312   : > { %v15802_v5 = vadd.f32 %v13099_v0, %v10098_v63  ;;  %13380 = vmatpush3.bf16.msra.mxu0 %v14561_v60  ;;  %v14601_v60 = vld [vmem:[%s14842_s27 + $0x1940] sm:$0xff]   ;;  %v2821_v51 = vcombine.high %v2813_v57, %v2813_v57  ;;  %v2829_v61 = vrot.slane %v2813_v57, %v14880_v42  ;;  %v15849_v62 = vrot.slane %v2806_v59, %v14880_v42  ;;  %v14640_v57 = vld [vmem:[%s14842_s27 + $0x1ac8] sm:$0xff]   ;;  %v14642_v59 = vld [vmem:[%s14842_s27 + $0x1a50] sm:$0xff]  }
 0x313   : > { %13381 = vmatprep.subr.bf16.mxu0 %v14564_v4  ;;  %v14603_v63 = vld [vmem:[%s14842_s27 + $0x19c0] sm:$0xff]   ;;  %v14605_v4 = vld [vmem:[%s14842_s27 + $0x1948] sm:$0xff]  }
 0x314   : > { %13402 = vmatpush3.bf16.msra.mxu1 %v14563_v2  ;;  %v2843_v0 = vrot.slane %v2821_v51, %v14880_v42  ;;  %v2822_v2 = vcombine.high %v15849_v62, %v15849_v62  ;;  %v2851_v3 = vcombine.high %v2829_v61, %v2829_v61  ;;  %v14637_v56 = vld [vmem:[%s14842_s27 + $0x1a80] sm:$0xff]   ;;  %v14644_v51 = vld [vmem:[%s14842_s27 + $0x1ad0] sm:$0xff]  }
 0x315   : > { %13403 = vmatprep.subr.bf16.mxu1 %v14566_v7 }
 0x316   : > { %13382 = vmatpush3.bf16.msra.mxu0 %v14565_v6  ;;  %v14604_v6 = vld [vmem:[%s14842_s27 + $0x1980] sm:$0xff]   ;;  %v2850_v7 = vrot.slane %v2822_v2, %v14880_v42 }
 0x317   : > { %13411 = vmatprep.subr.bf16.mxu0 %v14569_v10  ;;  %v14650_v2 = vld [vmem:[%s14842_s27 + $0x1a60] sm:$0xff]  }
 0x318   : > { %13404 = vmatpush3.bf16.msra.mxu1 %v14568_v8  ;;  %v14607_v8 = vld [vmem:[%s14842_s27 + $0x19c8] sm:$0xff]   ;;  %v2854_v10 = vcombine.high %v2850_v7, %v2850_v7 }
 0x319   : > { %10656 = vmatmul.mubr.bf16.vlgmr.msra.gmra.mrb[92].mxu0 %v2787_v9  ;;  %13433 = vmatprep.subr.bf16.mxu1 %v14571_v12  ;;  %v14606_v9 = vld [vmem:[%s14842_s27 + $0x1908] sm:$0xff]  }
 0x31a   : > { %13412 = vmatpush3.bf16.msra.mxu0 %v14570_v11  ;;  %10735 = vmatprep.mubr.bf16.mxu0 %v2843_v0  ;;  %v14609_v11 = vld [vmem:[%s14842_s27 + $0x1950] sm:$0xff]   ;;  %v14608_v12 = vld [vmem:[%s14842_s27 + $0x1988] sm:$0xff]  }
 0x31b   : > { %10696 = vmatmul.mubr.bf16.vlgmr.msra.gmra.mrb[92].mxu1 %v2803_v14  ;;  %13413 = vmatprep.subr.bf16.mxu0 %v14573_v15  ;;  %v14610_v14 = vld [vmem:[%s14842_s27 + $0x1910] sm:$0xff]   ;;  %v14613_v15 = vld [vmem:[%s14842_s27 + $0x1958] sm:$0xff]  }
 0x31c   : > { %13434 = vmatpush3.bf16.msra.mxu1 %v14572_v13  ;;  %v14611_v13 = vld [vmem:[%s14842_s27 + $0x19d0] sm:$0xff]  }
 0x31d   : > { %13435 = vmatprep.subr.bf16.mxu1 %v14575_v17  ;;  %v14615_v17 = vld [vmem:[%s14842_s27 + $0x19d8] sm:$0xff]  }
 0x31e   : > { %13414 = vmatpush3.bf16.msra.mxu0 %v14574_v16  ;;  %v14612_v16 = vld [vmem:[%s14842_s27 + $0x1990] sm:$0xff]  }
 0x31f   : > { %13415 = vmatprep.subr.bf16.mxu0 %v14577_v19  ;;  %v14617_v19 = vld [vmem:[%s14842_s27 + $0x1960] sm:$0xff]  }
 0x320   : > { %13436 = vmatpush3.bf16.msra.mxu1 %v14576_v18  ;;  %v14614_v18 = vld [vmem:[%s14842_s27 + $0x1918] sm:$0xff]  }
 0x321   : > { %13437 = vmatprep.subr.bf16.mxu1 %v14579_v21  ;;  %v14619_v21 = vld [vmem:[%s14842_s27 + $0x19e0] sm:$0xff]  }
 0x322   : > { %13416 = vmatpush3.bf16.msra.mxu0 %v14578_v20  ;;  %v14616_v20 = vld [vmem:[%s14842_s27 + $0x1998] sm:$0xff]  }
 0x323   : > { %13417 = vmatprep.subr.bf16.mxu0 %v14581_v23  ;;  %v14621_v23 = vld [vmem:[%s14842_s27 + $0x1968] sm:$0xff]  }
 0x324   : > { %13438 = vmatpush3.bf16.msra.mxu1 %v14580_v22  ;;  %v14618_v22 = vld [vmem:[%s14842_s27 + $0x1920] sm:$0xff]  }
 0x325   : > { %13439 = vmatprep.subr.bf16.mxu1 %v14583_v25 }
 0x326   : > { %13418 = vmatpush3.bf16.msra.mxu0 %v14582_v24  ;;  %v14620_v24 = vld [vmem:[%s14842_s27 + $0x19a0] sm:$0xff]  }
 0x327   : > { %13419 = vmatprep.subr.bf16.mxu0 %v14585_v27 }
 0x328   : > { %13440 = vmatpush3.bf16.msra.mxu1 %v14584_v26  ;;  %v14623_v26 = vld [vmem:[%s14842_s27 + $0x19e8] sm:$0xff]  }
 0x329   : > { %13441 = vmatprep.subr.bf16.mxu1 %v14587_v29 }
 0x32a   : > { %13420 = vmatpush3.bf16.msra.mxu0 %v14586_v28  ;;  %v14622_v28 = vld [vmem:[%s14842_s27 + $0x1928] sm:$0xff]  }
 0x32b   : > { %13421 = vmatprep.subr.bf16.mxu0 %v14589_v32 }
 0x32c   : > { %v13119_v35 = vpop.f32.mrb[68].mxu0  ;;  %13442 = vmatpush3.bf16.msra.mxu1 %v14588_v31 }
 0x32d   : > { %v13120_v36 = vpop.f32.mrb[69].mxu0  ;;  %13443 = vmatprep.subr.bf16.mxu1 %v14591_v34  ;;  %v14625_v34 = vld [vmem:[%s14842_s27 + $0x1970] sm:$0xff]  }
 0x32e   : > { %v13121_v38 = vadd.f32 %v13120_v36, %v13119_v35  ;;  %v13122_v39 = vpop.f32.mrb[70].mxu0  ;;  %v13141_v40 = vpop.f32.mrb[68].mxu1  ;;  %13422 = vmatpush3.bf16.msra.mxu0 %v14590_v33  ;;  %v14624_v33 = vld [vmem:[%s14842_s27 + $0x19a8] sm:$0xff]  }
 0x32f   : > { %v13123_v44 = vpop.f32.mrb[71].mxu0  ;;  %v13142_v45 = vpop.f32.mrb[69].mxu1  ;;  %13423 = vmatprep.subr.bf16.mxu0 %v14593_v37  ;;  %v14627_v39 = vld [vmem:[%s14842_s27 + $0x19f0] sm:$0xff]  }
 0x330   : > { %v10178_v46 = vadd.f32 %v13121_v38, %v15802_v5  ;;  %v13143_v47 = vadd.f32 %v13142_v45, %v13141_v40  ;;  %v13144_v48 = vpop.f32.mrb[70].mxu1  ;;  %13444 = vmatpush3.bf16.msra.mxu1 %v14592_v30  ;;  %v2853_v5 = vcombine.high %v2843_v0, %v2843_v0  ;;  %v14629_v44 = vld [vmem:[%s14842_s27 + $0x1978] sm:$0xff]   ;;  %v14628_v45 = vld [vmem:[%s14842_s27 + $0x19b0] sm:$0xff]  }
 0x331   : > { %v13145_v50 = vpop.f32.mrb[71].mxu1  ;;  %13445 = vmatprep.subr.bf16.mxu1 %v14595_v43  ;;  %v2836_v48 = vrot.slane %v15849_v62, %v14880_v42  ;;  %v14646_v62 = vld [vmem:[%s14842_s27 + $0x1a58] sm:$0xff]  }
 0x332   : > { %v15839_v53 = vadd.f32 %v13143_v47, %v10178_v46  ;;  %13424 = vmatpush3.bf16.msra.mxu0 %v14594_v41  ;;  %10775 = vmatprep.mubr.bf16.mxu1 %v2853_v5  ;;  %v14626_v41 = vld [vmem:[%s14842_s27 + $0x1930] sm:$0xff]   ;;  %v14631_v46 = vld [vmem:[%s14842_s27 + $0x19f8] sm:$0xff]   ;;  %v14651_v5 = vld [vmem:[%s14842_s27 + $0x1a20] sm:$0xff]  }
 0x333   : > { %13425 = vmatprep.subr.bf16.mxu0 %v14597_v52  ;;  %v14630_v47 = vld [vmem:[%s14842_s27 + $0x1938] sm:$0xff]   ;;  %v14636_v52 = vld [vmem:[%s14842_s27 + $0x1ac0] sm:$0xff]  }
 0x334   : > { %13446 = vmatpush3.bf16.msra.mxu1 %v14596_v49  ;;  %v14634_v49 = vld [vmem:[%s14842_s27 + $0x1a40] sm:$0xff]   ;;  %v14633_v50 = vld [vmem:[%s14842_s27 + $0x19b8] sm:$0xff]  }
 0x335   : > { %13447 = vmatprep.subr.bf16.mxu1 %v14599_v55  ;;  %v14638_v55 = vld [vmem:[%s14842_s27 + $0x1a48] sm:$0xff]   ;;  %v14648_v0 = vld [vmem:[%s14842_s27 + $0x1ad8] sm:$0xff]  }
 0x336   : > { %13426 = vmatpush3.bf16.msra.mxu0 %v14598_v54  ;;  %v2852_v54 = vcombine.high %v2836_v48, %v2836_v48 }
 0x337   : > { %13455 = vmatprep.subr.bf16.mxu0 %v14601_v60  ;;  %v14641_v60 = vld [vmem:[%s14842_s27 + $0x1a88] sm:$0xff]  }
 0x338   : > { %13448 = vmatpush3.bf16.msra.mxu1 %v14600_v58  ;;  %v14639_v58 = vld [vmem:[%s14842_s27 + $0x1a08] sm:$0xff]  }
 0x339   : > { %13477 = vmatprep.subr.bf16.mxu1 %v14603_v63  ;;  %10736 = vmatmul.mubr.bf16.vlgmr.msra.gmra.mrb[96].mxu0 %v2829_v61  ;;  %v14643_v61 = vld [vmem:[%s14842_s27 + $0x1a10] sm:$0xff]  }
 0x33a   : > { %13456 = vmatpush3.bf16.msra.mxu0 %v14602_v1  ;;  %10815 = vmatprep.mubr.bf16.mxu0 %v2850_v7  ;;  %v14645_v63 = vld [vmem:[%s14842_s27 + $0x1a90] sm:$0xff]   ;;  %v14647_v1 = vld [vmem:[%s14842_s27 + $0x1a18] sm:$0xff]   ;;  %v14653_v7 = vld [vmem:[%s14842_s27 + $0x1aa0] sm:$0xff]  }
 0x33b   : > { %10776 = vmatmul.mubr.bf16.vlgmr.msra.gmra.mrb[96].mxu1 %v2851_v3  ;;  %13457 = vmatprep.subr.bf16.mxu0 %v14605_v4  ;;  %v14649_v3 = vld [vmem:[%s14842_s27 + $0x1a98] sm:$0xff]   ;;  %v14652_v4 = vld [vmem:[%s14842_s27 + $0x1ae0] sm:$0xff]  }
 0x33c   : > { %13478 = vmatpush3.bf16.msra.mxu1 %v14604_v6  ;;  %10855 = vmatprep.mubr.bf16.mxu1 %v2854_v10  ;;  %v14654_v6 = vld [vmem:[%s14842_s27 + $0x1a68] sm:$0xff]  }
 0x33d   : > { %13479 = vmatprep.subr.bf16.mxu1 %v14607_v8 }
 0x33e   : > { %13458 = vmatpush3.bf16.msra.mxu0 %v14606_v9  ;;  %v14656_v9 = vld [vmem:[%s14842_s27 + $0x1ae8] sm:$0xff]  }
 0x33f   : > { %13459 = vmatprep.subr.bf16.mxu0 %v14609_v11  ;;  %v14655_v11 = vld [vmem:[%s14842_s27 + $0x1a28] sm:$0xff]  }
 0x340   : > { %13480 = vmatpush3.bf16.msra.mxu1 %v14608_v12 }
 0x341   : > { %13481 = vmatprep.subr.bf16.mxu1 %v14611_v13 }
 0x342   : > { %13460 = vmatpush3.bf16.msra.mxu0 %v14610_v14 }
 0x343   : > { %13461 = vmatprep.subr.bf16.mxu0 %v14613_v15  ;;  %v14657_v15 = vld [vmem:[%s14842_s27 + $0x1aa8] sm:$0xff]  }
 0x344   : > { %13482 = vmatpush3.bf16.msra.mxu1 %v14612_v16  ;;  %v14658_v16 = vld [vmem:[%s14842_s27 + $0x1a70] sm:$0xff]  }
 0x345   : > { %13483 = vmatprep.subr.bf16.mxu1 %v14615_v17 }
 0x346   : > { %13462 = vmatpush3.bf16.msra.mxu0 %v14614_v18 }
 0x347   : > { %13463 = vmatprep.subr.bf16.mxu0 %v14617_v19  ;;  %v14659_v19 = vld [vmem:[%s14842_s27 + $0x1a30] sm:$0xff]  }
 0x348   : > { %13484 = vmatpush3.bf16.msra.mxu1 %v14616_v20 }
 0x349   : > { %13485 = vmatprep.subr.bf16.mxu1 %v14619_v21 }
 0x34a   : > { %13464 = vmatpush3.bf16.msra.mxu0 %v14618_v22 }
 0x34b   : > { %13465 = vmatprep.subr.bf16.mxu0 %v14621_v23  ;;  %v14660_v23 = vld [vmem:[%s14842_s27 + $0x1af0] sm:$0xff]  }
 0x34c   : > { %v13163_v25 = vpop.f32.mrb[72].mxu0  ;;  %13486 = vmatpush3.bf16.msra.mxu1 %v14620_v24 }
 0x34d   : > { %v13164_v27 = vpop.f32.mrb[73].mxu0  ;;  %13487 = vmatprep.subr.bf16.mxu1 %v14623_v26 }
 0x34e   : > { %v13165_v29 = vadd.f32 %v13164_v27, %v13163_v25  ;;  %v13166_v31 = vpop.f32.mrb[74].mxu0  ;;  %v13185_v32 = vpop.f32.mrb[72].mxu1  ;;  %13466 = vmatpush3.bf16.msra.mxu0 %v14622_v28  ;;  %v14661_v25 = vld [vmem:[%s14842_s27 + $0x1ab0] sm:$0xff]   ;;  %v14662_v27 = vld [vmem:[%s14842_s27 + $0x1a78] sm:$0xff]  }
 0x34f   : > { %v13167_v35 = vpop.f32.mrb[75].mxu0  ;;  %v13186_v30 = vpop.f32.mrb[73].mxu1  ;;  %13467 = vmatprep.subr.bf16.mxu0 %v14625_v34  ;;  %v14663_v28 = vld [vmem:[%s14842_s27 + $0x1a38] sm:$0xff]   ;;  %v297_v31 = vld [vmem:[%s14837_s23 + $0x68] sm:$0xff] }
 0x350   : > { %v10258_v36 = vadd.f32 %v13165_v29, %v15839_v53  ;;  %v13187_v37 = vadd.f32 %v13186_v30, %v13185_v32  ;;  %v13188_v38 = vpop.f32.mrb[74].mxu1  ;;  %13488 = vmatpush3.bf16.msra.mxu1 %v14624_v33  ;;  %v14635_v53 = vld [vmem:[%s14842_s27 + $0x1a00] sm:$0xff]   ;;  %v14664_v29 = vld [vmem:[%s14842_s27 + $0x1af8] sm:$0xff]   ;;  %v2862_v32 = vrot.slane %v297_v31, %v14880_v42  ;;  %v2855_v34 = vcombine.high %v297_v31, %v297_v31 }
 0x351   : > { %v13189_v40 = vpop.f32.mrb[75].mxu1  ;;  %13489 = vmatprep.subr.bf16.mxu1 %v14627_v39  ;;  %v14665_v33 = vld [vmem:[%s14842_s27 + $0x1ab8] sm:$0xff]   ;;  %v14666_v35 = vld [vmem:[%s14842_s27 + $0x1b40] sm:$0xff]  }
 0x352   : > { %v15882_v43 = vadd.f32 %v13187_v37, %v10258_v36  ;;  %13468 = vmatpush3.bf16.msra.mxu0 %v14626_v41  ;;  %v2870_v30 = vcombine.high %v2862_v32, %v2862_v32  ;;  %v2878_v36 = vrot.slane %v2862_v32, %v14880_v42  ;;  %v15931_v37 = vrot.slane %v2855_v34, %v14880_v42  ;;  %v14668_v38 = vld [vmem:[%s14842_s27 + $0x1bc0] sm:$0xff]   ;;  %v14705_v32 = vld [vmem:[%s14842_s27 + $0x1cc8] sm:$0xff]   ;;  %v14707_v34 = vld [vmem:[%s14842_s27 + $0x1c50] sm:$0xff]  }
 0x353   : > { %13469 = vmatprep.subr.bf16.mxu0 %v14629_v44  ;;  %v14667_v40 = vld [vmem:[%s14842_s27 + $0x1b00] sm:$0xff]   ;;  %v14670_v44 = vld [vmem:[%s14842_s27 + $0x1b48] sm:$0xff]  }
 0x354   : > { %13490 = vmatpush3.bf16.msra.mxu1 %v14628_v45  ;;  %v2892_v39 = vrot.slane %v2870_v30, %v14880_v42  ;;  %v2871_v41 = vcombine.high %v15931_v37, %v15931_v37  ;;  %v14702_v31 = vld [vmem:[%s14842_s27 + $0x1c80] sm:$0xff]   ;;  %v14709_v30 = vld [vmem:[%s14842_s27 + $0x1cd0] sm:$0xff]  }
 0x355   : > { %13491 = vmatprep.subr.bf16.mxu1 %v14631_v46  ;;  %v14669_v46 = vld [vmem:[%s14842_s27 + $0x1b80] sm:$0xff]  }
 0x356   : > { %13470 = vmatpush3.bf16.msra.mxu0 %v14630_v47  ;;  %v2902_v45 = vcombine.high %v2892_v39, %v2892_v39  ;;  %v2899_v47 = vrot.slane %v2871_v41, %v14880_v42  ;;  %v14715_v41 = vld [vmem:[%s14842_s27 + $0x1c60] sm:$0xff]  }
 0x357   : > { %13499 = vmatprep.subr.bf16.mxu0 %v14634_v49  ;;  %v14671_v49 = vld [vmem:[%s14842_s27 + $0x1b08] sm:$0xff]  }
 0x358   : > { %13492 = vmatpush3.bf16.msra.mxu1 %v14633_v50  ;;  %v2903_v50 = vcombine.high %v2899_v47, %v2899_v47 }
 0x359   : > { %10816 = vmatmul.mubr.bf16.vlgmr.msra.gmra.mrb[100].mxu0 %v2836_v48  ;;  %13521 = vmatprep.subr.bf16.mxu1 %v14636_v52  ;;  %v14672_v48 = vld [vmem:[%s14842_s27 + $0x1bc8] sm:$0xff]   ;;  %v14674_v52 = vld [vmem:[%s14842_s27 + $0x1b50] sm:$0xff]  }
 0x35a   : > { %13500 = vmatpush3.bf16.msra.mxu0 %v14635_v53  ;;  %10895 = vmatprep.mubr.bf16.mxu0 %v2892_v39  ;;  %v14673_v53 = vld [vmem:[%s14842_s27 + $0x1b88] sm:$0xff]   ;;  %v14713_v39 = vld [vmem:[%s14842_s27 + $0x1cd8] sm:$0xff]  }
 0x35b   : > { %10856 = vmatmul.mubr.bf16.vlgmr.msra.gmra.mrb[100].mxu1 %v2852_v54  ;;  %13501 = vmatprep.subr.bf16.mxu0 %v14638_v55  ;;  %v14676_v54 = vld [vmem:[%s14842_s27 + $0x1bd0] sm:$0xff]  }
 0x35c   : > { %13522 = vmatpush3.bf16.msra.mxu1 %v14637_v56  ;;  %10935 = vmatprep.mubr.bf16.mxu1 %v2902_v45  ;;  %v14675_v55 = vld [vmem:[%s14842_s27 + $0x1b10] sm:$0xff]   ;;  %v14678_v56 = vld [vmem:[%s14842_s27 + $0x1b58] sm:$0xff]   ;;  %v14716_v45 = vld [vmem:[%s14842_s27 + $0x1c20] sm:$0xff]  }
 0x35d   : > { %13523 = vmatprep.subr.bf16.mxu1 %v14640_v57  ;;  %v14677_v57 = vld [vmem:[%s14842_s27 + $0x1b90] sm:$0xff]  }
 0x35e   : > { %13502 = vmatpush3.bf16.msra.mxu0 %v14639_v58  ;;  %v14680_v58 = vld [vmem:[%s14842_s27 + $0x1bd8] sm:$0xff]  }
 0x35f   : > { %13503 = vmatprep.subr.bf16.mxu0 %v14642_v59  ;;  %v14679_v59 = vld [vmem:[%s14842_s27 + $0x1b18] sm:$0xff]  }
 0x360   : > { %13524 = vmatpush3.bf16.msra.mxu1 %v14641_v60  ;;  %v14682_v60 = vld [vmem:[%s14842_s27 + $0x1b60] sm:$0xff]  }
 0x361   : > { %13525 = vmatprep.subr.bf16.mxu1 %v14644_v51  ;;  %v14681_v51 = vld [vmem:[%s14842_s27 + $0x1b98] sm:$0xff]  }
 0x362   : > { %13504 = vmatpush3.bf16.msra.mxu0 %v14643_v61  ;;  %v14684_v61 = vld [vmem:[%s14842_s27 + $0x1be0] sm:$0xff]  }
 0x363   : > { %13505 = vmatprep.subr.bf16.mxu0 %v14646_v62  ;;  %v14683_v62 = vld [vmem:[%s14842_s27 + $0x1b20] sm:$0xff]  }
 0x364   : > { %13526 = vmatpush3.bf16.msra.mxu1 %v14645_v63  ;;  %v14686_v63 = vld [vmem:[%s14842_s27 + $0x1b68] sm:$0xff]  }
 0x365   : > { %13527 = vmatprep.subr.bf16.mxu1 %v14648_v0  ;;  %v14685_v0 = vld [vmem:[%s14842_s27 + $0x1ba0] sm:$0xff]  }
 0x366   : > { %13506 = vmatpush3.bf16.msra.mxu0 %v14647_v1 }
 0x367   : > { %13507 = vmatprep.subr.bf16.mxu0 %v14650_v2  ;;  %v14688_v2 = vld [vmem:[%s14842_s27 + $0x1be8] sm:$0xff]  }
 0x368   : > { %13528 = vmatpush3.bf16.msra.mxu1 %v14649_v3 }
 0x369   : > { %13529 = vmatprep.subr.bf16.mxu1 %v14652_v4  ;;  %v14687_v4 = vld [vmem:[%s14842_s27 + $0x1b28] sm:$0xff]  }
 0x36a   : > { %13508 = vmatpush3.bf16.msra.mxu0 %v14651_v5 }
 0x36b   : > { %13509 = vmatprep.subr.bf16.mxu0 %v14654_v6 }
 0x36c   : > { %v13207_v8 = vpop.f32.mrb[76].mxu0  ;;  %13530 = vmatpush3.bf16.msra.mxu1 %v14653_v7 }
 0x36d   : > { %v13208_v10 = vpop.f32.mrb[77].mxu0  ;;  %13531 = vmatprep.subr.bf16.mxu1 %v14656_v9  ;;  %v14690_v9 = vld [vmem:[%s14842_s27 + $0x1b70] sm:$0xff]  }
 0x36e   : > { %v13209_v12 = vadd.f32 %v13208_v10, %v13207_v8  ;;  %v13210_v13 = vpop.f32.mrb[78].mxu0  ;;  %v13229_v14 = vpop.f32.mrb[76].mxu1  ;;  %13510 = vmatpush3.bf16.msra.mxu0 %v14655_v11  ;;  %v14689_v8 = vld [vmem:[%s14842_s27 + $0x1ba8] sm:$0xff]  }
 0x36f   : > { %v13211_v17 = vpop.f32.mrb[79].mxu0  ;;  %v13230_v18 = vpop.f32.mrb[77].mxu1  ;;  %13511 = vmatprep.subr.bf16.mxu0 %v14658_v16 }
 0x370   : > { %v10338_v20 = vadd.f32 %v13209_v12, %v15882_v43  ;;  %v13231_v21 = vadd.f32 %v13230_v18, %v13229_v14  ;;  %v13232_v22 = vpop.f32.mrb[78].mxu1  ;;  %13532 = vmatpush3.bf16.msra.mxu1 %v14657_v15  ;;  %v2900_v43 = vcombine.high %v2878_v36, %v2878_v36  ;;  %v14692_v15 = vld [vmem:[%s14842_s27 + $0x1bf0] sm:$0xff]  }
 0x371   : > { %v13233_v24 = vpop.f32.mrb[79].mxu1  ;;  %13533 = vmatprep.subr.bf16.mxu1 %v14660_v23  ;;  %v14691_v17 = vld [vmem:[%s14842_s27 + $0x1b30] sm:$0xff]   ;;  %v14695_v22 = vld [vmem:[%s14842_s27 + $0x1b38] sm:$0xff]   ;;  %v2885_v23 = vrot.slane %v15931_v37, %v14880_v42 }
 0x372   : > { %v15920_v26 = vadd.f32 %v13231_v21, %v10338_v20  ;;  %13512 = vmatpush3.bf16.msra.mxu0 %v14659_v19  ;;  %v14694_v19 = vld [vmem:[%s14842_s27 + $0x1b78] sm:$0xff]   ;;  %v14693_v20 = vld [vmem:[%s14842_s27 + $0x1bb0] sm:$0xff]   ;;  %v14699_v24 = vld [vmem:[%s14842_s27 + $0x1c40] sm:$0xff]  }
 0x373   : > { %13513 = vmatprep.subr.bf16.mxu0 %v14662_v27  ;;  %v14696_v21 = vld [vmem:[%s14842_s27 + $0x1bf8] sm:$0xff]   ;;  %v14700_v27 = vld [vmem:[%s14842_s27 + $0x1c00] sm:$0xff]  }
 0x374   : > { %13534 = vmatpush3.bf16.msra.mxu1 %v14661_v25  ;;  %v14698_v25 = vld [vmem:[%s14842_s27 + $0x1bb8] sm:$0xff]  }
 0x375   : > { %13535 = vmatprep.subr.bf16.mxu1 %v14664_v29  ;;  %v14703_v29 = vld [vmem:[%s14842_s27 + $0x1c48] sm:$0xff]   ;;  %v14711_v37 = vld [vmem:[%s14842_s27 + $0x1c58] sm:$0xff]  }
 0x376   : > { %13514 = vmatpush3.bf16.msra.mxu0 %v14663_v28  ;;  %v2901_v28 = vcombine.high %v2885_v23, %v2885_v23 }
 0x377   : > { %13543 = vmatprep.subr.bf16.mxu0 %v14666_v35  ;;  %v14706_v35 = vld [vmem:[%s14842_s27 + $0x1c88] sm:$0xff]  }
 0x378   : > { %13536 = vmatpush3.bf16.msra.mxu1 %v14665_v33  ;;  %v14704_v33 = vld [vmem:[%s14842_s27 + $0x1c08] sm:$0xff]  }
 0x379   : > { %13565 = vmatprep.subr.bf16.mxu1 %v14668_v38  ;;  %10896 = vmatmul.mubr.bf16.vlgmr.msra.gmra.mrb[104].mxu0 %v2878_v36  ;;  %v14708_v36 = vld [vmem:[%s14842_s27 + $0x1c10] sm:$0xff]  }
 0x37a   : > { %13544 = vmatpush3.bf16.msra.mxu0 %v14667_v40  ;;  %10975 = vmatprep.mubr.bf16.mxu0 %v2899_v47  ;;  %v14710_v38 = vld [vmem:[%s14842_s27 + $0x1c90] sm:$0xff]   ;;  %v14712_v40 = vld [vmem:[%s14842_s27 + $0x1c18] sm:$0xff]   ;;  %v14718_v47 = vld [vmem:[%s14842_s27 + $0x1ca0] sm:$0xff]  }
 0x37b   : > { %10936 = vmatmul.mubr.bf16.vlgmr.msra.gmra.mrb[104].mxu1 %v2900_v43  ;;  %13545 = vmatprep.subr.bf16.mxu0 %v14670_v44  ;;  %v14714_v43 = vld [vmem:[%s14842_s27 + $0x1c98] sm:$0xff]   ;;  %v14717_v44 = vld [vmem:[%s14842_s27 + $0x1ce0] sm:$0xff]  }
 0x37c   : > { %13566 = vmatpush3.bf16.msra.mxu1 %v14669_v46  ;;  %11015 = vmatprep.mubr.bf16.mxu1 %v2903_v50  ;;  %v14719_v46 = vld [vmem:[%s14842_s27 + $0x1c68] sm:$0xff]  }
 0x37d   : > { %13567 = vmatprep.subr.bf16.mxu1 %v14672_v48 }
 0x37e   : > { %13546 = vmatpush3.bf16.msra.mxu0 %v14671_v49  ;;  %v14721_v49 = vld [vmem:[%s14842_s27 + $0x1ce8] sm:$0xff]  }
 0x37f   : > { %13547 = vmatprep.subr.bf16.mxu0 %v14674_v52  ;;  %v14720_v52 = vld [vmem:[%s14842_s27 + $0x1c28] sm:$0xff]  }
 0x380   : > { %13568 = vmatpush3.bf16.msra.mxu1 %v14673_v53 }
 0x381   : > { %13569 = vmatprep.subr.bf16.mxu1 %v14676_v54 }
 0x382   : > { %13548 = vmatpush3.bf16.msra.mxu0 %v14675_v55 }
 0x383   : > { %13549 = vmatprep.subr.bf16.mxu0 %v14678_v56  ;;  %v14722_v56 = vld [vmem:[%s14842_s27 + $0x1ca8] sm:$0xff]  }
 0x384   : > { %13570 = vmatpush3.bf16.msra.mxu1 %v14677_v57  ;;  %v14723_v57 = vld [vmem:[%s14842_s27 + $0x1c70] sm:$0xff]  }
 0x385   : > { %13571 = vmatprep.subr.bf16.mxu1 %v14680_v58 }
 0x386   : > { %13550 = vmatpush3.bf16.msra.mxu0 %v14679_v59 }
 0x387   : > { %13551 = vmatprep.subr.bf16.mxu0 %v14682_v60  ;;  %v14724_v60 = vld [vmem:[%s14842_s27 + $0x1c30] sm:$0xff]  }
 0x388   : > { %13572 = vmatpush3.bf16.msra.mxu1 %v14681_v51 }
 0x389   : > { %13573 = vmatprep.subr.bf16.mxu1 %v14684_v61 }
 0x38a   : > { %13552 = vmatpush3.bf16.msra.mxu0 %v14683_v62 }
 0x38b   : > { %13553 = vmatprep.subr.bf16.mxu0 %v14686_v63  ;;  %v14725_v63 = vld [vmem:[%s14842_s27 + $0x1cf0] sm:$0xff]  }
 0x38c   : > { %v13251_v1 = vpop.f32.mrb[80].mxu0  ;;  %13574 = vmatpush3.bf16.msra.mxu1 %v14685_v0 }
 0x38d   : > { %v13252_v3 = vpop.f32.mrb[81].mxu0  ;;  %13575 = vmatprep.subr.bf16.mxu1 %v14688_v2 }
 0x38e   : > { %v13253_v5 = vadd.f32 %v13252_v3, %v13251_v1  ;;  %v13254_v6 = vpop.f32.mrb[82].mxu0  ;;  %v13273_v7 = vpop.f32.mrb[80].mxu1  ;;  %13554 = vmatpush3.bf16.msra.mxu0 %v14687_v4  ;;  %v14726_v1 = vld [vmem:[%s14842_s27 + $0x1cb0] sm:$0xff]   ;;  %v14727_v3 = vld [vmem:[%s14842_s27 + $0x1c78] sm:$0xff]  }
 0x38f   : > { %v13255_v10 = vpop.f32.mrb[83].mxu0  ;;  %v13274_v11 = vpop.f32.mrb[81].mxu1  ;;  %13555 = vmatprep.subr.bf16.mxu0 %v14690_v9  ;;  %v14728_v4 = vld [vmem:[%s14842_s27 + $0x1c38] sm:$0xff]   ;;  %v298_v6 = vld [vmem:[%s14837_s23 + $0x70] sm:$0x7f] }
 0x390   : > { %v10418_v12 = vadd.f32 %v13253_v5, %v15920_v26  ;;  %v13275_v13 = vadd.f32 %v13274_v11, %v13273_v7  ;;  %v13276_v14 = vpop.f32.mrb[82].mxu1  ;;  %13576 = vmatpush3.bf16.msra.mxu1 %v14689_v8  ;;  %v14701_v26 = vld [vmem:[%s14842_s27 + $0x1cc0] sm:$0xff]   ;;  %v14729_v5 = vld [vmem:[%s14842_s27 + $0x1cf8] sm:$0xff]   ;;  %v2911_v7 = vrot.slane %v298_v6, %v14880_v42  ;;  %v2904_v9 = vcombine.high %v298_v6, %v298_v6 }
 0x391   : > { %v13277_v16 = vpop.f32.mrb[83].mxu1  ;;  %13577 = vmatprep.subr.bf16.mxu1 %v14692_v15  ;;  %v14730_v8 = vld [vmem:[%s14842_s27 + $0x1cb8] sm:$0xff]   ;;  %v14731_v10 = vld [vmem:[%s14842_s27 + $0x1d40] sm:$0xff]  }
 0x392   : > { %v15964_v18 = vadd.f32 %v13275_v13, %v10418_v12  ;;  %13556 = vmatpush3.bf16.msra.mxu0 %v14691_v17  ;;  %v2919_v11 = vcombine.high %v2911_v7, %v2911_v7  ;;  %v2927_v12 = vrot.slane %v2911_v7, %v14880_v42  ;;  %v16013_v13 = vrot.slane %v2904_v9, %v14880_v42  ;;  %v14732_v15 = vld [vmem:[%s14842_s27 + $0x1d00] sm:$0xff]  }
 0x393   : > { %13557 = vmatprep.subr.bf16.mxu0 %v14694_v19 }
 0x394   : > { %13578 = vmatpush3.bf16.msra.mxu1 %v14693_v20  ;;  %v2941_v14 = vrot.slane %v2919_v11, %v14880_v42  ;;  %v2920_v16 = vcombine.high %v16013_v13, %v16013_v13  ;;  %v2949_v17 = vcombine.high %v2927_v12, %v2927_v12  ;;  %v14782_v20 = vmov 0.0  }
 0x395   : > { %13579 = vmatprep.subr.bf16.mxu1 %v14696_v21  ;;  %v14733_v21 = vld [vmem:[%s14842_s27 + $0x1d80] sm:$0xff]  }
 0x396   : > { %13558 = vmatpush3.bf16.msra.mxu0 %v14695_v22  ;;  %v2951_v19 = vcombine.high %v2941_v14, %v2941_v14  ;;  %v2948_v22 = vrot.slane %v2920_v16, %v14880_v42 }
 0x397   : > { %13587 = vmatprep.subr.bf16.mxu0 %v14699_v24  ;;  %v14737_v24 = vld [vmem:[%s14842_s27 + $0x1d50] sm:$0xff]  }
 0x398   : > { %13580 = vmatpush3.bf16.msra.mxu1 %v14698_v25  ;;  %v14736_v25 = vld [vmem:[%s14842_s27 + $0x1d88] sm:$0xff]  }
 0x399   : > { %10976 = vmatmul.mubr.bf16.vlgmr.msra.gmra.mrb[108].mxu0 %v2885_v23  ;;  %13609 = vmatprep.subr.bf16.mxu1 %v14701_v26  ;;  %v14735_v23 = vld [vmem:[%s14842_s27 + $0x1d08] sm:$0xff]   ;;  %v14738_v26 = vld [vmem:[%s14842_s27 + $0x1d10] sm:$0xff]  }
 0x39a   : > { %13588 = vmatpush3.bf16.msra.mxu0 %v14700_v27  ;;  %11055 = vmatprep.mubr.bf16.mxu0 %v2941_v14  ;;  %v14740_v27 = vld [vmem:[%s14842_s27 + $0x1d58] sm:$0xff]  }
 0x39b   : > { %11016 = vmatmul.mubr.bf16.vlgmr.msra.gmra.mrb[108].mxu1 %v2901_v28  ;;  %13589 = vmatprep.subr.bf16.mxu0 %v14703_v29  ;;  %v14739_v28 = vld [vmem:[%s14842_s27 + $0x1d90] sm:$0xff]   ;;  %v14741_v29 = vld [vmem:[%s14842_s27 + $0x1d18] sm:$0xff]  }
 0x39c   : > { %13610 = vmatpush3.bf16.msra.mxu1 %v14702_v31  ;;  %11095 = vmatprep.mubr.bf16.mxu1 %v2951_v19  ;;  %v14743_v31 = vld [vmem:[%s14842_s27 + $0x1d60] sm:$0xff]  }
 0x39d   : > { %13611 = vmatprep.subr.bf16.mxu1 %v14705_v32  ;;  %v14742_v32 = vld [vmem:[%s14842_s27 + $0x1d98] sm:$0xff]  }
 0x39e   : > { %13590 = vmatpush3.bf16.msra.mxu0 %v14704_v33  ;;  %v14744_v33 = vld [vmem:[%s14842_s27 + $0x1d20] sm:$0xff]  }
 0x39f   : > { %13591 = vmatprep.subr.bf16.mxu0 %v14707_v34  ;;  %v14746_v34 = vld [vmem:[%s14842_s27 + $0x1d68] sm:$0xff]  }
 0x3a0   : > { %13612 = vmatpush3.bf16.msra.mxu1 %v14706_v35  ;;  %v14745_v35 = vld [vmem:[%s14842_s27 + $0x1da0] sm:$0xff]  }
 0x3a1   : > { %13613 = vmatprep.subr.bf16.mxu1 %v14709_v30 }
 0x3a2   : > { %13592 = vmatpush3.bf16.msra.mxu0 %v14708_v36 }
 0x3a3   : > { %13593 = vmatprep.subr.bf16.mxu0 %v14711_v37  ;;  %v14747_v37 = vld [vmem:[%s14842_s27 + $0x1d28] sm:$0xff]  }
 0x3a4   : > { %13614 = vmatpush3.bf16.msra.mxu1 %v14710_v38 }
 0x3a5   : > { %13615 = vmatprep.subr.bf16.mxu1 %v14713_v39 }
 0x3a6   : > { %13594 = vmatpush3.bf16.msra.mxu0 %v14712_v40 }
 0x3a7   : > { %13595 = vmatprep.subr.bf16.mxu0 %v14715_v41  ;;  %v14749_v41 = vld [vmem:[%s14842_s27 + $0x1d70] sm:$0xff]  }
 0x3a8   : > { %13616 = vmatpush3.bf16.msra.mxu1 %v14714_v43 }
 0x3a9   : > { %13617 = vmatprep.subr.bf16.mxu1 %v14717_v44 }
 0x3aa   : > { %13596 = vmatpush3.bf16.msra.mxu0 %v14716_v45  ;;  %v14748_v45 = vld [vmem:[%s14842_s27 + $0x1da8] sm:$0xff]  }
 0x3ab   : > { %13597 = vmatprep.subr.bf16.mxu0 %v14719_v46 }
 0x3ac   : > { %v13295_v48 = vpop.f32.mrb[84].mxu0  ;;  %13618 = vmatpush3.bf16.msra.mxu1 %v14718_v47 }
 0x3ad   : > { %v13296_v50 = vpop.f32.mrb[85].mxu0  ;;  %13619 = vmatprep.subr.bf16.mxu1 %v14721_v49 }
 0x3ae   : > { %v13297_v53 = vadd.f32 %v13296_v50, %v13295_v48  ;;  %v13298_v54 = vpop.f32.mrb[86].mxu0  ;;  %v13317_v55 = vpop.f32.mrb[84].mxu1  ;;  %13598 = vmatpush3.bf16.msra.mxu0 %v14720_v52  ;;  %v14750_v50 = vld [vmem:[%s14842_s27 + $0x1d30] sm:$0xff]  }
 0x3af   : > { %v13299_v58 = vpop.f32.mrb[87].mxu0  ;;  %v13318_v59 = vpop.f32.mrb[85].mxu1  ;;  %13599 = vmatprep.subr.bf16.mxu0 %v14723_v57  ;;  %v14751_v54 = vld [vmem:[%s14842_s27 + $0x1db0] sm:$0xff]   ;;  %v14755_v57 = vld [vmem:[%s14842_s27 + $0x1db8] sm:$0xff]  }
 0x3b0   : > { %v10498_v51 = vadd.f32 %v13297_v53, %v15964_v18  ;;  %v13319_v61 = vadd.f32 %v13318_v59, %v13317_v55  ;;  %v13320_v62 = vpop.f32.mrb[86].mxu1  ;;  %13620 = vmatpush3.bf16.msra.mxu1 %v14722_v56  ;;  %v14734_v18 = vld [vmem:[%s14842_s27 + $0x1d48] sm:$0xff]   ;;  %v14752_v53 = vld [vmem:[%s14842_s27 + $0x1d78] sm:$0xff]   ;;  %v2934_v56 = vrot.slane %v16013_v13, %v14880_v42 }
 0x3b1   : > { %v13321_v0 = vpop.f32.mrb[87].mxu1  ;;  %13621 = vmatprep.subr.bf16.mxu1 %v14725_v63  ;;  %v14753_v55 = vld [vmem:[%s14842_s27 + $0x1d38] sm:$0xff]  }
 0x3b2   : > { %v16002_v2 = vadd.f32 %v13319_v61, %v10498_v51  ;;  %13600 = vmatpush3.bf16.msra.mxu0 %v14724_v60  ;;  %v2950_v58 = vcombine.high %v2934_v56, %v2934_v56 }
 0x3b3   : > { %13601 = vmatprep.subr.bf16.mxu0 %v14727_v3 }
 0x3b4   : > { %13622 = vmatpush3.bf16.msra.mxu1 %v14726_v1 }
 0x3b5   : > { %13623 = vmatprep.subr.bf16.mxu1 %v14729_v5 }
 0x3b6   : > { %13602 = vmatpush3.bf16.msra.mxu0 %v14728_v4 }
 0x3b7   : > { %13631 = vmatprep.subr.bf16.mxu0 %v14731_v10 }
 0x3b8   : > { %13624 = vmatpush3.bf16.msra.mxu1 %v14730_v8 }
 0x3b9   : > { %13679 = vmatprep.subr.bf16.mxu1 %v14782_v20  ;;  %11056 = vmatmul.mubr.bf16.vlgmr.msra.gmra.mrb[112].mxu0 %v2927_v12 }
 0x3ba   : > { %13632 = vmatpush3.bf16.msra.mxu0 %v14732_v15  ;;  %11135 = vmatprep.mubr.bf16.mxu0 %v2948_v22 }
 0x3bb   : > { %11096 = vmatmul.mubr.bf16.vlgmr.msra.gmra.mrb[112].mxu1 %v2949_v17  ;;  %13633 = vmatprep.subr.bf16.mxu0 %v14734_v18 }
 0x3bc   : > { %13680 = vmatpush3.bf16.msra.mxu1 %v14733_v21  ;;  %13695 = vmatprep.mubr.msk.bf16.mxu1 %vm14783_vm0, %v14782_v20 }
 0x3bd   : > { %13681 = vmatprep.subr.bf16.mxu1 %v14782_v20 }
 0x3be   : > { %13634 = vmatpush3.bf16.msra.mxu0 %v14735_v23 }
 0x3bf   : > { %13635 = vmatprep.subr.bf16.mxu0 %v14737_v24 }
 0x3c0   : > { %13682 = vmatpush3.bf16.msra.mxu1 %v14736_v25 }
 0x3c1   : > { %13683 = vmatprep.subr.bf16.mxu1 %v14782_v20 }
 0x3c2   : > { %13636 = vmatpush3.bf16.msra.mxu0 %v14738_v26 }
 0x3c3   : > { %13637 = vmatprep.subr.bf16.mxu0 %v14740_v27 }
 0x3c4   : > { %13684 = vmatpush3.bf16.msra.mxu1 %v14739_v28 }
 0x3c5   : > { %13685 = vmatprep.subr.bf16.mxu1 %v14782_v20 }
 0x3c6   : > { %13638 = vmatpush3.bf16.msra.mxu0 %v14741_v29 }
 0x3c7   : > { %13639 = vmatprep.subr.bf16.mxu0 %v14743_v31 }
 0x3c8   : > { %13686 = vmatpush3.bf16.msra.mxu1 %v14742_v32 }
 0x3c9   : > { %13687 = vmatprep.subr.bf16.mxu1 %v14782_v20 }
 0x3ca   : > { %13640 = vmatpush3.bf16.msra.mxu0 %v14744_v33 }
 0x3cb   : > { %13641 = vmatprep.subr.bf16.mxu0 %v14746_v34 }
 0x3cc   : > { %v13339_v30 = vpop.f32.mrb[88].mxu0  ;;  %13688 = vmatpush3.bf16.msra.mxu1 %v14745_v35 }
 0x3cd   : > { %v13340_v36 = vpop.f32.mrb[89].mxu0  ;;  %13689 = vmatprep.subr.bf16.mxu1 %v14782_v20 }
 0x3ce   : > { %v13341_v38 = vadd.f32 %v13340_v36, %v13339_v30  ;;  %v13342_v39 = vpop.f32.mrb[90].mxu0  ;;  %v13361_v40 = vpop.f32.mrb[88].mxu1  ;;  %13642 = vmatpush3.bf16.msra.mxu0 %v14747_v37 }
 0x3cf   : > { %v13343_v43 = vpop.f32.mrb[91].mxu0  ;;  %v13362_v44 = vpop.f32.mrb[89].mxu1  ;;  %13643 = vmatprep.subr.bf16.mxu0 %v14749_v41 }
 0x3d0   : > { %v10578_v46 = vadd.f32 %v13341_v38, %v16002_v2  ;;  %v13363_v47 = vadd.f32 %v13362_v44, %v13361_v40  ;;  %v13364_v48 = vpop.f32.mrb[90].mxu1  ;;  %13690 = vmatpush3.bf16.msra.mxu1 %v14748_v45 }
 0x3d1   : > { %v13365_v49 = vpop.f32.mrb[91].mxu1  ;;  %13691 = vmatprep.subr.bf16.mxu1 %v14782_v20 }
 0x3d2   : > { %v10618_v52 = vadd.f32 %v13363_v47, %v10578_v46  ;;  %13644 = vmatpush3.bf16.msra.mxu0 %v14750_v50 }
 0x3d3   : > { %13645 = vmatprep.subr.bf16.mxu0 %v14752_v53 }
 0x3d4   : > { %13692 = vmatpush3.bf16.msra.mxu1 %v14751_v54 }
 0x3d5   : > { %13693 = vmatprep.subr.bf16.mxu1 %v14782_v20 }
 0x3d6   : > { %13646 = vmatpush3.bf16.msra.mxu0 %v14753_v55 }
 0x3d8   : > { %13694 = vmatpush3.bf16.msra.mxu1 %v14755_v57 }
 0x3d9   : > { %11136 = vmatmul.mubr.bf16.vlgmr.msra.gmra.mrb[116].mxu0 %v2934_v56 }
 0x3db   : > { %13696 = vmatmul.mubr.bf16.vlgmr.msra.gmra.mrb[116].mxu1 %v2950_v58 }
 0x3ec   : > { %v13383_v59 = vpop.f32.mrb[92].mxu0 }
 0x3ed   : > { %v13384_v60 = vpop.f32.mrb[93].mxu0 }
 0x3ee   : > { %v13385_v51 = vadd.f32 %v13384_v60, %v13383_v59  ;;  %v13386_v61 = vpop.f32.mrb[94].mxu0  ;;  %v13405_v62 = vpop.f32.mrb[92].mxu1 }
 0x3ef   : > { %v13387_v63 = vpop.f32.mrb[95].mxu0  ;;  %v13406_v0 = vpop.f32.mrb[93].mxu1 }
 0x3f0   : > { %v10658_v1 = vadd.f32 %v13385_v51, %v10618_v52  ;;  %v13407_v2 = vadd.f32 %v13406_v0, %v13405_v62  ;;  %v13408_v3 = vpop.f32.mrb[94].mxu1 }
 0x3f1   : > { %v13409_v42 = vpop.f32.mrb[95].mxu1 }
 0x3f2   : > { %v10698_v4 = vadd.f32 %v13407_v2, %v10658_v1 }
 0x40c   : > { %v13427_v5 = vpop.f32.mrb[96].mxu0 }
 0x40d   : > { %v13428_v6 = vpop.f32.mrb[97].mxu0 }
 0x40e   : > { %v13429_v7 = vadd.f32 %v13428_v6, %v13427_v5  ;;  %v13430_v8 = vpop.f32.mrb[98].mxu0  ;;  %v13449_v9 = vpop.f32.mrb[96].mxu1 }
 0x40f   : > { %v13431_v10 = vpop.f32.mrb[99].mxu0  ;;  %v13450_v11 = vpop.f32.mrb[97].mxu1 }
 0x410   : > { %v10738_v12 = vadd.f32 %v13429_v7, %v10698_v4  ;;  %v13451_v13 = vadd.f32 %v13450_v11, %v13449_v9  ;;  %v13452_v14 = vpop.f32.mrb[98].mxu1  ;;  %v283_v10 = vld [vmem:[#allocation2] sm:$0x3] }
 0x411   : > { %v13453_v15 = vpop.f32.mrb[99].mxu1  ;;  %v11201_v14 = vld [vmem:[%s16121_s3] sm:$0xff] (!%p12350_p7) }
 0x412   : > { %v10778_v16 = vadd.f32 %v13451_v13, %v10738_v12  ;;  %v11202_v15 = vld [vmem:[%s16121_s3 + $0x8] sm:$0xff] (!%p12350_p7) }
 0x42c   : > { %v13471_v17 = vpop.f32.mrb[100].mxu0 }
 0x42d   : > { %v13472_v18 = vpop.f32.mrb[101].mxu0 }
 0x42e   : > { %v13473_v19 = vadd.f32 %v13472_v18, %v13471_v17  ;;  %v13474_v20 = vpop.f32.mrb[102].mxu0  ;;  %v13493_v21 = vpop.f32.mrb[100].mxu1  ;;  %v14784_v17 = vmov (!%p12350_p7), 0.0|0.0   ;;  %v13735_v18 = vpack.c.bf16 (!%p12350_p7), %v11202_v15, %v11201_v14 }
 0x42f   : > { %v13475_v22 = vpop.f32.mrb[103].mxu0  ;;  %v13494_v23 = vpop.f32.mrb[101].mxu1  ;;  %13734 = vmatprep.subr.bf16.mxu0 (!%p12350_p7), %v14784_v17  ;;  %v14786_v20 = vmov (!%p12350_p7), 0.0  }
 0x430   : > { %v10818_v24 = vadd.f32 %v13473_v19, %v10778_v16  ;;  %v13495_v25 = vadd.f32 %v13494_v23, %v13493_v21  ;;  %v13496_v26 = vpop.f32.mrb[102].mxu1  ;;  %v11203_v16 = vld [vmem:[%s16121_s3 + $0x10] sm:$0xff] (!%p12350_p7)  ;;  %v11204_v19 = vld [vmem:[%s16121_s3 + $0x18] sm:$0xff] (!%p12350_p7)  ;;  %13731 = vmatprep.mubr.msk.f32.mxu0 (!%p12350_p7), %vm14785_vm1, %v14786_v20  ;;  %13736 = vmatpush3.bf16.msra.mxu0 (!%p12350_p7), %v13735_v18  ;;  %v11205_v22 = vld [vmem:[%s16121_s3 + $0x20] sm:$0xff] (!%p12350_p7) }
 0x431   : > { %v13497_v27 = vpop.f32.mrb[103].mxu1  ;;  %v13738_v21 = vpack.c.bf16 (!%p12350_p7), %v11204_v19, %v11203_v16  ;;  %13737 = vmatprep.subr.bf16.mxu0 (!%p12350_p7), %v14784_v17  ;;  %v11206_v23 = vld [vmem:[%s16121_s3 + $0x28] sm:$0xff] (!%p12350_p7)  ;;  %v11208_v26 = vld [vmem:[%s16121_s3 + $0x38] sm:$0xff] (!%p12350_p7) }
 0x432   : > { %v10858_v28 = vadd.f32 %v13495_v25, %v10818_v24  ;;  %v13741_v24 = vpack.c.bf16 (!%p12350_p7), %v11206_v23, %v11205_v22  ;;  %v11207_v25 = vld [vmem:[%s16121_s3 + $0x30] sm:$0xff] (!%p12350_p7) }
 0x433   : > { %v13744_v27 = vpack.c.bf16 (!%p12350_p7), %v11208_v26, %v11207_v25 }
 0x434   : > { %13739 = vmatpush3.bf16.msra.mxu0 (!%p12350_p7), %v13738_v21 }
 0x435   : > { %13740 = vmatprep.subr.bf16.mxu0 (!%p12350_p7), %v14784_v17 }
 0x438   : > { %13742 = vmatpush3.bf16.msra.mxu0 (!%p12350_p7), %v13741_v24 }
 0x439   : > { %13743 = vmatprep.subr.bf16.mxu0 (!%p12350_p7), %v14784_v17 }
 0x43c   : > { %13745 = vmatpush3.bf16.msra.mxu0 (!%p12350_p7), %v13744_v27 }
 0x43d   : > { %13746 = vmatprep.subr.bf16.mxu0 (!%p12350_p7), %v14784_v17 }
 0x44c   : > { %v13515_v29 = vpop.f32.mrb[104].mxu0 }
 0x44d   : > { %v13516_v31 = vpop.f32.mrb[105].mxu0 }
 0x44e   : > { %v13517_v32 = vadd.f32 %v13516_v31, %v13515_v29  ;;  %v13518_v33 = vpop.f32.mrb[106].mxu0  ;;  %v13537_v34 = vpop.f32.mrb[104].mxu1  ;;  %v11210_v29 = vld [vmem:[%s16121_s3 + $0x48] sm:$0xff] (!%p12350_p7) }
 0x44f   : > { %v13519_v35 = vpop.f32.mrb[107].mxu0  ;;  %v13538_v30 = vpop.f32.mrb[105].mxu1  ;;  %v11212_v33 = vld [vmem:[%s16121_s3 + $0x58] sm:$0xff] (!%p12350_p7) }
 0x450   : > { %v10898_v36 = vadd.f32 %v13517_v32, %v10858_v28  ;;  %v13539_v37 = vadd.f32 %v13538_v30, %v13537_v34  ;;  %v13540_v38 = vpop.f32.mrb[106].mxu1  ;;  %v11209_v28 = vld [vmem:[%s16121_s3 + $0x40] sm:$0xff] (!%p12350_p7)  ;;  %v11211_v32 = vld [vmem:[%s16121_s3 + $0x50] sm:$0xff] (!%p12350_p7)  ;;  %v11214_v30 = vld [vmem:[%s16121_s3 + $0x68] sm:$0xff] (!%p12350_p7) }
 0x451   : > { %v13541_v39 = vpop.f32.mrb[107].mxu1  ;;  %v13747_v31 = vpack.c.bf16 (!%p12350_p7), %v11210_v29, %v11209_v28  ;;  %v13750_v34 = vpack.c.bf16 (!%p12350_p7), %v11212_v33, %v11211_v32  ;;  %v11213_v35 = vld [vmem:[%s16121_s3 + $0x60] sm:$0xff] (!%p12350_p7) }
 0x452   : > { %v10938_v40 = vadd.f32 %v13539_v37, %v10898_v36  ;;  %v12351_v37 = vld [vmem:[%s16120_s2] ss:$0 sm:$0xff] (!%p12350_p7)  ;;  %v13753_v38 = vpack.c.bf16 (!%p12350_p7), %v11214_v30, %v11213_v35 }
 0x453   : > { %13748 = vmatpush3.bf16.msra.mxu0 (!%p12350_p7), %v13747_v31 }
 0x454   : > { %13749 = vmatprep.subr.bf16.mxu0 (!%p12350_p7), %v14784_v17 }
 0x457   : > { %13751 = vmatpush3.bf16.msra.mxu0 (!%p12350_p7), %v13750_v34 }
 0x458   : > { %13752 = vmatprep.subr.bf16.mxu0 (!%p12350_p7), %v14784_v17 }
 0x45b   : > { %13754 = vmatpush3.bf16.msra.mxu0 (!%p12350_p7), %v13753_v38 }
 0x45c   : > { %13755 = vmatprep.subr.bf16.mxu0 (!%p12350_p7), %v14784_v17 }
 0x46c   : > { %v13559_v41 = vpop.f32.mrb[108].mxu0 }
 0x46d   : > { %v13560_v43 = vpop.f32.mrb[109].mxu0 }
 0x46e   : > { %v13561_v44 = vadd.f32 %v13560_v43, %v13559_v41  ;;  %v13562_v45 = vpop.f32.mrb[110].mxu0  ;;  %v13581_v46 = vpop.f32.mrb[108].mxu1  ;;  %v11216_v41 = vld [vmem:[%s16121_s3 + $0x78] sm:$0xff] (!%p12350_p7) }
 0x46f   : > { %v13563_v47 = vpop.f32.mrb[111].mxu0  ;;  %v13582_v48 = vpop.f32.mrb[109].mxu1 }
 0x470   : > { %v10978_v49 = vadd.f32 %v13561_v44, %v10938_v40  ;;  %v13583_v50 = vadd.f32 %v13582_v48, %v13581_v46  ;;  %v13584_v52 = vpop.f32.mrb[110].mxu1  ;;  %v11215_v40 = vld [vmem:[%s16121_s3 + $0x70] sm:$0xff] (!%p12350_p7) }
 0x471   : > { %v13585_v53 = vpop.f32.mrb[111].mxu1  ;;  %v13756_v43 = vpack.c.bf16 (!%p12350_p7), %v11216_v41, %v11215_v40 }
 0x472   : > { %v11018_v54 = vadd.f32 %v13583_v50, %v10978_v49 }
 0x473   : > { %13757 = vmatpush3.bf16.msra.mxu0 (!%p12350_p7), %v13756_v43 }
 0x48c   : > { %v13603_v55 = vpop.f32.mrb[112].mxu0 }
 0x48d   : > { %v13604_v56 = vpop.f32.mrb[113].mxu0 }
 0x48e   : > { %v13605_v57 = vadd.f32 %v13604_v56, %v13603_v55  ;;  %v13606_v58 = vpop.f32.mrb[114].mxu0  ;;  %v13625_v59 = vpop.f32.mrb[112].mxu1 }
 0x48f   : > { %v13607_v60 = vpop.f32.mrb[115].mxu0  ;;  %v13626_v51 = vpop.f32.mrb[113].mxu1 }
 0x490   : > { %v11058_v61 = vadd.f32 %v13605_v57, %v11018_v54  ;;  %v13627_v62 = vadd.f32 %v13626_v51, %v13625_v59  ;;  %v13628_v63 = vpop.f32.mrb[114].mxu1 }
 0x491   : > { %v13629_v0 = vpop.f32.mrb[115].mxu1 }
 0x492   : > { %v11098_v1 = vadd.f32 %v13627_v62, %v11058_v61 }
 0x4ac   : > { %v13647_v2 = vpop.f32.mrb[116].mxu0 }
 0x4ad   : > { %v13648_v3 = vpop.f32.mrb[117].mxu0 }
 0x4ae   : > { %v13649_v42 = vadd.f32 %v13648_v3, %v13647_v2  ;;  %v13650_v4 = vpop.f32.mrb[118].mxu0  ;;  %v11177_v5 = vpop.f32.mrb[116].mxu1 }
 0x4af   : > { %v13651_v6 = vpop.f32.mrb[119].mxu0  ;;  %v13697_v7 = vpop.f32.mrb[117].mxu1 }
 0x4b0   : > { %v11138_v8 = vadd.f32 %v13649_v42, %v11098_v1  ;;  %v11180_v9 = vpop.f32.mrb[118].mxu1  ;;  %11188 = sbr.rel (%p12350_p7) target bundleno = 1432 (0x598), region = 44 }
 0x4b1   : > { %v13698_v11 = vpop.f32.mrb[119].mxu1 }
 0x4b2   : > { %v11178_v12 = vadd.f32 %v11177_v5, %v11138_v8 }
 0x4b4   : > { %v11183_v13 = vadd.f32 %v11178_v12, %v283_v10 }
 0x4b6   : > { %11184 = vst [vmem:[#allocation2] sm:$0x3] %v11183_v13 }
 0x4bd   : > { %v11189_v36 = vld [vmem:[#allocation2] sm:$0x3] }
 0x4be   : > { %v11197_v39 = vadd.f32 %v12351_v37, %v11189_v36 }
 0x4c0   : > { %v11199_v44 = vmul.f32 0.01, %v11197_v39  ;;  %vm11198_vm2 = vcmp.ge.f32.partialorder %v11197_v39, 0.0 }
 0x4c2   : > { %v11200_v45 = vsel %vm11198_vm2, %v11197_v39, %v11199_v44 }
 0x4c3   : > { %13732 = vmatmul.mubr.f32.vlgmr.msra.gmra.mrb[0].mxu0 %v11200_v45 }
 0x596   : > { %v11283_v46 = vpop.f32.mrb[0].mxu0 }
 0x597   : > { %11288 = vst.msk [vmem:[%s16122_s4] sm:$0x3] %vm11287_vm3, %v11283_v46  ;;  %v13733_v47 = vpop.f32.mrb[1].mxu0 }
 0x598 PF: > { %s14_s17 = sadd.s32 1, %s14778_s17   ;;  %s16123_s15 = smov %s14774_s16 }
 0x599   : > { %p11_p8 = scmp.ge.s32.totalorder %s14_s17, 4   ;;  %s16124_s16 = smov %s16126_s18 }
 0x59b   :  { %13 = sbr.rel (!%p11_p8) target bundleno = 2 (0x2), region = 83 }

</bundles_post_ra>
